<compile_context>
chip_gen: v5e
topology: v5e:2x2
jax: 0.10.0
libtpu: 0.0.40
codegen_flags: <defaults>
</compile_context>

<pallas_src>
import numpy as np

import jax
import jax.numpy as jnp
from jax.experimental import pallas as pl
from jax.experimental.pallas import tpu as pltpu

# ----------------------------------------------------------------------------
# Model configuration (synthetic UNet, config.dim = 16)
# ----------------------------------------------------------------------------
DIM = 16                      # input spatial size (config.dim)
CIN = 3                       # input channels
C3 = 32                       # deepest encoder channels (= Classifier.shape)
NCLS = 7                      # output_classes
FC_HIDDEN = 512
XFLAT = DIM * DIM * CIN       # 768
SEGFLAT = DIM * DIM           # 256 (seg head has 1 channel)
CLS_PAD = 128                 # fc2 output padded to 128 lanes for a dense store

# Per-layer matmul geometry (K = contraction, N = output lanes) in the flattened layout.
_LAYERS = ("e1", "e2", "e3", "d1", "d2", "d3", "sh", "fc1", "fc2")
_K = {"e1": 768, "e2": 512, "e3": 256, "d1": 384, "d2": 768, "d3": 512,
      "sh": 2048, "fc1": 32, "fc2": 512}
_N = {"e1": 512, "e2": 256, "e3": 128, "d1": 256, "d2": 512, "d3": 2048,
      "sh": 256, "fc1": 512, "fc2": 128}
# Row offset of each layer's matrix inside its column-width-grouped bf16 slab.
_ROW_OFF = {"e1": 0, "d2": 768, "fc1": 1536,      # slab w512 (1568, 512)
            "e2": 0, "d1": 512, "sh": 896,        # slab w256 (2944, 256)
            "e3": 0, "fc2": 256,                  # slab w128 (768, 128)
            "d3": 0}                              # slab w2048 (512, 2048)
_BIAS_OFF = {}
_off = 0
for _name in _LAYERS:
    _BIAS_OFF[_name] = _off
    _off += _N[_name]
BIAS_LEN = _off               # 4608 (every segment 128-aligned)


# ----------------------------------------------------------------------------
# Fused forward kernel: entire UNet + classifier head for B_TILE images per grid step
# ----------------------------------------------------------------------------
def _fused_forward_kernel(x_ref, w512, w256, w128, w2048, bias, seg_ref, cls_ref):
    f32, bf16 = jnp.float32, jnp.bfloat16

    def layer(name, a_bf, w_ref, relu=True):
        r0, k, n, b0 = _ROW_OFF[name], _K[name], _N[name], _BIAS_OFF[name]
        y = jnp.dot(a_bf, w_ref[r0:r0 + k, :], preferred_element_type=f32)
        y = y + bias[0:1, b0:b0 + n]
        return jnp.maximum(y, 0.0) if relu else y

    x = x_ref[...].astype(bf16)                                   # (BT, 768)

    # ---- encoder (stride-2 3x3 convs + ReLU), one matmul each ----
    f1 = layer("e1", x, w512).astype(bf16)                        # (BT, 512)  8x8x8
    f2 = layer("e2", f1, w256).astype(bf16)                       # (BT, 256)  4x4x16
    f3_f32 = layer("e3", f2, w128)                                # (BT, 128)  2x2x32 f32
    f3 = f3_f32.astype(bf16)

    # ---- decoder: nearest-2x upsample + skip concat folded into the weight matrix ----
    d1 = layer("d1", jnp.concatenate([f3, f2], axis=-1), w256).astype(bf16)   # (BT, 256)
    d2 = layer("d2", jnp.concatenate([d1, f1], axis=-1), w512).astype(bf16)   # (BT, 512)
    d3 = layer("d3", d2, w2048).astype(bf16)                                  # (BT, 2048)

    # ---- segmentation head (no activation), f32 epilogue, lane-dense store ----
    seg_ref[...] = layer("sh", d3, w256, relu=False)              # (BT, 256)

    # ---- classifier head: AdaptiveMaxPool2d(1) + fc1 + ReLU + fc2 + sigmoid ----
    # f3 layout per image is (h, w, c) with 2x2 spatial -> 4 channel blocks of 32.
    m = f3_f32[:, 0:C3]
    for blk in range(1, 4):
        m = jnp.maximum(m, f3_f32[:, blk * C3:(blk + 1) * C3])    # (BT, 32)
    h = layer("fc1", m.astype(bf16), w512).astype(bf16)           # (BT, 512)
    cls_ref[...] = jax.nn.sigmoid(layer("fc2", h, w128, relu=False))   # (BT, 128)


# ----------------------------------------------------------------------------
# Host-side precomputation: conv weights -> full-unroll matrices, packed into slabs
#   out_flat = in_flat @ M + bias_row   (channel-minor (h, w, c) flattening, pad=1)
# ----------------------------------------------------------------------------
def _conv_full(w, H, W, stride):
    """3x3 conv, padding=1, given stride: (H*W*Cin, Ho*Wo*Cout)."""
    w = np.asarray(w, np.float32)                   # (3, 3, Cin, Cout)
    Cin, Cout = w.shape[2], w.shape[3]
    Ho = (H + 2 - 3) // stride + 1
    Wo = (W + 2 - 3) // stride + 1
    M = np.zeros((H * W * Cin, Ho * Wo * Cout), np.float32)
    for ho in range(Ho):
        for wo in range(Wo):
            c0 = (ho * Wo + wo) * Cout
            for di in range(3):
                hi = stride * ho + di - 1
                if hi < 0 or hi >= H:
                    continue
                for dj in range(3):
                    wi = stride * wo + dj - 1
                    if wi < 0 or wi >= W:
                        continue
                    r0 = (hi * W + wi) * Cin
                    M[r0:r0 + Cin, c0:c0 + Cout] += w[di, dj]
    return M


def _upconv_full(w, Hs, Ws):
    """nearest-2x upsample of (Hs,Ws,Cu) then 3x3 stride-1 conv, pad=1 -> (2Hs,2Ws,Cout)."""
    w = np.asarray(w, np.float32)                   # (3, 3, Cu, Cout)
    Cu, Cout = w.shape[2], w.shape[3]
    Hu, Wu = 2 * Hs, 2 * Ws
    M = np.zeros((Hs * Ws * Cu, Hu * Wu * Cout), np.float32)
    for ho in range(Hu):
        for wo in range(Wu):
            c0 = (ho * Wu + wo) * Cout
            for di in range(3):
                hu = ho + di - 1
                if hu < 0 or hu >= Hu:
                    continue
                for dj in range(3):
                    wu = wo + dj - 1
                    if wu < 0 or wu >= Wu:
                        continue
                    r0 = ((hu // 2) * Ws + (wu // 2)) * Cu
                    M[r0:r0 + Cu, c0:c0 + Cout] += w[di, dj]
    return M


def prepare_params(params):
    """Build packed kernel slabs: 4 bf16 weight slabs (grouped by output width) + 1 f32 bias slab."""
    mats = {
        "e1": _conv_full(params["e1_w"], 16, 16, 2),          # (768, 512)
        "e2": _conv_full(params["e2_w"], 8, 8, 2),             # (512, 256)
        "e3": _conv_full(params["e3_w"], 4, 4, 2),             # (256, 128)
        "d3": _upconv_full(params["d3_w"], 8, 8),              # (512, 2048)
        "sh": _conv_full(params["sh_w"], 16, 16, 1),           # (2048, 256)
        "fc1": np.asarray(params["fc1_w"], np.float32),        # (32, 512)
    }
    d1w = np.asarray(params["d1_w"], np.float32)               # in-channels: [up(32) | skip(16)]
    mats["d1"] = np.concatenate(
        [_upconv_full(d1w[:, :, :32, :], 2, 2),
         _conv_full(d1w[:, :, 32:, :], 4, 4, 1)], axis=0)      # (384, 256)
    d2w = np.asarray(params["d2_w"], np.float32)               # in-channels: [up(16) | skip(8)]
    mats["d2"] = np.concatenate(
        [_upconv_full(d2w[:, :, :16, :], 4, 4),
         _conv_full(d2w[:, :, 16:, :], 8, 8, 1)], axis=0)      # (768, 512)
    fc2 = np.zeros((FC_HIDDEN, CLS_PAD), np.float32)           # pad to 128 output lanes
    fc2[:, :NCLS] = np.asarray(params["fc2_w"], np.float32)
    mats["fc2"] = fc2

    for name in _LAYERS:
        assert mats[name].shape == (_K[name], _N[name]), (name, mats[name].shape)

    w512 = np.concatenate([mats["e1"], mats["d2"], mats["fc1"]], axis=0)
    w256 = np.concatenate([mats["e2"], mats["d1"], mats["sh"]], axis=0)
    w128 = np.concatenate([mats["e3"], mats["fc2"]], axis=0)
    w2048 = mats["d3"]
    assert w512.shape == (1568, 512) and w256.shape == (2944, 256)
    assert w128.shape == (768, 128) and w2048.shape == (512, 2048)

    # bias slab: per-channel biases tiled over spatial positions (channel-minor layout)
    spatial = {"e1": 64, "e2": 16, "e3": 4, "d1": 16, "d2": 64, "d3": 256, "sh": 256,
               "fc1": 1, "fc2": 1}
    bias = np.zeros((1, BIAS_LEN), np.float32)
    for name in _LAYERS:
        if name == "fc2":
            b = np.pad(np.asarray(params["fc2_b"], np.float32), (0, CLS_PAD - NCLS))
        else:
            b = np.asarray(params[name + "_b"], np.float32)
        bias[0, _BIAS_OFF[name]:_BIAS_OFF[name] + _N[name]] = np.tile(b, spatial[name])

    return (jnp.asarray(w512, jnp.bfloat16), jnp.asarray(w256, jnp.bfloat16),
            jnp.asarray(w128, jnp.bfloat16), jnp.asarray(w2048, jnp.bfloat16),
            jnp.asarray(bias, jnp.float32))


# ----------------------------------------------------------------------------
# Wrapper: one pallas_call per forward, B_TILE images per grid step
# ----------------------------------------------------------------------------
def _round_up(x, m):
    return (x + m - 1) // m * m


def _const_index(ndim):
    def index_map(i):
        return (0,) * ndim
    return index_map


def classifier_forward(prepared, x_nchw, b_tile=16):
    B = x_nchw.shape[0]
    # batch tile: multiple of 8; pick <= b_tile.  For v7x prefer b_tile such that
    # grid = ceil(B / b_tile) >= 2 so both TensorCores get work.
    bt = _round_up(int(min(b_tile, _round_up(B, 8))), 8)
    Bp = _round_up(B, bt)

    # NCHW -> per-image flattened (h, w, c) channel-minor lane row
    x_flat = jnp.transpose(x_nchw, (0, 2, 3, 1)).reshape(B, XFLAT).astype(jnp.float32)
    if Bp != B:
        x_flat = jnp.pad(x_flat, ((0, Bp - B), (0, 0)))

    in_specs = [pl.BlockSpec((bt, XFLAT), lambda i: (i, 0))]
    in_specs += [pl.BlockSpec(p.shape, _const_index(p.ndim)) for p in prepared]

    seg_rows, cls = pl.pallas_call(
        _fused_forward_kernel,
        grid=(Bp // bt,),
        in_specs=in_specs,
        out_specs=(pl.BlockSpec((bt, SEGFLAT), lambda i: (i, 0)),
                   pl.BlockSpec((bt, CLS_PAD), lambda i: (i, 0))),
        out_shape=(jax.ShapeDtypeStruct((Bp, SEGFLAT), jnp.float32),
                   jax.ShapeDtypeStruct((Bp, CLS_PAD), jnp.float32)),
        compiler_params=pltpu.CompilerParams(
            dimension_semantics=("parallel",),
            vmem_limit_bytes=40 * 1024 * 1024),
    )(x_flat, *prepared)

    seg = seg_rows[:B].reshape(B, 1, DIM, DIM)     # NCHW segmentation map
    return seg, cls[:B, :NCLS]


# ----------------------------------------------------------------------------
# Synthetic UNet + classifier parameters (deterministic, same as previous version)
# ----------------------------------------------------------------------------
def init_params(key, output_classes=NCLS):
    def conv_init(k, kh, kw, cin, cout):
        kw_, kb_ = jax.random.split(k)
        scale = 1.0 / jnp.sqrt(kh * kw * cin)
        w = jax.random.uniform(kw_, (kh, kw, cin, cout), jnp.float32, -scale, scale)
        b = jax.random.uniform(kb_, (cout,), jnp.float32, -scale, scale)
        return w, b

    def fc_init(k, cin, cout):
        kw_, kb_ = jax.random.split(k)
        scale = 1.0 / jnp.sqrt(cin)
        w = jax.random.uniform(kw_, (cin, cout), jnp.float32, -scale, scale)
        b = jax.random.uniform(kb_, (cout,), jnp.float32, -scale, scale)
        return w, b

    keys = jax.random.split(key, 9)
    p = {}
    p["e1_w"], p["e1_b"] = conv_init(keys[0], 3, 3, 3, 8)
    p["e2_w"], p["e2_b"] = conv_init(keys[1], 3, 3, 8, 16)
    p["e3_w"], p["e3_b"] = conv_init(keys[2], 3, 3, 16, 32)
    p["d1_w"], p["d1_b"] = conv_init(keys[3], 3, 3, 32 + 16, 16)
    p["d2_w"], p["d2_b"] = conv_init(keys[4], 3, 3, 16 + 8, 8)
    p["d3_w"], p["d3_b"] = conv_init(keys[5], 3, 3, 8, 8)
    p["sh_w"], p["sh_b"] = conv_init(keys[6], 3, 3, 8, 1)
    p["fc1_w"], p["fc1_b"] = fc_init(keys[7], C3, FC_HIDDEN)
    p["fc2_w"], p["fc2_b"] = fc_init(keys[8], FC_HIDDEN, output_classes)
    return p


# ----------------------------------------------------------------------------
if __name__ == "__main__":
    root = jax.random.PRNGKey(0)
    pkey, xkey = jax.random.split(root)
    params = init_params(pkey, output_classes=NCLS)
    prepared = prepare_params(params)       # host-side, once per set of weights

    x = jax.random.normal(xkey, (2, CIN, DIM, DIM), jnp.float32)   # NCHW input

    fwd = jax.jit(classifier_forward)
    seg_out, cls_out = fwd(prepared, x)
    jax.block_until_ready((seg_out, cls_out))

    assert seg_out.shape == (2, 1, DIM, DIM), seg_out.shape
    assert cls_out.shape == (2, NCLS), cls_out.shape
    assert bool(jnp.all(jnp.isfinite(seg_out))) and bool(jnp.all(jnp.isfinite(cls_out)))
    assert bool(jnp.all(cls_out >= 0.0)) and bool(jnp.all(cls_out <= 1.0))
    print("KERNEL_OK")
</pallas_src>

<mosaic_0001>
module attributes {stable_mosaic.version = 11 : i64} {
  func.func @_fused_forward_kernel(%arg0: i32, %arg1: memref<8x768xf32, #tpu.memory_space<vmem>>, %arg2: memref<1568x512xbf16, #tpu.memory_space<vmem>>, %arg3: memref<2944x256xbf16, #tpu.memory_space<vmem>>, %arg4: memref<768x128xbf16, #tpu.memory_space<vmem>>, %arg5: memref<512x2048xbf16, #tpu.memory_space<vmem>>, %arg6: memref<1x4608xf32, #tpu.memory_space<vmem>>, %arg7: memref<8x256xf32, #tpu.memory_space<vmem>>, %arg8: memref<8x128xf32, #tpu.memory_space<vmem>>) attributes {dimension_semantics = [#tpu.dimension_semantics<parallel>], iteration_bounds = array<i64: 1>, scalar_prefetch = 0 : i64, scratch_operands = 0 : i64, tpu.core_type = #tpu.core_type<tc>, window_params = [{transform_indices = @transform_0, window_bounds = array<i64: 8, 768>}, {pipeline_mode = #tpu.pipeline_mode<synchronous>, transform_indices = @transform_1, window_bounds = array<i64: 1568, 512>}, {pipeline_mode = #tpu.pipeline_mode<synchronous>, transform_indices = @transform_2, window_bounds = array<i64: 2944, 256>}, {pipeline_mode = #tpu.pipeline_mode<synchronous>, transform_indices = @transform_3, window_bounds = array<i64: 768, 128>}, {pipeline_mode = #tpu.pipeline_mode<synchronous>, transform_indices = @transform_4, window_bounds = array<i64: 512, 2048>}, {pipeline_mode = #tpu.pipeline_mode<synchronous>, transform_indices = @transform_5, window_bounds = array<i64: 1, 4608>}, {transform_indices = @transform_6, window_bounds = array<i64: 8, 256>}, {transform_indices = @transform_7, window_bounds = array<i64: 8, 128>}]} {
    %c0 = arith.constant 0 : index
    %c0_0 = arith.constant 0 : index
    %0 = vector.load %arg1[%c0, %c0_0] : memref<8x768xf32, #tpu.memory_space<vmem>>, vector<8x768xf32>
    %1 = arith.truncf %0 : vector<8x768xf32> to vector<8x768xbf16>
    %c0_1 = arith.constant 0 : index
    %c0_2 = arith.constant 0 : index
    %2 = vector.load %arg2[%c0_1, %c0_2] : memref<1568x512xbf16, #tpu.memory_space<vmem>>, vector<768x512xbf16>
    %cst = arith.constant dense<0.000000e+00> : vector<8x512xf32>
    %3 = tpu.matmul %1, %2, %cst {dimension_numbers = #tpu.dot_dimension_numbers<[1], [0], [0], [1], [0, 0, 1, 1], [], []>} : vector<8x768xbf16>, vector<768x512xbf16>, vector<8x512xf32> -> vector<8x512xf32>
    %c0_3 = arith.constant 0 : index
    %c0_4 = arith.constant 0 : index
    %4 = vector.load %arg6[%c0_3, %c0_4] : memref<1x4608xf32, #tpu.memory_space<vmem>>, vector<1x512xf32>
    %5 = vector.broadcast %4 : vector<1x512xf32> to vector<8x512xf32>
    %6 = arith.addf %3, %5 : vector<8x512xf32>
    %cst_5 = arith.constant 0.000000e+00 : f32
    %7 = vector.broadcast %cst_5 : f32 to vector<8x512xf32>
    %8 = arith.maximumf %6, %7 : vector<8x512xf32>
    %9 = arith.truncf %8 : vector<8x512xf32> to vector<8x512xbf16>
    %c0_6 = arith.constant 0 : index
    %c0_7 = arith.constant 0 : index
    %10 = vector.load %arg3[%c0_6, %c0_7] : memref<2944x256xbf16, #tpu.memory_space<vmem>>, vector<512x256xbf16>
    %cst_8 = arith.constant dense<0.000000e+00> : vector<8x256xf32>
    %11 = tpu.matmul %9, %10, %cst_8 {dimension_numbers = #tpu.dot_dimension_numbers<[1], [0], [0], [1], [0, 0, 1, 1], [], []>} : vector<8x512xbf16>, vector<512x256xbf16>, vector<8x256xf32> -> vector<8x256xf32>
    %c0_9 = arith.constant 0 : index
    %c512 = arith.constant 512 : index
    %12 = vector.load %arg6[%c0_9, %c512] : memref<1x4608xf32, #tpu.memory_space<vmem>>, vector<1x256xf32>
    %13 = vector.broadcast %12 : vector<1x256xf32> to vector<8x256xf32>
    %14 = arith.addf %11, %13 : vector<8x256xf32>
    %cst_10 = arith.constant 0.000000e+00 : f32
    %15 = vector.broadcast %cst_10 : f32 to vector<8x256xf32>
    %16 = arith.maximumf %14, %15 : vector<8x256xf32>
    %17 = arith.truncf %16 : vector<8x256xf32> to vector<8x256xbf16>
    %c0_11 = arith.constant 0 : index
    %c0_12 = arith.constant 0 : index
    %18 = vector.load %arg4[%c0_11, %c0_12] : memref<768x128xbf16, #tpu.memory_space<vmem>>, vector<256x128xbf16>
    %cst_13 = arith.constant dense<0.000000e+00> : vector<8x128xf32>
    %19 = tpu.matmul %17, %18, %cst_13 {dimension_numbers = #tpu.dot_dimension_numbers<[1], [0], [0], [1], [0, 0, 1, 1], [], []>} : vector<8x256xbf16>, vector<256x128xbf16>, vector<8x128xf32> -> vector<8x128xf32>
    %c0_14 = arith.constant 0 : index
    %c768 = arith.constant 768 : index
    %20 = vector.load %arg6[%c0_14, %c768] : memref<1x4608xf32, #tpu.memory_space<vmem>>, vector<1x128xf32>
    %21 = vector.broadcast %20 : vector<1x128xf32> to vector<8x128xf32>
    %22 = arith.addf %19, %21 : vector<8x128xf32>
    %cst_15 = arith.constant 0.000000e+00 : f32
    %23 = vector.broadcast %cst_15 : f32 to vector<8x128xf32>
    %24 = arith.maximumf %22, %23 : vector<8x128xf32>
    %25 = arith.truncf %24 : vector<8x128xf32> to vector<8x128xbf16>
    %26 = tpu.concatenate %25, %17 in 1 : vector<8x128xbf16>, vector<8x256xbf16> -> vector<8x384xbf16>
    %c512_16 = arith.constant 512 : index
    %c0_17 = arith.constant 0 : index
    %27 = vector.load %arg3[%c512_16, %c0_17] : memref<2944x256xbf16, #tpu.memory_space<vmem>>, vector<384x256xbf16>
    %cst_18 = arith.constant dense<0.000000e+00> : vector<8x256xf32>
    %28 = tpu.matmul %26, %27, %cst_18 {dimension_numbers = #tpu.dot_dimension_numbers<[1], [0], [0], [1], [0, 0, 1, 1], [], []>} : vector<8x384xbf16>, vector<384x256xbf16>, vector<8x256xf32> -> vector<8x256xf32>
    %c0_19 = arith.constant 0 : index
    %c896 = arith.constant 896 : index
    %29 = vector.load %arg6[%c0_19, %c896] : memref<1x4608xf32, #tpu.memory_space<vmem>>, vector<1x256xf32>
    %30 = vector.broadcast %29 : vector<1x256xf32> to vector<8x256xf32>
    %31 = arith.addf %28, %30 : vector<8x256xf32>
    %cst_20 = arith.constant 0.000000e+00 : f32
    %32 = vector.broadcast %cst_20 : f32 to vector<8x256xf32>
    %33 = arith.maximumf %31, %32 : vector<8x256xf32>
    %34 = arith.truncf %33 : vector<8x256xf32> to vector<8x256xbf16>
    %35 = tpu.concatenate %34, %9 in 1 : vector<8x256xbf16>, vector<8x512xbf16> -> vector<8x768xbf16>
    %c768_21 = arith.constant 768 : index
    %c0_22 = arith.constant 0 : index
    %36 = vector.load %arg2[%c768_21, %c0_22] : memref<1568x512xbf16, #tpu.memory_space<vmem>>, vector<768x512xbf16>
    %cst_23 = arith.constant dense<0.000000e+00> : vector<8x512xf32>
    %37 = tpu.matmul %35, %36, %cst_23 {dimension_numbers = #tpu.dot_dimension_numbers<[1], [0], [0], [1], [0, 0, 1, 1], [], []>} : vector<8x768xbf16>, vector<768x512xbf16>, vector<8x512xf32> -> vector<8x512xf32>
    %c0_24 = arith.constant 0 : index
    %c1152 = arith.constant 1152 : index
    %38 = vector.load %arg6[%c0_24, %c1152] : memref<1x4608xf32, #tpu.memory_space<vmem>>, vector<1x512xf32>
    %39 = vector.broadcast %38 : vector<1x512xf32> to vector<8x512xf32>
    %40 = arith.addf %37, %39 : vector<8x512xf32>
    %cst_25 = arith.constant 0.000000e+00 : f32
    %41 = vector.broadcast %cst_25 : f32 to vector<8x512xf32>
    %42 = arith.maximumf %40, %41 : vector<8x512xf32>
    %43 = arith.truncf %42 : vector<8x512xf32> to vector<8x512xbf16>
    %c0_26 = arith.constant 0 : index
    %c0_27 = arith.constant 0 : index
    %44 = vector.load %arg5[%c0_26, %c0_27] : memref<512x2048xbf16, #tpu.memory_space<vmem>>, vector<512x2048xbf16>
    %cst_28 = arith.constant dense<0.000000e+00> : vector<8x2048xf32>
    %45 = tpu.matmul %43, %44, %cst_28 {dimension_numbers = #tpu.dot_dimension_numbers<[1], [0], [0], [1], [0, 0, 1, 1], [], []>} : vector<8x512xbf16>, vector<512x2048xbf16>, vector<8x2048xf32> -> vector<8x2048xf32>
    %c0_29 = arith.constant 0 : index
    %c1664 = arith.constant 1664 : index
    %46 = vector.load %arg6[%c0_29, %c1664] : memref<1x4608xf32, #tpu.memory_space<vmem>>, vector<1x2048xf32>
    %47 = vector.broadcast %46 : vector<1x2048xf32> to vector<8x2048xf32>
    %48 = arith.addf %45, %47 : vector<8x2048xf32>
    %cst_30 = arith.constant 0.000000e+00 : f32
    %49 = vector.broadcast %cst_30 : f32 to vector<8x2048xf32>
    %50 = arith.maximumf %48, %49 : vector<8x2048xf32>
    %51 = arith.truncf %50 : vector<8x2048xf32> to vector<8x2048xbf16>
    %c896_31 = arith.constant 896 : index
    %c0_32 = arith.constant 0 : index
    %52 = vector.load %arg3[%c896_31, %c0_32] : memref<2944x256xbf16, #tpu.memory_space<vmem>>, vector<2048x256xbf16>
    %cst_33 = arith.constant dense<0.000000e+00> : vector<8x256xf32>
    %53 = tpu.matmul %51, %52, %cst_33 {dimension_numbers = #tpu.dot_dimension_numbers<[1], [0], [0], [1], [0, 0, 1, 1], [], []>} : vector<8x2048xbf16>, vector<2048x256xbf16>, vector<8x256xf32> -> vector<8x256xf32>
    %c0_34 = arith.constant 0 : index
    %c3712 = arith.constant 3712 : index
    %54 = vector.load %arg6[%c0_34, %c3712] : memref<1x4608xf32, #tpu.memory_space<vmem>>, vector<1x256xf32>
    %55 = vector.broadcast %54 : vector<1x256xf32> to vector<8x256xf32>
    %56 = arith.addf %53, %55 : vector<8x256xf32>
    %c0_35 = arith.constant 0 : index
    %c0_36 = arith.constant 0 : index
    %57 = vector.load %arg7[%c0_35, %c0_36] : memref<8x256xf32, #tpu.memory_space<vmem>>, vector<8x256xf32>
    tpu.vector_store %arg7[%c0_35, %c0_36], %56 {strides = array<i32>} : memref<8x256xf32, #tpu.memory_space<vmem>>, vector<8x256xf32>,
    %58 = vector.extract_strided_slice %24 {offsets = [0, 0], sizes = [8, 32], strides = [1, 1]} : vector<8x128xf32> to vector<8x32xf32>
    %59 = vector.extract_strided_slice %24 {offsets = [0, 32], sizes = [8, 32], strides = [1, 1]} : vector<8x128xf32> to vector<8x32xf32>
    %60 = arith.maximumf %58, %59 : vector<8x32xf32>
    %61 = vector.extract_strided_slice %24 {offsets = [0, 64], sizes = [8, 32], strides = [1, 1]} : vector<8x128xf32> to vector<8x32xf32>
    %62 = arith.maximumf %60, %61 : vector<8x32xf32>
    %63 = vector.extract_strided_slice %24 {offsets = [0, 96], sizes = [8, 32], strides = [1, 1]} : vector<8x128xf32> to vector<8x32xf32>
    %64 = arith.maximumf %62, %63 : vector<8x32xf32>
    %65 = arith.truncf %64 : vector<8x32xf32> to vector<8x32xbf16>
    %c1536 = arith.constant 1536 : index
    %c0_37 = arith.constant 0 : index
    %66 = vector.load %arg2[%c1536, %c0_37] : memref<1568x512xbf16, #tpu.memory_space<vmem>>, vector<32x512xbf16>
    %cst_38 = arith.constant dense<0.000000e+00> : vector<8x512xf32>
    %67 = tpu.matmul %65, %66, %cst_38 {dimension_numbers = #tpu.dot_dimension_numbers<[1], [0], [0], [1], [0, 0, 1, 1], [], []>} : vector<8x32xbf16>, vector<32x512xbf16>, vector<8x512xf32> -> vector<8x512xf32>
    %c0_39 = arith.constant 0 : index
    %c3968 = arith.constant 3968 : index
    %68 = vector.load %arg6[%c0_39, %c3968] : memref<1x4608xf32, #tpu.memory_space<vmem>>, vector<1x512xf32>
    %69 = vector.broadcast %68 : vector<1x512xf32> to vector<8x512xf32>
    %70 = arith.addf %67, %69 : vector<8x512xf32>
    %cst_40 = arith.constant 0.000000e+00 : f32
    %71 = vector.broadcast %cst_40 : f32 to vector<8x512xf32>
    %72 = arith.maximumf %70, %71 : vector<8x512xf32>
    %73 = arith.truncf %72 : vector<8x512xf32> to vector<8x512xbf16>
    %c256 = arith.constant 256 : index
    %c0_41 = arith.constant 0 : index
    %74 = vector.load %arg4[%c256, %c0_41] : memref<768x128xbf16, #tpu.memory_space<vmem>>, vector<512x128xbf16>
    %cst_42 = arith.constant dense<0.000000e+00> : vector<8x128xf32>
    %75 = tpu.matmul %73, %74, %cst_42 {dimension_numbers = #tpu.dot_dimension_numbers<[1], [0], [0], [1], [0, 0, 1, 1], [], []>} : vector<8x512xbf16>, vector<512x128xbf16>, vector<8x128xf32> -> vector<8x128xf32>
    %c0_43 = arith.constant 0 : index
    %c4480 = arith.constant 4480 : index
    %76 = vector.load %arg6[%c0_43, %c4480] : memref<1x4608xf32, #tpu.memory_space<vmem>>, vector<1x128xf32>
    %77 = vector.broadcast %76 : vector<1x128xf32> to vector<8x128xf32>
    %78 = arith.addf %75, %77 : vector<8x128xf32>
    %79 = arith.negf %78 : vector<8x128xf32>
    %80 = math.exp %79 : vector<8x128xf32>
    %cst_44 = arith.constant 1.000000e+00 : f32
    %81 = vector.broadcast %cst_44 : f32 to vector<8x128xf32>
    %82 = arith.addf %81, %80 : vector<8x128xf32>
    %83 = arith.divf %81, %82 : vector<8x128xf32>
    %c0_45 = arith.constant 0 : index
    %c0_46 = arith.constant 0 : index
    %84 = vector.load %arg8[%c0_45, %c0_46] : memref<8x128xf32, #tpu.memory_space<vmem>>, vector<8x128xf32>
    tpu.vector_store %arg8[%c0_45, %c0_46], %83 {strides = array<i32>} : memref<8x128xf32, #tpu.memory_space<vmem>>, vector<8x128xf32>,
    return
  }
  func.func @transform_0(%arg0: i32) -> (i32, i32) {
    %c0_i32 = arith.constant 0 : i32
    %c0_i32_0 = arith.constant 0 : i32
    return %arg0, %c0_i32 : i32, i32
  }
  func.func @transform_1(%arg0: i32) -> (i32, i32) {
    %c0_i32 = arith.constant 0 : i32
    %c0_i32_0 = arith.constant 0 : i32
    %c0_i32_1 = arith.constant 0 : i32
    return %c0_i32, %c0_i32_0 : i32, i32
  }
  func.func @transform_2(%arg0: i32) -> (i32, i32) {
    %c0_i32 = arith.constant 0 : i32
    %c0_i32_0 = arith.constant 0 : i32
    %c0_i32_1 = arith.constant 0 : i32
    return %c0_i32, %c0_i32_0 : i32, i32
  }
  func.func @transform_3(%arg0: i32) -> (i32, i32) {
    %c0_i32 = arith.constant 0 : i32
    %c0_i32_0 = arith.constant 0 : i32
    %c0_i32_1 = arith.constant 0 : i32
    return %c0_i32, %c0_i32_0 : i32, i32
  }
  func.func @transform_4(%arg0: i32) -> (i32, i32) {
    %c0_i32 = arith.constant 0 : i32
    %c0_i32_0 = arith.constant 0 : i32
    %c0_i32_1 = arith.constant 0 : i32
    return %c0_i32, %c0_i32_0 : i32, i32
  }
  func.func @transform_5(%arg0: i32) -> (i32, i32) {
    %c0_i32 = arith.constant 0 : i32
    %c0_i32_0 = arith.constant 0 : i32
    %c0_i32_1 = arith.constant 0 : i32
    return %c0_i32, %c0_i32_0 : i32, i32
  }
  func.func @transform_6(%arg0: i32) -> (i32, i32) {
    %c0_i32 = arith.constant 0 : i32
    %c0_i32_0 = arith.constant 0 : i32
    return %arg0, %c0_i32 : i32, i32
  }
  func.func @transform_7(%arg0: i32) -> (i32, i32) {
    %c0_i32 = arith.constant 0 : i32
    %c0_i32_0 = arith.constant 0 : i32
    return %arg0, %c0_i32 : i32, i32
  }
}

</mosaic_0001>

<bundles_post_ra>
// kernel: classifier_forward.1
= control target key start
LH: loop header
LB: loop body
LE: loop exit
PB: predicated region body
PF: predicated region fallthrough
CT: control target
= control target key end

     0   :  { %13 = vsyncpa [#allocation3], 0  ;;  %s17946_s0 = inlined_call_operand.vmem [shape: f32[8,768], index: 0, kind: input, shape index: {}]   ;;  %s17947_s1 = inlined_call_operand.hbm [shape: bf16[1568,512], index: 1, kind: input, shape index: {}]   ;;  %s17948_s2 = inlined_call_operand.hbm [shape: bf16[2944,256], index: 2, kind: input, shape index: {}]   ;;  %s17949_s3 = inlined_call_operand.hbm [shape: bf16[768,128], index: 3, kind: input, shape index: {}]   ;;  %s17950_s4 = inlined_call_operand.hbm [shape: bf16[512,2048], index: 4, kind: input, shape index: {}]   ;;  %s17951_s5 = inlined_call_operand.hbm [shape: f32[1,4608], index: 5, kind: input, shape index: {}]   ;;  %s17952_s6 = inlined_call_operand.vmem [shape: f32[8,256], index: 6, kind: output, shape index: {0}]   ;;  %s17953_s7 = inlined_call_operand.vmem [shape: f32[8,128], index: 7, kind: output, shape index: {1}]  }
   0x1   :  { %14 = vsyncpa [#allocation5], 0  ;;  %s35_s26 = sshll.u32 %s17948_s2, 4  ;;  %s36_s26 = int_to_ptr.hbm [resolvable:$true] %s35_s26 }
   0x2   :  { %15 = vsyncpa [#allocation8], 0  ;;  %s17301_s27 = smov [#allocation4]   ;;  %s17302_s29 = smov 128  }
   0x3   :  { %s37_s28 = sshll.u32 %s17301_s27, 4  ;;  %s17303_s30 = smov 8   ;;  %s38_s28 = int_to_ptr.vmem [resolvable:$true] %s37_s28 }
   0x4   :  { %43 = dma.hbm_to_vmem [thread:$0]  %s36_s26, 47104, %s38_s28, [#allocation5], %s17302_s29, %s17302_s29, %s17303_s30  }
   0x5   :  { %s61_s10 = sshll.u32 %s17950_s4, 4  ;;  %s17304_s11 = smov [#allocation7]   ;;  %s62_s10 = int_to_ptr.hbm [resolvable:$true] %s61_s10 }
   0x6   :  { %s63_s12 = sshll.u32 %s17304_s11, 4  ;;  %s17305_s13 = smov 1024   ;;  %s64_s12 = int_to_ptr.vmem [resolvable:$true] %s63_s12 }
   0x7   :  { %s17306_s14 = smov 64   ;;  %s22_s16 = sshll.u32 %s17947_s1, 4  ;;  %s23_s16 = int_to_ptr.hbm [resolvable:$true] %s22_s16 }
   0x8   :  { %69 = dma.hbm_to_vmem [thread:$0]  %s62_s10, 65536, %s64_s12, [#allocation8], %s17305_s13, %s17305_s13, %s17306_s14  }
   0x9   :  { %s17307_s17 = smov [#allocation2]   ;;  %s48_s4 = sshll.u32 %s17949_s3, 4  ;;  %s49_s4 = int_to_ptr.hbm [resolvable:$true] %s48_s4 }
   0xa   :  { %s24_s18 = sshll.u32 %s17307_s17, 4  ;;  %s17308_s21 = smov 256   ;;  %s25_s18 = int_to_ptr.vmem [resolvable:$true] %s24_s18 }
   0xb   :  { %s17309_s22 = smov 16   ;;  %s17310_s23 = smov [#allocation6]  }
   0xc   :  { %30 = dma.hbm_to_vmem [thread:$0]  %s23_s16, 50176, %s25_s18, [#allocation3], %s17308_s21, %s17308_s21, %s17309_s22  }
   0xd   :  { %s50_s24 = sshll.u32 %s17310_s23, 4  ;;  %s75_s27 = sshll.u32 %s17951_s5, 4  ;;  %s51_s24 = int_to_ptr.vmem [resolvable:$true] %s50_s24  ;;  %s76_s27 = int_to_ptr.hbm [resolvable:$true] %s75_s27 }
   0xe   :  { %s17311_s1 = smov 4   ;;  %s17312_s28 = smov [#allocation9]  }
   0xf   :  { %56 = dma.hbm_to_vmem [thread:$0]  %s49_s4, 6144, %s51_s24, [#allocation5], %s17306_s14, %s17306_s14, %s17311_s1  }
  0x10   :  { %s77_s29 = sshll.u32 %s17312_s28, 4  ;;  %s78_s29 = int_to_ptr.vmem [resolvable:$true] %s77_s29 }
  0x11   :  { %80 = dma.hbm_to_vmem [thread:$0]  %s76_s27, 576, %s78_s29, [#allocation8]  }
  0x12   :  { %17295 = dma.done.wait [#allocation3], 50176  }
  0x13   :  { %17296 = vsyncadd [#allocation3], 4294917120 }
  0x14   :  { %17297 = dma.done.wait [#allocation5], 53248  }
  0x15   :  { %17298 = vsyncadd [#allocation5], 4294914048 }
  0x16   :  { %17299 = dma.done.wait [#allocation8], 66112  }
  0x17   :  { %17300 = vsyncadd [#allocation8], 4294901184  ;;  %v10661_v0 = vld [vmem:[#allocation2 + $0xe0] sm:$0xf]  ;;  %v15862_v1 = vld [vmem:[#allocation2 + $0xec] sm:$0xf0] }
  0x18   :  { %v10789_v2 = vld [vmem:[#allocation2 + $0x1e0] sm:$0xf]  ;;  %v10662_v3 = vor.u32 %v15862_v1, %v10661_v0  ;;  %v15894_v4 = vld [vmem:[#allocation2 + $0x1ec] sm:$0xf0]  ;;  %s17314_s17 = smov 96   ;;  %vm10140_vm0 = vcmask 261120  }
  0x19   :  { %v10917_v5 = vld [vmem:[#allocation2 + $0x2e0] sm:$0xf]  ;;  %v15926_v6 = vld [vmem:[#allocation2 + $0x2ec] sm:$0xf0]  ;;  %v10790_v7 = vor.u32 %v15894_v4, %v10789_v2 }
  0x1a   :  { %v10918_v8 = vor.u32 %v15926_v6, %v10917_v5  ;;  %v11045_v9 = vld [vmem:[#allocation2 + $0x3e0] sm:$0xf]  ;;  %v15958_v10 = vld [vmem:[#allocation2 + $0x3ec] sm:$0xf0]  ;;  %1276 = vmatpush.bf16.msra.mxu0 %v10662_v3 }
  0x1b   :  { %v10645_v11 = vld [vmem:[#allocation2 + $0xc0] sm:$0xf]  ;;  %v11046_v12 = vor.u32 %v15958_v10, %v11045_v9  ;;  %v15858_v13 = vld [vmem:[#allocation2 + $0xcc] sm:$0xf0]  ;;  %1289 = vmatpush.bf16.msra.mxu1 %v10790_v7 }
  0x1c   :  { %v10773_v14 = vld [vmem:[#allocation2 + $0x1c0] sm:$0xf]  ;;  %v15890_v15 = vld [vmem:[#allocation2 + $0x1cc] sm:$0xf0]  ;;  %1302 = vmatpush.bf16.msra.mxu2 %v10918_v8  ;;  %v10646_v16 = vor.u32 %v15858_v13, %v10645_v11 }
  0x1d   :  { %v10774_v17 = vor.u32 %v15890_v15, %v10773_v14  ;;  %v10901_v18 = vld [vmem:[#allocation2 + $0x2c0] sm:$0xf]  ;;  %v15922_v19 = vld [vmem:[#allocation2 + $0x2cc] sm:$0xf0]  ;;  %1315 = vmatpush.bf16.msra.mxu3 %v11046_v12 }
  0x1e   :  { %v11029_v20 = vld [vmem:[#allocation2 + $0x3c0] sm:$0xf]  ;;  %v10902_v21 = vor.u32 %v15922_v19, %v10901_v18  ;;  %v15954_v22 = vld [vmem:[#allocation2 + $0x3cc] sm:$0xf0]  ;;  %1277 = vmatpush.bf16.msra.mxu0 %v10646_v16 }
  0x1f   :  { %v10629_v23 = vld [vmem:[#allocation2 + $0xa0] sm:$0xf]  ;;  %v15854_v24 = vld [vmem:[#allocation2 + $0xac] sm:$0xf0]  ;;  %v11030_v25 = vor.u32 %v15954_v22, %v11029_v20  ;;  %1290 = vmatpush.bf16.msra.mxu1 %v10774_v17 }
  0x20   :  { %v10757_v26 = vld [vmem:[#allocation2 + $0x1a0] sm:$0xf]  ;;  %v15886_v27 = vld [vmem:[#allocation2 + $0x1ac] sm:$0xf0]  ;;  %v10630_v29 = vor.u32 %v15854_v24, %v10629_v23  ;;  %1303 = vmatpush.bf16.msra.mxu2 %v10902_v21 }
  0x21   :  { %v10885_v28 = vld [vmem:[#allocation2 + $0x2a0] sm:$0xf]  ;;  %v15918_v30 = vld [vmem:[#allocation2 + $0x2ac] sm:$0xf0]  ;;  %v10758_v33 = vor.u32 %v15886_v27, %v10757_v26  ;;  %1316 = vmatpush.bf16.msra.mxu3 %v11030_v25 }
  0x22   :  { %v11013_v31 = vld [vmem:[#allocation2 + $0x3a0] sm:$0xf]  ;;  %v15950_v32 = vld [vmem:[#allocation2 + $0x3ac] sm:$0xf0]  ;;  %v10886_v34 = vor.u32 %v15918_v30, %v10885_v28  ;;  %1278 = vmatpush.bf16.msra.mxu0 %v10630_v29 }
  0x23   :  { %v10613_v35 = vld [vmem:[#allocation2 + $0x80] sm:$0xf]  ;;  %v15850_v36 = vld [vmem:[#allocation2 + $0x8c] sm:$0xf0]  ;;  %v11014_v38 = vor.u32 %v15950_v32, %v11013_v31  ;;  %1291 = vmatpush.bf16.msra.mxu1 %v10758_v33  ;;  %v15860_v33 = vld [vmem:[#allocation2 + $0xe4] sm:$0xf] }
  0x24   :  { %v10741_v37 = vld [vmem:[#allocation2 + $0x180] sm:$0xf]  ;;  %v15882_v39 = vld [vmem:[#allocation2 + $0x18c] sm:$0xf0]  ;;  %v10614_v44 = vor.u32 %v15850_v36, %v10613_v35  ;;  %1304 = vmatpush.bf16.msra.mxu2 %v10886_v34  ;;  %v10663_v34 = vld [vmem:[#allocation2 + $0xf0] sm:$0xf0] }
  0x25   :  { %v10869_v40 = vld [vmem:[#allocation2 + $0x280] sm:$0xf]  ;;  %v15914_v41 = vld [vmem:[#allocation2 + $0x28c] sm:$0xf0]  ;;  %v10742_v45 = vor.u32 %v15882_v39, %v10741_v37  ;;  %1317 = vmatpush.bf16.msra.mxu3 %v11014_v38  ;;  %v15892_v37 = vld [vmem:[#allocation2 + $0x1e4] sm:$0xf] }
  0x26   :  { %v10997_v42 = vld [vmem:[#allocation2 + $0x380] sm:$0xf]  ;;  %v15946_v43 = vld [vmem:[#allocation2 + $0x38c] sm:$0xf0]  ;;  %v10870_v46 = vor.u32 %v15914_v41, %v10869_v40  ;;  %1279 = vmatpush.bf16.msra.mxu0 %v10614_v44  ;;  %v10791_v38 = vld [vmem:[#allocation2 + $0x1f0] sm:$0xf0] }
  0x27   :  { %v10597_v47 = vld [vmem:[#allocation2 + $0x60] sm:$0xf]  ;;  %v15846_v48 = vld [vmem:[#allocation2 + $0x6c] sm:$0xf0]  ;;  %v10998_v50 = vor.u32 %v15946_v43, %v10997_v42  ;;  %1292 = vmatpush.bf16.msra.mxu1 %v10742_v45  ;;  %v10666_v42 = vor.u32 %v15860_v33, %v10663_v34 }
  0x28   :  { %v10725_v49 = vld [vmem:[#allocation2 + $0x160] sm:$0xf]  ;;  %v15878_v51 = vld [vmem:[#allocation2 + $0x16c] sm:$0xf0]  ;;  %v10598_v56 = vor.u32 %v15846_v48, %v10597_v47  ;;  %1305 = vmatpush.bf16.msra.mxu2 %v10870_v46  ;;  %v10794_v46 = vor.u32 %v15892_v37, %v10791_v38  ;;  %v15856_v48 = vld [vmem:[#allocation2 + $0xc4] sm:$0xf] }
  0x29   :  { %v10853_v52 = vld [vmem:[#allocation2 + $0x260] sm:$0xf]  ;;  %v15910_v53 = vld [vmem:[#allocation2 + $0x26c] sm:$0xf0]  ;;  %v10726_v57 = vor.u32 %v15878_v51, %v10725_v49  ;;  %1318 = vmatpush.bf16.msra.mxu3 %v10998_v50  ;;  %v10647_v49 = vld [vmem:[#allocation2 + $0xd0] sm:$0xf0] }
  0x2a   :  { %v10981_v54 = vld [vmem:[#allocation2 + $0x360] sm:$0xf]  ;;  %v15942_v55 = vld [vmem:[#allocation2 + $0x36c] sm:$0xf0]  ;;  %v10854_v58 = vor.u32 %v15910_v53, %v10853_v52  ;;  %1280 = vmatpush.bf16.msra.mxu0 %v10598_v56  ;;  %v15888_v50 = vld [vmem:[#allocation2 + $0x1c4] sm:$0xf] }
  0x2b   :  { %v10581_v59 = vld [vmem:[#allocation2 + $0x40] sm:$0xf]  ;;  %v15842_v60 = vld [vmem:[#allocation2 + $0x4c] sm:$0xf0]  ;;  %v10982_v62 = vor.u32 %v15942_v55, %v10981_v54  ;;  %1293 = vmatpush.bf16.msra.mxu1 %v10726_v57  ;;  %v10775_v51 = vld [vmem:[#allocation2 + $0x1d0] sm:$0xf0]  ;;  %v10650_v55 = vor.u32 %v15856_v48, %v10647_v49 }
  0x2c   :  { %v10709_v61 = vld [vmem:[#allocation2 + $0x140] sm:$0xf]  ;;  %v15874_v63 = vld [vmem:[#allocation2 + $0x14c] sm:$0xf0]  ;;  %v10582_v4 = vor.u32 %v15842_v60, %v10581_v59  ;;  %1306 = vmatpush.bf16.msra.mxu2 %v10854_v58  ;;  %v10778_v59 = vor.u32 %v15888_v50, %v10775_v51  ;;  %v15852_v60 = vld [vmem:[#allocation2 + $0xa4] sm:$0xf] }
  0x2d   :  { %v10837_v0 = vld [vmem:[#allocation2 + $0x240] sm:$0xf]  ;;  %v15906_v1 = vld [vmem:[#allocation2 + $0x24c] sm:$0xf0]  ;;  %v10710_v5 = vor.u32 %v15874_v63, %v10709_v61  ;;  %1319 = vmatpush.bf16.msra.mxu3 %v10982_v62  ;;  %v10631_v61 = vld [vmem:[#allocation2 + $0xb0] sm:$0xf0] }
  0x2e   :  { %v10965_v2 = vld [vmem:[#allocation2 + $0x340] sm:$0xf]  ;;  %v15938_v3 = vld [vmem:[#allocation2 + $0x34c] sm:$0xf0]  ;;  %v10838_v6 = vor.u32 %v15906_v1, %v10837_v0  ;;  %1281 = vmatpush.bf16.msra.mxu0 %v10582_v4  ;;  %v15884_v62 = vld [vmem:[#allocation2 + $0x1a4] sm:$0xf] }
  0x2f   :  { %v10565_v7 = vld [vmem:[#allocation2 + $0x20] sm:$0xf]  ;;  %v15838_v8 = vld [vmem:[#allocation2 + $0x2c] sm:$0xf0]  ;;  %v10966_v10 = vor.u32 %v15938_v3, %v10965_v2  ;;  %1294 = vmatpush.bf16.msra.mxu1 %v10710_v5  ;;  %v10759_v63 = vld [vmem:[#allocation2 + $0x1b0] sm:$0xf0]  ;;  %v10634_v5 = vor.u32 %v15852_v60, %v10631_v61 }
  0x30   :  { %v10693_v9 = vld [vmem:[#allocation2 + $0x120] sm:$0xf]  ;;  %v15870_v11 = vld [vmem:[#allocation2 + $0x12c] sm:$0xf0]  ;;  %v10566_v16 = vor.u32 %v15838_v8, %v10565_v7  ;;  %1307 = vmatpush.bf16.msra.mxu2 %v10838_v6 }
  0x31   :  { %v10821_v12 = vld [vmem:[#allocation2 + $0x220] sm:$0xf]  ;;  %v15902_v13 = vld [vmem:[#allocation2 + $0x22c] sm:$0xf0]  ;;  %v10694_v19 = vor.u32 %v15870_v11, %v10693_v9  ;;  %1320 = vmatpush.bf16.msra.mxu3 %v10966_v10  ;;  %v105_v10 = vld [vmem:[%s17946_s0 + $0x18] sm:$0xff]  ;;  %v10762_v11 = vor.u32 %v15884_v62, %v10759_v63 }
  0x32   :  { %v10949_v14 = vld [vmem:[#allocation2 + $0x320] sm:$0xf]  ;;  %v15934_v15 = vld [vmem:[#allocation2 + $0x32c] sm:$0xf0]  ;;  %v10822_v20 = vor.u32 %v15902_v13, %v10821_v12  ;;  %1282 = vmatpush.bf16.msra.mxu0 %v10566_v16  ;;  %v15848_v13 = vld [vmem:[#allocation2 + $0x84] sm:$0xf] }
  0x33   :  { %v10549_v17 = vld [vmem:[#allocation2] sm:$0xf]  ;;  %v15834_v18 = vld [vmem:[#allocation2 + $0xc] sm:$0xf0]  ;;  %v10950_v24 = vor.u32 %v15934_v15, %v10949_v14  ;;  %1295 = vmatpush.bf16.msra.mxu1 %v10694_v19  ;;  %v10615_v14 = vld [vmem:[#allocation2 + $0x90] sm:$0xf0]  ;;  %v17386_v15 = vpack.c.bf16 %v105_v10, %v105_v10 }
  0x34   :  { %v10677_v21 = vld [vmem:[#allocation2 + $0x100] sm:$0xf]  ;;  %v15866_v22 = vld [vmem:[#allocation2 + $0x10c] sm:$0xf0]  ;;  %v10550_v31 = vor.u32 %v15834_v18, %v10549_v17  ;;  %1308 = vmatpush.bf16.msra.mxu2 %v10822_v20  ;;  %v15880_v16 = vld [vmem:[#allocation2 + $0x184] sm:$0xf] }
  0x35   :  { %v10805_v23 = vld [vmem:[#allocation2 + $0x200] sm:$0xf]  ;;  %v15898_v25 = vld [vmem:[#allocation2 + $0x20c] sm:$0xf0]  ;;  %v10678_v35 = vor.u32 %v15866_v22, %v10677_v21  ;;  %1321 = vmatpush.bf16.msra.mxu3 %v10950_v24  ;;  %v10743_v17 = vld [vmem:[#allocation2 + $0x190] sm:$0xf0]  ;;  %v10618_v21 = vor.u32 %v15848_v13, %v10615_v14 }
  0x36   :  { %v10933_v26 = vld [vmem:[#allocation2 + $0x300] sm:$0xf]  ;;  %v15930_v27 = vld [vmem:[#allocation2 + $0x30c] sm:$0xf0]  ;;  %v10806_v36 = vor.u32 %v15898_v25, %v10805_v23  ;;  %1283 = vmatpush.bf16.msra.mxu0 %v10550_v31  ;;  %v103_v19 = vld [vmem:[%s17946_s0 + $0x8] sm:$0xff] }
  0x37   :  { %v11173_v28 = vld [vmem:[#allocation2 + $0x4e0] sm:$0xf]  ;;  %v15990_v29 = vld [vmem:[#allocation2 + $0x4ec] sm:$0xf0]  ;;  %v10934_v39 = vor.u32 %v15930_v27, %v10933_v26  ;;  %1296 = vmatpush.bf16.msra.mxu1 %v10678_v35  ;;  %v17394_v25 = vpack.c.bf16 %v103_v19, %v103_v19  ;;  %v10746_v26 = vor.u32 %v15880_v16, %v10743_v17  ;;  %v10727_v31 = vld [vmem:[#allocation2 + $0x170] sm:$0xf0] }
  0x38   :  { %v11301_v30 = vld [vmem:[#allocation2 + $0x5e0] sm:$0xf]  ;;  %v16022_v32 = vld [vmem:[#allocation2 + $0x5ec] sm:$0xf0]  ;;  %v11174_v40 = vor.u32 %v15990_v29, %v11173_v28  ;;  %1309 = vmatpush.bf16.msra.mxu2 %v10806_v36  ;;  %v15844_v28 = vld [vmem:[#allocation2 + $0x64] sm:$0xf] }
  0x39   :  { %v11302_v41 = vor.u32 %v16022_v32, %v11301_v30  ;;  %v11157_v43 = vld [vmem:[#allocation2 + $0x4c0] sm:$0xf]  ;;  %v15986_v44 = vld [vmem:[#allocation2 + $0x4cc] sm:$0xf0]  ;;  %1322 = vmatpush.bf16.msra.mxu3 %v10934_v39  ;;  %v10599_v29 = vld [vmem:[#allocation2 + $0x70] sm:$0xf0] }
  0x3a   :  { %v11285_v45 = vld [vmem:[#allocation2 + $0x5c0] sm:$0xf]  ;;  %v16018_v47 = vld [vmem:[#allocation2 + $0x5cc] sm:$0xf0]  ;;  %1328 = vmatpush.bf16.msrb.mxu0 %v11174_v40  ;;  %v11158_v52 = vor.u32 %v15986_v44, %v11157_v43  ;;  %v15876_v30 = vld [vmem:[#allocation2 + $0x164] sm:$0xf]  ;;  %1297 = vmatmul.bf16.vlgmr.msra.gmra.mxu1 %v17394_v25  ;;  %v10602_v34 = vor.u32 %v15844_v28, %v10599_v29 }
  0x3b   :  { %v11141_v53 = vld [vmem:[#allocation2 + $0x4a0] sm:$0xf]  ;;  %1341 = vmatpush.bf16.msrb.mxu1 %v11302_v41  ;;  %v11286_v54 = vor.u32 %v16018_v47, %v11285_v45  ;;  %v15982_v56 = vld [vmem:[#allocation2 + $0x4ac] sm:$0xf0]  ;;  %v10730_v38 = vor.u32 %v15876_v30, %v10727_v31  ;;  %v15840_v40 = vld [vmem:[#allocation2 + $0x44] sm:$0xf] }
  0x3c   :  { %1354 = vmatpush.bf16.msrb.mxu2 %v10666_v42  ;;  %v11269_v57 = vld [vmem:[#allocation2 + $0x5a0] sm:$0xf]  ;;  %v16014_v58 = vld [vmem:[#allocation2 + $0x5ac] sm:$0xf0]  ;;  %v11142_v0 = vor.u32 %v15982_v56, %v11141_v53  ;;  %1323 = vmatmul.bf16.vlgmr.msra.gmra.mxu3 %v17386_v15  ;;  %v10583_v41 = vld [vmem:[#allocation2 + $0x50] sm:$0xf0] }
  0x3d   :  { %1367 = vmatpush.bf16.msrb.mxu3 %v10794_v46  ;;  %v11270_v1 = vor.u32 %v16014_v58, %v11269_v57  ;;  %v11125_v2 = vld [vmem:[#allocation2 + $0x480] sm:$0xf]  ;;  %v104_v3 = vld [vmem:[%s17946_s0 + $0x10] sm:$0xff]  ;;  %v15872_v42 = vld [vmem:[#allocation2 + $0x144] sm:$0xf]  ;;  %v10586_v46 = vor.u32 %v15840_v40, %v10583_v41 }
  0x3e   :  { %1329 = vmatpush.bf16.msrb.mxu0 %v11158_v52  ;;  %v102_v4 = vld [vmem:[%s17946_s0] sm:$0xff]  ;;  %v15978_v6 = vld [vmem:[#allocation2 + $0x48c] sm:$0xf0]  ;;  %v17379_v8 = vpack.c.bf16 %v104_v3, %v104_v3  ;;  %v10711_v43 = vld [vmem:[#allocation2 + $0x150] sm:$0xf0] }
  0x3f   :  { %1342 = vmatpush.bf16.msrb.mxu1 %v11286_v54  ;;  %v11253_v7 = vld [vmem:[#allocation2 + $0x580] sm:$0xf]  ;;  %v17381_v9 = vpack.c.bf16 %v102_v4, %v102_v4  ;;  %v16010_v12 = vld [vmem:[#allocation2 + $0x58c] sm:$0xf0]  ;;  %v11126_v18 = vor.u32 %v15978_v6, %v11125_v2  ;;  %v10714_v50 = vor.u32 %v15872_v42, %v10711_v43  ;;  %v15836_v52 = vld [vmem:[#allocation2 + $0x24] sm:$0xf] }
  0x40   :  { %1355 = vmatpush.bf16.msrb.mxu2 %v10650_v55  ;;  %v11254_v20 = vor.u32 %v16010_v12, %v11253_v7  ;;  %v11109_v22 = vld [vmem:[#allocation2 + $0x460] sm:$0xf]  ;;  %v15974_v23 = vld [vmem:[#allocation2 + $0x46c] sm:$0xf0]  ;;  %v10567_v53 = vld [vmem:[#allocation2 + $0x30] sm:$0xf0] }
  0x41   :  { %1368 = vmatpush.bf16.msrb.mxu3 %v10778_v59  ;;  %1310 = vmatmul.bf16.vlgmr.msra.gmra.mxu2 %v17379_v8  ;;  %v11237_v24 = vld [vmem:[#allocation2 + $0x560] sm:$0xf]  ;;  %v16006_v27 = vld [vmem:[#allocation2 + $0x56c] sm:$0xf0]  ;;  %v11110_v32 = vor.u32 %v15974_v23, %v11109_v22  ;;  %v15868_v54 = vld [vmem:[#allocation2 + $0x124] sm:$0xf]  ;;  %v10570_v60 = vor.u32 %v15836_v52, %v10567_v53 }
  0x42   :  { %1284 = vmatmul.bf16.vlgmr.msra.gmra.mxu0 %v17381_v9  ;;  %v11238_v33 = vor.u32 %v16006_v27, %v11237_v24  ;;  %v11093_v35 = vld [vmem:[#allocation2 + $0x440] sm:$0xf]  ;;  %v15970_v36 = vld [vmem:[#allocation2 + $0x44c] sm:$0xf0]  ;;  %v10695_v55 = vld [vmem:[#allocation2 + $0x130] sm:$0xf0] }
  0x43   :  { %1330 = vmatpush.bf16.msrb.mxu0 %v11142_v0  ;;  %1343 = vmatpush.bf16.msrb.mxu1 %v11270_v1  ;;  %v11221_v37 = vld [vmem:[#allocation2 + $0x540] sm:$0xf]  ;;  %v16002_v39 = vld [vmem:[#allocation2 + $0x54c] sm:$0xf0]  ;;  %v11094_v44 = vor.u32 %v15970_v36, %v11093_v35  ;;  %v15832_v63 = vld [vmem:[#allocation2 + $0x4] sm:$0xf]  ;;  %v10698_v0 = vor.u32 %v15868_v54, %v10695_v55 }
  0x44   :  { %1356 = vmatpush.bf16.msrb.mxu2 %v10634_v5  ;;  %v11222_v45 = vor.u32 %v16002_v39, %v11221_v37  ;;  %v11077_v47 = vld [vmem:[#allocation2 + $0x420] sm:$0xf]  ;;  %v15966_v48 = vld [vmem:[#allocation2 + $0x42c] sm:$0xf0]  ;;  %v10551_v1 = vld [vmem:[#allocation2 + $0x10] sm:$0xf0] }
  0x45   :  { %1369 = vmatpush.bf16.msrb.mxu3 %v10762_v11  ;;  %v11205_v49 = vld [vmem:[#allocation2 + $0x520] sm:$0xf]  ;;  %v15998_v51 = vld [vmem:[#allocation2 + $0x52c] sm:$0xf0]  ;;  %v11078_v56 = vor.u32 %v15966_v48, %v11077_v47  ;;  %v15864_v2 = vld [vmem:[#allocation2 + $0x104] sm:$0xf]  ;;  %v10554_v14 = vor.u32 %v15832_v63, %v10551_v1 }
  0x46   :  { %v11061_v57 = vld [vmem:[#allocation2 + $0x400] sm:$0xf]  ;;  %v15962_v58 = vld [vmem:[#allocation2 + $0x40c] sm:$0xf0]  ;;  %v11206_v59 = vor.u32 %v15998_v51, %v11205_v49  ;;  %v10679_v3 = vld [vmem:[#allocation2 + $0x110] sm:$0xf0] }
  0x47   :  { %1331 = vmatpush.bf16.msrb.mxu0 %v11126_v18  ;;  %1344 = vmatpush.bf16.msrb.mxu1 %v11254_v20  ;;  %v11189_v61 = vld [vmem:[#allocation2 + $0x500] sm:$0xf]  ;;  %v15994_v62 = vld [vmem:[#allocation2 + $0x50c] sm:$0xf0]  ;;  %v15924_v4 = vld [vmem:[#allocation2 + $0x2e4] sm:$0xf]  ;;  %v11062_v7 = vor.u32 %v15962_v58, %v11061_v57  ;;  %v10682_v19 = vor.u32 %v15864_v2, %v10679_v3 }
  0x48   :  { %1357 = vmatpush.bf16.msrb.mxu2 %v10618_v21  ;;  %v10919_v5 = vld [vmem:[#allocation2 + $0x2f0] sm:$0xf0]  ;;  %v15956_v6 = vld [vmem:[#allocation2 + $0x3e4] sm:$0xf]  ;;  %v11190_v13 = vor.u32 %v15994_v62, %v11189_v61  ;;  %v107_v21 = vld [vmem:[%s17946_s0 + $0x28] sm:$0xff] }
  0x49   :  { %1370 = vmatpush.bf16.msrb.mxu3 %v10746_v26  ;;  %v11047_v10 = vld [vmem:[#allocation2 + $0x3f0] sm:$0xf0]  ;;  %v15988_v11 = vld [vmem:[#allocation2 + $0x4e4] sm:$0xf]  ;;  %v10922_v20 = vor.u32 %v15924_v4, %v10919_v5  ;;  %v17405_v35 = vpack.c.bf16 %v107_v21, %v107_v21 }
  0x4a   :  { %v11175_v12 = vld [vmem:[#allocation2 + $0x4f0] sm:$0xf0]  ;;  %v16020_v16 = vld [vmem:[#allocation2 + $0x5e4] sm:$0xf]  ;;  %v11050_v22 = vor.u32 %v15956_v6, %v11047_v10 }
  0x4b   :  { %1332 = vmatpush.bf16.msrb.mxu0 %v11110_v32  ;;  %1345 = vmatpush.bf16.msrb.mxu1 %v11238_v33  ;;  %v11303_v17 = vld [vmem:[#allocation2 + $0x5f0] sm:$0xf0]  ;;  %v106_v18 = vld [vmem:[%s17946_s0 + $0x20] sm:$0xff]  ;;  %v11178_v23 = vor.u32 %v15988_v11, %v11175_v12  ;;  %s17313_s0 = smov 32  }
  0x4c   :  { %1358 = vmatpush.bf16.msrb.mxu2 %v10602_v34  ;;  %v15920_v24 = vld [vmem:[#allocation2 + $0x2c4] sm:$0xf]  ;;  %v10903_v26 = vld [vmem:[#allocation2 + $0x2d0] sm:$0xf0]  ;;  %v11306_v28 = vor.u32 %v16020_v16, %v11303_v17  ;;  %v17403_v32 = vpack.c.bf16 %v106_v18, %v106_v18 }
  0x4d   :  { %1371 = vmatpush.bf16.msrb.mxu3 %v10730_v38  ;;  %v15952_v27 = vld [vmem:[#allocation2 + $0x3c4] sm:$0xf]  ;;  %v11031_v29 = vld [vmem:[#allocation2 + $0x3d0] sm:$0xf0]  ;;  %v10906_v36 = vor.u32 %v15920_v24, %v10903_v26 }
  0x4e   :  { %v15984_v30 = vld [vmem:[#allocation2 + $0x4c4] sm:$0xf]  ;;  %v11159_v31 = vld [vmem:[#allocation2 + $0x4d0] sm:$0xf0]  ;;  %v11034_v37 = vor.u32 %v15952_v27, %v11031_v29 }
  0x4f   :  { %1333 = vmatpush.bf16.msrb.mxu0 %v11094_v44  ;;  %1346 = vmatpush.bf16.msrb.mxu1 %v11222_v45  ;;  %v16016_v33 = vld [vmem:[#allocation2 + $0x5c4] sm:$0xf]  ;;  %v11287_v34 = vld [vmem:[#allocation2 + $0x5d0] sm:$0xf0]  ;;  %v11162_v38 = vor.u32 %v15984_v30, %v11159_v31 }
  0x50   :  { %1359 = vmatpush.bf16.msrb.mxu2 %v10586_v46  ;;  %v15916_v39 = vld [vmem:[#allocation2 + $0x2a4] sm:$0xf]  ;;  %v10887_v40 = vld [vmem:[#allocation2 + $0x2b0] sm:$0xf0]  ;;  %v11290_v42 = vor.u32 %v16016_v33, %v11287_v34 }
  0x51   :  { %1372 = vmatpush.bf16.msrb.mxu3 %v10714_v50  ;;  %v15948_v41 = vld [vmem:[#allocation2 + $0x3a4] sm:$0xf]  ;;  %v11015_v43 = vld [vmem:[#allocation2 + $0x3b0] sm:$0xf0]  ;;  %v10890_v48 = vor.u32 %v15916_v39, %v10887_v40 }
  0x52   :  { %v15980_v44 = vld [vmem:[#allocation2 + $0x4a4] sm:$0xf]  ;;  %v11143_v45 = vld [vmem:[#allocation2 + $0x4b0] sm:$0xf0]  ;;  %v11018_v49 = vor.u32 %v15948_v41, %v11015_v43 }
  0x53   :  { %1334 = vmatpush.bf16.msrb.mxu0 %v11078_v56  ;;  %1347 = vmatpush.bf16.msrb.mxu1 %v11206_v59  ;;  %v16012_v46 = vld [vmem:[#allocation2 + $0x5a4] sm:$0xf]  ;;  %v11271_v47 = vld [vmem:[#allocation2 + $0x5b0] sm:$0xf0]  ;;  %v11146_v50 = vor.u32 %v15980_v44, %v11143_v45 }
  0x54   :  { %1360 = vmatpush.bf16.msrb.mxu2 %v10570_v60  ;;  %v15912_v51 = vld [vmem:[#allocation2 + $0x284] sm:$0xf]  ;;  %v10871_v52 = vld [vmem:[#allocation2 + $0x290] sm:$0xf0]  ;;  %v11274_v54 = vor.u32 %v16012_v46, %v11271_v47 }
  0x55   :  { %1373 = vmatpush.bf16.msrb.mxu3 %v10698_v0  ;;  %v15944_v53 = vld [vmem:[#allocation2 + $0x384] sm:$0xf]  ;;  %v10999_v55 = vld [vmem:[#allocation2 + $0x390] sm:$0xf0]  ;;  %v10874_v60 = vor.u32 %v15912_v51, %v10871_v52  ;;  %v15863_v51 = vld [vmem:[#allocation2 + $0xf4] sm:$0xf0] }
  0x56   :  { %v15976_v56 = vld [vmem:[#allocation2 + $0x484] sm:$0xf]  ;;  %v11127_v57 = vld [vmem:[#allocation2 + $0x490] sm:$0xf0]  ;;  %v11002_v61 = vor.u32 %v15944_v53, %v10999_v55  ;;  %v10797_v52 = vld [vmem:[#allocation2 + $0x1e8] sm:$0xf] }
  0x57   :  { %1335 = vmatpush.bf16.msrb.mxu0 %v11062_v7  ;;  %1348 = vmatpush.bf16.msrb.mxu1 %v11190_v13  ;;  %v16008_v58 = vld [vmem:[#allocation2 + $0x584] sm:$0xf]  ;;  %v11255_v59 = vld [vmem:[#allocation2 + $0x590] sm:$0xf0]  ;;  %v11130_v62 = vor.u32 %v15976_v56, %v11127_v57  ;;  %v10925_v55 = vld [vmem:[#allocation2 + $0x2e8] sm:$0xf] }
  0x58   :  { %1361 = vmatpush.bf16.msrb.mxu2 %v10554_v14  ;;  %v15908_v63 = vld [vmem:[#allocation2 + $0x264] sm:$0xf]  ;;  %v10855_v0 = vld [vmem:[#allocation2 + $0x270] sm:$0xf0]  ;;  %v11258_v2 = vor.u32 %v16008_v58, %v11255_v59  ;;  %v15927_v56 = vld [vmem:[#allocation2 + $0x2f4] sm:$0xf0] }
  0x59   :  { %1374 = vmatpush.bf16.msrb.mxu3 %v10682_v19  ;;  %v15940_v1 = vld [vmem:[#allocation2 + $0x364] sm:$0xf]  ;;  %v10983_v3 = vld [vmem:[#allocation2 + $0x370] sm:$0xf0]  ;;  %v10858_v10 = vor.u32 %v15908_v63, %v10855_v0  ;;  %v11053_v59 = vld [vmem:[#allocation2 + $0x3e8] sm:$0xf]  ;;  %v10926_v0 = vor.u32 %v15927_v56, %v10925_v55 }
  0x5a   :  { %1336 = vmatmul.bf16.vlgmr.msrb.gmra.mxu0 %v17403_v32  ;;  %1349 = vmatmul.bf16.vlgmr.msrb.gmra.mxu1 %v17405_v35  ;;  %v15972_v4 = vld [vmem:[#allocation2 + $0x464] sm:$0xf]  ;;  %v11111_v5 = vld [vmem:[#allocation2 + $0x470] sm:$0xf0]  ;;  %v10986_v11 = vor.u32 %v15940_v1, %v10983_v3  ;;  %v10653_v1 = vld [vmem:[#allocation2 + $0xc8] sm:$0xf] }
  0x5b   :  { %1380 = vmatpush.bf16.msra.mxu0 %v10922_v20  ;;  %1393 = vmatpush.bf16.msra.mxu1 %v11050_v22  ;;  %v16004_v6 = vld [vmem:[#allocation2 + $0x564] sm:$0xf]  ;;  %v11239_v7 = vld [vmem:[#allocation2 + $0x570] sm:$0xf0]  ;;  %v11114_v12 = vor.u32 %v15972_v4, %v11111_v5  ;;  %v10781_v3 = vld [vmem:[#allocation2 + $0x1c8] sm:$0xf] }
  0x5c   :  { %1406 = vmatpush.bf16.msra.mxu2 %v11178_v23  ;;  %1375 = vmatmul.bf16.vlgmr.msrb.gmra.mxu3 %v17394_v25  ;;  %v15904_v13 = vld [vmem:[#allocation2 + $0x244] sm:$0xf]  ;;  %v10839_v14 = vld [vmem:[#allocation2 + $0x250] sm:$0xf0]  ;;  %v11242_v17 = vor.u32 %v16004_v6, %v11239_v7  ;;  %v15891_v5 = vld [vmem:[#allocation2 + $0x1d4] sm:$0xf0] }
  0x5d   :  { %1419 = vmatpush.bf16.msra.mxu3 %v11306_v28  ;;  %1362 = vmatmul.bf16.vlgmr.msrb.gmra.mxu2 %v17381_v9  ;;  %v15936_v16 = vld [vmem:[#allocation2 + $0x344] sm:$0xf]  ;;  %v10967_v18 = vld [vmem:[#allocation2 + $0x350] sm:$0xf0]  ;;  %v10842_v23 = vor.u32 %v15904_v13, %v10839_v14  ;;  %v10909_v6 = vld [vmem:[#allocation2 + $0x2c8] sm:$0xf]  ;;  %v10782_v13 = vor.u32 %v15891_v5, %v10781_v3 }
  0x5e   :  { %v15968_v19 = vld [vmem:[#allocation2 + $0x444] sm:$0xf]  ;;  %v11095_v20 = vld [vmem:[#allocation2 + $0x450] sm:$0xf0]  ;;  %v10970_v26 = vor.u32 %v15936_v16, %v10967_v18  ;;  %v15923_v7 = vld [vmem:[#allocation2 + $0x2d4] sm:$0xf0] }
  0x5f   :  { %1381 = vmatpush.bf16.msra.mxu0 %v10906_v36  ;;  %1394 = vmatpush.bf16.msra.mxu1 %v11034_v37  ;;  %v16000_v21 = vld [vmem:[#allocation2 + $0x544] sm:$0xf]  ;;  %v11223_v22 = vld [vmem:[#allocation2 + $0x550] sm:$0xf0]  ;;  %v11098_v27 = vor.u32 %v15968_v19, %v11095_v20  ;;  %v10910_v14 = vor.u32 %v15923_v7, %v10909_v6  ;;  %v10637_v16 = vld [vmem:[#allocation2 + $0xa8] sm:$0xf] }
  0x60   :  { %1407 = vmatpush.bf16.msra.mxu2 %v11162_v38  ;;  %v15900_v24 = vld [vmem:[#allocation2 + $0x224] sm:$0xf]  ;;  %v10823_v28 = vld [vmem:[#allocation2 + $0x230] sm:$0xf0]  ;;  %v11226_v31 = vor.u32 %v16000_v21, %v11223_v22  ;;  %v10765_v18 = vld [vmem:[#allocation2 + $0x1a8] sm:$0xf] }
  0x61   :  { %1420 = vmatpush.bf16.msra.mxu3 %v11290_v42  ;;  %v15932_v29 = vld [vmem:[#allocation2 + $0x324] sm:$0xf]  ;;  %v10951_v30 = vld [vmem:[#allocation2 + $0x330] sm:$0xf0]  ;;  %v10826_v38 = vor.u32 %v15900_v24, %v10823_v28  ;;  %v15887_v20 = vld [vmem:[#allocation2 + $0x1b4] sm:$0xf0] }
  0x62   :  { %v15964_v33 = vld [vmem:[#allocation2 + $0x424] sm:$0xf]  ;;  %v11079_v34 = vld [vmem:[#allocation2 + $0x430] sm:$0xf0]  ;;  %v10954_v41 = vor.u32 %v15932_v29, %v10951_v30  ;;  %v10893_v21 = vld [vmem:[#allocation2 + $0x2a8] sm:$0xf] }
  0x63   :  { %1382 = vmatpush.bf16.msra.mxu0 %v10890_v48  ;;  %1395 = vmatpush.bf16.msra.mxu1 %v11018_v49  ;;  %v15996_v36 = vld [vmem:[#allocation2 + $0x524] sm:$0xf]  ;;  %v11207_v37 = vld [vmem:[#allocation2 + $0x530] sm:$0xf0]  ;;  %v11082_v42 = vor.u32 %v15964_v33, %v11079_v34  ;;  %v15919_v22 = vld [vmem:[#allocation2 + $0x2b4] sm:$0xf0] }
  0x64   :  { %1408 = vmatpush.bf16.msra.mxu2 %v11146_v50  ;;  %v15896_v39 = vld [vmem:[#allocation2 + $0x204] sm:$0xf]  ;;  %v10807_v40 = vld [vmem:[#allocation2 + $0x210] sm:$0xf0]  ;;  %v11210_v46 = vor.u32 %v15996_v36, %v11207_v37  ;;  %v10669_v50 = vld [vmem:[#allocation2 + $0xe8] sm:$0xf]  ;;  %v10894_v28 = vor.u32 %v15919_v22, %v10893_v21 }
  0x65   :  { %1421 = vmatpush.bf16.msra.mxu3 %v11274_v54  ;;  %v15928_v43 = vld [vmem:[#allocation2 + $0x304] sm:$0xf]  ;;  %v10935_v44 = vld [vmem:[#allocation2 + $0x310] sm:$0xf0]  ;;  %v10810_v53 = vor.u32 %v15896_v39, %v10807_v40  ;;  %v15895_v54 = vld [vmem:[#allocation2 + $0x1f4] sm:$0xf0] }
  0x66   :  { %v15960_v45 = vld [vmem:[#allocation2 + $0x404] sm:$0xf]  ;;  %v11063_v47 = vld [vmem:[#allocation2 + $0x410] sm:$0xf0]  ;;  %v10938_v57 = vor.u32 %v15928_v43, %v10935_v44  ;;  %v10798_v63 = vor.u32 %v15895_v54, %v10797_v52  ;;  %v15951_v24 = vld [vmem:[#allocation2 + $0x3b4] sm:$0xf0] }
  0x67   :  { %1383 = vmatpush.bf16.msra.mxu0 %v10874_v60  ;;  %1396 = vmatpush.bf16.msra.mxu1 %v11002_v61  ;;  %v15992_v48 = vld [vmem:[#allocation2 + $0x504] sm:$0xf]  ;;  %v11191_v49 = vld [vmem:[#allocation2 + $0x510] sm:$0xf0]  ;;  %v11066_v58 = vor.u32 %v15960_v45, %v11063_v47  ;;  %v15959_v60 = vld [vmem:[#allocation2 + $0x3f4] sm:$0xf0] }
  0x68   :  { %1409 = vmatpush.bf16.msra.mxu2 %v11130_v62  ;;  %v11194_v61 = vor.u32 %v15992_v48, %v11191_v49  ;;  %v10670_v62 = vor.u32 %v15863_v51, %v10669_v50  ;;  %v11054_v4 = vor.u32 %v15959_v60, %v11053_v59  ;;  %v10621_v29 = vld [vmem:[#allocation2 + $0x88] sm:$0xf]  ;;  %v15851_v30 = vld [vmem:[#allocation2 + $0x94] sm:$0xf0] }
  0x69   :  { %1422 = vmatpush.bf16.msra.mxu3 %v11258_v2  ;;  %v15859_v2 = vld [vmem:[#allocation2 + $0xd4] sm:$0xf0]  ;;  %v10877_v36 = vld [vmem:[#allocation2 + $0x288] sm:$0xf]  ;;  %v10622_v40 = vor.u32 %v15851_v30, %v10621_v29 }
  0x6a   :  { %v15883_v34 = vld [vmem:[#allocation2 + $0x194] sm:$0xf0]  ;;  %v10605_v43 = vld [vmem:[#allocation2 + $0x68] sm:$0xf] }
  0x6b   :  { %1384 = vmatpush.bf16.msra.mxu0 %v10858_v10  ;;  %1397 = vmatpush.bf16.msra.mxu1 %v10986_v11  ;;  %v11037_v10 = vld [vmem:[#allocation2 + $0x3c8] sm:$0xf]  ;;  %v15955_v11 = vld [vmem:[#allocation2 + $0x3d4] sm:$0xf0] }
  0x6c   :  { %1410 = vmatpush.bf16.msra.mxu2 %v11114_v12  ;;  %v10654_v12 = vor.u32 %v15859_v2, %v10653_v1  ;;  %v11038_v19 = vor.u32 %v15955_v11, %v11037_v10  ;;  %v15915_v37 = vld [vmem:[#allocation2 + $0x294] sm:$0xf0]  ;;  %v10733_v45 = vld [vmem:[#allocation2 + $0x168] sm:$0xf] }
  0x6d   :  { %1423 = vmatpush.bf16.msra.mxu3 %v11242_v17  ;;  %v15855_v17 = vld [vmem:[#allocation2 + $0xb4] sm:$0xf0]  ;;  %v10861_v48 = vld [vmem:[#allocation2 + $0x268] sm:$0xf] }
  0x6e   :  { %v15947_v39 = vld [vmem:[#allocation2 + $0x394] sm:$0xf0]  ;;  %v10989_v50 = vld [vmem:[#allocation2 + $0x368] sm:$0xf] }
  0x6f   :  { %1385 = vmatpush.bf16.msra.mxu0 %v10842_v23  ;;  %1398 = vmatpush.bf16.msra.mxu1 %v10970_v26  ;;  %v11021_v23 = vld [vmem:[#allocation2 + $0x3a8] sm:$0xf]  ;;  %v10638_v26 = vor.u32 %v15855_v17, %v10637_v16  ;;  %v15847_v44 = vld [vmem:[#allocation2 + $0x74] sm:$0xf0] }
  0x70   :  { %1411 = vmatpush.bf16.msra.mxu2 %v11098_v27  ;;  %v10766_v27 = vor.u32 %v15887_v20, %v10765_v18  ;;  %v11022_v33 = vor.u32 %v15951_v24, %v11021_v23  ;;  %v15879_v47 = vld [vmem:[#allocation2 + $0x174] sm:$0xf0]  ;;  %v10606_v52 = vor.u32 %v15847_v44, %v10605_v43  ;;  %v10589_v55 = vld [vmem:[#allocation2 + $0x48] sm:$0xf] }
  0x71   :  { %1424 = vmatpush.bf16.msra.mxu3 %v11226_v31  ;;  %v10749_v31 = vld [vmem:[#allocation2 + $0x188] sm:$0xf]  ;;  %v15911_v49 = vld [vmem:[#allocation2 + $0x274] sm:$0xf0] }
  0x72   :  { %v15943_v51 = vld [vmem:[#allocation2 + $0x374] sm:$0xf0]  ;;  %v10862_v54 = vor.u32 %v15911_v49, %v10861_v48  ;;  %v10845_v60 = vld [vmem:[#allocation2 + $0x248] sm:$0xf] }
  0x73   :  { %1386 = vmatpush.bf16.msra.mxu0 %v10826_v38  ;;  %1399 = vmatpush.bf16.msra.mxu1 %v10954_v41  ;;  %v11005_v38 = vld [vmem:[#allocation2 + $0x388] sm:$0xf]  ;;  %v10750_v41 = vor.u32 %v15883_v34, %v10749_v31  ;;  %v15843_v56 = vld [vmem:[#allocation2 + $0x54] sm:$0xf0]  ;;  %v15861_v34 = vld [vmem:[#allocation2 + $0xec] sm:$0xf] }
  0x74   :  { %1412 = vmatpush.bf16.msra.mxu2 %v11082_v42  ;;  %v10878_v42 = vor.u32 %v15915_v37, %v10877_v36  ;;  %v15875_v59 = vld [vmem:[#allocation2 + $0x154] sm:$0xf0]  ;;  %v10573_v3 = vld [vmem:[#allocation2 + $0x28] sm:$0xf]  ;;  %v10671_v36 = vld [vmem:[#allocation2 + $0xf8] sm:$0xf0] }
  0x75   :  { %1425 = vmatpush.bf16.msra.mxu3 %v11210_v46  ;;  %v11006_v46 = vor.u32 %v15947_v39, %v11005_v38  ;;  %v10701_v5 = vld [vmem:[#allocation2 + $0x128] sm:$0xf]  ;;  %v15871_v7 = vld [vmem:[#allocation2 + $0x134] sm:$0xf0]  ;;  %v15893_v39 = vld [vmem:[#allocation2 + $0x1ec] sm:$0xf]  ;;  %v10674_v44 = vor.u32 %v15861_v34, %v10671_v36 }
  0x76   :  { %v10829_v10 = vld [vmem:[#allocation2 + $0x228] sm:$0xf]  ;;  %v15903_v11 = vld [vmem:[#allocation2 + $0x234] sm:$0xf0]  ;;  %v10702_v18 = vor.u32 %v15871_v7, %v10701_v5 }
  0x77   :  { %1387 = vmatpush.bf16.msra.mxu0 %v10810_v53  ;;  %1400 = vmatpush.bf16.msra.mxu1 %v10938_v57  ;;  %v10734_v53 = vor.u32 %v15879_v47, %v10733_v45  ;;  %v10717_v57 = vld [vmem:[#allocation2 + $0x148] sm:$0xf]  ;;  %v15835_v17 = vld [vmem:[#allocation2 + $0x14] sm:$0xf0] }
  0x78   :  { %1413 = vmatpush.bf16.msra.mxu2 %v11066_v58  ;;  %v10990_v58 = vor.u32 %v15943_v51, %v10989_v50  ;;  %v10718_v1 = vor.u32 %v15875_v59, %v10717_v57  ;;  %v10557_v16 = vld [vmem:[#allocation2 + $0x8] sm:$0xf]  ;;  %v15867_v21 = vld [vmem:[#allocation2 + $0x114] sm:$0xf0]  ;;  %v15857_v50 = vld [vmem:[#allocation2 + $0xcc] sm:$0xf] }
  0x79   :  { %1426 = vmatpush.bf16.msra.mxu3 %v11194_v61  ;;  %v15907_v61 = vld [vmem:[#allocation2 + $0x254] sm:$0xf0]  ;;  %v10685_v20 = vld [vmem:[#allocation2 + $0x108] sm:$0xf]  ;;  %v10558_v31 = vor.u32 %v15835_v17, %v10557_v16  ;;  %v10655_v51 = vld [vmem:[#allocation2 + $0xd8] sm:$0xf0] }
  0x7a   :  { %1388 = vmatmul.bf16.vlgmr.msra.gmra.mxu0 %v17379_v8  ;;  %1401 = vmatmul.bf16.vlgmr.msra.gmra.mxu1 %v17386_v15  ;;  %v10846_v2 = vor.u32 %v15907_v61, %v10845_v60  ;;  %v10813_v22 = vld [vmem:[#allocation2 + $0x208] sm:$0xf]  ;;  %v15899_v24 = vld [vmem:[#allocation2 + $0x214] sm:$0xf0]  ;;  %v10686_v37 = vor.u32 %v15867_v21, %v10685_v20  ;;  %v10751_v16 = vld [vmem:[#allocation2 + $0x198] sm:$0xf0] }
  0x7b   :  { %1432 = vmatpush.bf16.msrb.mxu0 %v10670_v62  ;;  %1445 = vmatpush.bf16.msrb.mxu1 %v10798_v63  ;;  %v10973_v62 = vld [vmem:[#allocation2 + $0x348] sm:$0xf]  ;;  %v15939_v63 = vld [vmem:[#allocation2 + $0x354] sm:$0xf0]  ;;  %v10814_v38 = vor.u32 %v15899_v24, %v10813_v22 }
  0x7c   :  { %1458 = vmatpush.bf16.msrb.mxu2 %v10926_v0  ;;  %1427 = vmatmul.bf16.vlgmr.msra.gmra.mxu3 %v17405_v35  ;;  %v10590_v0 = vor.u32 %v15843_v56, %v10589_v55  ;;  %v10974_v6 = vor.u32 %v15939_v63, %v10973_v62  ;;  %v15991_v29 = vld [vmem:[#allocation2 + $0x4f4] sm:$0xf0]  ;;  %v11309_v30 = vld [vmem:[#allocation2 + $0x5e8] sm:$0xf]  ;;  %v10658_v56 = vor.u32 %v15857_v50, %v10655_v51  ;;  %v15853_v62 = vld [vmem:[#allocation2 + $0xac] sm:$0xf] }
  0x7d   :  { %1471 = vmatpush.bf16.msrb.mxu3 %v11054_v4  ;;  %1414 = vmatmul.bf16.vlgmr.msra.gmra.mxu2 %v17403_v32  ;;  %v15839_v4 = vld [vmem:[#allocation2 + $0x34] sm:$0xf0]  ;;  %v11165_v45 = vld [vmem:[#allocation2 + $0x4c8] sm:$0xf]  ;;  %v10639_v63 = vld [vmem:[#allocation2 + $0xb8] sm:$0xf0] }
  0x7e   :  { %v11293_v47 = vld [vmem:[#allocation2 + $0x5c8] sm:$0xf]  ;;  %v16019_v49 = vld [vmem:[#allocation2 + $0x5d4] sm:$0xf0] }
  0x7f   :  { %1433 = vmatpush.bf16.msrb.mxu0 %v10654_v12  ;;  %1446 = vmatpush.bf16.msrb.mxu1 %v10782_v13  ;;  %v10957_v12 = vld [vmem:[#allocation2 + $0x328] sm:$0xf]  ;;  %v15935_v13 = vld [vmem:[#allocation2 + $0x334] sm:$0xf0]  ;;  %v11294_v55 = vor.u32 %v16019_v49, %v11293_v47 }
  0x80   :  { %1459 = vmatpush.bf16.msrb.mxu2 %v10910_v14  ;;  %v10574_v14 = vor.u32 %v15839_v4, %v10573_v3  ;;  %v10958_v23 = vor.u32 %v15935_v13, %v10957_v12  ;;  %v11149_v57 = vld [vmem:[#allocation2 + $0x4a8] sm:$0xf]  ;;  %v16015_v61 = vld [vmem:[#allocation2 + $0x5b4] sm:$0xf0]  ;;  %v10642_v4 = vor.u32 %v15853_v62, %v10639_v63  ;;  %v15849_v12 = vld [vmem:[#allocation2 + $0x8c] sm:$0xf] }
  0x81   :  { %1472 = vmatpush.bf16.msrb.mxu3 %v11038_v19  ;;  %v10830_v19 = vor.u32 %v15903_v11, %v10829_v10  ;;  %v11277_v59 = vld [vmem:[#allocation2 + $0x5a8] sm:$0xf]  ;;  %v16011_v11 = vld [vmem:[#allocation2 + $0x594] sm:$0xf0]  ;;  %v10623_v13 = vld [vmem:[#allocation2 + $0x98] sm:$0xf0] }
  0x82   :  { %v11278_v3 = vor.u32 %v16015_v61, %v11277_v59  ;;  %v11133_v5 = vld [vmem:[#allocation2 + $0x488] sm:$0xf]  ;;  %v15975_v21 = vld [vmem:[#allocation2 + $0x474] sm:$0xf0]  ;;  %v15833_v63 = vld [vmem:[#allocation2 + $0xc] sm:$0xf] }
  0x83   :  { %1434 = vmatpush.bf16.msrb.mxu0 %v10638_v26  ;;  %1447 = vmatpush.bf16.msrb.mxu1 %v10766_v27  ;;  %v10941_v26 = vld [vmem:[#allocation2 + $0x308] sm:$0xf]  ;;  %v15931_v27 = vld [vmem:[#allocation2 + $0x314] sm:$0xf0] }
  0x84   :  { %1460 = vmatpush.bf16.msrb.mxu2 %v10894_v28  ;;  %v11181_v28 = vld [vmem:[#allocation2 + $0x4e8] sm:$0xf]  ;;  %v16007_v24 = vld [vmem:[#allocation2 + $0x574] sm:$0xf0] }
  0x85   :  { %1473 = vmatpush.bf16.msrb.mxu3 %v11022_v33  ;;  %v16023_v33 = vld [vmem:[#allocation2 + $0x5f4] sm:$0xf0]  ;;  %v11261_v7 = vld [vmem:[#allocation2 + $0x588] sm:$0xf] }
  0x86   :  { %v11310_v43 = vor.u32 %v16023_v33, %v11309_v30  ;;  %v11117_v20 = vld [vmem:[#allocation2 + $0x468] sm:$0xf]  ;;  %v15971_v36 = vld [vmem:[#allocation2 + $0x454] sm:$0xf0] }
  0x87   :  { %1435 = vmatpush.bf16.msrb.mxu0 %v10622_v40  ;;  %1448 = vmatpush.bf16.msrb.mxu1 %v10750_v41  ;;  %v10799_v40 = vld [vmem:[#allocation2 + $0x1f8] sm:$0xf0]  ;;  %v10942_v41 = vor.u32 %v15931_v27, %v10941_v26  ;;  %v11245_v22 = vld [vmem:[#allocation2 + $0x568] sm:$0xf]  ;;  %v15845_v26 = vld [vmem:[#allocation2 + $0x6c] sm:$0xf]  ;;  %v11118_v30 = vor.u32 %v15975_v21, %v11117_v20 }
  0x88   :  { %1461 = vmatpush.bf16.msrb.mxu2 %v10878_v42  ;;  %v11182_v42 = vor.u32 %v15991_v29, %v11181_v28  ;;  %v10802_v48 = vor.u32 %v15893_v39, %v10799_v40  ;;  %v10607_v27 = vld [vmem:[#allocation2 + $0x78] sm:$0xf0]  ;;  %v15877_v28 = vld [vmem:[#allocation2 + $0x16c] sm:$0xf]  ;;  %v11101_v34 = vld [vmem:[#allocation2 + $0x448] sm:$0xf] }
  0x89   :  { %1474 = vmatpush.bf16.msrb.mxu3 %v11006_v46  ;;  %v15987_v46 = vld [vmem:[#allocation2 + $0x4d4] sm:$0xf0]  ;;  %v10735_v29 = vld [vmem:[#allocation2 + $0x178] sm:$0xf0]  ;;  %v10610_v33 = vor.u32 %v15845_v26, %v10607_v27  ;;  %v15841_v40 = vld [vmem:[#allocation2 + $0x4c] sm:$0xf] }
  0x8a   :  { %v16003_v39 = vld [vmem:[#allocation2 + $0x554] sm:$0xf0]  ;;  %v11085_v47 = vld [vmem:[#allocation2 + $0x428] sm:$0xf]  ;;  %v11039_v27 = vld [vmem:[#allocation2 + $0x3d8] sm:$0xf0] }
  0x8b   :  { %1436 = vmatpush.bf16.msrb.mxu0 %v10606_v52  ;;  %1449 = vmatpush.bf16.msrb.mxu1 %v10734_v53  ;;  %v15889_v52 = vld [vmem:[#allocation2 + $0x1cc] sm:$0xf]  ;;  %v10783_v53 = vld [vmem:[#allocation2 + $0x1d8] sm:$0xf0]  ;;  %v11213_v49 = vld [vmem:[#allocation2 + $0x528] sm:$0xf] }
  0x8c   :  { %1462 = vmatpush.bf16.msrb.mxu2 %v10862_v54  ;;  %v11166_v54 = vor.u32 %v15987_v46, %v11165_v45  ;;  %v10786_v60 = vor.u32 %v15889_v52, %v10783_v53  ;;  %v15999_v51 = vld [vmem:[#allocation2 + $0x534] sm:$0xf0]  ;;  %v15837_v52 = vld [vmem:[#allocation2 + $0x2c] sm:$0xf]  ;;  %v10575_v53 = vld [vmem:[#allocation2 + $0x38] sm:$0xf0] }
  0x8d   :  { %1475 = vmatpush.bf16.msrb.mxu3 %v10990_v58  ;;  %v15983_v58 = vld [vmem:[#allocation2 + $0x4b4] sm:$0xf0]  ;;  %v11214_v59 = vor.u32 %v15999_v51, %v11213_v49  ;;  %v11197_v61 = vld [vmem:[#allocation2 + $0x508] sm:$0xf]  ;;  %v15913_v49 = vld [vmem:[#allocation2 + $0x28c] sm:$0xf] }
  0x8e   :  { %v15995_v62 = vld [vmem:[#allocation2 + $0x514] sm:$0xf0] }
  0x8f   :  { %1437 = vmatpush.bf16.msrb.mxu0 %v10590_v0  ;;  %1450 = vmatpush.bf16.msrb.mxu1 %v10718_v1  ;;  %v15885_v0 = vld [vmem:[#allocation2 + $0x1ac] sm:$0xf]  ;;  %v10767_v1 = vld [vmem:[#allocation2 + $0x1b8] sm:$0xf0] }
  0x90   :  { %1463 = vmatpush.bf16.msrb.mxu2 %v10846_v2  ;;  %v11150_v2 = vor.u32 %v15983_v58, %v11149_v57  ;;  %v10770_v10 = vor.u32 %v15885_v0, %v10767_v1  ;;  %v11069_v57 = vld [vmem:[#allocation2 + $0x408] sm:$0xf]  ;;  %v15963_v58 = vld [vmem:[#allocation2 + $0x414] sm:$0xf0]  ;;  %v10559_v1 = vld [vmem:[#allocation2 + $0x18] sm:$0xf0] }
  0x91   :  { %1476 = vmatpush.bf16.msrb.mxu3 %v10974_v6  ;;  %v15979_v6 = vld [vmem:[#allocation2 + $0x494] sm:$0xf0] }
  0x92   :  { %v11134_v17 = vor.u32 %v15979_v6, %v11133_v5  ;;  %v10927_v5 = vld [vmem:[#allocation2 + $0x2f8] sm:$0xf0]  ;;  %v15957_v6 = vld [vmem:[#allocation2 + $0x3ec] sm:$0xf] }
  0x93   :  { %1438 = vmatpush.bf16.msrb.mxu0 %v10574_v14  ;;  %1451 = vmatpush.bf16.msrb.mxu1 %v10702_v18  ;;  %v15881_v14 = vld [vmem:[#allocation2 + $0x18c] sm:$0xf]  ;;  %v11262_v18 = vor.u32 %v16011_v11, %v11261_v7  ;;  %v11070_v7 = vor.u32 %v15963_v58, %v11069_v57 }
  0x94   :  { %1464 = vmatpush.bf16.msrb.mxu2 %v10830_v19  ;;  %v10626_v19 = vor.u32 %v15849_v12, %v10623_v13  ;;  %v15989_v11 = vld [vmem:[#allocation2 + $0x4ec] sm:$0xf]  ;;  %v11183_v12 = vld [vmem:[#allocation2 + $0x4f8] sm:$0xf0]  ;;  %v11198_v13 = vor.u32 %v15995_v62, %v11197_v61 }
  0x95   :  { %1477 = vmatpush.bf16.msrb.mxu3 %v10958_v23  ;;  %v10754_v23 = vor.u32 %v15881_v14, %v10751_v16  ;;  %v10562_v14 = vor.u32 %v15833_v63, %v10559_v1  ;;  %v16021_v16 = vld [vmem:[#allocation2 + $0x5ec] sm:$0xf]  ;;  %v11186_v21 = vor.u32 %v15989_v11, %v11183_v12  ;;  %v10991_v63 = vld [vmem:[#allocation2 + $0x378] sm:$0xf0] }
  0x96   :  { %v15941_v61 = vld [vmem:[#allocation2 + $0x36c] sm:$0xf]  ;;  %v11119_v1 = vld [vmem:[#allocation2 + $0x478] sm:$0xf0] }
  0x97   :  { %1439 = vmatpush.bf16.msrb.mxu0 %v10558_v31  ;;  %1452 = vmatpush.bf16.msrb.mxu1 %v10686_v37  ;;  %v11246_v31 = vor.u32 %v16007_v24, %v11245_v22  ;;  %v11229_v37 = vld [vmem:[#allocation2 + $0x548] sm:$0xf]  ;;  %v15921_v22 = vld [vmem:[#allocation2 + $0x2cc] sm:$0xf]  ;;  %v10847_v11 = vld [vmem:[#allocation2 + $0x258] sm:$0xf0] }
  0x98   :  { %1465 = vmatpush.bf16.msrb.mxu2 %v10814_v38  ;;  %v10738_v38 = vor.u32 %v15877_v28, %v10735_v29  ;;  %v11230_v45 = vor.u32 %v16003_v39, %v11229_v37  ;;  %v15953_v24 = vld [vmem:[#allocation2 + $0x3cc] sm:$0xf]  ;;  %v11167_v29 = vld [vmem:[#allocation2 + $0x4d8] sm:$0xf0] }
  0x99   :  { %1478 = vmatpush.bf16.msrb.mxu3 %v10942_v41  ;;  %v10591_v41 = vld [vmem:[#allocation2 + $0x58] sm:$0xf0]  ;;  %v15985_v28 = vld [vmem:[#allocation2 + $0x4cc] sm:$0xf] }
  0x9a   :  { %1440 = vmatmul.bf16.vlgmr.msrb.gmra.mxu0 %v17381_v9  ;;  %1453 = vmatmul.bf16.vlgmr.msrb.gmra.mxu1 %v17394_v25  ;;  %v10594_v46 = vor.u32 %v15841_v40, %v10591_v41  ;;  %v15917_v37 = vld [vmem:[#allocation2 + $0x2ac] sm:$0xf]  ;;  %v11023_v41 = vld [vmem:[#allocation2 + $0x3b8] sm:$0xf0] }
  0x9b   :  { %1484 = vmatpush.bf16.msra.mxu0 %v11182_v42  ;;  %1497 = vmatpush.bf16.msra.mxu1 %v11310_v43  ;;  %v15873_v42 = vld [vmem:[#allocation2 + $0x14c] sm:$0xf]  ;;  %v10719_v43 = vld [vmem:[#allocation2 + $0x158] sm:$0xf0] }
  0x9c   :  { %1510 = vmatpush.bf16.msra.mxu2 %v10674_v44  ;;  %1479 = vmatmul.bf16.vlgmr.msrb.gmra.mxu3 %v17386_v15  ;;  %v11102_v44 = vor.u32 %v15971_v36, %v11101_v34  ;;  %v10722_v50 = vor.u32 %v15873_v42, %v10719_v43  ;;  %v11042_v34 = vor.u32 %v15953_v24, %v11039_v27  ;;  %v15949_v39 = vld [vmem:[#allocation2 + $0x3ac] sm:$0xf]  ;;  %v11151_v43 = vld [vmem:[#allocation2 + $0x4b8] sm:$0xf0] }
  0x9d   :  { %1523 = vmatpush.bf16.msra.mxu3 %v10802_v48  ;;  %1466 = vmatmul.bf16.vlgmr.msrb.gmra.mxu2 %v17379_v8  ;;  %v15967_v48 = vld [vmem:[#allocation2 + $0x434] sm:$0xf0]  ;;  %v11170_v36 = vor.u32 %v15985_v28, %v11167_v29  ;;  %v15981_v42 = vld [vmem:[#allocation2 + $0x4ac] sm:$0xf]  ;;  %v10959_v29 = vld [vmem:[#allocation2 + $0x338] sm:$0xf0] }
  0x9e   :  { %v15937_v12 = vld [vmem:[#allocation2 + $0x34c] sm:$0xf] }
  0x9f   :  { %1485 = vmatpush.bf16.msra.mxu0 %v11166_v54  ;;  %1498 = vmatpush.bf16.msra.mxu1 %v11294_v55  ;;  %v15869_v54 = vld [vmem:[#allocation2 + $0x12c] sm:$0xf]  ;;  %v10703_v55 = vld [vmem:[#allocation2 + $0x138] sm:$0xf0] }
  0xa0   :  { %1511 = vmatpush.bf16.msra.mxu2 %v10658_v56  ;;  %v11086_v56 = vor.u32 %v15967_v48, %v11085_v47  ;;  %v10706_v0 = vor.u32 %v15869_v54, %v10703_v55  ;;  %v11026_v47 = vor.u32 %v15949_v39, %v11023_v41  ;;  %v11154_v48 = vor.u32 %v15981_v42, %v11151_v43  ;;  %v11135_v54 = vld [vmem:[#allocation2 + $0x498] sm:$0xf0]  ;;  %v16009_v55 = vld [vmem:[#allocation2 + $0x58c] sm:$0xf] }
  0xa1   :  { %1524 = vmatpush.bf16.msra.mxu3 %v10786_v60  ;;  %v10578_v60 = vor.u32 %v15837_v52, %v10575_v53  ;;  %v11007_v52 = vld [vmem:[#allocation2 + $0x398] sm:$0xf0]  ;;  %v15977_v53 = vld [vmem:[#allocation2 + $0x48c] sm:$0xf] }
  0xa2   :  { %v11138_v58 = vor.u32 %v15977_v53, %v11135_v54  ;;  %v15901_v24 = vld [vmem:[#allocation2 + $0x22c] sm:$0xf]  ;;  %v10815_v43 = vld [vmem:[#allocation2 + $0x218] sm:$0xf0]  ;;  %v11437_v54 = vld [vmem:[#allocation4 + $0xf0] sm:$0xf] }
  0xa3   :  { %1486 = vmatpush.bf16.msra.mxu0 %v11150_v2  ;;  %1499 = vmatpush.bf16.msra.mxu1 %v11278_v3  ;;  %v15865_v2 = vld [vmem:[#allocation2 + $0x10c] sm:$0xf]  ;;  %v10687_v3 = vld [vmem:[#allocation2 + $0x118] sm:$0xf0] }
  0xa4   :  { %1512 = vmatpush.bf16.msra.mxu2 %v10642_v4  ;;  %v15925_v4 = vld [vmem:[#allocation2 + $0x2ec] sm:$0xf] }
  0xa5   :  { %1525 = vmatpush.bf16.msra.mxu3 %v10770_v10  ;;  %v11055_v10 = vld [vmem:[#allocation2 + $0x3f8] sm:$0xf0]  ;;  %v15933_v27 = vld [vmem:[#allocation2 + $0x32c] sm:$0xf] }
  0xa6   :  { %v11058_v20 = vor.u32 %v15957_v6, %v11055_v10  ;;  %v10994_v6 = vor.u32 %v15941_v61, %v10991_v63  ;;  %v15905_v10 = vld [vmem:[#allocation2 + $0x24c] sm:$0xf]  ;;  %v10962_v41 = vor.u32 %v15933_v27, %v10959_v29  ;;  %v16037_v63 = vld [vmem:[#allocation4 + $0x64] sm:$0xf0]  ;;  %v11397_v29 = vld [vmem:[#allocation4 + $0xa0] sm:$0xf] }
  0xa7   :  { %1487 = vmatpush.bf16.msra.mxu0 %v11134_v17  ;;  %1500 = vmatpush.bf16.msra.mxu1 %v11262_v18  ;;  %v11311_v17 = vld [vmem:[#allocation2 + $0x5f8] sm:$0xf0]  ;;  %v10690_v18 = vor.u32 %v15865_v2, %v10687_v3  ;;  %v16005_v2 = vld [vmem:[#allocation2 + $0x56c] sm:$0xf]  ;;  %v16029_v27 = vld [vmem:[#allocation4 + $0x24] sm:$0xf0] }
  0xa8   :  { %1513 = vmatpush.bf16.msra.mxu2 %v10626_v19  ;;  %v10930_v19 = vor.u32 %v15925_v4, %v10927_v5  ;;  %v11314_v26 = vor.u32 %v16021_v16, %v11311_v17  ;;  %v11247_v3 = vld [vmem:[#allocation2 + $0x578] sm:$0xf0]  ;;  %v15969_v16 = vld [vmem:[#allocation2 + $0x44c] sm:$0xf] }
  0xa9   :  { %1526 = vmatpush.bf16.msra.mxu3 %v10754_v23  ;;  %v10911_v23 = vld [vmem:[#allocation2 + $0x2d8] sm:$0xf0]  ;;  %v15897_v39 = vld [vmem:[#allocation2 + $0x20c] sm:$0xf] }
  0xaa   :  { %v11103_v17 = vld [vmem:[#allocation2 + $0x458] sm:$0xf0] }
  0xab   :  { %1488 = vmatpush.bf16.msra.mxu0 %v11118_v30  ;;  %1501 = vmatpush.bf16.msra.mxu1 %v11246_v31  ;;  %v16017_v30 = vld [vmem:[#allocation2 + $0x5cc] sm:$0xf]  ;;  %v11295_v31 = vld [vmem:[#allocation2 + $0x5d8] sm:$0xf0] }
  0xac   :  { %1514 = vmatpush.bf16.msra.mxu2 %v10610_v33  ;;  %v10914_v33 = vor.u32 %v15921_v22, %v10911_v23  ;;  %v11298_v40 = vor.u32 %v16017_v30, %v11295_v31  ;;  %v11106_v23 = vor.u32 %v15969_v16, %v11103_v17  ;;  %v15965_v30 = vld [vmem:[#allocation2 + $0x42c] sm:$0xf]  ;;  %v11087_v31 = vld [vmem:[#allocation2 + $0x438] sm:$0xf0]  ;;  %v11413_v16 = vld [vmem:[#allocation4 + $0xc0] sm:$0xf] }
  0xad   :  { %1527 = vmatpush.bf16.msra.mxu3 %v10738_v38  ;;  %v10895_v38 = vld [vmem:[#allocation2 + $0x2b8] sm:$0xf0]  ;;  %v11090_v42 = vor.u32 %v15965_v30, %v11087_v31  ;;  %v16045_v30 = vld [vmem:[#allocation4 + $0xa4] sm:$0xf0] }
  0xaf   :  { %1489 = vmatpush.bf16.msra.mxu0 %v11102_v44  ;;  %1502 = vmatpush.bf16.msra.mxu1 %v11230_v45  ;;  %v16013_v44 = vld [vmem:[#allocation2 + $0x5ac] sm:$0xf]  ;;  %v11279_v45 = vld [vmem:[#allocation2 + $0x5b8] sm:$0xf0] }
  0xb0   :  { %1515 = vmatpush.bf16.msra.mxu2 %v10594_v46  ;;  %v10898_v46 = vor.u32 %v15917_v37, %v10895_v38  ;;  %v11282_v51 = vor.u32 %v16013_v44, %v11279_v45  ;;  %v15929_v44 = vld [vmem:[#allocation2 + $0x30c] sm:$0xf]  ;;  %v10943_v45 = vld [vmem:[#allocation2 + $0x318] sm:$0xf0] }
  0xb1   :  { %1528 = vmatpush.bf16.msra.mxu3 %v10722_v50  ;;  %v10879_v50 = vld [vmem:[#allocation2 + $0x298] sm:$0xf0] }
  0xb3   :  { %1490 = vmatpush.bf16.msra.mxu0 %v11086_v56  ;;  %1503 = vmatpush.bf16.msra.mxu1 %v11214_v59  ;;  %v11263_v56 = vld [vmem:[#allocation2 + $0x598] sm:$0xf0]  ;;  %v15909_v59 = vld [vmem:[#allocation2 + $0x26c] sm:$0xf] }
  0xb4   :  { %1516 = vmatpush.bf16.msra.mxu2 %v10578_v60  ;;  %v10863_v60 = vld [vmem:[#allocation2 + $0x278] sm:$0xf0]  ;;  %v11266_v62 = vor.u32 %v16009_v55, %v11263_v56  ;;  %v16055_v55 = vld [vmem:[#allocation4 + $0xf4] sm:$0xf0]  ;;  %v10946_v56 = vor.u32 %v15929_v44, %v10943_v45 }
  0xb5   :  { %1529 = vmatpush.bf16.msra.mxu3 %v10706_v0  ;;  %v15973_v0 = vld [vmem:[#allocation2 + $0x46c] sm:$0xf]  ;;  %v10866_v4 = vor.u32 %v15909_v59, %v10863_v60  ;;  %v11438_v60 = vor.u32 %v16055_v55, %v11437_v54  ;;  %v16043_v44 = vld [vmem:[#allocation4 + $0x94] sm:$0xf0]  ;;  %v16054_v55 = vld [vmem:[#allocation4 + $0xf4] sm:$0xf] }
  0xb7   :  { %1491 = vmatpush.bf16.msra.mxu0 %v11070_v7  ;;  %1504 = vmatpush.bf16.msra.mxu1 %v11198_v13  ;;  %v11122_v7 = vor.u32 %v15973_v0, %v11119_v1  ;;  %v11250_v13 = vor.u32 %v16005_v2, %v11247_v3  ;;  %v11429_v0 = vld [vmem:[#allocation4 + $0xe0] sm:$0xf]  ;;  %v16053_v1 = vld [vmem:[#allocation4 + $0xe4] sm:$0xf0] }
  0xb8   :  { %1517 = vmatpush.bf16.msra.mxu2 %v10562_v14  ;;  %v10975_v14 = vld [vmem:[#allocation2 + $0x358] sm:$0xf0]  ;;  %v11430_v3 = vor.u32 %v16053_v1, %v11429_v0  ;;  %v16052_v0 = vld [vmem:[#allocation4 + $0xe4] sm:$0xf]  ;;  %v11431_v1 = vld [vmem:[#allocation4 + $0xe8] sm:$0xf0] }
  0xb9   :  { %1530 = vmatpush.bf16.msra.mxu3 %v10690_v18  ;;  %v16001_v18 = vld [vmem:[#allocation2 + $0x54c] sm:$0xf]  ;;  %v10978_v22 = vor.u32 %v15937_v12, %v10975_v14  ;;  %v16033_v14 = vld [vmem:[#allocation4 + $0x44] sm:$0xf0] }
  0xba   :  { %1492 = vmatmul.bf16.vlgmr.msra.gmra.mxu0 %v17403_v32  ;;  %1505 = vmatmul.bf16.vlgmr.msra.gmra.mxu1 %v17405_v35 }
  0xbb   :  { %1536 = vmatpush.bf16.msrb.mxu0 %v10930_v19  ;;  %1549 = vmatpush.bf16.msrb.mxu1 %v11058_v20  ;;  %v11231_v19 = vld [vmem:[#allocation2 + $0x558] sm:$0xf0]  ;;  %v10850_v20 = vor.u32 %v15905_v10, %v10847_v11  ;;  %v16051_v10 = vld [vmem:[#allocation4 + $0xd4] sm:$0xf0] }
  0xbc   :  { %1562 = vmatpush.bf16.msrb.mxu2 %v11186_v21  ;;  %1531 = vmatmul.bf16.vlgmr.msra.gmra.mxu3 %v17394_v25  ;;  %v10882_v25 = vor.u32 %v15913_v49, %v10879_v50  ;;  %v17425_v21 = vpop.f32.mrf.mxu1  ;;  %v11234_v28 = vor.u32 %v16001_v18, %v11231_v19  ;;  %v15993_v49 = vld [vmem:[#allocation2 + $0x50c] sm:$0xf]  ;;  %v11199_v50 = vld [vmem:[#allocation2 + $0x518] sm:$0xf0]  ;;  %v11341_v19 = vld [vmem:[#allocation4 + $0x30] sm:$0xf] }
  0xbd   :  { %1575 = vmatpush.bf16.msrb.mxu3 %v11314_v26  ;;  %1518 = vmatmul.bf16.vlgmr.msra.gmra.mxu2 %v17381_v9  ;;  %v15945_v9 = vld [vmem:[#allocation2 + $0x38c] sm:$0xf]  ;;  %v10831_v26 = vld [vmem:[#allocation2 + $0x238] sm:$0xf0] }
  0xbe   :  { %v11010_v57 = vor.u32 %v15945_v9, %v11007_v52  ;;  %v10834_v38 = vor.u32 %v15901_v24, %v10831_v26  ;;  %v11373_v9 = vld [vmem:[#allocation4 + $0x70] sm:$0xf]  ;;  %v10818_v52 = vor.u32 %v15897_v39, %v10815_v43  ;;  %v11333_v26 = vld [vmem:[#allocation4 + $0x20] sm:$0xf] }
  0xbf   :  { %1537 = vmatpush.bf16.msrb.mxu0 %v10914_v33  ;;  %1550 = vmatpush.bf16.msrb.mxu1 %v11042_v34  ;;  %v17423_v5 = vpop.f32.mrf.mxu0  ;;  %v15997_v34 = vld [vmem:[#allocation2 + $0x52c] sm:$0xf]  ;;  %v17429_v37 = vpop.f32.mrf.mxu3  ;;  %v17439_v39 = vld [vmem:[#allocation9] sm:$0xf]  ;;  %v11389_v43 = vld [vmem:[#allocation4 + $0x90] sm:$0xf] }
  0xc0   :  { %1563 = vmatpush.bf16.msrb.mxu2 %v11170_v36  ;;  %v11215_v36 = vld [vmem:[#allocation2 + $0x538] sm:$0xf0]  ;;  %v308_v45 = vperm.slane %v17439_v39, 0 }
  0xc1   :  { %1576 = vmatpush.bf16.msrb.mxu3 %v11298_v40 }
  0xc3   :  { %1538 = vmatpush.bf16.msrb.mxu0 %v10898_v46  ;;  %1551 = vmatpush.bf16.msrb.mxu1 %v11026_v47  ;;  %v11218_v46 = vor.u32 %v15997_v34, %v11215_v36  ;;  %v15961_v47 = vld [vmem:[#allocation2 + $0x40c] sm:$0xf]  ;;  %v11334_v36 = vor.u32 %v16029_v27, %v11333_v26  ;;  %v16046_v27 = vld [vmem:[#allocation4 + $0xb4] sm:$0xf] }
  0xc4   :  { %1564 = vmatpush.bf16.msrb.mxu2 %v11154_v48  ;;  %v17427_v33 = vpop.f32.mrf.mxu2  ;;  %v11071_v48 = vld [vmem:[#allocation2 + $0x418] sm:$0xf0]  ;;  %v1300_v53 = vpop.f32.mrf.mxu1 }
  0xc5   :  { %1577 = vmatpush.bf16.msrb.mxu3 %v11282_v51  ;;  %v16039_v51 = vld [vmem:[#allocation4 + $0x74] sm:$0xf0]  ;;  %v11375_v53 = vld [vmem:[#allocation4 + $0x78] sm:$0xf0] }
  0xc6   :  { %v11374_v59 = vor.u32 %v16039_v51, %v11373_v9  ;;  %v16041_v51 = vld [vmem:[#allocation4 + $0x84] sm:$0xf0] }
  0xc7   :  { %1539 = vmatpush.bf16.msrb.mxu0 %v10882_v25  ;;  %1552 = vmatpush.bf16.msrb.mxu1 %v11010_v57  ;;  %v1287_v40 = vpop.f32.mrf.mxu0  ;;  %v11074_v25 = vor.u32 %v15961_v47, %v11071_v48  ;;  %v11202_v57 = vor.u32 %v15993_v49, %v11199_v50  ;;  %v1326_v61 = vpop.f32.mrf.mxu3  ;;  %v11390_v47 = vor.u32 %v16043_v44, %v11389_v43  ;;  %v11317_v48 = vld [vmem:[#allocation4] sm:$0xf]  ;;  %v16025_v49 = vld [vmem:[#allocation4 + $0x4] sm:$0xf0] }
  0xc8   :  { %1565 = vmatpush.bf16.msrb.mxu2 %v11138_v58  ;;  %v11398_v40 = vor.u32 %v16045_v30, %v11397_v29  ;;  %v11381_v50 = vld [vmem:[#allocation4 + $0x80] sm:$0xf]  ;;  %v16036_v61 = vld [vmem:[#allocation4 + $0x64] sm:$0xf] }
  0xc9   :  { %1578 = vmatpush.bf16.msrb.mxu3 %v11266_v62  ;;  %v11365_v62 = vld [vmem:[#allocation4 + $0x60] sm:$0xf] }
  0xca   :  { %v11366_v2 = vor.u32 %v16037_v63, %v11365_v62  ;;  %v11367_v62 = vld [vmem:[#allocation4 + $0x68] sm:$0xf0]  ;;  %v309_v63 = vperm.slane %v17439_v39, 1 }
  0xcb   :  { %1540 = vmatpush.bf16.msrb.mxu0 %v10866_v4  ;;  %1553 = vmatpush.bf16.msrb.mxu1 %v10994_v6  ;;  %v11357_v4 = vld [vmem:[#allocation4 + $0x50] sm:$0xf]  ;;  %v16035_v6 = vld [vmem:[#allocation4 + $0x54] sm:$0xf0] }
  0xcc   :  { %1566 = vmatpush.bf16.msrb.mxu2 %v11122_v7  ;;  %v1313_v58 = vpop.f32.mrf.mxu2  ;;  %v11421_v7 = vld [vmem:[#allocation4 + $0xd0] sm:$0xf]  ;;  %v11358_v11 = vor.u32 %v16035_v6, %v11357_v4  ;;  %v16034_v4 = vld [vmem:[#allocation4 + $0x54] sm:$0xf]  ;;  %v11359_v6 = vld [vmem:[#allocation4 + $0x58] sm:$0xf0] }
  0xcd   :  { %1579 = vmatpush.bf16.msrb.mxu3 %v11250_v13  ;;  %v11422_v12 = vor.u32 %v16051_v10, %v11421_v7  ;;  %v11349_v13 = vld [vmem:[#allocation4 + $0x40] sm:$0xf]  ;;  %v11382_v58 = vor.u32 %v16041_v51, %v11381_v50  ;;  %v16050_v10 = vld [vmem:[#allocation4 + $0xd4] sm:$0xf] }
  0xce   :  { %v16042_v50 = vld [vmem:[#allocation4 + $0x94] sm:$0xf] }
  0xcf   :  { %1541 = vmatpush.bf16.msrb.mxu0 %v10850_v20  ;;  %1554 = vmatpush.bf16.msrb.mxu1 %v10978_v22  ;;  %v16031_v20 = vld [vmem:[#allocation4 + $0x34] sm:$0xf0]  ;;  %v11405_v22 = vld [vmem:[#allocation4 + $0xb0] sm:$0xf] }
  0xd0   :  { %1567 = vmatpush.bf16.msrb.mxu2 %v11106_v23  ;;  %v11342_v23 = vor.u32 %v16031_v20, %v11341_v19 }
  0xd1   :  { %1580 = vmatpush.bf16.msrb.mxu3 %v11234_v28 }
  0xd3   :  { %1542 = vmatpush.bf16.msrb.mxu0 %v10834_v38  ;;  %1555 = vmatpush.bf16.msrb.mxu1 %v10962_v41  ;;  %v11325_v41 = vld [vmem:[#allocation4 + $0x10] sm:$0xf] }
  0xd4   :  { %1568 = vmatpush.bf16.msrb.mxu2 %v11090_v42  ;;  %v16027_v42 = vld [vmem:[#allocation4 + $0x14] sm:$0xf0] }
  0xd5   :  { %1581 = vmatpush.bf16.msrb.mxu3 %v11218_v46  ;;  %v11326_v46 = vor.u32 %v16027_v42, %v11325_v41  ;;  %v11399_v41 = vld [vmem:[#allocation4 + $0xa8] sm:$0xf0] }
  0xd7   :  { %1543 = vmatpush.bf16.msrb.mxu0 %v10818_v52  ;;  %1556 = vmatpush.bf16.msrb.mxu1 %v10946_v56  ;;  %v17435_v17 = vpop.f32.mrf.mxu0  ;;  %v17437_v18 = vpop.f32.mrf.mxu1  ;;  %v16038_v52 = vld [vmem:[#allocation4 + $0x74] sm:$0xf]  ;;  %v11439_v56 = vld [vmem:[#allocation4 + $0xf8] sm:$0xf0] }
  0xd8   :  { %1569 = vmatpush.bf16.msrb.mxu2 %v11074_v25  ;;  %v1286_v25 = vadd.f32 %v17423_v5, %v308_v45  ;;  %v11434_v5 = vor.u32 %v16052_v0, %v11431_v1 }
  0xd9   :  { %1582 = vmatpush.bf16.msrb.mxu3 %v11202_v57  ;;  %v11318_v57 = vor.u32 %v16025_v49, %v11317_v48  ;;  %v11327_v48 = vld [vmem:[#allocation4 + $0x18] sm:$0xf0] }
  0xda   :  { %1544 = vmatmul.bf16.vlgmr.msrb.gmra.mxu0 %v17379_v8  ;;  %1557 = vmatmul.bf16.vlgmr.msrb.gmra.mxu1 %v17386_v15  ;;  %v16049_v8 = vld [vmem:[#allocation4 + $0xc4] sm:$0xf0]  ;;  %v11350_v15 = vor.u32 %v16033_v14, %v11349_v13  ;;  %v11362_v13 = vor.u32 %v16034_v4, %v11359_v6 }
  0xdb   :  { %1998 = vmatpush.bf16.msra.mxu0 %v11374_v59  ;;  %2011 = vmatpush.bf16.msra.mxu1 %v11438_v60  ;;  %v11378_v59 = vor.u32 %v16038_v52, %v11375_v53  ;;  %v11442_v60 = vor.u32 %v16054_v55, %v11439_v56  ;;  %v11501_v55 = vld [vmem:[#allocation4 + $0x170] sm:$0xf]  ;;  %v16071_v56 = vld [vmem:[#allocation4 + $0x174] sm:$0xf0] }
  0xdc   :  { %1570 = vmatmul.bf16.vlgmr.msrb.gmra.mxu2 %v17403_v32  ;;  %1583 = vmatmul.bf16.vlgmr.msrb.gmra.mxu3 %v17405_v35  ;;  %v11414_v32 = vor.u32 %v16049_v8, %v11413_v16  ;;  %v16047_v35 = vld [vmem:[#allocation4 + $0xb4] sm:$0xf0]  ;;  %v16032_v16 = vld [vmem:[#allocation4 + $0x44] sm:$0xf]  ;;  %v11351_v8 = vld [vmem:[#allocation4 + $0x48] sm:$0xf0] }
  0xdd   :  { %v11406_v24 = vor.u32 %v16047_v35, %v11405_v22  ;;  %v11354_v20 = vor.u32 %v16032_v16, %v11351_v8  ;;  %v16085_v8 = vld [vmem:[#allocation4 + $0x1e4] sm:$0xf0] }
  0xdf   :  { %1999 = vmatpush.bf16.msra.mxu0 %v11366_v2  ;;  %2012 = vmatpush.bf16.msra.mxu1 %v11430_v3  ;;  %v1376_v31 = vpop.f32.mrf.mxu3  ;;  %v1339_v34 = vpop.f32.mrf.mxu0  ;;  %v1299_v2 = vadd.f32 %v17425_v21, %v1286_v25  ;;  %v11370_v3 = vor.u32 %v16036_v61, %v11367_v62  ;;  %v16087_v61 = vld [vmem:[#allocation4 + $0x1f4] sm:$0xf0]  ;;  %v16040_v62 = vld [vmem:[#allocation4 + $0x84] sm:$0xf] }
  0xe0   :  { %v1363_v28 = vpop.f32.mrf.mxu2  ;;  %v1352_v38 = vpop.f32.mrf.mxu1 }
  0xe1   :  { %v1364_v7 = vadd.f32 %v1363_v28, %v309_v63  ;;  %v11407_v28 = vld [vmem:[#allocation4 + $0xb8] sm:$0xf0]  ;;  %v11383_v63 = vld [vmem:[#allocation4 + $0x88] sm:$0xf0] }
  0xe2   :  { %v11410_v34 = vor.u32 %v16046_v27, %v11407_v28  ;;  %v16065_v27 = vld [vmem:[#allocation4 + $0x144] sm:$0xf0]  ;;  %v11541_v28 = vld [vmem:[#allocation4 + $0x1c0] sm:$0xf] }
  0xe3   :  { %2000 = vmatpush.bf16.msra.mxu0 %v11358_v11  ;;  %2013 = vmatpush.bf16.msra.mxu1 %v11422_v12  ;;  %v11423_v11 = vld [vmem:[#allocation4 + $0xd8] sm:$0xf0]  ;;  %v1312_v12 = vadd.f32 %v17427_v33, %v1299_v2  ;;  %v1377_v21 = vadd.f32 %v1376_v31, %v1364_v7 }
  0xe4   :  { %v11426_v14 = vor.u32 %v16050_v10, %v11423_v11  ;;  %v11386_v10 = vor.u32 %v16040_v62, %v11383_v63  ;;  %v11493_v11 = vld [vmem:[#allocation4 + $0x160] sm:$0xf] }
  0xe5   :  { %v1325_v19 = vadd.f32 %v17429_v37, %v1312_v12  ;;  %v11335_v37 = vld [vmem:[#allocation4 + $0x28] sm:$0xf0]  ;;  %v16069_v12 = vld [vmem:[#allocation4 + $0x164] sm:$0xf0] }
  0xe6   :  { %v11494_v16 = vor.u32 %v16069_v12, %v11493_v11  ;;  %v11559_v12 = vld [vmem:[#allocation4 + $0x1e8] sm:$0xf0] }
  0xe7   :  { %2001 = vmatpush.bf16.msra.mxu0 %v11350_v15  ;;  %2014 = vmatpush.bf16.msra.mxu1 %v11414_v32  ;;  %v1378_v54 = vpop.f32.mrf.mxu3  ;;  %v16048_v15 = vld [vmem:[#allocation4 + $0xc4] sm:$0xf]  ;;  %v11415_v32 = vld [vmem:[#allocation4 + $0xc8] sm:$0xf0]  ;;  %v1338_v29 = vadd.f32 %v17435_v17, %v1325_v19  ;;  %v16026_v17 = vld [vmem:[#allocation4 + $0x14] sm:$0xf] }
  0xe8   :  { %v1365_v9 = vpop.f32.mrf.mxu2  ;;  %v11418_v35 = vor.u32 %v16048_v15, %v11415_v32  ;;  %v11330_v54 = vor.u32 %v16026_v17, %v11327_v48  ;;  %v11485_v32 = vld [vmem:[#allocation4 + $0x150] sm:$0xf]  ;;  %v16067_v19 = vld [vmem:[#allocation4 + $0x154] sm:$0xf0]  ;;  %v16077_v17 = vld [vmem:[#allocation4 + $0x1a4] sm:$0xf0] }
  0xe9   :  { %v1351_v42 = vadd.f32 %v17437_v18, %v1338_v29  ;;  %v11391_v9 = vld [vmem:[#allocation4 + $0x98] sm:$0xf0]  ;;  %v11565_v18 = vld [vmem:[#allocation4 + $0x1f0] sm:$0xf] }
  0xea   :  { %v11566_v1 = vor.u32 %v16087_v61, %v11565_v18  ;;  %v16057_v18 = vld [vmem:[#allocation4 + $0x104] sm:$0xf0] }
  0xeb   :  { %2002 = vmatpush.bf16.msra.mxu0 %v11342_v23  ;;  %2015 = vmatpush.bf16.msra.mxu1 %v11406_v24  ;;  %v16030_v23 = vld [vmem:[#allocation4 + $0x34] sm:$0xf]  ;;  %v11343_v24 = vld [vmem:[#allocation4 + $0x38] sm:$0xf0]  ;;  %v1588_v52 = vmax.f32 %v1351_v42, 0.0 }
  0xec   :  { %v11346_v31 = vor.u32 %v16030_v23, %v11343_v24  ;;  %2037 = vmatpush.bf16.msra.mxu3 %v11566_v1  ;;  %v16083_v23 = vld [vmem:[#allocation4 + $0x1d4] sm:$0xf0]  ;;  %v11567_v1 = vld [vmem:[#allocation4 + $0x1f8] sm:$0xf0] }
  0xed   :  { %v16079_v42 = vld [vmem:[#allocation4 + $0x1b4] sm:$0xf0] }
  0xef   :  { %2003 = vmatpush.bf16.msra.mxu0 %v11334_v36  ;;  %2016 = vmatpush.bf16.msra.mxu1 %v11398_v40  ;;  %v16028_v36 = vld [vmem:[#allocation4 + $0x24] sm:$0xf] }
  0xf0   :  { %v16044_v40 = vld [vmem:[#allocation4 + $0xa4] sm:$0xf]  ;;  %v11338_v45 = vor.u32 %v16028_v36, %v11335_v37  ;;  %v11469_v37 = vld [vmem:[#allocation4 + $0x130] sm:$0xf] }
  0xf3   :  { %2004 = vmatpush.bf16.msra.mxu0 %v11326_v46  ;;  %2017 = vmatpush.bf16.msra.mxu1 %v11390_v47  ;;  %v11402_v47 = vor.u32 %v16044_v40, %v11399_v41  ;;  %v11533_v40 = vld [vmem:[#allocation4 + $0x1b0] sm:$0xf] }
  0xf7   :  { %2005 = vmatpush.bf16.msra.mxu0 %v11318_v57  ;;  %2018 = vmatpush.bf16.msra.mxu1 %v11382_v58  ;;  %v1389_v22 = vpop.f32.mrf.mxu0  ;;  %v1402_v33 = vpop.f32.mrf.mxu1  ;;  %v11394_v57 = vor.u32 %v16042_v50, %v11391_v9  ;;  %v16024_v58 = vld [vmem:[#allocation4 + $0x4] sm:$0xf]  ;;  %v11453_v9 = vld [vmem:[#allocation4 + $0x110] sm:$0xf] }
  0xf8   :  { %v1390_v26 = vadd.f32 %v1389_v22, %v1377_v21 }
  0xfa   :  { %v1403_v30 = vadd.f32 %v1402_v33, %v1390_v26  ;;  %v11477_v33 = vld [vmem:[#allocation4 + $0x140] sm:$0xf] }
  0xfb   :  { %2050 = vmatpush.bf16.msrb.mxu0 %v11378_v59  ;;  %2063 = vmatpush.bf16.msrb.mxu1 %v11442_v60  ;;  %v11319_v59 = vld [vmem:[#allocation4 + $0x8] sm:$0xf0]  ;;  %v11502_v60 = vor.u32 %v16071_v56, %v11501_v55  ;;  %v11478_v29 = vor.u32 %v16065_v27, %v11477_v33  ;;  %v11445_v56 = vld [vmem:[#allocation4 + $0x100] sm:$0xf]  ;;  %v16064_v27 = vld [vmem:[#allocation4 + $0x144] sm:$0xf] }
  0xfc   :  { %v11322_v4 = vor.u32 %v16024_v58, %v11319_v59  ;;  %v16073_v58 = vld [vmem:[#allocation4 + $0x184] sm:$0xf0]  ;;  %v16070_v59 = vld [vmem:[#allocation4 + $0x174] sm:$0xf] }
  0xfd   :  { %2024 = vmatpush.bf16.msra.mxu2 %v11502_v60  ;;  %v11503_v60 = vld [vmem:[#allocation4 + $0x178] sm:$0xf0] }
  0xfe   :  { %v11506_v63 = vor.u32 %v16070_v59, %v11503_v60  ;;  %v16072_v60 = vld [vmem:[#allocation4 + $0x184] sm:$0xf] }
  0xff   :  { %2051 = vmatpush.bf16.msrb.mxu0 %v11370_v3  ;;  %2064 = vmatpush.bf16.msrb.mxu1 %v11434_v5  ;;  %v1428_v44 = vpop.f32.mrf.mxu3  ;;  %v1391_v49 = vpop.f32.mrf.mxu0 }
 0x100   :  { %v1415_v38 = vpop.f32.mrf.mxu2  ;;  %v1404_v51 = vpop.f32.mrf.mxu1 }
 0x101   :  { %v1416_v43 = vadd.f32 %v1415_v38, %v1403_v30  ;;  %2025 = vmatpush.bf16.msra.mxu2 %v11494_v16  ;;  %v16081_v30 = vld [vmem:[#allocation4 + $0x1c4] sm:$0xf0]  ;;  %v16063_v38 = vld [vmem:[#allocation4 + $0x134] sm:$0xf0] }
 0x102   :  { %v11470_v41 = vor.u32 %v16063_v38, %v11469_v37  ;;  %v16059_v51 = vld [vmem:[#allocation4 + $0x114] sm:$0xf0] }
 0x103   :  { %2052 = vmatpush.bf16.msrb.mxu0 %v11362_v13  ;;  %2065 = vmatpush.bf16.msrb.mxu1 %v11426_v14  ;;  %v1429_v46 = vadd.f32 %v1428_v44, %v1416_v43  ;;  %v11557_v13 = vld [vmem:[#allocation4 + $0x1e0] sm:$0xf]  ;;  %v16061_v44 = vld [vmem:[#allocation4 + $0x124] sm:$0xf0] }
 0x104   :  { %v11558_v15 = vor.u32 %v16085_v8, %v11557_v13  ;;  %v11461_v43 = vld [vmem:[#allocation4 + $0x120] sm:$0xf] }
 0x105   :  { %v1589_v53 = vmax.f32 %v1429_v46, 0.0  ;;  %v11534_v46 = vor.u32 %v16079_v42, %v11533_v40  ;;  %v11462_v49 = vor.u32 %v16061_v44, %v11461_v43  ;;  %v16062_v40 = vld [vmem:[#allocation4 + $0x134] sm:$0xf] }
 0x106   :  { %2038 = vmatpush.bf16.msra.mxu3 %v11558_v15  ;;  %v16066_v15 = vld [vmem:[#allocation4 + $0x154] sm:$0xf] }
 0x107   :  { %2053 = vmatpush.bf16.msrb.mxu0 %v11354_v20  ;;  %2066 = vmatpush.bf16.msrb.mxu1 %v11418_v35  ;;  %v1592_v25 = vpack.c.bf16 %v1589_v53, %v1588_v52  ;;  %v1430_v5 = vpop.f32.mrf.mxu3  ;;  %v11549_v20 = vld [vmem:[#allocation4 + $0x1d0] sm:$0xf]  ;;  %v11486_v35 = vor.u32 %v16067_v19, %v11485_v32  ;;  %v16075_v53 = vld [vmem:[#allocation4 + $0x194] sm:$0xf0]  ;;  %v11487_v32 = vld [vmem:[#allocation4 + $0x158] sm:$0xf0] }
 0x108   :  { %v1417_v0 = vpop.f32.mrf.mxu2  ;;  %v11550_v26 = vor.u32 %v16083_v23, %v11549_v20  ;;  %v11517_v52 = vld [vmem:[#allocation4 + $0x190] sm:$0xf]  ;;  %v16068_v5 = vld [vmem:[#allocation4 + $0x164] sm:$0xf]  ;;  %v16082_v19 = vld [vmem:[#allocation4 + $0x1d4] sm:$0xf] }
 0x109   :  { %v1666_v2 = vunpack.c.l.b16 %v1592_v25  ;;  %v1667_v3 = vunpack.c.h.b16 %v1592_v25  ;;  %2026 = vmatpush.bf16.msra.mxu2 %v11486_v35  ;;  %v11518_v55 = vor.u32 %v16075_v53, %v11517_v52  ;;  %v11509_v25 = vld [vmem:[#allocation4 + $0x180] sm:$0xf]  ;;  %v16086_v0 = vld [vmem:[#allocation4 + $0x1f4] sm:$0xf]  ;;  %v11490_v35 = vor.u32 %v16066_v15, %v11487_v32  ;;  %v11551_v23 = vld [vmem:[#allocation4 + $0x1d8] sm:$0xf0] }
 0x10a   :  { %2039 = vmatpush.bf16.msra.mxu3 %v11550_v26  ;;  %v11510_v62 = vor.u32 %v16073_v58, %v11509_v25  ;;  %v11554_v33 = vor.u32 %v16082_v19, %v11551_v23  ;;  %v16078_v42 = vld [vmem:[#allocation4 + $0x1b4] sm:$0xf]  ;;  %v11455_v52 = vld [vmem:[#allocation4 + $0x118] sm:$0xf0]  ;;  %v16056_v25 = vld [vmem:[#allocation4 + $0x104] sm:$0xf] }
 0x10b   :  { %2054 = vmatpush.bf16.msrb.mxu0 %v11346_v31  ;;  %2067 = vmatpush.bf16.msrb.mxu1 %v11410_v34  ;;  %v17449_v6 = vpack.c.b16 %v1666_v2, %v1666_v2  ;;  %v17451_v7 = vpack.c.b16 %v1667_v3, %v1667_v3  ;;  %v11542_v34 = vor.u32 %v16081_v30, %v11541_v28  ;;  %v11479_v28 = vld [vmem:[#allocation4 + $0x148] sm:$0xf0]  ;;  %v310_v30 = vperm.slane %v17439_v39, 2 }
 0x10c   :  { %v11570_v3 = vor.u32 %v16086_v0, %v11567_v1 }
 0x10d   :  { %2006 = vmatmul.bf16.vlgmr.msra.gmra.mxu0 %v17449_v6  ;;  %2019 = vmatmul.bf16.vlgmr.msra.gmra.mxu1 %v17451_v7 }
 0x10e   :  { %2027 = vmatpush.bf16.msra.mxu2 %v11478_v29  ;;  %2040 = vmatpush.bf16.msra.mxu3 %v11542_v34  ;;  %v16080_v29 = vld [vmem:[#allocation4 + $0x1c4] sm:$0xf]  ;;  %v11543_v34 = vld [vmem:[#allocation4 + $0x1c8] sm:$0xf0] }
 0x10f   :  { %2055 = vmatpush.bf16.msrb.mxu0 %v11338_v45  ;;  %2068 = vmatpush.bf16.msrb.mxu1 %v11402_v47  ;;  %v11525_v47 = vld [vmem:[#allocation4 + $0x1a0] sm:$0xf]  ;;  %v11546_v37 = vor.u32 %v16080_v29, %v11543_v34  ;;  %v16095_v34 = vld [vmem:[#allocation6 + $0x38] sm:$0xff] }
 0x110   :  { %v11526_v50 = vor.u32 %v16077_v17, %v11525_v47  ;;  %v11463_v47 = vld [vmem:[#allocation4 + $0x128] sm:$0xf0] }
 0x112   :  { %2028 = vmatpush.bf16.msra.mxu2 %v11470_v41  ;;  %2041 = vmatpush.bf16.msra.mxu3 %v11534_v46  ;;  %v11471_v41 = vld [vmem:[#allocation4 + $0x138] sm:$0xf0]  ;;  %v16060_v46 = vld [vmem:[#allocation4 + $0x124] sm:$0xf] }
 0x113   :  { %2056 = vmatpush.bf16.msrb.mxu0 %v11330_v54  ;;  %2069 = vmatpush.bf16.msrb.mxu1 %v11394_v57  ;;  %v11454_v54 = vor.u32 %v16059_v51, %v11453_v9  ;;  %v11446_v57 = vor.u32 %v16057_v18, %v11445_v56  ;;  %v11474_v44 = vor.u32 %v16062_v40, %v11471_v41  ;;  %v16058_v51 = vld [vmem:[#allocation4 + $0x114] sm:$0xf]  ;;  %v11519_v56 = vld [vmem:[#allocation4 + $0x198] sm:$0xf0] }
 0x114   :  { %v16094_v40 = vld [vmem:[#allocation6 + $0x30] sm:$0xff] }
 0x116   :  { %2029 = vmatpush.bf16.msra.mxu2 %v11462_v49  ;;  %2042 = vmatpush.bf16.msra.mxu3 %v11526_v50  ;;  %v11527_v49 = vld [vmem:[#allocation4 + $0x1a8] sm:$0xf0]  ;;  %v11466_v50 = vor.u32 %v16060_v46, %v11463_v47  ;;  %v11733_v46 = vld [vmem:[#allocation4 + $0x2c0] sm:$0xf]  ;;  %v16129_v47 = vld [vmem:[#allocation4 + $0x2c4] sm:$0xf0] }
 0x117   :  { %2057 = vmatpush.bf16.msrb.mxu0 %v11322_v4  ;;  %2070 = vmatpush.bf16.msrb.mxu1 %v11386_v10  ;;  %v17455_v14 = vpop.f32.mrf.mxu0  ;;  %v17457_v21 = vpop.f32.mrf.mxu1  ;;  %v11495_v4 = vld [vmem:[#allocation4 + $0x168] sm:$0xf0]  ;;  %v16084_v10 = vld [vmem:[#allocation4 + $0x1e4] sm:$0xf] }
 0x118   :  { %v11498_v11 = vor.u32 %v16068_v5, %v11495_v4  ;;  %v11562_v16 = vor.u32 %v16084_v10, %v11559_v12  ;;  %v1442_v43 = vadd.f32 %v17455_v14, %v310_v30  ;;  %v11458_v14 = vor.u32 %v16058_v51, %v11455_v52  ;;  %v16133_v30 = vld [vmem:[#allocation4 + $0x2e4] sm:$0xf0]  ;;  %v16127_v51 = vld [vmem:[#allocation4 + $0x2b4] sm:$0xf0]  ;;  %v16092_v52 = vld [vmem:[#allocation6 + $0x20] sm:$0xff] }
 0x11a   :  { %2030 = vmatpush.bf16.msra.mxu2 %v11454_v54  ;;  %2043 = vmatpush.bf16.msra.mxu3 %v11518_v55  ;;  %v1455_v53 = vadd.f32 %v17457_v21, %v1442_v43  ;;  %v311_v54 = vperm.slane %v17439_v39, 3  ;;  %v16074_v55 = vld [vmem:[#allocation4 + $0x194] sm:$0xf] }
 0x11b   :  { %v11522_v18 = vor.u32 %v16074_v55, %v11519_v56  ;;  %2244 = vmatpush.bf16.msra.mxu0 %v16095_v34  ;;  %v11717_v56 = vld [vmem:[#allocation4 + $0x2a0] sm:$0xf] }
 0x11d   :  { %2058 = vmatmul.bf16.vlgmr.msrb.gmra.mxu0 %v17449_v6  ;;  %2071 = vmatmul.bf16.vlgmr.msrb.gmra.mxu1 %v17451_v7 }
 0x11e   :  { %2031 = vmatpush.bf16.msra.mxu2 %v11446_v57  ;;  %2044 = vmatpush.bf16.msra.mxu3 %v11510_v62  ;;  %v11447_v57 = vld [vmem:[#allocation4 + $0x108] sm:$0xf0] }
 0x11f   :  { %v17463_v24 = vpop.f32.mrf.mxu3  ;;  %v1443_v31 = vpop.f32.mrf.mxu0  ;;  %v11511_v62 = vld [vmem:[#allocation4 + $0x188] sm:$0xf0]  ;;  %2245 = vmatpush.bf16.msra.mxu0 %v16094_v40  ;;  %v11813_v40 = vld [vmem:[#allocation4 + $0x360] sm:$0xf] }
 0x120   :  { %v17461_v22 = vpop.f32.mrf.mxu2  ;;  %v1456_v36 = vpop.f32.mrf.mxu1  ;;  %v11482_v31 = vor.u32 %v16064_v27, %v11479_v28  ;;  %v11514_v0 = vor.u32 %v16072_v60, %v11511_v62  ;;  %v11749_v28 = vld [vmem:[#allocation4 + $0x2e0] sm:$0xf] }
 0x121   :  { %v1468_v58 = vadd.f32 %v17461_v22, %v1455_v53 }
 0x122   :  { %2076 = vmatpush.bf16.msrb.mxu2 %v11506_v63  ;;  %2089 = vmatpush.bf16.msrb.mxu3 %v11570_v3  ;;  %v11450_v63 = vor.u32 %v16056_v25, %v11447_v57  ;;  %v11709_v25 = vld [vmem:[#allocation4 + $0x290] sm:$0xf]  ;;  %v16123_v57 = vld [vmem:[#allocation4 + $0x294] sm:$0xf0] }
 0x123   :  { %v1481_v21 = vadd.f32 %v17463_v24, %v1468_v58 }
 0x126   :  { %2077 = vmatpush.bf16.msrb.mxu2 %v11498_v11  ;;  %2090 = vmatpush.bf16.msrb.mxu3 %v11562_v16 }
 0x127   :  { %v1482_v48 = vpop.f32.mrf.mxu3 }
 0x128   :  { %v1469_v45 = vpop.f32.mrf.mxu2  ;;  %v16076_v48 = vld [vmem:[#allocation4 + $0x1a4] sm:$0xf] }
 0x129   :  { %v11535_v45 = vld [vmem:[#allocation4 + $0x1b8] sm:$0xf0]  ;;  %v11530_v9 = vor.u32 %v16076_v48, %v11527_v49 }
 0x12a   :  { %2078 = vmatpush.bf16.msrb.mxu2 %v11490_v35  ;;  %2091 = vmatpush.bf16.msrb.mxu3 %v11554_v33  ;;  %v11538_v17 = vor.u32 %v16078_v42, %v11535_v45  ;;  %v16103_v42 = vld [vmem:[#allocation6 + $0x78] sm:$0xff] }
 0x12b   :  { %2257 = vmatpush.bf16.msra.mxu1 %v16103_v42  ;;  %v16098_v42 = vld [vmem:[#allocation6 + $0x50] sm:$0xff] }
 0x12e   :  { %2079 = vmatpush.bf16.msrb.mxu2 %v11482_v31  ;;  %2092 = vmatpush.bf16.msrb.mxu3 %v11546_v37  ;;  %v1658_v31 = vld [vmem:[#allocation9 + $0x4] sm:$0x3]  ;;  %v11741_v37 = vld [vmem:[#allocation4 + $0x2d0] sm:$0xf] }
 0x12f   :  { %v1660_v41 = vperm.slane %v1658_v31, 0  ;;  %v1661_v58 = vperm.slane %v1658_v31, 1  ;;  %v16099_v31 = vld [vmem:[#allocation6 + $0x58] sm:$0xff] }
 0x132   :  { %2080 = vmatpush.bf16.msrb.mxu2 %v11474_v44  ;;  %2093 = vmatpush.bf16.msrb.mxu3 %v11538_v17  ;;  %v16093_v17 = vld [vmem:[#allocation6 + $0x28] sm:$0xff] }
 0x133   :  { %2246 = vmatpush.bf16.msra.mxu0 %v16093_v17  ;;  %v16147_v17 = vld [vmem:[#allocation4 + $0x354] sm:$0xf0] }
 0x136   :  { %2081 = vmatpush.bf16.msrb.mxu2 %v11466_v50  ;;  %2094 = vmatpush.bf16.msrb.mxu3 %v11530_v9  ;;  %v11734_v50 = vor.u32 %v16129_v47, %v11733_v46  ;;  %v11725_v9 = vld [vmem:[#allocation4 + $0x2b0] sm:$0xf] }
 0x137   :  { %v17465_v61 = vpop.f32.mrf.mxu0  ;;  %v17467_v2 = vpop.f32.mrf.mxu1  ;;  %v11726_v53 = vor.u32 %v16127_v51, %v11725_v9  ;;  %2247 = vmatpush.bf16.msra.mxu0 %v16092_v52  ;;  %v11805_v47 = vld [vmem:[#allocation4 + $0x350] sm:$0xf]  ;;  %v16138_v9 = vld [vmem:[#allocation4 + $0x314] sm:$0xf]  ;;  %v11775_v51 = vld [vmem:[#allocation4 + $0x318] sm:$0xf0] }
 0x138   :  { %v1494_v4 = vadd.f32 %v17465_v61, %v1481_v21  ;;  %v11757_v61 = vld [vmem:[#allocation4 + $0x2f0] sm:$0xf]  ;;  %v11778_v52 = vor.u32 %v16138_v9, %v11775_v51  ;;  %v12277_v9 = vld [vmem:[#allocation2 + $0x980] sm:$0xf] }
 0x139   :  { %v16266_v51 = vld [vmem:[#allocation2 + $0x98c] sm:$0xf0] }
 0x13a   :  { %2082 = vmatpush.bf16.msrb.mxu2 %v11458_v14  ;;  %2095 = vmatpush.bf16.msrb.mxu3 %v11522_v18  ;;  %v1507_v22 = vadd.f32 %v17467_v2, %v1494_v4  ;;  %v16135_v2 = vld [vmem:[#allocation4 + $0x2f4] sm:$0xf0]  ;;  %v16125_v14 = vld [vmem:[#allocation4 + $0x2a4] sm:$0xf0]  ;;  %v16150_v4 = vld [vmem:[#allocation4 + $0x374] sm:$0xf] }
 0x13b   :  { %v11758_v29 = vor.u32 %v16135_v2, %v11757_v61  ;;  %v11718_v18 = vor.u32 %v16125_v14, %v11717_v56  ;;  %v11799_v61 = vld [vmem:[#allocation4 + $0x348] sm:$0xf0]  ;;  %v16088_v2 = vld [vmem:[#allocation6] sm:$0xff] }
 0x13c   :  { %v1590_v19 = vmax.f32 %v1507_v22, 0.0  ;;  %v16136_v14 = vld [vmem:[#allocation4 + $0x304] sm:$0xf] }
 0x13e   :  { %2083 = vmatpush.bf16.msrb.mxu2 %v11450_v63  ;;  %2096 = vmatpush.bf16.msrb.mxu3 %v11514_v0 }
 0x13f   :  { %v1532_v8 = vpop.f32.mrf.mxu3  ;;  %v1495_v20 = vpop.f32.mrf.mxu0 }
 0x140   :  { %v1519_v13 = vpop.f32.mrf.mxu2  ;;  %v1508_v26 = vpop.f32.mrf.mxu1 }
 0x141   :  { %v1520_v59 = vadd.f32 %v1519_v13, %v311_v54 }
 0x143   :  { %v1533_v39 = vadd.f32 %v1532_v8, %v1520_v59  ;;  %v11710_v59 = vor.u32 %v16123_v57, %v11709_v25  ;;  %v11789_v57 = vld [vmem:[#allocation4 + $0x330] sm:$0xf] }
 0x147   :  { %v1534_v38 = vpop.f32.mrf.mxu3 }
 0x148   :  { %v1521_v36 = vpop.f32.mrf.mxu2  ;;  %v16131_v38 = vld [vmem:[#allocation4 + $0x2d4] sm:$0xf0] }
 0x149   :  { %v11750_v36 = vor.u32 %v16133_v30, %v11749_v28  ;;  %v11742_v43 = vor.u32 %v16131_v38, %v11741_v37  ;;  %v16151_v30 = vld [vmem:[#allocation4 + $0x374] sm:$0xf0]  ;;  %v11791_v37 = vld [vmem:[#allocation4 + $0x338] sm:$0xf0] }
 0x157   :  { %v1545_v1 = vpop.f32.mrf.mxu0  ;;  %v1558_v3 = vpop.f32.mrf.mxu1 }
 0x158   :  { %v1546_v5 = vadd.f32 %v1545_v1, %v1533_v39  ;;  %v11701_v1 = vld [vmem:[#allocation4 + $0x280] sm:$0xf] }
 0x15a   :  { %v1559_v10 = vadd.f32 %v1558_v3, %v1546_v5  ;;  %v16121_v3 = vld [vmem:[#allocation4 + $0x284] sm:$0xf0] }
 0x15b   :  { %v11702_v5 = vor.u32 %v16121_v3, %v11701_v1  ;;  %v11773_v1 = vld [vmem:[#allocation4 + $0x310] sm:$0xf]  ;;  %v16139_v3 = vld [vmem:[#allocation4 + $0x314] sm:$0xf0] }
 0x15f   :  { %v1571_v11 = vpop.f32.mrf.mxu2  ;;  %v1584_v13 = vpop.f32.mrf.mxu3 }
 0x160   :  { %v1572_v12 = vadd.f32 %v1571_v11, %v1559_v10  ;;  %v1547_v16 = vpop.f32.mrf.mxu0  ;;  %v1560_v15 = vpop.f32.mrf.mxu1  ;;  %v11823_v10 = vld [vmem:[#allocation4 + $0x378] sm:$0xf0] }
 0x161   :  { %v16091_v11 = vld [vmem:[#allocation6 + $0x18] sm:$0xff]  ;;  %v11826_v22 = vor.u32 %v16150_v4, %v11823_v10  ;;  %v11815_v16 = vld [vmem:[#allocation4 + $0x368] sm:$0xf0]  ;;  %v16090_v15 = vld [vmem:[#allocation6 + $0x10] sm:$0xff] }
 0x162   :  { %v1585_v32 = vadd.f32 %v1584_v13, %v1572_v12  ;;  %v16102_v12 = vld [vmem:[#allocation6 + $0x70] sm:$0xff]  ;;  %2248 = vmatpush.bf16.msra.mxu0 %v16091_v11  ;;  %v16148_v13 = vld [vmem:[#allocation4 + $0x364] sm:$0xf]  ;;  %v11765_v4 = vld [vmem:[#allocation4 + $0x300] sm:$0xf] }
 0x163   :  { %2258 = vmatpush.bf16.msra.mxu1 %v16102_v12  ;;  %v16137_v10 = vld [vmem:[#allocation4 + $0x304] sm:$0xf0] }
 0x164   :  { %v1591_v20 = vmax.f32 %v1585_v32, 0.0  ;;  %v11818_v32 = vor.u32 %v16148_v13, %v11815_v16  ;;  %v11766_v12 = vor.u32 %v16137_v10, %v11765_v4  ;;  %v12245_v4 = vld [vmem:[#allocation2 + $0x940] sm:$0xf]  ;;  %v16258_v10 = vld [vmem:[#allocation2 + $0x94c] sm:$0xf0] }
 0x166   :  { %v1593_v24 = vpack.c.bf16 %v1591_v20, %v1590_v19  ;;  %v16101_v19 = vld [vmem:[#allocation6 + $0x68] sm:$0xff]  ;;  %2249 = vmatpush.bf16.msra.mxu0 %v16090_v15  ;;  %v16146_v20 = vld [vmem:[#allocation4 + $0x354] sm:$0xf] }
 0x167   :  { %v1573_v8 = vpop.f32.mrf.mxu2  ;;  %v1586_v26 = vpop.f32.mrf.mxu3  ;;  %2259 = vmatpush.bf16.msra.mxu1 %v16101_v19 }
 0x168   :  { %v1668_v35 = vunpack.c.l.b16 %v1593_v24  ;;  %v1669_v23 = vunpack.c.h.b16 %v1593_v24  ;;  %v11807_v24 = vld [vmem:[#allocation4 + $0x358] sm:$0xf0]  ;;  %v16089_v8 = vld [vmem:[#allocation6 + $0x8] sm:$0xff]  ;;  %v16144_v26 = vld [vmem:[#allocation4 + $0x344] sm:$0xf] }
 0x169   :  { %v11802_v28 = vor.u32 %v16144_v26, %v11799_v61  ;;  %v12325_v61 = vld [vmem:[#allocation2 + $0x9e0] sm:$0xf] }
 0x16a   :  { %v17477_v33 = vpack.c.b16 %v1668_v35, %v1668_v35  ;;  %v17479_v27 = vpack.c.b16 %v1669_v23, %v1669_v23  ;;  %v11810_v35 = vor.u32 %v16146_v20, %v11807_v24  ;;  %v16100_v23 = vld [vmem:[#allocation6 + $0x60] sm:$0xff]  ;;  %2250 = vmatpush.bf16.msra.mxu0 %v16089_v8 }
 0x16b   :  { %2260 = vmatpush.bf16.msra.mxu1 %v16100_v23 }
 0x16c   :  { %2032 = vmatmul.bf16.vlgmr.msra.gmra.mxu2 %v17477_v33  ;;  %2045 = vmatmul.bf16.vlgmr.msra.gmra.mxu3 %v17479_v27 }
 0x16d   :  { %2579 = vmatpush.bf16.msra.mxu3 %v11758_v29  ;;  %v11821_v29 = vld [vmem:[#allocation4 + $0x370] sm:$0xf] }
 0x16e   :  { %v11822_v34 = vor.u32 %v16151_v30, %v11821_v29  ;;  %2251 = vmatpush.bf16.msra.mxu0 %v16088_v2  ;;  %v16278_v2 = vld [vmem:[#allocation2 + $0x9ec] sm:$0xf0] }
 0x16f   :  { %2261 = vmatpush.bf16.msra.mxu1 %v16099_v31 }
 0x171   :  { %2580 = vmatpush.bf16.msra.mxu3 %v11750_v36  ;;  %v16142_v36 = vld [vmem:[#allocation4 + $0x334] sm:$0xf] }
 0x172   :  { %2592 = vmatpush.bf16.msrb.mxu0 %v11822_v34  ;;  %v11794_v38 = vor.u32 %v16142_v36, %v11791_v37  ;;  %v12326_v34 = vor.u32 %v16278_v2, %v12325_v61  ;;  %v16274_v36 = vld [vmem:[#allocation2 + $0x9cc] sm:$0xf0]  ;;  %v16119_v37 = vld [vmem:[#allocation4 + $0x274] sm:$0xf0]  ;;  %v16108_v61 = vld [vmem:[#allocation4 + $0x224] sm:$0xf] }
 0x173   :  { %2262 = vmatpush.bf16.msra.mxu1 %v16098_v42  ;;  %v16117_v42 = vld [vmem:[#allocation4 + $0x264] sm:$0xf0]  ;;  %v11655_v2 = vld [vmem:[#allocation4 + $0x228] sm:$0xf0] }
 0x175   :  { %2581 = vmatpush.bf16.msra.mxu3 %v11742_v43 }
 0x179   :  { %2582 = vmatpush.bf16.msra.mxu3 %v11734_v50  ;;  %v11806_v50 = vor.u32 %v16147_v17, %v11805_v47  ;;  %v16115_v47 = vld [vmem:[#allocation4 + $0x254] sm:$0xf0]  ;;  %v16118_v17 = vld [vmem:[#allocation4 + $0x274] sm:$0xf] }
 0x17c   :  { %2084 = vmatmul.bf16.vlgmr.msrb.gmra.mxu2 %v17477_v33  ;;  %2097 = vmatmul.bf16.vlgmr.msrb.gmra.mxu3 %v17479_v27 }
 0x17d   :  { %2583 = vmatpush.bf16.msra.mxu3 %v11726_v53  ;;  %v11797_v53 = vld [vmem:[#allocation4 + $0x340] sm:$0xf] }
 0x181   :  { %2584 = vmatpush.bf16.msra.mxu3 %v11718_v18  ;;  %v11767_v18 = vld [vmem:[#allocation4 + $0x308] sm:$0xf0] }
 0x182   :  { %v11770_v25 = vor.u32 %v16136_v14, %v11767_v18  ;;  %v16113_v14 = vld [vmem:[#allocation4 + $0x244] sm:$0xf0] }
 0x185   :  { %2585 = vmatpush.bf16.msra.mxu3 %v11710_v59 }
 0x189   :  { %2586 = vmatpush.bf16.msra.mxu3 %v11702_v5  ;;  %v11774_v5 = vor.u32 %v16139_v3, %v11773_v1  ;;  %v16112_v3 = vld [vmem:[#allocation4 + $0x244] sm:$0xf] }
 0x18a   :  { %v2007_v44 = vpop.f32.mrf.mxu0  ;;  %v2020_v45 = vpop.f32.mrf.mxu1 }
 0x18b   :  { %v2008_v48 = vadd.f32 %v2007_v44, %v1660_v41  ;;  %v16149_v41 = vld [vmem:[#allocation4 + $0x364] sm:$0xf0]  ;;  %v16140_v44 = vld [vmem:[#allocation4 + $0x324] sm:$0xf] }
 0x18c   :  { %v11814_v43 = vor.u32 %v16149_v41, %v11813_v40 }
 0x18d   :  { %v17485_v49 = vadd.f32 %v2020_v45, %v2008_v48  ;;  %2631 = vmatpush.bf16.msrb.mxu3 %v11826_v22  ;;  %v11783_v45 = vld [vmem:[#allocation4 + $0x328] sm:$0xf0] }
 0x18e   :  { %2593 = vmatpush.bf16.msrb.mxu0 %v11814_v43  ;;  %v11786_v46 = vor.u32 %v16140_v44, %v11783_v45  ;;  %v16097_v48 = vld [vmem:[#allocation6 + $0x48] sm:$0xff]  ;;  %v12293_v43 = vld [vmem:[#allocation2 + $0x9a0] sm:$0xf]  ;;  %v16270_v44 = vld [vmem:[#allocation2 + $0x9ac] sm:$0xf0] }
 0x18f   :  { %2263 = vmatpush.bf16.msra.mxu1 %v16097_v48  ;;  %v12294_v48 = vor.u32 %v16270_v44, %v12293_v43  ;;  %v11751_v43 = vld [vmem:[#allocation4 + $0x2e8] sm:$0xf0] }
 0x191   :  { %2632 = vmatpush.bf16.msrb.mxu3 %v11818_v32 }
 0x192   :  { %v2009_v54 = vpop.f32.mrf.mxu0  ;;  %v2022_v55 = vpop.f32.mrf.mxu1  ;;  %2594 = vmatpush.bf16.msrb.mxu0 %v11806_v50  ;;  %v11695_v50 = vld [vmem:[#allocation4 + $0x278] sm:$0xf0] }
 0x193   :  { %v16145_v54 = vld [vmem:[#allocation4 + $0x344] sm:$0xf0]  ;;  %v16096_v55 = vld [vmem:[#allocation6 + $0x40] sm:$0xff] }
 0x194   :  { %v11798_v56 = vor.u32 %v16145_v54, %v11797_v53  ;;  %2264 = vmatpush.bf16.msra.mxu1 %v16096_v55  ;;  %v16116_v53 = vld [vmem:[#allocation4 + $0x264] sm:$0xf]  ;;  %v11687_v55 = vld [vmem:[#allocation4 + $0x268] sm:$0xf0] }
 0x195   :  { %2633 = vmatpush.bf16.msrb.mxu3 %v11810_v35  ;;  %v11690_v18 = vor.u32 %v16116_v53, %v11687_v55  ;;  %v16124_v53 = vld [vmem:[#allocation4 + $0x2a4] sm:$0xf] }
 0x196   :  { %2595 = vmatpush.bf16.msrb.mxu0 %v11798_v56  ;;  %v11669_v56 = vld [vmem:[#allocation4 + $0x240] sm:$0xf] }
 0x199   :  { %2634 = vmatpush.bf16.msrb.mxu3 %v11802_v28 }
 0x19a   :  { %v2059_v60 = vpop.f32.mrf.mxu0  ;;  %v2072_v62 = vpop.f32.mrf.mxu1 }
 0x19b   :  { %v2060_v63 = vadd.f32 %v2059_v60, %v1661_v58  ;;  %v16143_v58 = vld [vmem:[#allocation4 + $0x334] sm:$0xf0]  ;;  %v11781_v60 = vld [vmem:[#allocation4 + $0x320] sm:$0xf] }
 0x19c   :  { %v11790_v59 = vor.u32 %v16143_v58, %v11789_v57  ;;  %v16114_v57 = vld [vmem:[#allocation4 + $0x254] sm:$0xf]  ;;  %v11679_v58 = vld [vmem:[#allocation4 + $0x258] sm:$0xf0] }
 0x19d   :  { %v17487_v0 = vadd.f32 %v2072_v62, %v2060_v63  ;;  %2635 = vmatpush.bf16.msrb.mxu3 %v11794_v38  ;;  %v16141_v62 = vld [vmem:[#allocation4 + $0x324] sm:$0xf0]  ;;  %v11685_v38 = vld [vmem:[#allocation4 + $0x260] sm:$0xf] }
 0x19e   :  { %2596 = vmatpush.bf16.msrb.mxu0 %v11790_v59  ;;  %v11686_v45 = vor.u32 %v16117_v42, %v11685_v38  ;;  %v12261_v59 = vld [vmem:[#allocation2 + $0x960] sm:$0xf]  ;;  %v11759_v38 = vld [vmem:[#allocation4 + $0x2f8] sm:$0xf0]  ;;  %v16132_v42 = vld [vmem:[#allocation4 + $0x2e4] sm:$0xf] }
 0x19f   :  { %v11754_v44 = vor.u32 %v16132_v42, %v11751_v43 }
 0x1a1   :  { %2636 = vmatpush.bf16.msrb.mxu3 %v11786_v46  ;;  %v11677_v46 = vld [vmem:[#allocation4 + $0x250] sm:$0xf] }
 0x1a2   :  { %v2061_v21 = vpop.f32.mrf.mxu0  ;;  %v2074_v39 = vpop.f32.mrf.mxu1  ;;  %v11678_v54 = vor.u32 %v16115_v47, %v11677_v46  ;;  %v11743_v46 = vld [vmem:[#allocation4 + $0x2d8] sm:$0xf0] }
 0x1a3   :  { %v11782_v39 = vor.u32 %v16141_v62, %v11781_v60  ;;  %v16262_v60 = vld [vmem:[#allocation2 + $0x96c] sm:$0xf0]  ;;  %v11670_v62 = vor.u32 %v16113_v14, %v11669_v56  ;;  %v16106_v56 = vld [vmem:[#allocation4 + $0x214] sm:$0xf]  ;;  %v11647_v14 = vld [vmem:[#allocation4 + $0x218] sm:$0xf0] }
 0x1a4   :  { %v12262_v1 = vor.u32 %v16262_v60, %v12261_v59  ;;  %v16104_v59 = vld [vmem:[#allocation4 + $0x204] sm:$0xf]  ;;  %v11639_v60 = vld [vmem:[#allocation4 + $0x208] sm:$0xf0] }
 0x1a5   :  { %2637 = vmatpush.bf16.msrb.mxu3 %v11778_v52  ;;  %2597 = vmatpush.bf16.msrb.mxu0 %v11782_v39  ;;  %v11698_v52 = vor.u32 %v16118_v17, %v11695_v50  ;;  %v11682_v39 = vor.u32 %v16114_v57, %v11679_v58  ;;  %v16128_v17 = vld [vmem:[#allocation4 + $0x2c4] sm:$0xf]  ;;  %v11711_v57 = vld [vmem:[#allocation4 + $0x298] sm:$0xf0] }
 0x1a7   :  { %2605 = vmatpush.bf16.msrb.mxu1 %v11698_v52 }
 0x1a9   :  { %2638 = vmatpush.bf16.msrb.mxu3 %v11770_v25  ;;  %2598 = vmatpush.bf16.msrb.mxu0 %v11774_v5  ;;  %v12278_v25 = vor.u32 %v16266_v51, %v12277_v9  ;;  %v11671_v5 = vld [vmem:[#allocation4 + $0x248] sm:$0xf0]  ;;  %v16126_v9 = vld [vmem:[#allocation4 + $0x2b4] sm:$0xf]  ;;  %v11727_v51 = vld [vmem:[#allocation4 + $0x2b8] sm:$0xf0] }
 0x1aa   :  { %v11730_v52 = vor.u32 %v16126_v9, %v11727_v51  ;;  %v16208_v9 = vld [vmem:[#allocation2 + $0x7c4] sm:$0xf]  ;;  %v12055_v51 = vld [vmem:[#allocation2 + $0x7d0] sm:$0xf0] }
 0x1ab   :  { %2606 = vmatpush.bf16.msrb.mxu1 %v11690_v18  ;;  %v11650_v18 = vor.u32 %v16106_v56, %v11647_v14  ;;  %v16206_v56 = vld [vmem:[#allocation2 + $0x7ac] sm:$0xf0] }
 0x1ad   :  { %2599 = vmatpush.bf16.msrb.mxu0 %v11766_v12  ;;  %v16109_v12 = vld [vmem:[#allocation4 + $0x224] sm:$0xf0] }
 0x1af   :  { %2607 = vmatpush.bf16.msrb.mxu1 %v11682_v39 }
 0x1ef   :  { %v2033_v63 = vpop.f32.mrf.mxu2  ;;  %v2046_v21 = vpop.f32.mrf.mxu3 }
 0x1f0   :  { %v2034_v13 = vadd.f32 %v2033_v63, %v17485_v49  ;;  %v12309_v49 = vld [vmem:[#allocation2 + $0x9c0] sm:$0xf]  ;;  %v11661_v63 = vld [vmem:[#allocation4 + $0x230] sm:$0xf] }
 0x1f1   :  { %v12310_v40 = vor.u32 %v16274_v36, %v12309_v49  ;;  %v16105_v49 = vld [vmem:[#allocation4 + $0x204] sm:$0xf0]  ;;  %v11658_v36 = vor.u32 %v16108_v61, %v11655_v2  ;;  %v12149_v61 = vld [vmem:[#allocation2 + $0x880] sm:$0xf]  ;;  %v16234_v2 = vld [vmem:[#allocation2 + $0x88c] sm:$0xf0] }
 0x1f2   :  { %v2047_v32 = vadd.f32 %v2046_v21, %v2034_v13  ;;  %v16111_v21 = vld [vmem:[#allocation4 + $0x234] sm:$0xf0]  ;;  %v11674_v13 = vor.u32 %v16112_v3, %v11671_v5  ;;  %v12150_v42 = vor.u32 %v16234_v2, %v12149_v61  ;;  %v11893_v61 = vld [vmem:[#allocation2 + $0x680] sm:$0xf]  ;;  %v16170_v2 = vld [vmem:[#allocation2 + $0x68c] sm:$0xf0] }
 0x1f4   :  { %v2102_v24 = vmax.f32 %v2047_v32, 0.0  ;;  %v11663_v32 = vld [vmem:[#allocation4 + $0x238] sm:$0xf0]  ;;  %2608 = vmatpush.bf16.msrb.mxu1 %v11674_v13 }
 0x1f7   :  { %v2035_v11 = vpop.f32.mrf.mxu2  ;;  %v2048_v22 = vpop.f32.mrf.mxu3 }
 0x1f8   :  { %v11662_v11 = vor.u32 %v16111_v21, %v11661_v63  ;;  %v11653_v22 = vld [vmem:[#allocation4 + $0x220] sm:$0xf]  ;;  %v16120_v63 = vld [vmem:[#allocation4 + $0x284] sm:$0xf]  ;;  %v11703_v21 = vld [vmem:[#allocation4 + $0x288] sm:$0xf0] }
 0x1f9   :  { %v11706_v39 = vor.u32 %v16120_v63, %v11703_v21 }
 0x1ff   :  { %v2085_v16 = vpop.f32.mrf.mxu2  ;;  %v2098_v15 = vpop.f32.mrf.mxu3 }
 0x200   :  { %v2086_v19 = vadd.f32 %v2085_v16, %v17487_v0  ;;  %v11693_v0 = vld [vmem:[#allocation4 + $0x270] sm:$0xf]  ;;  %v12246_v16 = vor.u32 %v16258_v10, %v12245_v4 }
 0x201   :  { %v11694_v41 = vor.u32 %v16119_v37, %v11693_v0  ;;  %v16134_v37 = vld [vmem:[#allocation4 + $0x2f4] sm:$0xf] }
 0x202   :  { %v2099_v20 = vadd.f32 %v2098_v15, %v2086_v19  ;;  %v16110_v15 = vld [vmem:[#allocation4 + $0x234] sm:$0xf]  ;;  %v12229_v19 = vld [vmem:[#allocation2 + $0x920] sm:$0xf] }
 0x203   :  { %2566 = vmatpush.bf16.msra.mxu2 %v11694_v41  ;;  %v11762_v41 = vor.u32 %v16134_v37, %v11759_v38  ;;  %v16212_v38 = vld [vmem:[#allocation2 + $0x7e4] sm:$0xf] }
 0x204   :  { %v2103_v8 = vmax.f32 %v2099_v20, 0.0  ;;  %v16254_v20 = vld [vmem:[#allocation2 + $0x92c] sm:$0xf0] }
 0x206   :  { %v2104_v35 = vpack.c.bf16 %v2103_v8, %v2102_v24  ;;  %v11654_v24 = vor.u32 %v16109_v12, %v11653_v22  ;;  %v11645_v8 = vld [vmem:[#allocation4 + $0x210] sm:$0xf] }
 0x207   :  { %v2087_v23 = vpop.f32.mrf.mxu2  ;;  %v2100_v26 = vpop.f32.mrf.mxu3  ;;  %2567 = vmatpush.bf16.msra.mxu2 %v11686_v45  ;;  %v16130_v45 = vld [vmem:[#allocation4 + $0x2d4] sm:$0xf]  ;;  %v16246_v22 = vld [vmem:[#allocation2 + $0x8ec] sm:$0xf0] }
 0x208   :  { %v2142_v28 = vunpack.c.l.b16 %v2104_v35  ;;  %v2143_v29 = vunpack.c.h.b16 %v2104_v35  ;;  %v16107_v35 = vld [vmem:[#allocation4 + $0x214] sm:$0xf0]  ;;  %v11666_v23 = vor.u32 %v16110_v15, %v11663_v32  ;;  %v12230_v26 = vor.u32 %v16254_v20, %v12229_v19  ;;  %v12181_v32 = vld [vmem:[#allocation2 + $0x8c0] sm:$0xf]  ;;  %v16242_v19 = vld [vmem:[#allocation2 + $0x8cc] sm:$0xf0] }
 0x209   :  { %v11746_v47 = vor.u32 %v16130_v45, %v11743_v46  ;;  %v12053_v45 = vld [vmem:[#allocation2 + $0x7c0] sm:$0xf]  ;;  %v16210_v46 = vld [vmem:[#allocation2 + $0x7cc] sm:$0xf0] }
 0x20a   :  { %v17491_v30 = vpack.c.b16 %v2142_v28, %v2142_v28  ;;  %v2145_v31 = vpack.c.b16 %v2143_v29, %v2143_v29  ;;  %v12213_v28 = vld [vmem:[#allocation2 + $0x900] sm:$0xf]  ;;  %v16250_v29 = vld [vmem:[#allocation2 + $0x90c] sm:$0xf0]  ;;  %2609 = vmatpush.bf16.msrb.mxu1 %v11666_v23 }
 0x20b   :  { %2568 = vmatpush.bf16.msra.mxu2 %v11678_v54  ;;  %v12214_v0 = vor.u32 %v16250_v29, %v12213_v28  ;;  %v11719_v54 = vld [vmem:[#allocation4 + $0x2a8] sm:$0xf0]  ;;  %v16238_v23 = vld [vmem:[#allocation2 + $0x8ac] sm:$0xf0]  ;;  %v11941_v29 = vld [vmem:[#allocation2 + $0x6e0] sm:$0xf] }
 0x20c   :  { %2252 = vmatmul.bf16.vlgmr.msra.gmra.mxu0 %v17491_v30  ;;  %2265 = vmatmul.bf16.vlgmr.msra.gmra.mxu1 %v2145_v31  ;;  %v11722_v55 = vor.u32 %v16124_v53, %v11719_v54  ;;  %v16174_v53 = vld [vmem:[#allocation2 + $0x6ac] sm:$0xf0]  ;;  %v12058_v54 = vor.u32 %v16208_v9, %v12055_v51  ;;  %v12007_v51 = vld [vmem:[#allocation2 + $0x770] sm:$0xf0] }
 0x20d   :  { %2587 = vmatmul.bf16.vlgmr.msra.gmra.mxu3 %v17491_v30 }
 0x20e   :  { %3855 = vmatpush.bf16.msra.mxu3 %v12326_v34  ;;  %v11637_v34 = vld [vmem:[#allocation4 + $0x200] sm:$0xf]  ;;  %2610 = vmatpush.bf16.msrb.mxu1 %v11658_v36 }
 0x20f   :  { %2569 = vmatpush.bf16.msra.mxu2 %v11670_v62  ;;  %v11642_v62 = vor.u32 %v16104_v59, %v11639_v60  ;;  %v12117_v59 = vld [vmem:[#allocation2 + $0x840] sm:$0xf]  ;;  %v16226_v60 = vld [vmem:[#allocation2 + $0x84c] sm:$0xf0] }
 0x212   :  { %3856 = vmatpush.bf16.msra.mxu3 %v12310_v40  ;;  %v11638_v40 = vor.u32 %v16105_v49, %v11637_v34  ;;  %2611 = vmatpush.bf16.msrb.mxu1 %v11650_v18  ;;  %v12069_v34 = vld [vmem:[#allocation2 + $0x7e0] sm:$0xf] }
 0x213   :  { %2570 = vmatpush.bf16.msra.mxu2 %v11662_v11  ;;  %v12197_v11 = vld [vmem:[#allocation2 + $0x8e0] sm:$0xf] }
 0x214   :  { %v12198_v13 = vor.u32 %v16246_v22, %v12197_v11  ;;  %v16218_v11 = vld [vmem:[#allocation2 + $0x80c] sm:$0xf0]  ;;  %v16180_v22 = vld [vmem:[#allocation2 + $0x6e4] sm:$0xf] }
 0x216   :  { %3857 = vmatpush.bf16.msra.mxu3 %v12294_v48  ;;  %v11735_v48 = vld [vmem:[#allocation4 + $0x2c8] sm:$0xf0]  ;;  %2612 = vmatpush.bf16.msrb.mxu1 %v11642_v62 }
 0x217   :  { %2571 = vmatpush.bf16.msra.mxu2 %v11654_v24  ;;  %v11738_v50 = vor.u32 %v16128_v17, %v11735_v48  ;;  %v16230_v17 = vld [vmem:[#allocation2 + $0x86c] sm:$0xf0] }
 0x21a   :  { %3858 = vmatpush.bf16.msra.mxu3 %v12278_v25  ;;  %v16122_v25 = vld [vmem:[#allocation4 + $0x294] sm:$0xf] }
 0x21b   :  { %v11714_v58 = vor.u32 %v16122_v25, %v11711_v57  ;;  %v16204_v25 = vld [vmem:[#allocation2 + $0x7a4] sm:$0xf]  ;;  %v12039_v57 = vld [vmem:[#allocation2 + $0x7b0] sm:$0xf0] }
 0x21c   :  { %2600 = vmatmul.bf16.vlgmr.msrb.gmra.mxu0 %v2145_v31  ;;  %v12042_v21 = vor.u32 %v16204_v25, %v12039_v57  ;;  %v11863_v25 = vld [vmem:[#allocation2 + $0x650] sm:$0xf0] }
 0x21d   :  { %2639 = vmatmul.bf16.vlgmr.msrb.gmra.mxu3 %v2145_v31  ;;  %v11646_v31 = vor.u32 %v16107_v35, %v11645_v8  ;;  %v12182_v8 = vor.u32 %v16242_v19, %v12181_v32  ;;  %v12165_v35 = vld [vmem:[#allocation2 + $0x8a0] sm:$0xf]  ;;  %v16176_v19 = vld [vmem:[#allocation2 + $0x6c4] sm:$0xf] }
 0x21e   :  { %3859 = vmatpush.bf16.msra.mxu3 %v12262_v1  ;;  %v17166_v1 = vld [vmem:[#allocation9 + $0x6] ss:$0 sm:$0xff] }
 0x21f   :  { %2572 = vmatpush.bf16.msra.mxu2 %v11646_v31  ;;  %v16182_v31 = vld [vmem:[#allocation2 + $0x6ec] sm:$0xf0] }
 0x220   :  { %v11942_v36 = vor.u32 %v16182_v31, %v11941_v29  ;;  %v11894_v29 = vor.u32 %v16170_v2, %v11893_v61  ;;  %v16202_v31 = vld [vmem:[#allocation2 + $0x78c] sm:$0xf0]  ;;  %v11831_v61 = vld [vmem:[#allocation2 + $0x610] sm:$0xf0]  ;;  %v16184_v2 = vld [vmem:[#allocation2 + $0x704] sm:$0xf] }
 0x222   :  { %3860 = vmatpush.bf16.msra.mxu3 %v12246_v16  ;;  %3816 = vmatpush.bf16.msra.mxu0 %v11942_v36  ;;  %v11895_v36 = vld [vmem:[#allocation2 + $0x690] sm:$0xf0] }
 0x223   :  { %2573 = vmatpush.bf16.msra.mxu2 %v11638_v40  ;;  %v12071_v40 = vld [vmem:[#allocation2 + $0x7f0] sm:$0xf0] }
 0x224   :  { %v12074_v43 = vor.u32 %v16212_v38, %v12071_v40  ;;  %v16200_v38 = vld [vmem:[#allocation2 + $0x784] sm:$0xf]  ;;  %v12023_v40 = vld [vmem:[#allocation2 + $0x790] sm:$0xf0] }
 0x226   :  { %3861 = vmatpush.bf16.msra.mxu3 %v12230_v26  ;;  %v12166_v26 = vor.u32 %v16238_v23, %v12165_v35  ;;  %v11911_v35 = vld [vmem:[#allocation2 + $0x6b0] sm:$0xf0] }
 0x227   :  { %2618 = vmatpush.bf16.msrb.mxu2 %v11762_v41  ;;  %v11925_v41 = vld [vmem:[#allocation2 + $0x6c0] sm:$0xf] }
 0x22a   :  { %3862 = vmatpush.bf16.msra.mxu3 %v12214_v0  ;;  %v16214_v0 = vld [vmem:[#allocation2 + $0x7ec] sm:$0xf0] }
 0x22b   :  { %2619 = vmatpush.bf16.msrb.mxu2 %v11754_v44  ;;  %v12070_v37 = vor.u32 %v16214_v0, %v12069_v34  ;;  %v16178_v44 = vld [vmem:[#allocation2 + $0x6cc] sm:$0xf0]  ;;  %v16168_v34 = vld [vmem:[#allocation2 + $0x684] sm:$0xf] }
 0x22c   :  { %v11926_v48 = vor.u32 %v16178_v44, %v11925_v41  ;;  %v11877_v41 = vld [vmem:[#allocation2 + $0x660] sm:$0xf] }
 0x22d   :  { %3863 = vmatmul.bf16.vlgmr.msra.gmra.mxu3 %v17451_v7  ;;  %3829 = vmatpush.bf16.msra.mxu1 %v12070_v37  ;;  %v11898_v37 = vor.u32 %v16168_v34, %v11895_v36  ;;  %v12005_v44 = vld [vmem:[#allocation2 + $0x760] sm:$0xf]  ;;  %v16310_v36 = vld [vmem:[#allocation2 + $0xaec] sm:$0xf0] }
 0x22e   :  { %3907 = vmatpush.bf16.msrb.mxu3 %v12074_v43  ;;  %3817 = vmatpush.bf16.msra.mxu0 %v11926_v48  ;;  %v16166_v43 = vld [vmem:[#allocation2 + $0x66c] sm:$0xf0]  ;;  %v11879_v48 = vld [vmem:[#allocation2 + $0x670] sm:$0xf0]  ;;  %v12453_v34 = vld [vmem:[#allocation2 + $0xae0] sm:$0xf] }
 0x22f   :  { %2620 = vmatpush.bf16.msrb.mxu2 %v11746_v47  ;;  %v12133_v47 = vld [vmem:[#allocation2 + $0x860] sm:$0xf] }
 0x230   :  { %v12134_v14 = vor.u32 %v16230_v17, %v12133_v47  ;;  %v16164_v17 = vld [vmem:[#allocation2 + $0x664] sm:$0xf] }
 0x231   :  { %v11882_v9 = vor.u32 %v16164_v17, %v11879_v48  ;;  %v16306_v17 = vld [vmem:[#allocation2 + $0xacc] sm:$0xf0]  ;;  %v12565_v48 = vld [vmem:[#allocation2 + $0xbc0] sm:$0xf] }
 0x232   :  { %3908 = vmatpush.bf16.msrb.mxu3 %v12058_v54  ;;  %v16162_v54 = vld [vmem:[#allocation2 + $0x64c] sm:$0xf0] }
 0x233   :  { %2621 = vmatpush.bf16.msrb.mxu2 %v11738_v50  ;;  %v12054_v50 = vor.u32 %v16210_v46, %v12053_v45  ;;  %v16198_v45 = vld [vmem:[#allocation2 + $0x76c] sm:$0xf0]  ;;  %v11878_v46 = vor.u32 %v16166_v43, %v11877_v41  ;;  %v16340_v43 = vld [vmem:[#allocation2 + $0xbe4] sm:$0xf] }
 0x234   :  { %v12006_v47 = vor.u32 %v16198_v45, %v12005_v44  ;;  %v12583_v44 = vld [vmem:[#allocation2 + $0xbf0] sm:$0xf0] }
 0x235   :  { %3830 = vmatpush.bf16.msra.mxu1 %v12054_v50  ;;  %v16196_v50 = vld [vmem:[#allocation2 + $0x764] sm:$0xf] }
 0x236   :  { %3909 = vmatpush.bf16.msrb.mxu3 %v12042_v21  ;;  %v11845_v21 = vld [vmem:[#allocation2 + $0x620] sm:$0xf] }
 0x237   :  { %2622 = vmatpush.bf16.msrb.mxu2 %v11730_v52  ;;  %v11909_v52 = vld [vmem:[#allocation2 + $0x6a0] sm:$0xf] }
 0x238   :  { %v11910_v18 = vor.u32 %v16174_v53, %v11909_v52  ;;  %v12010_v52 = vor.u32 %v16196_v50, %v12007_v51  ;;  %v11861_v53 = vld [vmem:[#allocation2 + $0x640] sm:$0xf]  ;;  %v16304_v51 = vld [vmem:[#allocation2 + $0xac4] sm:$0xf] }
 0x23a   :  { %3818 = vmatpush.bf16.msra.mxu0 %v11910_v18  ;;  %v16160_v18 = vld [vmem:[#allocation2 + $0x644] sm:$0xf] }
 0x23b   :  { %2623 = vmatpush.bf16.msrb.mxu2 %v11722_v55  ;;  %v12037_v55 = vld [vmem:[#allocation2 + $0x7a0] sm:$0xf] }
 0x23c   :  { %v12038_v62 = vor.u32 %v16206_v56, %v12037_v55  ;;  %v11989_v55 = vld [vmem:[#allocation2 + $0x740] sm:$0xf]  ;;  %v11862_v56 = vor.u32 %v16162_v54, %v11861_v53 }
 0x23e   :  { %3831 = vmatpush.bf16.msra.mxu1 %v12038_v62  ;;  %3819 = vmatpush.bf16.msra.mxu0 %v11894_v29  ;;  %v11991_v62 = vld [vmem:[#allocation2 + $0x750] sm:$0xf0] }
 0x23f   :  { %2624 = vmatpush.bf16.msrb.mxu2 %v11714_v58 }
 0x242   :  { %3820 = vmatpush.bf16.msra.mxu0 %v11878_v46  ;;  %v12586_v46 = vor.u32 %v16340_v43, %v12583_v44  ;;  %v16322_v44 = vld [vmem:[#allocation2 + $0xb4c] sm:$0xf0] }
 0x243   :  { %2625 = vmatpush.bf16.msrb.mxu2 %v11706_v39  ;;  %v12118_v39 = vor.u32 %v16226_v60, %v12117_v59  ;;  %v11866_v59 = vor.u32 %v16160_v18, %v11863_v25  ;;  %v16192_v60 = vld [vmem:[#allocation2 + $0x744] sm:$0xf]  ;;  %v12421_v18 = vld [vmem:[#allocation2 + $0xaa0] sm:$0xf]  ;;  %v16302_v25 = vld [vmem:[#allocation2 + $0xaac] sm:$0xf0] }
 0x246   :  { %3821 = vmatpush.bf16.msra.mxu0 %v11862_v56  ;;  %v12567_v56 = vld [vmem:[#allocation2 + $0xbd0] sm:$0xf0] }
 0x289   :  { %v2253_v3 = vpop.f32.mrf.mxu0  ;;  %v2266_v5 = vpop.f32.mrf.mxu1 }
 0x28a   :  { %v2254_v4 = vadd.f32 %v17166_v1, %v2253_v3  ;;  %v12101_v1 = vld [vmem:[#allocation2 + $0x820] sm:$0xf]  ;;  %v16222_v3 = vld [vmem:[#allocation2 + $0x82c] sm:$0xf0] }
 0x28c   :  { %v2267_v10 = vadd.f32 %v2266_v5, %v2254_v4  ;;  %v12102_v5 = vor.u32 %v16222_v3, %v12101_v1  ;;  %v11973_v3 = vld [vmem:[#allocation2 + $0x720] sm:$0xf] }
 0x28e   :  { %v17496_v12 = vmax.f32 %v2267_v10, 0.0  ;;  %v12085_v10 = vld [vmem:[#allocation2 + $0x800] sm:$0xf] }
 0x290   :  { %v17498_v16 = vpop.f32.mrf.mxu3  ;;  %10077 = vrot.lane.b32.xlu1 %v17496_v12, %s17313_s0  ;;  %10069 = vrot.lane.b32.xlu0 %v17496_v12, %s17314_s17  ;;  %v2271_v15 = vpack.c.bf16 %v17496_v12, %v17496_v12 }
 0x291   :  { %v2255_v20 = vpop.f32.mrf.mxu0  ;;  %v2268_v24 = vpop.f32.mrf.mxu1 }
 0x292   :  { %2574 = vmatmul.bf16.vlgmr.msra.gmra.mxu2 %v2271_v15  ;;  %2613 = vmatmul.bf16.vlgmr.msrb.gmra.mxu1 %v2271_v15  ;;  %v12086_v15 = vor.u32 %v16218_v11, %v12085_v10  ;;  %v11927_v20 = vld [vmem:[#allocation2 + $0x6d0] sm:$0xf0]  ;;  %v16156_v10 = vld [vmem:[#allocation2 + $0x624] sm:$0xf] }
 0x293   :  { %3842 = vmatpush.bf16.msra.mxu2 %v12198_v13  ;;  %v11943_v13 = vld [vmem:[#allocation2 + $0x6f0] sm:$0xf0]  ;;  %v11930_v24 = vor.u32 %v16176_v19, %v11927_v20  ;;  %v16154_v19 = vld [vmem:[#allocation2 + $0x60c] sm:$0xf0] }
 0x294   :  { %v11946_v32 = vor.u32 %v16180_v22, %v11943_v13  ;;  %v11847_v11 = vld [vmem:[#allocation2 + $0x630] sm:$0xf0]  ;;  %v16188_v22 = vld [vmem:[#allocation2 + $0x724] sm:$0xf] }
 0x295   :  { %v11850_v13 = vor.u32 %v16156_v10, %v11847_v11  ;;  %v16298_v10 = vld [vmem:[#allocation2 + $0xa8c] sm:$0xf0]  ;;  %v12533_v11 = vld [vmem:[#allocation2 + $0xb80] sm:$0xf] }
 0x297   :  { %3843 = vmatpush.bf16.msra.mxu2 %v12182_v8  ;;  %v16172_v8 = vld [vmem:[#allocation2 + $0x6a4] sm:$0xf] }
 0x298   :  { %v2590_v28 = vpop.f32.mrf.mxu3  ;;  %10073 = vrot.lane.b32.xlu0 %v17496_v12, %s17306_s14  ;;  %v11914_v23 = vor.u32 %v16172_v8, %v11911_v35  ;;  %v11957_v8 = vld [vmem:[#allocation2 + $0x700] sm:$0xf]  ;;  %v16186_v35 = vld [vmem:[#allocation2 + $0x70c] sm:$0xf0] }
 0x299   :  { %v17506_v49 = vpop.f32.mrf.mxu0  ;;  %v12021_v28 = vld [vmem:[#allocation2 + $0x780] sm:$0xf] }
 0x29a   :  { %v12022_v0 = vor.u32 %v16202_v31, %v12021_v28  ;;  %v11959_v28 = vld [vmem:[#allocation2 + $0x710] sm:$0xf0] }
 0x29b   :  { %3844 = vmatpush.bf16.msra.mxu2 %v12166_v26  ;;  %v11962_v31 = vor.u32 %v16184_v2, %v11959_v28  ;;  %v16326_v28 = vld [vmem:[#allocation2 + $0xb6c] sm:$0xf0] }
 0x29c   :  { %3832 = vmatpush.bf16.msra.mxu1 %v12022_v0  ;;  %v12454_v0 = vor.u32 %v16310_v36, %v12453_v34 }
 0x29f   :  { %3845 = vmatpush.bf16.msra.mxu2 %v12150_v42  ;;  %v12026_v42 = vor.u32 %v16200_v38, %v12023_v40  ;;  %v16342_v38 = vld [vmem:[#allocation2 + $0xbec] sm:$0xf0]  ;;  %v16308_v40 = vld [vmem:[#allocation2 + $0xae4] sm:$0xf] }
 0x2a0   :  { %v17508_v58 = vpop.f32.mrf.mxu3  ;;  %3833 = vmatpush.bf16.msra.mxu1 %v12006_v47  ;;  %v12437_v47 = vld [vmem:[#allocation2 + $0xac0] sm:$0xf] }
 0x2a1   :  { %v2603_v63 = vpop.f32.mrf.mxu0  ;;  %3910 = vmatpush.bf16.msrb.mxu3 %v12026_v42  ;;  %v12455_v42 = vld [vmem:[#allocation2 + $0xaf0] sm:$0xf0]  ;;  %v12438_v50 = vor.u32 %v16306_v17, %v12437_v47 }
 0x2a2   :  { %2626 = vmatmul.bf16.vlgmr.msrb.gmra.mxu2 %v17491_v30  ;;  %v11994_v63 = vor.u32 %v16192_v60, %v11991_v62  ;;  %v12458_v45 = vor.u32 %v16308_v40, %v12455_v42  ;;  %v16334_v60 = vld [vmem:[#allocation2 + $0xbac] sm:$0xf0]  ;;  %v16300_v62 = vld [vmem:[#allocation2 + $0xaa4] sm:$0xf]  ;;  %v12373_v40 = vld [vmem:[#allocation2 + $0xa40] sm:$0xf] }
 0x2a3   :  { %3846 = vmatpush.bf16.msra.mxu2 %v12134_v14  ;;  %v16194_v14 = vld [vmem:[#allocation2 + $0x74c] sm:$0xf0]  ;;  %v12501_v42 = vld [vmem:[#allocation2 + $0xb40] sm:$0xf] }
 0x2a4   :  { %v11990_v57 = vor.u32 %v16194_v14, %v11989_v55  ;;  %v16336_v55 = vld [vmem:[#allocation2 + $0xbc4] sm:$0xf]  ;;  %v12502_v47 = vor.u32 %v16322_v44, %v12501_v42  ;;  %v12327_v42 = vld [vmem:[#allocation2 + $0x9f0] sm:$0xf0] }
 0x2a5   :  { %3911 = vmatpush.bf16.msrb.mxu3 %v12010_v52  ;;  %v12439_v52 = vld [vmem:[#allocation2 + $0xad0] sm:$0xf0]  ;;  %v12570_v14 = vor.u32 %v16336_v55, %v12567_v56  ;;  %v16318_v55 = vld [vmem:[#allocation2 + $0xb2c] sm:$0xf0]  ;;  %v16284_v56 = vld [vmem:[#allocation2 + $0xa24] sm:$0xf] }
 0x2a6   :  { %3834 = vmatpush.bf16.msra.mxu1 %v11990_v57  ;;  %v12442_v54 = vor.u32 %v16304_v51, %v12439_v52  ;;  %v12549_v57 = vld [vmem:[#allocation2 + $0xba0] sm:$0xf]  ;;  %v16286_v52 = vld [vmem:[#allocation2 + $0xa2c] sm:$0xf0] }
 0x2a7   :  { %3847 = vmatpush.bf16.msra.mxu2 %v12118_v39  ;;  %v16158_v39 = vld [vmem:[#allocation2 + $0x62c] sm:$0xf0]  ;;  %v12357_v51 = vld [vmem:[#allocation2 + $0xa20] sm:$0xf] }
 0x2a8   :  { %v2642_v4 = vpop.f32.mrf.mxu3  ;;  %v11846_v1 = vor.u32 %v16158_v39, %v11845_v21  ;;  %v12550_v21 = vor.u32 %v16334_v60, %v12549_v57  ;;  %v16316_v57 = vld [vmem:[#allocation2 + $0xb24] sm:$0xf] }
 0x2a9   :  { %3912 = vmatpush.bf16.msrb.mxu3 %v11994_v63  ;;  %v12423_v63 = vld [vmem:[#allocation2 + $0xab0] sm:$0xf0] }
 0x2aa   :  { %3822 = vmatpush.bf16.msra.mxu0 %v11846_v1  ;;  %v12426_v39 = vor.u32 %v16300_v62, %v12423_v63  ;;  %v16332_v1 = vld [vmem:[#allocation2 + $0xba4] sm:$0xf]  ;;  %v12341_v62 = vld [vmem:[#allocation2 + $0xa00] sm:$0xf]  ;;  %v16282_v63 = vld [vmem:[#allocation2 + $0xa0c] sm:$0xf0] }
 0x2ab   :  { %3848 = vmatpush.bf16.msra.mxu2 %v12102_v5  ;;  %v16190_v5 = vld [vmem:[#allocation2 + $0x72c] sm:$0xf0] }
 0x2ac   :  { %v11974_v4 = vor.u32 %v16190_v5, %v11973_v3  ;;  %v12551_v3 = vld [vmem:[#allocation2 + $0xbb0] sm:$0xf0]  ;;  %v12405_v5 = vld [vmem:[#allocation2 + $0xa80] sm:$0xf] }
 0x2ae   :  { %3835 = vmatpush.bf16.msra.mxu1 %v11974_v4  ;;  %v12554_v4 = vor.u32 %v16332_v1, %v12551_v3  ;;  %v12342_v1 = vor.u32 %v16282_v63, %v12341_v62  ;;  %v16314_v3 = vld [vmem:[#allocation2 + $0xb0c] sm:$0xf0] }
 0x2af   :  { %3849 = vmatpush.bf16.msra.mxu2 %v12086_v15  ;;  %v11975_v15 = vld [vmem:[#allocation2 + $0x730] sm:$0xf0] }
 0x2b0   :  { %v17511_v30 = vpop.f32.mrf.mxu3  ;;  %v11978_v20 = vor.u32 %v16188_v22, %v11975_v15  ;;  %v16330_v22 = vld [vmem:[#allocation2 + $0xb8c] sm:$0xf0]  ;;  %v16296_v15 = vld [vmem:[#allocation2 + $0xa84] sm:$0xf] }
 0x2b2   :  { %3850 = vmatmul.bf16.vlgmr.msra.gmra.mxu2 %v17449_v6  ;;  %3913 = vmatpush.bf16.msrb.mxu3 %v11978_v20  ;;  %v12534_v20 = vor.u32 %v16330_v22, %v12533_v11  ;;  %v16312_v11 = vld [vmem:[#allocation2 + $0xb04] sm:$0xf]  ;;  %v12471_v22 = vld [vmem:[#allocation2 + $0xb10] sm:$0xf0] }
 0x2b3   :  { %3894 = vmatpush.bf16.msrb.mxu2 %v11946_v32  ;;  %v11829_v32 = vld [vmem:[#allocation2 + $0x600] sm:$0xf] }
 0x2b6   :  { %3914 = vmatpush.bf16.msrb.mxu3 %v11962_v31  ;;  %v12391_v31 = vld [vmem:[#allocation2 + $0xa70] sm:$0xf0] }
 0x2b7   :  { %3895 = vmatpush.bf16.msrb.mxu2 %v11930_v24  ;;  %v11830_v24 = vor.u32 %v16154_v19, %v11829_v32  ;;  %v12407_v32 = vld [vmem:[#allocation2 + $0xa90] sm:$0xf0]  ;;  %v16328_v19 = vld [vmem:[#allocation2 + $0xb84] sm:$0xf] }
 0x2b8   :  { %v3866_v26 = vpop.f32.mrf.mxu3 }
 0x2b9   :  { %v11958_v26 = vor.u32 %v16186_v35, %v11957_v8  ;;  %3823 = vmatpush.bf16.msra.mxu0 %v11830_v24  ;;  %v12535_v24 = vld [vmem:[#allocation2 + $0xb90] sm:$0xf0]  ;;  %v12410_v8 = vor.u32 %v16296_v15, %v12407_v32  ;;  %v12474_v15 = vor.u32 %v16312_v11, %v12471_v22 }
 0x2ba   :  { %3959 = vmatpush.bf16.msra.mxu3 %v12586_v46  ;;  %v12538_v35 = vor.u32 %v16328_v19, %v12535_v24  ;;  %v12375_v46 = vld [vmem:[#allocation2 + $0xa50] sm:$0xf0] }
 0x2bb   :  { %3896 = vmatpush.bf16.msrb.mxu2 %v11914_v23  ;;  %v16152_v23 = vld [vmem:[#allocation2 + $0x604] sm:$0xf]  ;;  %3836 = vmatpush.bf16.msra.mxu1 %v11958_v26  ;;  %v16294_v26 = vld [vmem:[#allocation2 + $0xa6c] sm:$0xf0] }
 0x2bc   :  { %v11834_v29 = vor.u32 %v16152_v23, %v11831_v61  ;;  %v12389_v23 = vld [vmem:[#allocation2 + $0xa60] sm:$0xf] }
 0x2bd   :  { %3868 = vmatpush.bf16.msrb.mxu0 %v12454_v0  ;;  %v12517_v61 = vld [vmem:[#allocation2 + $0xb60] sm:$0xf]  ;;  %v12390_v2 = vor.u32 %v16294_v26, %v12389_v23  ;;  %v16324_v0 = vld [vmem:[#allocation2 + $0xb64] sm:$0xf] }
 0x2be   :  { %3960 = vmatpush.bf16.msra.mxu3 %v12570_v14  ;;  %v12518_v34 = vor.u32 %v16326_v28, %v12517_v61  ;;  %v12359_v14 = vld [vmem:[#allocation2 + $0xa30] sm:$0xf0] }
 0x2bf   :  { %3897 = vmatpush.bf16.msrb.mxu2 %v11898_v37  ;;  %v12581_v37 = vld [vmem:[#allocation2 + $0xbe0] sm:$0xf] }
 0x2c0   :  { %v12582_v41 = vor.u32 %v16342_v38, %v12581_v37  ;;  %v12519_v37 = vld [vmem:[#allocation2 + $0xb70] sm:$0xf0] }
 0x2c1   :  { %3869 = vmatpush.bf16.msrb.mxu0 %v12438_v50  ;;  %v12522_v38 = vor.u32 %v16324_v0, %v12519_v37  ;;  %v12503_v50 = vld [vmem:[#allocation2 + $0xb50] sm:$0xf0]  ;;  %v16244_v37 = vld [vmem:[#allocation2 + $0x8e4] sm:$0xf] }
 0x2c2   :  { %3881 = vmatpush.bf16.msrb.mxu1 %v12582_v41  ;;  %3961 = vmatpush.bf16.msra.mxu3 %v12554_v4  ;;  %v16290_v41 = vld [vmem:[#allocation2 + $0xa4c] sm:$0xf0]  ;;  %v12343_v4 = vld [vmem:[#allocation2 + $0xa10] sm:$0xf0] }
 0x2c3   :  { %3898 = vmatpush.bf16.msrb.mxu2 %v11882_v9  ;;  %v16338_v9 = vld [vmem:[#allocation2 + $0xbcc] sm:$0xf0]  ;;  %v12374_v43 = vor.u32 %v16290_v41, %v12373_v40  ;;  %v16276_v41 = vld [vmem:[#allocation2 + $0x9e4] sm:$0xf] }
 0x2c4   :  { %v12566_v53 = vor.u32 %v16338_v9, %v12565_v48  ;;  %v16320_v48 = vld [vmem:[#allocation2 + $0xb44] sm:$0xf] }
 0x2c5   :  { %v12506_v9 = vor.u32 %v16320_v48, %v12503_v50  ;;  %v16240_v50 = vld [vmem:[#allocation2 + $0x8c4] sm:$0xf] }
 0x2c6   :  { %3882 = vmatpush.bf16.msrb.mxu1 %v12566_v53  ;;  %3962 = vmatpush.bf16.msra.mxu3 %v12538_v35  ;;  %v12485_v53 = vld [vmem:[#allocation2 + $0xb20] sm:$0xf] }
 0x2c7   :  { %3899 = vmatpush.bf16.msrb.mxu2 %v11866_v59  ;;  %v12422_v59 = vor.u32 %v16302_v25, %v12421_v18  ;;  %v12486_v18 = vor.u32 %v16318_v55, %v12485_v53  ;;  %v12362_v25 = vor.u32 %v16284_v56, %v12359_v14  ;;  %v16272_v53 = vld [vmem:[#allocation2 + $0x9c4] sm:$0xf]  ;;  %v12189_v55 = vld [vmem:[#allocation2 + $0x8c8] sm:$0xf]  ;;  %v16243_v56 = vld [vmem:[#allocation2 + $0x8d4] sm:$0xf0] }
 0x2c8   :  { %v12317_v14 = vld [vmem:[#allocation2 + $0x9c8] sm:$0xf]  ;;  %v12190_v63 = vor.u32 %v16243_v56, %v12189_v55  ;;  %v16220_v55 = vld [vmem:[#allocation2 + $0x824] sm:$0xf]  ;;  %v12103_v56 = vld [vmem:[#allocation2 + $0x830] sm:$0xf0] }
 0x2c9   :  { %3870 = vmatpush.bf16.msrb.mxu0 %v12422_v59  ;;  %v12487_v59 = vld [vmem:[#allocation2 + $0xb30] sm:$0xf0] }
 0x2ca   :  { %3883 = vmatpush.bf16.msrb.mxu1 %v12550_v21  ;;  %3963 = vmatpush.bf16.msra.mxu3 %v12522_v38  ;;  %v12490_v60 = vor.u32 %v16316_v57, %v12487_v59  ;;  %v12469_v21 = vld [vmem:[#allocation2 + $0xb00] sm:$0xf]  ;;  %v12199_v38 = vld [vmem:[#allocation2 + $0x8f0] sm:$0xf0]  ;;  %v16236_v59 = vld [vmem:[#allocation2 + $0x8a4] sm:$0xf] }
 0x2cb   :  { %3900 = vmatpush.bf16.msrb.mxu2 %v11850_v13  ;;  %v12406_v13 = vor.u32 %v16298_v10, %v12405_v5  ;;  %v16280_v5 = vld [vmem:[#allocation2 + $0xa04] sm:$0xf]  ;;  %v12470_v10 = vor.u32 %v16314_v3, %v12469_v21  ;;  %v12202_v48 = vor.u32 %v16244_v37, %v12199_v38  ;;  %v12173_v3 = vld [vmem:[#allocation2 + $0x8a8] sm:$0xf]  ;;  %v12263_v37 = vld [vmem:[#allocation2 + $0x970] sm:$0xf0] }
 0x2cc   :  { %v12141_v38 = vld [vmem:[#allocation2 + $0x868] sm:$0xf] }
 0x2cd   :  { %3871 = vmatpush.bf16.msrb.mxu0 %v12406_v13  ;;  %v12346_v13 = vor.u32 %v16280_v5, %v12343_v4  ;;  %v16239_v5 = vld [vmem:[#allocation2 + $0x8b4] sm:$0xf0]  ;;  %v12301_v4 = vld [vmem:[#allocation2 + $0x9a8] sm:$0xf] }
 0x2ce   :  { %3884 = vmatpush.bf16.msrb.mxu1 %v12534_v20  ;;  %3964 = vmatpush.bf16.msra.mxu3 %v12506_v9  ;;  %v2320_v20 = vld [vmem:[#allocation9 + $0x7] sm:$0x3]  ;;  %v12183_v9 = vld [vmem:[#allocation2 + $0x8d0] sm:$0xf0] }
 0x2cf   :  { %3901 = vmatpush.bf16.msrb.mxu2 %v11834_v29  ;;  %v16292_v29 = vld [vmem:[#allocation2 + $0xa64] sm:$0xf]  ;;  %v2322_v24 = vperm.slane %v2320_v20, 0  ;;  %v2323_v23 = vperm.slane %v2320_v20, 1 }
 0x2d0   :  { %v12394_v36 = vor.u32 %v16292_v29, %v12391_v31  ;;  %v16264_v20 = vld [vmem:[#allocation2 + $0x984] sm:$0xf] }
 0x2d1   :  { %3872 = vmatpush.bf16.msrb.mxu0 %v12390_v2 }
 0x2d2   :  { %3885 = vmatpush.bf16.msrb.mxu1 %v12518_v34  ;;  %3965 = vmatpush.bf16.msra.mxu3 %v12490_v60  ;;  %v12167_v60 = vld [vmem:[#allocation2 + $0x8b0] sm:$0xf0] }
 0x2d3   :  { %3946 = vmatpush.bf16.msra.mxu2 %v12458_v45  ;;  %v16288_v45 = vld [vmem:[#allocation2 + $0xa44] sm:$0xf]  ;;  %v12170_v11 = vor.u32 %v16236_v59, %v12167_v60  ;;  %v12109_v59 = vld [vmem:[#allocation2 + $0x828] sm:$0xf]  ;;  %v16223_v60 = vld [vmem:[#allocation2 + $0x834] sm:$0xf0] }
 0x2d4   :  { %v12378_v17 = vor.u32 %v16288_v45, %v12375_v46  ;;  %v16247_v46 = vld [vmem:[#allocation2 + $0x8f4] sm:$0xf0] }
 0x2d5   :  { %3873 = vmatpush.bf16.msrb.mxu0 %v12374_v43  ;;  %v12205_v43 = vld [vmem:[#allocation2 + $0x8e8] sm:$0xf] }
 0x2d6   :  { %3886 = vmatpush.bf16.msrb.mxu1 %v12502_v47  ;;  %3966 = vmatpush.bf16.msra.mxu3 %v12474_v15  ;;  %v16279_v47 = vld [vmem:[#allocation2 + $0x9f4] sm:$0xf0]  ;;  %v12151_v15 = vld [vmem:[#allocation2 + $0x890] sm:$0xf0] }
 0x2d7   :  { %3947 = vmatpush.bf16.msra.mxu2 %v12442_v54  ;;  %v12358_v54 = vor.u32 %v16286_v52, %v12357_v51  ;;  %v12206_v51 = vor.u32 %v16247_v46, %v12205_v43  ;;  %v12119_v46 = vld [vmem:[#allocation2 + $0x850] sm:$0xf0] }
 0x2d9   :  { %3874 = vmatpush.bf16.msrb.mxu0 %v12358_v54  ;;  %v12311_v54 = vld [vmem:[#allocation2 + $0x9d0] sm:$0xf0] }
 0x2da   :  { %3887 = vmatpush.bf16.msrb.mxu1 %v12486_v18  ;;  %v16275_v18 = vld [vmem:[#allocation2 + $0x9d4] sm:$0xf0]  ;;  %v12314_v57 = vor.u32 %v16272_v53, %v12311_v54 }
 0x2db   :  { %3948 = vmatpush.bf16.msra.mxu2 %v12426_v39  ;;  %v12318_v21 = vor.u32 %v16275_v18, %v12317_v14 }
 0x2dd   :  { %3875 = vmatpush.bf16.msrb.mxu0 %v12342_v1  ;;  %v12295_v1 = vld [vmem:[#allocation2 + $0x9b0] sm:$0xf0] }
 0x2de   :  { %3888 = vmatpush.bf16.msrb.mxu1 %v12470_v10  ;;  %v16271_v10 = vld [vmem:[#allocation2 + $0x9b4] sm:$0xf0] }
 0x2df   :  { %3949 = vmatpush.bf16.msra.mxu2 %v12410_v8 }
 0x2e3   :  { %3950 = vmatpush.bf16.msra.mxu2 %v12394_v36 }
 0x2e7   :  { %3951 = vmatpush.bf16.msra.mxu2 %v12378_v17 }
 0x2eb   :  { %3952 = vmatpush.bf16.msra.mxu2 %v12362_v25  ;;  %v12186_v25 = vor.u32 %v16240_v50, %v12183_v9  ;;  %v12125_v50 = vld [vmem:[#allocation2 + $0x848] sm:$0xf]  ;;  %v16227_v9 = vld [vmem:[#allocation2 + $0x854] sm:$0xf0] }
 0x2ec   :  { %v12126_v14 = vor.u32 %v16227_v9, %v12125_v50  ;;  %v16175_v50 = vld [vmem:[#allocation2 + $0x6b4] sm:$0xf0] }
 0x2ef   :  { %3953 = vmatpush.bf16.msra.mxu2 %v12346_v13  ;;  %v16232_v13 = vld [vmem:[#allocation2 + $0x884] sm:$0xf] }
 0x30f   :  { %v2614_v39 = vpop.f32.mrf.mxu1 }
 0x310   :  { %v2615_v61 = vadd.f32 %v2614_v39, %v2323_v23  ;;  %v16268_v39 = vld [vmem:[#allocation2 + $0x9a4] sm:$0xf]  ;;  %v12285_v23 = vld [vmem:[#allocation2 + $0x988] sm:$0xf] }
 0x311   :  { %v12298_v22 = vor.u32 %v16268_v39, %v12295_v1  ;;  %v16216_v39 = vld [vmem:[#allocation2 + $0x804] sm:$0xf]  ;;  %v12106_v1 = vor.u32 %v16220_v55, %v12103_v56  ;;  %v11919_v55 = vld [vmem:[#allocation2 + $0x6b8] sm:$0xf0]  ;;  %v16205_v56 = vld [vmem:[#allocation2 + $0x7ac] sm:$0xf] }
 0x315   :  { %v2575_v32 = vpop.f32.mrf.mxu2 }
 0x316   :  { %v2576_v35 = vadd.f32 %v2575_v32, %v2322_v24  ;;  %v12174_v32 = vor.u32 %v16239_v5, %v12173_v3  ;;  %v12279_v24 = vld [vmem:[#allocation2 + $0x990] sm:$0xf0] }
 0x317   :  { %v2616_v19 = vpop.f32.mrf.mxu1  ;;  %v12087_v5 = vld [vmem:[#allocation2 + $0x810] sm:$0xf0] }
 0x318   :  { %v2589_v26 = vadd.f32 %v17498_v16, %v2576_v35  ;;  %v12333_v16 = vld [vmem:[#allocation2 + $0x9e8] sm:$0xf]  ;;  %v12302_v19 = vor.u32 %v16271_v10, %v12301_v4  ;;  %v16235_v35 = vld [vmem:[#allocation2 + $0x894] sm:$0xf0]  ;;  %v16248_v4 = vld [vmem:[#allocation2 + $0x904] sm:$0xf] }
 0x319   :  { %v12334_v52 = vor.u32 %v16279_v47, %v12333_v16  ;;  %v12215_v10 = vld [vmem:[#allocation2 + $0x910] sm:$0xf0] }
 0x31a   :  { %v2602_v28 = vadd.f32 %v17506_v49, %v2589_v26  ;;  %v16267_v26 = vld [vmem:[#allocation2 + $0x994] sm:$0xf0] }
 0x31c   :  { %v2644_v34 = vmax.f32 %v2602_v28, 0.0  ;;  %v16228_v28 = vld [vmem:[#allocation2 + $0x864] sm:$0xf] }
 0x31d   :  { %v2577_v8 = vpop.f32.mrf.mxu2 }
 0x31e   :  { %v12157_v8 = vld [vmem:[#allocation2 + $0x888] sm:$0xf] }
 0x325   :  { %v2627_v2 = vpop.f32.mrf.mxu2 }
 0x326   :  { %v2628_v29 = vadd.f32 %v2627_v2, %v2615_v61  ;;  %v12154_v61 = vor.u32 %v16232_v13, %v12151_v15  ;;  %v12282_v2 = vor.u32 %v16264_v20, %v12279_v24  ;;  %v12093_v13 = vld [vmem:[#allocation2 + $0x808] sm:$0xf]  ;;  %v16219_v15 = vld [vmem:[#allocation2 + $0x814] sm:$0xf0] }
 0x327   :  { %v11949_v20 = vld [vmem:[#allocation2 + $0x6e8] sm:$0xf]  ;;  %v16183_v24 = vld [vmem:[#allocation2 + $0x6f4] sm:$0xf0] }
 0x328   :  { %v2641_v31 = vadd.f32 %v17508_v58, %v2628_v29  ;;  %v12330_v58 = vor.u32 %v16276_v41, %v12327_v42  ;;  %v12135_v29 = vld [vmem:[#allocation2 + $0x870] sm:$0xf0]  ;;  %v12269_v41 = vld [vmem:[#allocation2 + $0x968] sm:$0xf]  ;;  %v16263_v42 = vld [vmem:[#allocation2 + $0x974] sm:$0xf0] }
 0x329   :  { %v12138_v43 = vor.u32 %v16228_v28, %v12135_v29  ;;  %v12270_v47 = vor.u32 %v16263_v42, %v12269_v41  ;;  %v16213_v28 = vld [vmem:[#allocation2 + $0x7ec] sm:$0xf]  ;;  %v12079_v29 = vld [vmem:[#allocation2 + $0x7f8] sm:$0xf0]  ;;  %v12061_v42 = vld [vmem:[#allocation2 + $0x7c8] sm:$0xf] }
 0x32a   :  { %v2645_v36 = vmax.f32 %v2641_v31, 0.0  ;;  %v12082_v41 = vor.u32 %v16213_v28, %v12079_v29  ;;  %v16163_v28 = vld [vmem:[#allocation2 + $0x654] sm:$0xf0] }
 0x32c   :  { %v2646_v0 = vpack.c.bf16 %v2645_v36, %v2644_v34  ;;  %v12158_v34 = vor.u32 %v16235_v35, %v12157_v8  ;;  %v12286_v36 = vor.u32 %v16267_v26, %v12285_v23  ;;  %v12077_v8 = vld [vmem:[#allocation2 + $0x7e8] sm:$0xf]  ;;  %v16215_v35 = vld [vmem:[#allocation2 + $0x7f4] sm:$0xf0]  ;;  %v16181_v23 = vld [vmem:[#allocation2 + $0x6ec] sm:$0xf]  ;;  %v12090_v26 = vor.u32 %v16216_v39, %v12087_v5 }
 0x32d   :  { %v2629_v40 = vpop.f32.mrf.mxu2  ;;  %v16203_v39 = vld [vmem:[#allocation2 + $0x794] sm:$0xf0]  ;;  %v16201_v5 = vld [vmem:[#allocation2 + $0x78c] sm:$0xf] }
 0x32e   :  { %v2648_v44 = vunpack.c.l.b16 %v2646_v0  ;;  %v2649_v45 = vunpack.c.h.b16 %v2646_v0  ;;  %v16260_v0 = vld [vmem:[#allocation2 + $0x964] sm:$0xf]  ;;  %v16231_v40 = vld [vmem:[#allocation2 + $0x874] sm:$0xf0] }
 0x32f   :  { %v12142_v16 = vor.u32 %v16231_v40, %v12141_v38  ;;  %v16179_v38 = vld [vmem:[#allocation2 + $0x6d4] sm:$0xf0] }
 0x330   :  { %v17517_v17 = vpack.c.b16 %v2648_v44, %v2648_v44  ;;  %v17519_v49 = vpack.c.b16 %v2649_v45, %v2649_v45  ;;  %v12266_v44 = vor.u32 %v16260_v0, %v12263_v37  ;;  %v16224_v45 = vld [vmem:[#allocation2 + $0x844] sm:$0xf]  ;;  %v12078_v0 = vor.u32 %v16215_v35, %v12077_v8  ;;  %v11933_v37 = vld [vmem:[#allocation2 + $0x6c8] sm:$0xf]  ;;  %v11887_v8 = vld [vmem:[#allocation2 + $0x678] sm:$0xf0] }
 0x331   :  { %v12122_v53 = vor.u32 %v16224_v45, %v12119_v46  ;;  %v11935_v45 = vld [vmem:[#allocation2 + $0x6d8] sm:$0xf0]  ;;  %v16209_v46 = vld [vmem:[#allocation2 + $0x7cc] sm:$0xf] }
 0x332   :  { %3824 = vmatmul.bf16.vlgmr.msra.gmra.mxu0 %v17517_v17  ;;  %3837 = vmatmul.bf16.vlgmr.msra.gmra.mxu1 %v17519_v49  ;;  %v16197_v35 = vld [vmem:[#allocation2 + $0x76c] sm:$0xf] }
 0x333   :  { %3902 = vmatmul.bf16.vlgmr.msrb.gmra.mxu2 %v17517_v17  ;;  %3915 = vmatmul.bf16.vlgmr.msrb.gmra.mxu3 %v17519_v49 }
 0x334   :  { %3920 = vmatpush.bf16.msra.mxu0 %v12202_v48  ;;  %3933 = vmatpush.bf16.msra.mxu1 %v12330_v58  ;;  %v16256_v48 = vld [vmem:[#allocation2 + $0x944] sm:$0xf]  ;;  %v12247_v58 = vld [vmem:[#allocation2 + $0x950] sm:$0xf0] }
 0x335   :  { %3998 = vmatpush.bf16.msrb.mxu2 %v12206_v51  ;;  %4011 = vmatpush.bf16.msrb.mxu3 %v12334_v52  ;;  %v17525_v62 = vpop.f32.mrf.mxu2  ;;  %v12253_v51 = vld [vmem:[#allocation2 + $0x948] sm:$0xf]  ;;  %v16259_v52 = vld [vmem:[#allocation2 + $0x954] sm:$0xf0]  ;;  %v12250_v54 = vor.u32 %v16256_v48, %v12247_v58 }
 0x336   :  { %v12254_v18 = vor.u32 %v16259_v52, %v12253_v51  ;;  %v11917_v58 = vld [vmem:[#allocation2 + $0x6a8] sm:$0xf] }
 0x337   :  { %v12045_v52 = vld [vmem:[#allocation2 + $0x7a8] sm:$0xf] }
 0x338   :  { %3921 = vmatpush.bf16.msra.mxu0 %v12186_v25  ;;  %3934 = vmatpush.bf16.msra.mxu1 %v12314_v57  ;;  %v16252_v25 = vld [vmem:[#allocation2 + $0x924] sm:$0xf]  ;;  %v12231_v57 = vld [vmem:[#allocation2 + $0x930] sm:$0xf0] }
 0x339   :  { %3999 = vmatpush.bf16.msrb.mxu2 %v12190_v63  ;;  %4012 = vmatpush.bf16.msrb.mxu3 %v12318_v21  ;;  %v12237_v63 = vld [vmem:[#allocation2 + $0x928] sm:$0xf]  ;;  %v16255_v21 = vld [vmem:[#allocation2 + $0x934] sm:$0xf0]  ;;  %v12234_v3 = vor.u32 %v16252_v25, %v12231_v57 }
 0x33a   :  { %v11901_v57 = vld [vmem:[#allocation2 + $0x688] sm:$0xf] }
 0x33c   :  { %3922 = vmatpush.bf16.msra.mxu0 %v12170_v11  ;;  %3935 = vmatpush.bf16.msra.mxu1 %v12298_v22  ;;  %v12110_v11 = vor.u32 %v16223_v60, %v12109_v59  ;;  %v12238_v22 = vor.u32 %v16255_v21, %v12237_v63  ;;  %v16171_v59 = vld [vmem:[#allocation2 + $0x694] sm:$0xf0]  ;;  %v12029_v21 = vld [vmem:[#allocation2 + $0x788] sm:$0xf] }
 0x33d   :  { %4000 = vmatpush.bf16.msrb.mxu2 %v12174_v32  ;;  %4013 = vmatpush.bf16.msrb.mxu3 %v12302_v19  ;;  %v3853_v31 = vpop.f32.mrf.mxu2  ;;  %v12221_v32 = vld [vmem:[#allocation2 + $0x908] sm:$0xf]  ;;  %v16251_v19 = vld [vmem:[#allocation2 + $0x914] sm:$0xf0] }
 0x33e   :  { %v12094_v31 = vor.u32 %v16219_v15, %v12093_v13  ;;  %v16167_v13 = vld [vmem:[#allocation2 + $0x674] sm:$0xf0] }
 0x340   :  { %3923 = vmatpush.bf16.msra.mxu0 %v12154_v61  ;;  %3936 = vmatpush.bf16.msra.mxu1 %v12282_v2  ;;  %v12218_v61 = vor.u32 %v16248_v4, %v12215_v10  ;;  %v11951_v2 = vld [vmem:[#allocation2 + $0x6f8] sm:$0xf0]  ;;  %v11902_v10 = vor.u32 %v16171_v59, %v11901_v57  ;;  %v16185_v59 = vld [vmem:[#allocation2 + $0x70c] sm:$0xf] }
 0x341   :  { %4001 = vmatpush.bf16.msrb.mxu2 %v12158_v34  ;;  %4014 = vmatpush.bf16.msrb.mxu3 %v12286_v36  ;;  %v12222_v34 = vor.u32 %v16251_v19, %v12221_v32  ;;  %v11950_v36 = vor.u32 %v16183_v24, %v11949_v20  ;;  %v11954_v40 = vor.u32 %v16181_v23, %v11951_v2  ;;  %v12031_v4 = vld [vmem:[#allocation2 + $0x798] sm:$0xf0]  ;;  %v12013_v19 = vld [vmem:[#allocation2 + $0x768] sm:$0xf]  ;;  %v16199_v20 = vld [vmem:[#allocation2 + $0x774] sm:$0xf0] }
 0x342   :  { %3876 = vmatmul.bf16.vlgmr.msrb.gmra.mxu0 %v17477_v33  ;;  %3889 = vmatmul.bf16.vlgmr.msrb.gmra.mxu1 %v17479_v27  ;;  %v12034_v32 = vor.u32 %v16201_v5, %v12031_v4  ;;  %v16165_v24 = vld [vmem:[#allocation2 + $0x66c] sm:$0xf]  ;;  %v12015_v23 = vld [vmem:[#allocation2 + $0x778] sm:$0xf0]  ;;  %v11869_v2 = vld [vmem:[#allocation2 + $0x648] sm:$0xf] }
 0x343   :  { %3954 = vmatmul.bf16.vlgmr.msra.gmra.mxu2 %v17477_v33  ;;  %3967 = vmatmul.bf16.vlgmr.msra.gmra.mxu3 %v17479_v27  ;;  %v11890_v29 = vor.u32 %v16165_v24, %v11887_v8  ;;  %v11839_v57 = vld [vmem:[#allocation2 + $0x618] sm:$0xf0]  ;;  %v16307_v24 = vld [vmem:[#allocation2 + $0xad4] sm:$0xf0] }
 0x344   :  { %3924 = vmatpush.bf16.msra.mxu0 %v12138_v43  ;;  %3937 = vmatpush.bf16.msra.mxu1 %v12266_v44  ;;  %v16211_v43 = vld [vmem:[#allocation2 + $0x7d4] sm:$0xf0]  ;;  %v16177_v44 = vld [vmem:[#allocation2 + $0x6cc] sm:$0xf] }
 0x345   :  { %4002 = vmatpush.bf16.msrb.mxu2 %v12142_v16  ;;  %4015 = vmatpush.bf16.msrb.mxu3 %v12270_v47  ;;  %v12063_v16 = vld [vmem:[#allocation2 + $0x7d8] sm:$0xf0]  ;;  %v11934_v47 = vor.u32 %v16179_v38, %v11933_v37  ;;  %v12062_v48 = vor.u32 %v16211_v43, %v12061_v42  ;;  %v11938_v9 = vor.u32 %v16177_v44, %v11935_v45  ;;  %v16193_v38 = vld [vmem:[#allocation2 + $0x74c] sm:$0xf]  ;;  %v11853_v43 = vld [vmem:[#allocation2 + $0x628] sm:$0xf] }
 0x346   :  { %v12066_v51 = vor.u32 %v16209_v46, %v12063_v16  ;;  %v11871_v37 = vld [vmem:[#allocation2 + $0x658] sm:$0xf0]  ;;  %v16159_v44 = vld [vmem:[#allocation2 + $0x634] sm:$0xf0]  ;;  %v11981_v16 = vld [vmem:[#allocation2 + $0x728] sm:$0xf] }
 0x348   :  { %3925 = vmatpush.bf16.msra.mxu0 %v12122_v53  ;;  %3938 = vmatpush.bf16.msra.mxu1 %v12250_v54  ;;  %v16207_v53 = vld [vmem:[#allocation2 + $0x7b4] sm:$0xf0]  ;;  %v16173_v54 = vld [vmem:[#allocation2 + $0x6ac] sm:$0xf] }
 0x349   :  { %4003 = vmatpush.bf16.msrb.mxu2 %v12126_v14  ;;  %4016 = vmatpush.bf16.msrb.mxu3 %v12254_v18  ;;  %v12047_v14 = vld [vmem:[#allocation2 + $0x7b8] sm:$0xf0]  ;;  %v11918_v18 = vor.u32 %v16175_v50, %v11917_v58  ;;  %v12046_v25 = vor.u32 %v16207_v53, %v12045_v52  ;;  %v11922_v60 = vor.u32 %v16173_v54, %v11919_v55  ;;  %v16189_v50 = vld [vmem:[#allocation2 + $0x72c] sm:$0xf]  ;;  %v16155_v54 = vld [vmem:[#allocation2 + $0x614] sm:$0xf0] }
 0x34a   :  { %v12050_v63 = vor.u32 %v16205_v56, %v12047_v14  ;;  %v11855_v58 = vld [vmem:[#allocation2 + $0x638] sm:$0xf0]  ;;  %v11854_v52 = vor.u32 %v16159_v44, %v11853_v43  ;;  %v11965_v55 = vld [vmem:[#allocation2 + $0x708] sm:$0xf]  ;;  %v16187_v56 = vld [vmem:[#allocation2 + $0x714] sm:$0xf0] }
 0x34b   :  { %v11966_v4 = vor.u32 %v16187_v56, %v11965_v55  ;;  %v12431_v43 = vld [vmem:[#allocation2 + $0xab8] sm:$0xf0]  ;;  %v16333_v44 = vld [vmem:[#allocation2 + $0xbac] sm:$0xf]  ;;  %v12397_v56 = vld [vmem:[#allocation2 + $0xa68] sm:$0xf] }
 0x34c   :  { %3926 = vmatpush.bf16.msra.mxu0 %v12106_v1  ;;  %3939 = vmatpush.bf16.msra.mxu1 %v12234_v3  ;;  %v16169_v1 = vld [vmem:[#allocation2 + $0x68c] sm:$0xf]  ;;  %v11903_v3 = vld [vmem:[#allocation2 + $0x698] sm:$0xf0] }
 0x34d   :  { %4004 = vmatpush.bf16.msrb.mxu2 %v12110_v11  ;;  %4017 = vmatpush.bf16.msrb.mxu3 %v12238_v22  ;;  %v12030_v11 = vor.u32 %v16203_v39, %v12029_v21  ;;  %v11885_v22 = vld [vmem:[#allocation2 + $0x668] sm:$0xf]  ;;  %v11906_v15 = vor.u32 %v16169_v1, %v11903_v3  ;;  %v16311_v21 = vld [vmem:[#allocation2 + $0xaf4] sm:$0xf0]  ;;  %v16309_v3 = vld [vmem:[#allocation2 + $0xaec] sm:$0xf] }
 0x34e   :  { %v12589_v39 = vld [vmem:[#allocation2 + $0xbe8] sm:$0xf]  ;;  %v16343_v1 = vld [vmem:[#allocation2 + $0xbf4] sm:$0xf0]  ;;  %v12543_v55 = vld [vmem:[#allocation2 + $0xb98] sm:$0xf0] }
 0x350   :  { %3927 = vmatpush.bf16.msra.mxu0 %v12090_v26  ;;  %3940 = vmatpush.bf16.msra.mxu1 %v12218_v61  ;;  %v11886_v26 = vor.u32 %v16167_v13, %v11885_v22  ;;  %v12014_v61 = vor.u32 %v16199_v20, %v12013_v19  ;;  %v12591_v22 = vld [vmem:[#allocation2 + $0xbf8] sm:$0xf0]  ;;  %v12590_v19 = vor.u32 %v16343_v1, %v12589_v39  ;;  %v12445_v20 = vld [vmem:[#allocation2 + $0xac8] sm:$0xf] }
 0x351   :  { %4005 = vmatpush.bf16.msrb.mxu2 %v12094_v31  ;;  %4018 = vmatpush.bf16.msrb.mxu3 %v12222_v34  ;;  %v12018_v31 = vor.u32 %v16197_v35, %v12015_v23  ;;  %v11997_v34 = vld [vmem:[#allocation2 + $0x748] sm:$0xf]  ;;  %v12527_v39 = vld [vmem:[#allocation2 + $0xb78] sm:$0xf0] }
 0x352   :  { %v12573_v23 = vld [vmem:[#allocation2 + $0xbc8] sm:$0xf] }
 0x353   :  { %3928 = vmatmul.bf16.vlgmr.msra.gmra.mxu0 %v17449_v6  ;;  %3941 = vmatmul.bf16.vlgmr.msra.gmra.mxu1 %v17451_v7 }
 0x354   :  { %3972 = vmatpush.bf16.msrb.mxu0 %v11950_v36  ;;  %3985 = vmatpush.bf16.msrb.mxu1 %v12078_v0  ;;  %v16195_v36 = vld [vmem:[#allocation2 + $0x754] sm:$0xf0]  ;;  %v16161_v0 = vld [vmem:[#allocation2 + $0x64c] sm:$0xf] }
 0x355   :  { %4050 = vmatpush.bf16.msra.mxu2 %v11954_v40  ;;  %4063 = vmatpush.bf16.msra.mxu3 %v12082_v41  ;;  %v11999_v40 = vld [vmem:[#allocation2 + $0x758] sm:$0xf0]  ;;  %v11870_v41 = vor.u32 %v16163_v28, %v11869_v2  ;;  %v11998_v42 = vor.u32 %v16195_v36, %v11997_v34  ;;  %v11874_v45 = vor.u32 %v16161_v0, %v11871_v37  ;;  %v16337_v28 = vld [vmem:[#allocation2 + $0xbcc] sm:$0xf]  ;;  %v12429_v36 = vld [vmem:[#allocation2 + $0xaa8] sm:$0xf] }
 0x356   :  { %4006 = vmatmul.bf16.vlgmr.msrb.gmra.mxu2 %v17449_v6  ;;  %4019 = vmatmul.bf16.vlgmr.msrb.gmra.mxu3 %v17451_v7  ;;  %v12002_v46 = vor.u32 %v16193_v38, %v11999_v40  ;;  %v12447_v2 = vld [vmem:[#allocation2 + $0xad8] sm:$0xf0]  ;;  %v16303_v0 = vld [vmem:[#allocation2 + $0xab4] sm:$0xf0]  ;;  %v12557_v40 = vld [vmem:[#allocation2 + $0xba8] sm:$0xf] }
 0x358   :  { %3973 = vmatpush.bf16.msrb.mxu0 %v11934_v47  ;;  %3986 = vmatpush.bf16.msrb.mxu1 %v12062_v48  ;;  %v16191_v47 = vld [vmem:[#allocation2 + $0x734] sm:$0xf0]  ;;  %v16157_v48 = vld [vmem:[#allocation2 + $0x62c] sm:$0xf] }
 0x359   :  { %4051 = vmatpush.bf16.msra.mxu2 %v11938_v9  ;;  %4064 = vmatpush.bf16.msra.mxu3 %v12066_v51  ;;  %v11983_v9 = vld [vmem:[#allocation2 + $0x738] sm:$0xf0]  ;;  %v11837_v51 = vld [vmem:[#allocation2 + $0x608] sm:$0xf]  ;;  %v11982_v53 = vor.u32 %v16191_v47, %v11981_v16  ;;  %v11858_v14 = vor.u32 %v16157_v48, %v11855_v58  ;;  %v16299_v48 = vld [vmem:[#allocation2 + $0xa94] sm:$0xf0] }
 0x35a   :  { %v11838_v5 = vor.u32 %v16155_v54, %v11837_v51  ;;  %v12413_v47 = vld [vmem:[#allocation2 + $0xa88] sm:$0xf]  ;;  %v16331_v51 = vld [vmem:[#allocation2 + $0xb94] sm:$0xf0]  ;;  %v16329_v54 = vld [vmem:[#allocation2 + $0xb8c] sm:$0xf] }
 0x35c   :  { %3974 = vmatpush.bf16.msrb.mxu0 %v11918_v18  ;;  %3987 = vmatpush.bf16.msrb.mxu1 %v12046_v25  ;;  %v11986_v18 = vor.u32 %v16189_v50, %v11983_v9  ;;  %v16153_v25 = vld [vmem:[#allocation2 + $0x60c] sm:$0xf]  ;;  %v12541_v9 = vld [vmem:[#allocation2 + $0xb88] sm:$0xf] }
 0x35d   :  { %4052 = vmatpush.bf16.msra.mxu2 %v11922_v60  ;;  %4065 = vmatpush.bf16.msra.mxu3 %v12050_v63  ;;  %v11967_v60 = vld [vmem:[#allocation2 + $0x718] sm:$0xf0]  ;;  %v12461_v63 = vld [vmem:[#allocation2 + $0xae8] sm:$0xf]  ;;  %v11842_v13 = vor.u32 %v16153_v25, %v11839_v57  ;;  %v12546_v25 = vor.u32 %v16329_v54, %v12543_v55 }
 0x35e   :  { %v12525_v57 = vld [vmem:[#allocation2 + $0xb68] sm:$0xf] }
 0x360   :  { %3975 = vmatpush.bf16.msrb.mxu0 %v11902_v10  ;;  %3988 = vmatpush.bf16.msrb.mxu1 %v12030_v11  ;;  %v12463_v10 = vld [vmem:[#allocation2 + $0xaf8] sm:$0xf0]  ;;  %v16341_v11 = vld [vmem:[#allocation2 + $0xbec] sm:$0xf] }
 0x361   :  { %4053 = vmatpush.bf16.msra.mxu2 %v11906_v15  ;;  %4066 = vmatpush.bf16.msra.mxu3 %v12034_v32  ;;  %v11970_v15 = vor.u32 %v16185_v59, %v11967_v60  ;;  %v12462_v32 = vor.u32 %v16311_v21, %v12461_v63  ;;  %v12466_v8 = vor.u32 %v16309_v3, %v12463_v10  ;;  %v16327_v59 = vld [vmem:[#allocation2 + $0xb74] sm:$0xf0]  ;;  %v16293_v60 = vld [vmem:[#allocation2 + $0xa6c] sm:$0xf]  ;;  %v12399_v63 = vld [vmem:[#allocation2 + $0xa78] sm:$0xf0] }
 0x362   :  { %v12594_v35 = vor.u32 %v16341_v11, %v12591_v22  ;;  %v16325_v21 = vld [vmem:[#allocation2 + $0xb6c] sm:$0xf]  ;;  %v12526_v3 = vor.u32 %v16327_v59, %v12525_v57  ;;  %v12402_v10 = vor.u32 %v16293_v60, %v12399_v63  ;;  %v12509_v22 = vld [vmem:[#allocation2 + $0xb48] sm:$0xf]  ;;  %v12175_v60 = vld [vmem:[#allocation2 + $0x8b8] sm:$0xf0] }
 0x363   :  { %v12530_v11 = vor.u32 %v16325_v21, %v12527_v39  ;;  %v16237_v59 = vld [vmem:[#allocation2 + $0x8ac] sm:$0xf]  ;;  %v12303_v21 = vld [vmem:[#allocation2 + $0x9b8] sm:$0xf0] }
 0x364   :  { %3976 = vmatpush.bf16.msrb.mxu0 %v11886_v26  ;;  %3989 = vmatpush.bf16.msrb.mxu1 %v12014_v61  ;;  %v16339_v26 = vld [vmem:[#allocation2 + $0xbd4] sm:$0xf0]  ;;  %v16305_v61 = vld [vmem:[#allocation2 + $0xacc] sm:$0xf]  ;;  %v12178_v39 = vor.u32 %v16237_v59, %v12175_v60  ;;  %v16416_v59 = vld [vmem:[#allocation7 + $0x23c] sm:$0xf0] }
 0x365   :  { %4054 = vmatpush.bf16.msra.mxu2 %v11890_v29  ;;  %4067 = vmatpush.bf16.msra.mxu3 %v12018_v31  ;;  %v12575_v29 = vld [vmem:[#allocation2 + $0xbd8] sm:$0xf0]  ;;  %v12446_v31 = vor.u32 %v16307_v24, %v12445_v20  ;;  %v12574_v34 = vor.u32 %v16339_v26, %v12573_v23  ;;  %v12450_v37 = vor.u32 %v16305_v61, %v12447_v2  ;;  %v16287_v23 = vld [vmem:[#allocation2 + $0xa34] sm:$0xf0]  ;;  %v12493_v2 = vld [vmem:[#allocation2 + $0xb28] sm:$0xf] }
 0x366   :  { %v12578_v38 = vor.u32 %v16337_v28, %v12575_v29  ;;  %v12511_v20 = vld [vmem:[#allocation2 + $0xb58] sm:$0xf0]  ;;  %v16319_v28 = vld [vmem:[#allocation2 + $0xb34] sm:$0xf0]  ;;  %v16285_v29 = vld [vmem:[#allocation2 + $0xa2c] sm:$0xf] }
 0x367   :  { %v16269_v63 = vld [vmem:[#allocation2 + $0x9ac] sm:$0xf]  ;;  %v13365_v60 = vld [vmem:[#allocation7 + $0x600] sm:$0xf] }
 0x368   :  { %3977 = vmatpush.bf16.msrb.mxu0 %v11870_v41  ;;  %3990 = vmatpush.bf16.msrb.mxu1 %v11998_v42  ;;  %v16335_v41 = vld [vmem:[#allocation2 + $0xbb4] sm:$0xf0]  ;;  %v16301_v42 = vld [vmem:[#allocation2 + $0xaac] sm:$0xf] }
 0x369   :  { %4055 = vmatpush.bf16.msra.mxu2 %v11874_v45  ;;  %4068 = vmatpush.bf16.msra.mxu3 %v12002_v46  ;;  %v12559_v45 = vld [vmem:[#allocation2 + $0xbb8] sm:$0xf0]  ;;  %v12430_v46 = vor.u32 %v16303_v0, %v12429_v36  ;;  %v12558_v16 = vor.u32 %v16335_v41, %v12557_v40  ;;  %v12434_v58 = vor.u32 %v16301_v42, %v12431_v43  ;;  %v16283_v40 = vld [vmem:[#allocation2 + $0xa14] sm:$0xf0]  ;;  %v12477_v41 = vld [vmem:[#allocation2 + $0xb08] sm:$0xf] }
 0x36a   :  { %v12562_v50 = vor.u32 %v16333_v44, %v12559_v45  ;;  %v12495_v36 = vld [vmem:[#allocation2 + $0xb38] sm:$0xf0]  ;;  %v16315_v44 = vld [vmem:[#allocation2 + $0xb14] sm:$0xf0]  ;;  %v16281_v45 = vld [vmem:[#allocation2 + $0xa0c] sm:$0xf] }
 0x36c   :  { %3978 = vmatpush.bf16.msrb.mxu0 %v11854_v52  ;;  %3991 = vmatpush.bf16.msrb.mxu1 %v11982_v53  ;;  %v16297_v52 = vld [vmem:[#allocation2 + $0xa8c] sm:$0xf]  ;;  %v12415_v53 = vld [vmem:[#allocation2 + $0xa98] sm:$0xf0] }
 0x36d   :  { %4056 = vmatpush.bf16.msra.mxu2 %v11858_v14  ;;  %4069 = vmatpush.bf16.msra.mxu3 %v11986_v18  ;;  %v16295_v14 = vld [vmem:[#allocation2 + $0xa74] sm:$0xf0]  ;;  %v12418_v18 = vor.u32 %v16297_v52, %v12415_v53  ;;  %v12478_v52 = vor.u32 %v16315_v44, %v12477_v41  ;;  %v16464_v41 = vld [vmem:[#allocation7 + $0x3bc] sm:$0xf0] }
 0x36e   :  { %v12398_v1 = vor.u32 %v16295_v14, %v12397_v56  ;;  %v12191_v56 = vld [vmem:[#allocation2 + $0x8d8] sm:$0xf0]  ;;  %v16273_v14 = vld [vmem:[#allocation2 + $0x9cc] sm:$0xf] }
 0x370   :  { %3979 = vmatpush.bf16.msrb.mxu0 %v11838_v5  ;;  %3992 = vmatpush.bf16.msrb.mxu1 %v11966_v4  ;;  %v12381_v5 = vld [vmem:[#allocation2 + $0xa48] sm:$0xf]  ;;  %v16291_v4 = vld [vmem:[#allocation2 + $0xa54] sm:$0xf0] }
 0x371   :  { %4057 = vmatpush.bf16.msra.mxu2 %v11842_v13  ;;  %4070 = vmatpush.bf16.msra.mxu3 %v11970_v15  ;;  %v16323_v13 = vld [vmem:[#allocation2 + $0xb54] sm:$0xf0]  ;;  %v16289_v15 = vld [vmem:[#allocation2 + $0xa4c] sm:$0xf]  ;;  %v12382_v24 = vor.u32 %v16291_v4, %v12381_v5  ;;  %v12159_v5 = vld [vmem:[#allocation2 + $0x898] sm:$0xf0] }
 0x372   :  { %v16265_v4 = vld [vmem:[#allocation2 + $0x98c] sm:$0xf] }
 0x373   :  { %3980 = vmatmul.bf16.vlgmr.msrb.gmra.mxu0 %v17517_v17  ;;  %3993 = vmatmul.bf16.vlgmr.msrb.gmra.mxu1 %v17519_v49 }
 0x374   :  { %4024 = vmatpush.bf16.msra.mxu0 %v12462_v32  ;;  %4037 = vmatpush.bf16.msra.mxu1 %v12590_v19  ;;  %v12383_v32 = vld [vmem:[#allocation2 + $0xa58] sm:$0xf0]  ;;  %v16321_v19 = vld [vmem:[#allocation2 + $0xb4c] sm:$0xf] }
 0x375   :  { %4102 = vmatpush.bf16.msrb.mxu2 %v12466_v8  ;;  %4115 = vmatpush.bf16.msrb.mxu3 %v12594_v35  ;;  %v12510_v8 = vor.u32 %v16323_v13, %v12509_v22  ;;  %v12365_v35 = vld [vmem:[#allocation2 + $0xa28] sm:$0xf]  ;;  %v12386_v26 = vor.u32 %v16289_v15, %v12383_v32  ;;  %v12514_v61 = vor.u32 %v16321_v19, %v12511_v20  ;;  %v16229_v13 = vld [vmem:[#allocation2 + $0x86c] sm:$0xf]  ;;  %v12143_v15 = vld [vmem:[#allocation2 + $0x878] sm:$0xf0] }
 0x376   :  { %4058 = vmatmul.bf16.vlgmr.msra.gmra.mxu2 %v17517_v17  ;;  %4071 = vmatmul.bf16.vlgmr.msra.gmra.mxu3 %v17519_v49  ;;  %v12414_v17 = vor.u32 %v16299_v48, %v12413_v47  ;;  %v12542_v49 = vor.u32 %v16331_v51, %v12541_v9  ;;  %v12366_v0 = vor.u32 %v16287_v23, %v12365_v35  ;;  %v12479_v47 = vld [vmem:[#allocation2 + $0xb18] sm:$0xf0]  ;;  %v16245_v48 = vld [vmem:[#allocation2 + $0x8ec] sm:$0xf] }
 0x377   :  { %v12335_v9 = vld [vmem:[#allocation2 + $0x9f8] sm:$0xf0]  ;;  %v16261_v32 = vld [vmem:[#allocation2 + $0x96c] sm:$0xf] }
 0x378   :  { %4025 = vmatpush.bf16.msra.mxu0 %v12446_v31  ;;  %4038 = vmatpush.bf16.msra.mxu1 %v12574_v34  ;;  %v12367_v31 = vld [vmem:[#allocation2 + $0xa38] sm:$0xf0]  ;;  %v16317_v34 = vld [vmem:[#allocation2 + $0xb2c] sm:$0xf] }
 0x379   :  { %4103 = vmatpush.bf16.msrb.mxu2 %v12450_v37  ;;  %4116 = vmatpush.bf16.msrb.mxu3 %v12578_v38  ;;  %v12494_v37 = vor.u32 %v16319_v28, %v12493_v2  ;;  %v12349_v38 = vld [vmem:[#allocation2 + $0xa08] sm:$0xf]  ;;  %v12370_v42 = vor.u32 %v16285_v29, %v12367_v31  ;;  %v12498_v43 = vor.u32 %v16317_v34, %v12495_v36  ;;  %v12271_v19 = vld [vmem:[#allocation2 + $0x978] sm:$0xf0]  ;;  %v16225_v20 = vld [vmem:[#allocation2 + $0x84c] sm:$0xf] }
 0x37a   :  { %v12350_v51 = vor.u32 %v16283_v40, %v12349_v38  ;;  %v12255_v35 = vld [vmem:[#allocation2 + $0x958] sm:$0xf0]  ;;  %v16253_v28 = vld [vmem:[#allocation2 + $0x92c] sm:$0xf]  ;;  %v13045_v40 = vld [vmem:[#allocation7 + $0x380] sm:$0xf] }
 0x37b   :  { %v12111_v2 = vld [vmem:[#allocation2 + $0x838] sm:$0xf0]  ;;  %v16217_v36 = vld [vmem:[#allocation2 + $0x80c] sm:$0xf] }
 0x37c   :  { %4026 = vmatpush.bf16.msra.mxu0 %v12430_v46  ;;  %4039 = vmatpush.bf16.msra.mxu1 %v12558_v16  ;;  %v12351_v46 = vld [vmem:[#allocation2 + $0xa18] sm:$0xf0]  ;;  %v16313_v16 = vld [vmem:[#allocation2 + $0xb0c] sm:$0xf] }
 0x37d   :  { %4104 = vmatpush.bf16.msrb.mxu2 %v12434_v58  ;;  %4117 = vmatpush.bf16.msrb.mxu3 %v12562_v50  ;;  %v12207_v58 = vld [vmem:[#allocation2 + $0x8f8] sm:$0xf0]  ;;  %v16277_v50 = vld [vmem:[#allocation2 + $0x9ec] sm:$0xf]  ;;  %v12354_v53 = vor.u32 %v16281_v45, %v12351_v46  ;;  %v12482_v54 = vor.u32 %v16313_v16, %v12479_v47  ;;  %v13046_v46 = vor.u32 %v16464_v41, %v13045_v40  ;;  %v12981_v47 = vld [vmem:[#allocation7 + $0x300] sm:$0xf] }
 0x37e   :  { %v12210_v55 = vor.u32 %v16245_v48, %v12207_v58  ;;  %v12239_v29 = vld [vmem:[#allocation2 + $0x938] sm:$0xf0]  ;;  %v16448_v48 = vld [vmem:[#allocation7 + $0x33c] sm:$0xf0] }
 0x37f   :  { %v12242_v34 = vor.u32 %v16253_v28, %v12239_v29  ;;  %v12223_v38 = vld [vmem:[#allocation2 + $0x918] sm:$0xf0]  ;;  %v13493_v58 = vld [vmem:[#allocation7 + $0x700] sm:$0xf] }
 0x380   :  { %4027 = vmatpush.bf16.msra.mxu0 %v12414_v17  ;;  %4040 = vmatpush.bf16.msra.mxu1 %v12542_v49  ;;  %v12338_v17 = vor.u32 %v16277_v50, %v12335_v9  ;;  %v16241_v49 = vld [vmem:[#allocation2 + $0x8cc] sm:$0xf]  ;;  %v16576_v50 = vld [vmem:[#allocation7 + $0x73c] sm:$0xf0]  ;;  %v12982_v9 = vor.u32 %v16448_v48, %v12981_v47  ;;  %v16456_v48 = vld [vmem:[#allocation7 + $0x384] sm:$0xf] }
 0x381   :  { %4105 = vmatpush.bf16.msrb.mxu2 %v12418_v18  ;;  %4118 = vmatpush.bf16.msrb.mxu3 %v12546_v25  ;;  %v12319_v18 = vld [vmem:[#allocation2 + $0x9d8] sm:$0xf0]  ;;  %v12194_v25 = vor.u32 %v16241_v49, %v12191_v56  ;;  %v16368_v28 = vld [vmem:[#allocation7 + $0xbc] sm:$0xf0] }
 0x382   :  { %v12322_v57 = vor.u32 %v16273_v14, %v12319_v18  ;;  %v13173_v29 = vld [vmem:[#allocation7 + $0x480] sm:$0xf] }
 0x383   :  { %v12597_v41 = vld [vmem:[#allocation7] sm:$0xf] }
 0x384   :  { %4028 = vmatpush.bf16.msra.mxu0 %v12398_v1  ;;  %4041 = vmatpush.bf16.msra.mxu1 %v12526_v3  ;;  %v12306_v1 = vor.u32 %v16269_v63, %v12303_v21  ;;  %v16233_v3 = vld [vmem:[#allocation2 + $0x88c] sm:$0xf]  ;;  %v16544_v63 = vld [vmem:[#allocation7 + $0x63c] sm:$0xf0] }
 0x385   :  { %4106 = vmatpush.bf16.msrb.mxu2 %v12402_v10  ;;  %4119 = vmatpush.bf16.msrb.mxu3 %v12530_v11  ;;  %v12287_v10 = vld [vmem:[#allocation2 + $0x998] sm:$0xf0]  ;;  %v12162_v11 = vor.u32 %v16233_v3, %v12159_v5  ;;  %v16400_v3 = vld [vmem:[#allocation7 + $0x1bc] sm:$0xf0] }
 0x386   :  { %v12290_v22 = vor.u32 %v16265_v4, %v12287_v10  ;;  %v16528_v5 = vld [vmem:[#allocation7 + $0x5bc] sm:$0xf0] }
 0x388   :  { %4029 = vmatpush.bf16.msra.mxu0 %v12382_v24  ;;  %4042 = vmatpush.bf16.msra.mxu1 %v12510_v8  ;;  %v12127_v24 = vld [vmem:[#allocation2 + $0x858] sm:$0xf0]  ;;  %v16257_v8 = vld [vmem:[#allocation2 + $0x94c] sm:$0xf] }
 0x389   :  { %4107 = vmatpush.bf16.msrb.mxu2 %v12386_v26  ;;  %4120 = vmatpush.bf16.msrb.mxu3 %v12514_v61  ;;  %v12130_v23 = vor.u32 %v16225_v20, %v12127_v24  ;;  %v12258_v26 = vor.u32 %v16257_v8, %v12255_v35  ;;  %v16221_v61 = vld [vmem:[#allocation2 + $0x82c] sm:$0xf]  ;;  %v16512_v20 = vld [vmem:[#allocation7 + $0x53c] sm:$0xf0] }
 0x38a   :  { %v12114_v31 = vor.u32 %v16221_v61, %v12111_v2  ;;  %v14069_v24 = vld [vmem:[#allocation7 + $0xb80] sm:$0xf] }
 0x38b   :  { %v16720_v8 = vld [vmem:[#allocation7 + $0xbbc] sm:$0xf0] }
 0x38c   :  { %4030 = vmatpush.bf16.msra.mxu0 %v12366_v0  ;;  %4043 = vmatpush.bf16.msra.mxu1 %v12494_v37  ;;  %v12095_v0 = vld [vmem:[#allocation2 + $0x818] sm:$0xf0]  ;;  %v16249_v37 = vld [vmem:[#allocation2 + $0x90c] sm:$0xf]  ;;  %v12661_v2 = vld [vmem:[#allocation7 + $0x80] sm:$0xf] }
 0x38d   :  { %4108 = vmatpush.bf16.msrb.mxu2 %v12370_v42  ;;  %4121 = vmatpush.bf16.msrb.mxu3 %v12498_v43  ;;  %v13557_v42 = vld [vmem:[#allocation7 + $0x780] sm:$0xf]  ;;  %v12098_v44 = vor.u32 %v16217_v36, %v12095_v0  ;;  %v12226_v45 = vor.u32 %v16249_v37, %v12223_v38 }
 0x38e   :  { %v16592_v43 = vld [vmem:[#allocation7 + $0x7bc] sm:$0xf0] }
 0x38f   :  { %v13558_v16 = vor.u32 %v16592_v43, %v13557_v42  ;;  %v16704_v36 = vld [vmem:[#allocation7 + $0xb3c] sm:$0xf0] }
 0x390   :  { %4031 = vmatpush.bf16.msra.mxu0 %v12350_v51  ;;  %4044 = vmatpush.bf16.msra.mxu1 %v12478_v52  ;;  %v13494_v51 = vor.u32 %v16576_v50, %v13493_v58  ;;  %v12917_v52 = vld [vmem:[#allocation7 + $0x280] sm:$0xf] }
 0x391   :  { %4109 = vmatpush.bf16.msrb.mxu2 %v12354_v53  ;;  %4122 = vmatpush.bf16.msrb.mxu3 %v12482_v54  ;;  %v17543_v53 = vld [vmem:[#allocation9 + $0x9] sm:$0xf]  ;;  %v16432_v54 = vld [vmem:[#allocation7 + $0x2bc] sm:$0xf0] }
 0x392   :  { %v2848_v49 = vperm.slane %v17543_v53, 0  ;;  %v12918_v56 = vor.u32 %v16432_v54, %v12917_v52  ;;  %v13941_v58 = vld [vmem:[#allocation7 + $0xa80] sm:$0xf]  ;;  %v13559_v52 = vld [vmem:[#allocation7 + $0x7c0] sm:$0xf0] }
 0x393   :  { %4032 = vmatmul.bf16.vlgmr.msra.gmra.mxu0 %v17477_v33  ;;  %4045 = vmatmul.bf16.vlgmr.msra.gmra.mxu1 %v17479_v27  ;;  %v16688_v50 = vld [vmem:[#allocation7 + $0xabc] sm:$0xf0] }
 0x394   :  { %4076 = vmatpush.bf16.msrb.mxu0 %v12210_v55  ;;  %4089 = vmatpush.bf16.msrb.mxu1 %v12338_v17  ;;  %v13429_v55 = vld [vmem:[#allocation7 + $0x680] sm:$0xf]  ;;  %v13942_v54 = vor.u32 %v16688_v50, %v13941_v58  ;;  %v16376_v58 = vld [vmem:[#allocation7 + $0x104] sm:$0xf] }
 0x395   :  { %4110 = vmatmul.bf16.vlgmr.msrb.gmra.mxu2 %v17477_v33  ;;  %4123 = vmatmul.bf16.vlgmr.msrb.gmra.mxu3 %v17479_v27  ;;  %v12146_v33 = vor.u32 %v16229_v13, %v12143_v15  ;;  %v12274_v27 = vor.u32 %v16261_v32, %v12271_v19  ;;  %v16560_v17 = vld [vmem:[#allocation7 + $0x6bc] sm:$0xf0]  ;;  %v12727_v50 = vld [vmem:[#allocation7 + $0x140] sm:$0xf0] }
 0x396   :  { %v13430_v14 = vor.u32 %v16560_v17, %v13429_v55  ;;  %v12725_v19 = vld [vmem:[#allocation7 + $0x100] sm:$0xf] }
 0x398   :  { %4077 = vmatpush.bf16.msrb.mxu0 %v12194_v25  ;;  %4090 = vmatpush.bf16.msrb.mxu1 %v12322_v57  ;;  %v12853_v57 = vld [vmem:[#allocation7 + $0x200] sm:$0xf] }
 0x39c   :  { %4078 = vmatpush.bf16.msrb.mxu0 %v12178_v39  ;;  %4091 = vmatpush.bf16.msrb.mxu1 %v12306_v1  ;;  %v12854_v39 = vor.u32 %v16416_v59, %v12853_v57  ;;  %v13366_v1 = vor.u32 %v16544_v63, %v13365_v60  ;;  %v16568_v57 = vld [vmem:[#allocation7 + $0x704] sm:$0xf]  ;;  %v13877_v60 = vld [vmem:[#allocation7 + $0xa00] sm:$0xf] }
 0x39d   :  { %v13495_v59 = vld [vmem:[#allocation7 + $0x740] sm:$0xf0]  ;;  %v16672_v63 = vld [vmem:[#allocation7 + $0xa3c] sm:$0xf0] }
 0x3a0   :  { %4079 = vmatpush.bf16.msrb.mxu0 %v12162_v11  ;;  %4092 = vmatpush.bf16.msrb.mxu1 %v12290_v22 }
 0x3a4   :  { %4080 = vmatpush.bf16.msrb.mxu0 %v12146_v33  ;;  %4093 = vmatpush.bf16.msrb.mxu1 %v12274_v27  ;;  %v16384_v33 = vld [vmem:[#allocation7 + $0x13c] sm:$0xf0] }
 0x3a5   :  { %v13237_v27 = vld [vmem:[#allocation7 + $0x500] sm:$0xf] }
 0x3a6   :  { %v13238_v61 = vor.u32 %v16512_v20, %v13237_v27  ;;  %v16656_v27 = vld [vmem:[#allocation7 + $0x9bc] sm:$0xf0] }
 0x3a8   :  { %4081 = vmatpush.bf16.msrb.mxu0 %v12130_v23  ;;  %4094 = vmatpush.bf16.msrb.mxu1 %v12258_v26  ;;  %v14070_v23 = vor.u32 %v16720_v8, %v14069_v24  ;;  %v12726_v26 = vor.u32 %v16384_v33, %v12725_v19  ;;  %v13431_v19 = vld [vmem:[#allocation7 + $0x6c0] sm:$0xf0]  ;;  %v13813_v33 = vld [vmem:[#allocation7 + $0x980] sm:$0xf] }
 0x3a9   :  { %v13814_v20 = vor.u32 %v16656_v27, %v13813_v33 }
 0x3aa   :  { %7270 = vmatpush.bf16.msra.mxu2 %v14070_v23  ;;  %v16408_v23 = vld [vmem:[#allocation7 + $0x204] sm:$0xf] }
 0x3ac   :  { %4082 = vmatpush.bf16.msrb.mxu0 %v12114_v31  ;;  %4095 = vmatpush.bf16.msrb.mxu1 %v12242_v34  ;;  %v16496_v31 = vld [vmem:[#allocation7 + $0x4bc] sm:$0xf0] }
 0x3ad   :  { %v14005_v34 = vld [vmem:[#allocation7 + $0xb00] sm:$0xf]  ;;  %v13174_v42 = vor.u32 %v16496_v31, %v13173_v29 }
 0x3ae   :  { %v14006_v0 = vor.u32 %v16704_v36, %v14005_v34  ;;  %v16640_v29 = vld [vmem:[#allocation7 + $0x93c] sm:$0xf0] }
 0x3af   :  { %v3825_v18 = vpop.f32.mrf.mxu0  ;;  %v3838_v25 = vpop.f32.mrf.mxu1 }
 0x3b0   :  { %4083 = vmatpush.bf16.msrb.mxu0 %v12098_v44  ;;  %4096 = vmatpush.bf16.msrb.mxu1 %v12226_v45  ;;  %v3826_v21 = vadd.f32 %v3825_v18, %v2848_v49  ;;  %v16352_v45 = vld [vmem:[#allocation7 + $0x3c] sm:$0xf0]  ;;  %v16440_v49 = vld [vmem:[#allocation7 + $0x304] sm:$0xf] }
 0x3b1   :  { %7271 = vmatpush.bf16.msra.mxu2 %v14006_v0  ;;  %v12598_v55 = vor.u32 %v16352_v45, %v12597_v41  ;;  %v16520_v41 = vld [vmem:[#allocation7 + $0x584] sm:$0xf]  ;;  %v16624_v45 = vld [vmem:[#allocation7 + $0x8bc] sm:$0xf0] }
 0x3b2   :  { %v3839_v4 = vadd.f32 %v3838_v25, %v3826_v21  ;;  %v12983_v25 = vld [vmem:[#allocation7 + $0x340] sm:$0xf0] }
 0x3b3   :  { %4084 = vmatmul.bf16.vlgmr.msrb.gmra.mxu0 %v17449_v6  ;;  %4097 = vmatmul.bf16.vlgmr.msrb.gmra.mxu1 %v17451_v7  ;;  %v12789_v6 = vld [vmem:[#allocation7 + $0x180] sm:$0xf] }
 0x3b4   :  { %7244 = vmatpush.bf16.msra.mxu0 %v13046_v46  ;;  %7257 = vmatpush.bf16.msra.mxu1 %v13558_v16  ;;  %v13301_v7 = vld [vmem:[#allocation7 + $0x580] sm:$0xf]  ;;  %v12790_v22 = vor.u32 %v16400_v3, %v12789_v6  ;;  %v3852_v35 = vadd.f32 %v17525_v62, %v3839_v4  ;;  %v12662_v62 = vor.u32 %v16368_v28, %v12661_v2  ;;  %v2849_v3 = vperm.slane %v17543_v53, 1  ;;  %v13367_v2 = vld [vmem:[#allocation7 + $0x640] sm:$0xf0] }
 0x3b5   :  { %v13302_v13 = vor.u32 %v16528_v5, %v13301_v7  ;;  %v13109_v46 = vld [vmem:[#allocation7 + $0x400] sm:$0xf]  ;;  %7272 = vmatpush.bf16.msra.mxu2 %v13942_v54  ;;  %v13878_v6 = vor.u32 %v16672_v63, %v13877_v60  ;;  %v12986_v4 = vor.u32 %v16440_v49, %v12983_v25  ;;  %v14071_v49 = vld [vmem:[#allocation7 + $0xbc0] sm:$0xf0] }
 0x3b6   :  { %v17548_v10 = vpop.f32.mrf.mxu2  ;;  %v17550_v11 = vpop.f32.mrf.mxu3  ;;  %v3865_v40 = vadd.f32 %v17511_v30, %v3852_v35  ;;  %v16480_v16 = vld [vmem:[#allocation7 + $0x43c] sm:$0xf0]  ;;  %v12663_v63 = vld [vmem:[#allocation7 + $0xc0] sm:$0xf0] }
 0x3b7   :  { %v3827_v15 = vpop.f32.mrf.mxu0  ;;  %v3840_v32 = vpop.f32.mrf.mxu1  ;;  %v13110_v17 = vor.u32 %v16480_v16, %v13109_v46  ;;  %v3904_v24 = vadd.f32 %v17548_v10, %v2849_v3  ;;  %v13749_v28 = vld [vmem:[#allocation7 + $0x900] sm:$0xf]  ;;  %v13175_v3 = vld [vmem:[#allocation7 + $0x4c0] sm:$0xf0] }
 0x3b8   :  { %7245 = vmatpush.bf16.msra.mxu0 %v12982_v9  ;;  %7258 = vmatpush.bf16.msra.mxu1 %v13494_v51  ;;  %v13047_v9 = vld [vmem:[#allocation7 + $0x3c0] sm:$0xf0]  ;;  %v13750_v36 = vor.u32 %v16640_v29, %v13749_v28  ;;  %v16608_v54 = vld [vmem:[#allocation7 + $0x83c] sm:$0xf0] }
 0x3b9   :  { %v16584_v51 = vld [vmem:[#allocation7 + $0x784] sm:$0xf]  ;;  %7273 = vmatpush.bf16.msra.mxu2 %v13878_v6  ;;  %v3917_v0 = vadd.f32 %v17550_v11, %v3904_v24  ;;  %v14517_v28 = vld [vmem:[#allocation7 + $0xf00] sm:$0xf] }
 0x3ba   :  { %v13562_v18 = vor.u32 %v16584_v51, %v13559_v52  ;;  %v12919_v15 = vld [vmem:[#allocation7 + $0x2c0] sm:$0xf0]  ;;  %v13621_v52 = vld [vmem:[#allocation7 + $0x800] sm:$0xf] }
 0x3bb   :  { %v16552_v32 = vld [vmem:[#allocation7 + $0x684] sm:$0xf]  ;;  %v16832_v29 = vld [vmem:[#allocation7 + $0xf3c] sm:$0xf0] }
 0x3bc   :  { %7246 = vmatpush.bf16.msra.mxu0 %v12918_v56  ;;  %7259 = vmatpush.bf16.msra.mxu1 %v13430_v14  ;;  %v13050_v14 = vor.u32 %v16456_v48, %v13047_v9  ;;  %v13434_v35 = vor.u32 %v16552_v32, %v13431_v19  ;;  %v16504_v9 = vld [vmem:[#allocation7 + $0x504] sm:$0xf] }
 0x3bd   :  { %7274 = vmatpush.bf16.msra.mxu2 %v13814_v20  ;;  %v13239_v51 = vld [vmem:[#allocation7 + $0x540] sm:$0xf0] }
 0x3be   :  { %v3905_v37 = vpop.f32.mrf.mxu2  ;;  %v3918_v38 = vpop.f32.mrf.mxu3  ;;  %v13242_v60 = vor.u32 %v16504_v9, %v13239_v51  ;;  %v16488_v6 = vld [vmem:[#allocation7 + $0x484] sm:$0xf] }
 0x3bf   :  { %v3877_v43 = vpop.f32.mrf.mxu0  ;;  %v3890_v44 = vpop.f32.mrf.mxu1  ;;  %v16392_v38 = vld [vmem:[#allocation7 + $0x184] sm:$0xf]  ;;  %v13178_v24 = vor.u32 %v16488_v6, %v13175_v3  ;;  %v16417_v6 = vld [vmem:[#allocation7 + $0x244] sm:$0xf0] }
 0x3c0   :  { %7247 = vmatpush.bf16.msra.mxu0 %v12854_v39  ;;  %7260 = vmatpush.bf16.msra.mxu1 %v13366_v1  ;;  %v3878_v47 = vadd.f32 %v3877_v43, %v3865_v40  ;;  %v12791_v40 = vld [vmem:[#allocation7 + $0x1c0] sm:$0xf0]  ;;  %v13373_v3 = vld [vmem:[#allocation7 + $0x608] sm:$0xf] }
 0x3c1   :  { %v13303_v43 = vld [vmem:[#allocation7 + $0x5c0] sm:$0xf0]  ;;  %7275 = vmatpush.bf16.msra.mxu2 %v13750_v36  ;;  %v12794_v48 = vor.u32 %v16392_v38, %v12791_v40  ;;  %v12989_v40 = vld [vmem:[#allocation7 + $0x308] sm:$0xf] }
 0x3c2   :  { %v3891_v30 = vadd.f32 %v3890_v44, %v3878_v47  ;;  %v13685_v44 = vld [vmem:[#allocation7 + $0x880] sm:$0xf]  ;;  %v13306_v11 = vor.u32 %v16520_v41, %v13303_v43  ;;  %v16344_v32 = vld [vmem:[#allocation7 + $0x4] sm:$0xf]  ;;  %v16449_v43 = vld [vmem:[#allocation7 + $0x344] sm:$0xf0] }
 0x3c3   :  { %v13686_v16 = vor.u32 %v16624_v45, %v13685_v44  ;;  %v12599_v19 = vld [vmem:[#allocation7 + $0x40] sm:$0xf0]  ;;  %v13501_v44 = vld [vmem:[#allocation7 + $0x708] sm:$0xf]  ;;  %v12990_v9 = vor.u32 %v16449_v43, %v12989_v40  ;;  %v16752_v40 = vld [vmem:[#allocation7 + $0xcbc] sm:$0xf0] }
 0x3c4   :  { %7248 = vmatpush.bf16.msra.mxu0 %v12790_v22  ;;  %7261 = vmatpush.bf16.msra.mxu1 %v13302_v13  ;;  %v4128_v56 = vmax.f32 %v3891_v30, 0.0  ;;  %v13498_v22 = vor.u32 %v16568_v57, %v13495_v59  ;;  %v16424_v13 = vld [vmem:[#allocation7 + $0x284] sm:$0xf]  ;;  %v12730_v59 = vor.u32 %v16376_v58, %v12727_v50  ;;  %v16577_v45 = vld [vmem:[#allocation7 + $0x744] sm:$0xf0] }
 0x3c5   :  { %v12922_v8 = vor.u32 %v16424_v13, %v12919_v15  ;;  %7276 = vmatpush.bf16.msra.mxu2 %v13686_v16  ;;  %v14007_v15 = vld [vmem:[#allocation7 + $0xb40] sm:$0xf0]  ;;  %v16816_v16 = vld [vmem:[#allocation7 + $0xebc] sm:$0xf0]  ;;  %v12925_v58 = vld [vmem:[#allocation7 + $0x288] sm:$0xf]  ;;  %v13502_v51 = vor.u32 %v16577_v45, %v13501_v44 }
 0x3c6   :  { %v17554_v21 = vpack.c.bf16 %v4128_v56, %v4128_v56  ;;  %v17556_v39 = vpop.f32.mrf.mxu2  ;;  %v17558_v1 = vpop.f32.mrf.mxu3  ;;  %v16360_v56 = vld [vmem:[#allocation7 + $0x84] sm:$0xf] }
 0x3c7   :  { %v3879_v7 = vpop.f32.mrf.mxu0  ;;  %v3892_v5 = vpop.f32.mrf.mxu1  ;;  %v12666_v20 = vor.u32 %v16360_v56, %v12663_v63  ;;  %v13943_v36 = vld [vmem:[#allocation7 + $0xac0] sm:$0xf0] }
 0x3c8   :  { %7249 = vmatpush.bf16.msra.mxu0 %v12726_v26  ;;  %7262 = vmatpush.bf16.msra.mxu1 %v13238_v61  ;;  %v12855_v26 = vld [vmem:[#allocation7 + $0x240] sm:$0xf0]  ;;  %v14581_v5 = vld [vmem:[#allocation7 + $0xf80] sm:$0xf] }
 0x3c9   :  { %v16536_v61 = vld [vmem:[#allocation7 + $0x604] sm:$0xf]  ;;  %v12858_v37 = vor.u32 %v16408_v23, %v12855_v26  ;;  %v13053_v23 = vld [vmem:[#allocation7 + $0x388] sm:$0xf] }
 0x3ca   :  { %v13370_v10 = vor.u32 %v16536_v61, %v13367_v2  ;;  %v16465_v26 = vld [vmem:[#allocation7 + $0x3c4] sm:$0xf0] }
 0x3cb   :  { %v13565_v61 = vld [vmem:[#allocation7 + $0x788] sm:$0xf] }
 0x3cc   :  { %7250 = vmatpush.bf16.msra.mxu0 %v12662_v62  ;;  %7263 = vmatpush.bf16.msra.mxu1 %v13174_v42  ;;  %v16593_v2 = vld [vmem:[#allocation7 + $0x7c4] sm:$0xf0] }
 0x3ce   :  { %v3957_v31 = vpop.f32.mrf.mxu2  ;;  %v3970_v34 = vpop.f32.mrf.mxu3 }
 0x3cf   :  { %v16680_v31 = vld [vmem:[#allocation7 + $0xa84] sm:$0xf]  ;;  %v14518_v34 = vor.u32 %v16832_v29, %v14517_v28  ;;  %v12733_v29 = vld [vmem:[#allocation7 + $0x108] sm:$0xf] }
 0x3d0   :  { %7251 = vmatpush.bf16.msra.mxu0 %v12598_v55  ;;  %7264 = vmatpush.bf16.msra.mxu1 %v13110_v17  ;;  %v3929_v62 = vpop.f32.mrf.mxu0  ;;  %v3942_v42 = vpop.f32.mrf.mxu1  ;;  %v13622_v55 = vor.u32 %v16608_v54, %v13621_v52  ;;  %v16712_v17 = vld [vmem:[#allocation7 + $0xb84] sm:$0xf]  ;;  %v13946_v41 = vor.u32 %v16680_v31, %v13943_v36  ;;  %v16433_v52 = vld [vmem:[#allocation7 + $0x2c4] sm:$0xf0] }
 0x3d1   :  { %v3930_v46 = vadd.f32 %v3929_v62, %v3917_v0  ;;  %v13054_v62 = vor.u32 %v16465_v26, %v13053_v23  ;;  %v13437_v54 = vld [vmem:[#allocation7 + $0x688] sm:$0xf]  ;;  %v16616_v23 = vld [vmem:[#allocation7 + $0x884] sm:$0xf] }
 0x3d2   :  { %7277 = vmatpush.bf16.msra.mxu2 %v13622_v55  ;;  %v14389_v55 = vld [vmem:[#allocation7 + $0xe00] sm:$0xf]  ;;  %v13687_v28 = vld [vmem:[#allocation7 + $0x8c0] sm:$0xf0] }
 0x3d3   :  { %7252 = vmatmul.bf16.vlgmr.msra.gmra.mxu0 %v17554_v21  ;;  %v3943_v47 = vadd.f32 %v3942_v42, %v3930_v46  ;;  %v13566_v42 = vor.u32 %v16593_v2, %v13565_v61  ;;  %v14453_v46 = vld [vmem:[#allocation7 + $0xe80] sm:$0xf]  ;;  %v13690_v31 = vor.u32 %v16616_v23, %v13687_v28  ;;  %v13503_v23 = vld [vmem:[#allocation7 + $0x748] sm:$0xf0]  ;;  %v14455_v28 = vld [vmem:[#allocation7 + $0xec0] sm:$0xf0] }
 0x3d4   :  { %7296 = vmatpush.bf16.msrb.mxu0 %v13050_v14  ;;  %7309 = vmatpush.bf16.msrb.mxu1 %v13562_v18  ;;  %v14074_v14 = vor.u32 %v16712_v17, %v14071_v49  ;;  %v16800_v17 = vld [vmem:[#allocation7 + $0xe3c] sm:$0xf0]  ;;  %v16648_v49 = vld [vmem:[#allocation7 + $0x984] sm:$0xf] }
 0x3d5   :  { %v3956_v30 = vadd.f32 %v17556_v39, %v3943_v47  ;;  %v16664_v47 = vld [vmem:[#allocation7 + $0xa04] sm:$0xf]  ;;  %v14390_v56 = vor.u32 %v16800_v17, %v14389_v55  ;;  %v12605_v55 = vld [vmem:[#allocation7 + $0x8] sm:$0xf] }
 0x3d6   :  { %7322 = vmatpush.bf16.msrb.mxu2 %v14074_v14  ;;  %v13815_v14 = vld [vmem:[#allocation7 + $0x9c0] sm:$0xf0] }
 0x3d7   :  { %v3969_v18 = vadd.f32 %v17558_v1, %v3956_v30  ;;  %v16561_v30 = vld [vmem:[#allocation7 + $0x6c4] sm:$0xf0] }
 0x3d8   :  { %7297 = vmatpush.bf16.msrb.mxu0 %v12986_v4  ;;  %7310 = vmatpush.bf16.msrb.mxu1 %v13498_v22  ;;  %v3931_v7 = vpop.f32.mrf.mxu0  ;;  %v3944_v39 = vpop.f32.mrf.mxu1  ;;  %v16848_v4 = vld [vmem:[#allocation7 + $0xfbc] sm:$0xf0]  ;;  %v16696_v22 = vld [vmem:[#allocation7 + $0xb04] sm:$0xf]  ;;  %v13438_v63 = vor.u32 %v16561_v30, %v13437_v54  ;;  %v2850_v30 = vperm.slane %v17543_v53, 2 }
 0x3d9   :  { %v17566_v25 = vpop.f32.mrf.mxu2  ;;  %v17568_v57 = vpop.f32.mrf.mxu3  ;;  %v4129_v13 = vmax.f32 %v3969_v18, 0.0  ;;  %v14582_v1 = vor.u32 %v16848_v4, %v14581_v5  ;;  %v14010_v33 = vor.u32 %v16696_v22, %v14007_v15  ;;  %v12861_v18 = vld [vmem:[#allocation7 + $0x208] sm:$0xf]  ;;  %v14325_v39 = vld [vmem:[#allocation7 + $0xd80] sm:$0xf] }
 0x3da   :  { %v16545_v7 = vld [vmem:[#allocation7 + $0x644] sm:$0xf0]  ;;  %v16784_v5 = vld [vmem:[#allocation7 + $0xdbc] sm:$0xf0]  ;;  %v16632_v4 = vld [vmem:[#allocation7 + $0x904] sm:$0xf] }
 0x3db   :  { %v17570_v27 = vpack.c.bf16 %v4129_v13, %v4129_v13  ;;  %7283 = vmatpush.bf16.msra.mxu3 %v14582_v1  ;;  %7323 = vmatpush.bf16.msrb.mxu2 %v14010_v33  ;;  %v14326_v22 = vor.u32 %v16784_v5, %v14325_v39  ;;  %v13751_v13 = vld [vmem:[#allocation7 + $0x940] sm:$0xf0]  ;;  %v12797_v1 = vld [vmem:[#allocation7 + $0x188] sm:$0xf]  ;;  %v13567_v39 = vld [vmem:[#allocation7 + $0x7c8] sm:$0xf0] }
 0x3dc   :  { %7298 = vmatpush.bf16.msrb.mxu0 %v12922_v8  ;;  %7311 = vmatpush.bf16.msrb.mxu1 %v13434_v35  ;;  %v16472_v8 = vld [vmem:[#allocation7 + $0x404] sm:$0xf]  ;;  %v13754_v15 = vor.u32 %v16632_v4, %v13751_v13  ;;  %v16401_v33 = vld [vmem:[#allocation7 + $0x1c4] sm:$0xf0] }
 0x3dd   :  { %v13111_v35 = vld [vmem:[#allocation7 + $0x440] sm:$0xf0]  ;;  %7265 = vmatmul.bf16.vlgmr.msra.gmra.mxu1 %v17570_v27 }
 0x3de   :  { %v13114_v38 = vor.u32 %v16472_v8, %v13111_v35  ;;  %v14261_v8 = vld [vmem:[#allocation7 + $0xd00] sm:$0xf]  ;;  %v16840_v54 = vld [vmem:[#allocation7 + $0xf84] sm:$0xf] }
 0x3df   :  { %7284 = vmatpush.bf16.msra.mxu3 %v14518_v34  ;;  %7324 = vmatpush.bf16.msrb.mxu2 %v13946_v41  ;;  %v16768_v35 = vld [vmem:[#allocation7 + $0xd3c] sm:$0xf0]  ;;  %v12798_v34 = vor.u32 %v16401_v33, %v12797_v1  ;;  %v16600_v41 = vld [vmem:[#allocation7 + $0x804] sm:$0xf] }
 0x3e0   :  { %7299 = vmatpush.bf16.msrb.mxu0 %v12858_v37  ;;  %7312 = vmatpush.bf16.msrb.mxu1 %v13370_v10  ;;  %v12602_v10 = vor.u32 %v16344_v32, %v12599_v19  ;;  %v12862_v32 = vor.u32 %v16417_v6, %v12861_v18  ;;  %v13374_v19 = vor.u32 %v16545_v7, %v13373_v3  ;;  %v16353_v18 = vld [vmem:[#allocation7 + $0x44] sm:$0xf0]  ;;  %v16457_v6 = vld [vmem:[#allocation7 + $0x38c] sm:$0xf]  ;;  %v16824_v5 = vld [vmem:[#allocation7 + $0xf04] sm:$0xf] }
 0x3e1   :  { %v4009_v0 = vpop.f32.mrf.mxu2  ;;  %v4022_v37 = vpop.f32.mrf.mxu3  ;;  %v14262_v2 = vor.u32 %v16768_v35, %v14261_v8  ;;  %v13055_v3 = vld [vmem:[#allocation7 + $0x3c8] sm:$0xf0]  ;;  %v14519_v4 = vld [vmem:[#allocation7 + $0xf40] sm:$0xf0]  ;;  %v12606_v13 = vor.u32 %v16353_v18, %v12605_v55 }
 0x3e2   :  { %v16385_v0 = vld [vmem:[#allocation7 + $0x144] sm:$0xf0]  ;;  %v16585_v7 = vld [vmem:[#allocation7 + $0x78c] sm:$0xf] }
 0x3e3   :  { %v13245_v37 = vld [vmem:[#allocation7 + $0x508] sm:$0xf]  ;;  %v12734_v44 = vor.u32 %v16385_v0, %v12733_v29  ;;  %v13570_v33 = vor.u32 %v16585_v7, %v13567_v39  ;;  %v12991_v8 = vld [vmem:[#allocation7 + $0x348] sm:$0xf0] }
 0x3e4   :  { %7300 = vmatpush.bf16.msrb.mxu0 %v12794_v48  ;;  %7313 = vmatpush.bf16.msrb.mxu1 %v13306_v11  ;;  %v14454_v48 = vor.u32 %v16816_v16, %v14453_v46  ;;  %v13879_v11 = vld [vmem:[#allocation7 + $0xa40] sm:$0xf0]  ;;  %v12669_v46 = vld [vmem:[#allocation7 + $0x88] sm:$0xf]  ;;  %v16569_v35 = vld [vmem:[#allocation7 + $0x70c] sm:$0xf] }
 0x3e5   :  { %v13882_v50 = vor.u32 %v16664_v47, %v13879_v11  ;;  %v13181_v11 = vld [vmem:[#allocation7 + $0x488] sm:$0xf]  ;;  %v13311_v55 = vld [vmem:[#allocation7 + $0x5c8] sm:$0xf0] }
 0x3e6   :  { %7285 = vmatpush.bf16.msra.mxu3 %v14454_v48  ;;  %v16369_v48 = vld [vmem:[#allocation7 + $0xc4] sm:$0xf0]  ;;  %v16377_v7 = vld [vmem:[#allocation7 + $0x10c] sm:$0xf] }
 0x3e7   :  { %7325 = vmatpush.bf16.msrb.mxu2 %v13882_v50  ;;  %v12735_v39 = vld [vmem:[#allocation7 + $0x148] sm:$0xf0] }
 0x3e8   :  { %7301 = vmatpush.bf16.msrb.mxu0 %v12730_v59  ;;  %7314 = vmatpush.bf16.msrb.mxu1 %v13242_v60  ;;  %v13818_v59 = vor.u32 %v16648_v49, %v13815_v14  ;;  %v12926_v60 = vor.u32 %v16433_v52, %v12925_v58  ;;  %v16497_v58 = vld [vmem:[#allocation7 + $0x4c4] sm:$0xf0]  ;;  %v16736_v52 = vld [vmem:[#allocation7 + $0xc3c] sm:$0xf0]  ;;  %v14583_v49 = vld [vmem:[#allocation7 + $0xfc0] sm:$0xf0] }
 0x3e9   :  { %v13182_v14 = vor.u32 %v16497_v58, %v13181_v11  ;;  %v14327_v11 = vld [vmem:[#allocation7 + $0xdc0] sm:$0xf0] }
 0x3ea   :  { %7286 = vmatpush.bf16.msra.mxu3 %v14390_v56  ;;  %v12670_v56 = vor.u32 %v16369_v48, %v12669_v46  ;;  %v13375_v46 = vld [vmem:[#allocation7 + $0x648] sm:$0xf0]  ;;  %v16776_v48 = vld [vmem:[#allocation7 + $0xd84] sm:$0xf] }
 0x3eb   :  { %7326 = vmatpush.bf16.msrb.mxu2 %v13818_v59  ;;  %v13117_v59 = vld [vmem:[#allocation7 + $0x408] sm:$0xf]  ;;  %v14330_v58 = vor.u32 %v16776_v48, %v14327_v11  ;;  %v16594_v48 = vld [vmem:[#allocation7 + $0x7cc] sm:$0xf0] }
 0x3ec   :  { %7302 = vmatpush.bf16.msrb.mxu0 %v12666_v20  ;;  %7315 = vmatpush.bf16.msrb.mxu1 %v13178_v24  ;;  %v13309_v20 = vld [vmem:[#allocation7 + $0x588] sm:$0xf] }
 0x3ed   :  { %v16529_v24 = vld [vmem:[#allocation7 + $0x5c4] sm:$0xf0] }
 0x3ee   :  { %7287 = vmatpush.bf16.msra.mxu3 %v14326_v22  ;;  %v13310_v36 = vor.u32 %v16529_v24, %v13309_v20  ;;  %v14522_v22 = vor.u32 %v16824_v5, %v14519_v4  ;;  %v16441_v20 = vld [vmem:[#allocation7 + $0x30c] sm:$0xf]  ;;  %v16744_v4 = vld [vmem:[#allocation7 + $0xc84] sm:$0xf] }
 0x3ef   :  { %7327 = vmatpush.bf16.msrb.mxu2 %v13754_v15  ;;  %v13247_v5 = vld [vmem:[#allocation7 + $0x548] sm:$0xf0] }
 0x3f0   :  { %7303 = vmatpush.bf16.msrb.mxu0 %v12602_v10  ;;  %7316 = vmatpush.bf16.msrb.mxu1 %v13114_v38  ;;  %v17575_v26 = vpop.f32.mrf.mxu0  ;;  %v17577_v61 = vpop.f32.mrf.mxu1  ;;  %v16513_v10 = vld [vmem:[#allocation7 + $0x544] sm:$0xf0]  ;;  %v14197_v38 = vld [vmem:[#allocation7 + $0xc80] sm:$0xf] }
 0x3f1   :  { %v13246_v45 = vor.u32 %v16513_v10, %v13245_v37  ;;  %v3982_v24 = vadd.f32 %v17575_v26, %v2850_v30  ;;  %v12927_v37 = vld [vmem:[#allocation7 + $0x2c8] sm:$0xf0]  ;;  %v16792_v26 = vld [vmem:[#allocation7 + $0xe04] sm:$0xf] }
 0x3f2   :  { %7288 = vmatpush.bf16.msra.mxu3 %v14262_v2  ;;  %v16808_v2 = vld [vmem:[#allocation7 + $0xe84] sm:$0xf]  ;;  %v16553_v10 = vld [vmem:[#allocation7 + $0x68c] sm:$0xf] }
 0x3f3   :  { %7304 = vmatmul.bf16.vlgmr.msrb.gmra.mxu0 %v17554_v21  ;;  %7317 = vmatmul.bf16.vlgmr.msrb.gmra.mxu1 %v17570_v27  ;;  %v14458_v29 = vor.u32 %v16808_v2, %v14455_v28  ;;  %v3995_v0 = vadd.f32 %v17577_v61, %v3982_v24  ;;  %v16537_v61 = vld [vmem:[#allocation7 + $0x60c] sm:$0xf] }
 0x3f4   :  { %7348 = vmatpush.bf16.msra.mxu0 %v13054_v62  ;;  %7361 = vmatpush.bf16.msra.mxu1 %v13566_v42  ;;  %v14198_v62 = vor.u32 %v16752_v40, %v14197_v38  ;;  %v13623_v42 = vld [vmem:[#allocation7 + $0x840] sm:$0xf0]  ;;  %v13439_v38 = vld [vmem:[#allocation7 + $0x6c8] sm:$0xf0] }
 0x3f5   :  { %7328 = vmatpush.bf16.msrb.mxu2 %v13690_v31  ;;  %v13626_v43 = vor.u32 %v16600_v41, %v13623_v42  ;;  %v12994_v31 = vor.u32 %v16441_v20, %v12991_v8  ;;  %v14391_v40 = vld [vmem:[#allocation7 + $0xe40] sm:$0xf0]  ;;  %v13442_v42 = vor.u32 %v16553_v10, %v13439_v38  ;;  %v16521_v30 = vld [vmem:[#allocation7 + $0x58c] sm:$0xf] }
 0x3f6   :  { %7289 = vmatpush.bf16.msra.mxu3 %v14198_v62  ;;  %v14394_v41 = vor.u32 %v16792_v26, %v14391_v40  ;;  %v12671_v2 = vld [vmem:[#allocation7 + $0xc8] sm:$0xf0]  ;;  %v13949_v26 = vld [vmem:[#allocation7 + $0xa88] sm:$0xf] }
 0x3f7   :  { %v16489_v28 = vld [vmem:[#allocation7 + $0x48c] sm:$0xf]  ;;  %v16689_v40 = vld [vmem:[#allocation7 + $0xac4] sm:$0xf0] }
 0x3f8   :  { %7349 = vmatpush.bf16.msra.mxu0 %v12990_v9  ;;  %7362 = vmatpush.bf16.msra.mxu1 %v13502_v51  ;;  %v3983_v50 = vpop.f32.mrf.mxu0  ;;  %v3996_v9 = vpop.f32.mrf.mxu1  ;;  %v14133_v51 = vld [vmem:[#allocation7 + $0xc00] sm:$0xf]  ;;  %v13950_v11 = vor.u32 %v16689_v40, %v13949_v26 }
 0x3f9   :  { %v17579_v16 = vpop.f32.mrf.mxu2  ;;  %v17581_v47 = vpop.f32.mrf.mxu3  ;;  %7329 = vmatpush.bf16.msrb.mxu2 %v13626_v43  ;;  %v14134_v17 = vor.u32 %v16736_v52, %v14133_v51  ;;  %v16409_v43 = vld [vmem:[#allocation7 + $0x20c] sm:$0xf]  ;;  %v13378_v9 = vor.u32 %v16537_v61, %v13375_v46  ;;  %v16466_v61 = vld [vmem:[#allocation7 + $0x3cc] sm:$0xf0] }
 0x3fa   :  { %v16393_v51 = vld [vmem:[#allocation7 + $0x18c] sm:$0xf]  ;;  %v13573_v46 = vld [vmem:[#allocation7 + $0x790] sm:$0xf] }
 0x3fb   :  { %7290 = vmatpush.bf16.msra.mxu3 %v14134_v17 }
 0x3fc   :  { %7350 = vmatpush.bf16.msra.mxu0 %v12926_v60  ;;  %7363 = vmatpush.bf16.msra.mxu1 %v13438_v63  ;;  %v16481_v60 = vld [vmem:[#allocation7 + $0x444] sm:$0xf0]  ;;  %v14586_v63 = vor.u32 %v16840_v54, %v14583_v49  ;;  %v12799_v54 = vld [vmem:[#allocation7 + $0x1c8] sm:$0xf0]  ;;  %v16760_v49 = vld [vmem:[#allocation7 + $0xd04] sm:$0xf] }
 0x3fd   :  { %v13118_v1 = vor.u32 %v16481_v60, %v13117_v59  ;;  %v12802_v59 = vor.u32 %v16393_v51, %v12799_v54  ;;  %v13314_v60 = vor.u32 %v16521_v30, %v13311_v55  ;;  %v13885_v54 = vld [vmem:[#allocation7 + $0xa08] sm:$0xf]  ;;  %v13574_v55 = vor.u32 %v16594_v48, %v13573_v46  ;;  %v13253_v48 = vld [vmem:[#allocation7 + $0x510] sm:$0xf] }
 0x3fe   :  { %v16673_v30 = vld [vmem:[#allocation7 + $0xa44] sm:$0xf0] }
 0x3ff   :  { %7335 = vmatpush.bf16.msrb.mxu3 %v14586_v63  ;;  %v14077_v63 = vld [vmem:[#allocation7 + $0xb88] sm:$0xf] }
 0x400   :  { %7351 = vmatpush.bf16.msra.mxu0 %v12862_v32  ;;  %7364 = vmatpush.bf16.msra.mxu1 %v13374_v19  ;;  %v13058_v19 = vor.u32 %v16457_v6, %v13055_v3  ;;  %v16721_v6 = vld [vmem:[#allocation7 + $0xbc4] sm:$0xf0] }
 0x401   :  { %v4061_v15 = vpop.f32.mrf.mxu2  ;;  %v4074_v32 = vpop.f32.mrf.mxu3 }
 0x402   :  { %v14078_v15 = vor.u32 %v16721_v6, %v14077_v63  ;;  %v12738_v32 = vor.u32 %v16377_v7, %v12735_v39  ;;  %v12933_v6 = vld [vmem:[#allocation7 + $0x290] sm:$0xf]  ;;  %v2851_v7 = vperm.slane %v17543_v53, 3 }
 0x403   :  { %7336 = vmatpush.bf16.msrb.mxu3 %v14522_v22  ;;  %v14199_v22 = vld [vmem:[#allocation7 + $0xcc0] sm:$0xf0]  ;;  %v13445_v39 = vld [vmem:[#allocation7 + $0x690] sm:$0xf] }
 0x404   :  { %7352 = vmatpush.bf16.msra.mxu0 %v12798_v34  ;;  %7365 = vmatpush.bf16.msra.mxu1 %v13310_v36  ;;  %v13506_v34 = vor.u32 %v16569_v35, %v13503_v23  ;;  %v16425_v36 = vld [vmem:[#allocation7 + $0x28c] sm:$0xf]  ;;  %v13381_v53 = vld [vmem:[#allocation7 + $0x610] sm:$0xf] }
 0x405   :  { %v12930_v62 = vor.u32 %v16425_v36, %v12927_v37  ;;  %v16361_v23 = vld [vmem:[#allocation7 + $0x8c] sm:$0xf]  ;;  %v16728_v36 = vld [vmem:[#allocation7 + $0xc04] sm:$0xf] }
 0x406   :  { %v12674_v38 = vor.u32 %v16361_v23, %v12671_v2  ;;  %v13693_v2 = vld [vmem:[#allocation7 + $0x888] sm:$0xf] }
 0x407   :  { %7337 = vmatpush.bf16.msrb.mxu3 %v14458_v29 }
 0x408   :  { %7353 = vmatpush.bf16.msra.mxu0 %v12734_v44  ;;  %7366 = vmatpush.bf16.msra.mxu1 %v13246_v45  ;;  %v4008_v44 = vadd.f32 %v17566_v25, %v3995_v0  ;;  %v12863_v45 = vld [vmem:[#allocation7 + $0x248] sm:$0xf0]  ;;  %v14135_v0 = vld [vmem:[#allocation7 + $0xc40] sm:$0xf0] }
 0x409   :  { %v12866_v50 = vor.u32 %v16409_v43, %v12863_v45  ;;  %v14138_v37 = vor.u32 %v16728_v36, %v14135_v0  ;;  %v16473_v43 = vld [vmem:[#allocation7 + $0x40c] sm:$0xf]  ;;  %v13061_v45 = vld [vmem:[#allocation7 + $0x390] sm:$0xf] }
 0x40a   :  { %v4021_v52 = vadd.f32 %v17568_v57, %v4008_v44  ;;  %v16505_v57 = vld [vmem:[#allocation7 + $0x50c] sm:$0xf]  ;;  %v13317_v0 = vld [vmem:[#allocation7 + $0x590] sm:$0xf] }
 0x40b   :  { %7338 = vmatpush.bf16.msrb.mxu3 %v14394_v41  ;;  %v13250_v35 = vor.u32 %v16505_v57, %v13247_v5  ;;  %v13119_v44 = vld [vmem:[#allocation7 + $0x448] sm:$0xf0]  ;;  %v16562_v57 = vld [vmem:[#allocation7 + $0x6cc] sm:$0xf0] }
 0x40c   :  { %7354 = vmatpush.bf16.msra.mxu0 %v12670_v56  ;;  %7367 = vmatpush.bf16.msra.mxu1 %v13182_v14  ;;  %v14263_v56 = vld [vmem:[#allocation7 + $0xd40] sm:$0xf0]  ;;  %v13122_v51 = vor.u32 %v16473_v43, %v13119_v44  ;;  %v14079_v44 = vld [vmem:[#allocation7 + $0xbc8] sm:$0xf0] }
 0x40d   :  { %v14266_v18 = vor.u32 %v16760_v49, %v14263_v56  ;;  %v13509_v49 = vld [vmem:[#allocation7 + $0x710] sm:$0xf] }
 0x40e   :  { %v16578_v56 = vld [vmem:[#allocation7 + $0x74c] sm:$0xf0] }
 0x40f   :  { %7339 = vmatpush.bf16.msrb.mxu3 %v14330_v58  ;;  %v13510_v63 = vor.u32 %v16578_v56, %v13509_v49  ;;  %v16370_v49 = vld [vmem:[#allocation7 + $0xcc] sm:$0xf0] }
 0x410   :  { %7355 = vmatpush.bf16.msra.mxu0 %v12606_v13  ;;  %7368 = vmatpush.bf16.msra.mxu1 %v13118_v1  ;;  %v4033_v17 = vpop.f32.mrf.mxu0  ;;  %v4046_v25 = vpop.f32.mrf.mxu1  ;;  %v14202_v1 = vor.u32 %v16744_v4, %v14199_v22  ;;  %v13757_v22 = vld [vmem:[#allocation7 + $0x908] sm:$0xf] }
 0x411   :  { %v4034_v14 = vadd.f32 %v4033_v17, %v4021_v52  ;;  %v13062_v52 = vor.u32 %v16466_v61, %v13061_v45  ;;  %v12997_v17 = vld [vmem:[#allocation7 + $0x310] sm:$0xf] }
 0x412   :  { %v12741_v45 = vld [vmem:[#allocation7 + $0x110] sm:$0xf] }
 0x413   :  { %7356 = vmatmul.bf16.vlgmr.msra.gmra.mxu0 %v17554_v21  ;;  %7369 = vmatmul.bf16.vlgmr.msra.gmra.mxu1 %v17570_v27  ;;  %v4047_v3 = vadd.f32 %v4046_v25, %v4034_v14  ;;  %v16450_v25 = vld [vmem:[#allocation7 + $0x34c] sm:$0xf0]  ;;  %v13886_v14 = vor.u32 %v16673_v30, %v13885_v54  ;;  %v16697_v54 = vld [vmem:[#allocation7 + $0xb0c] sm:$0xf] }
 0x414   :  { %7400 = vmatpush.bf16.msrb.mxu0 %v13058_v19  ;;  %7413 = vmatpush.bf16.msrb.mxu1 %v13570_v33  ;;  %v14013_v19 = vld [vmem:[#allocation7 + $0xb08] sm:$0xf]  ;;  %v16386_v61 = vld [vmem:[#allocation7 + $0x14c] sm:$0xf0]  ;;  %v14015_v30 = vld [vmem:[#allocation7 + $0xb48] sm:$0xf0] }
 0x415   :  { %7340 = vmatpush.bf16.msrb.mxu3 %v14266_v18  ;;  %v4130_v13 = vmax.f32 %v4047_v3, 0.0  ;;  %v16705_v33 = vld [vmem:[#allocation7 + $0xb44] sm:$0xf0]  ;;  %v12998_v18 = vor.u32 %v16450_v25, %v12997_v17  ;;  %v16434_v3 = vld [vmem:[#allocation7 + $0x2cc] sm:$0xf0] }
 0x416   :  { %v14014_v10 = vor.u32 %v16705_v33, %v14013_v19  ;;  %v12934_v4 = vor.u32 %v16434_v3, %v12933_v6  ;;  %v4060_v19 = vadd.f32 %v17579_v16, %v2851_v7  ;;  %v16546_v33 = vld [vmem:[#allocation7 + $0x64c] sm:$0xf0]  ;;  %v16849_v17 = vld [vmem:[#allocation7 + $0xfc4] sm:$0xf0] }
 0x417   :  { %v17590_v20 = vpack.c.bf16 %v4130_v13, %v4130_v13  ;;  %v16641_v13 = vld [vmem:[#allocation7 + $0x944] sm:$0xf0]  ;;  %v12677_v25 = vld [vmem:[#allocation7 + $0x90] sm:$0xf] }
 0x418   :  { %7401 = vmatpush.bf16.msrb.mxu0 %v12994_v31  ;;  %7414 = vmatpush.bf16.msrb.mxu1 %v13506_v34  ;;  %v17592_v24 = vpop.f32.mrf.mxu2  ;;  %v17594_v8 = vpop.f32.mrf.mxu3  ;;  %v13183_v34 = vld [vmem:[#allocation7 + $0x4c8] sm:$0xf0]  ;;  %v4073_v36 = vadd.f32 %v17581_v47, %v4060_v19  ;;  %v16514_v47 = vld [vmem:[#allocation7 + $0x54c] sm:$0xf0]  ;;  %v12678_v3 = vor.u32 %v16370_v49, %v12677_v25  ;;  %v16833_v7 = vld [vmem:[#allocation7 + $0xf44] sm:$0xf0] }
 0x419   :  { %7341 = vmatpush.bf16.msrb.mxu3 %v14202_v1  ;;  %v4035_v29 = vpop.f32.mrf.mxu0  ;;  %v4048_v31 = vpop.f32.mrf.mxu1  ;;  %7278 = vmatmul.bf16.vlgmr.msra.gmra.mxu2 %v17590_v20  ;;  %v13186_v41 = vor.u32 %v16489_v28, %v13183_v34  ;;  %v13446_v1 = vor.u32 %v16562_v57, %v13445_v39  ;;  %v16625_v28 = vld [vmem:[#allocation7 + $0x8c4] sm:$0xf0]  ;;  %v16402_v34 = vld [vmem:[#allocation7 + $0x1cc] sm:$0xf0]  ;;  %v16681_v39 = vld [vmem:[#allocation7 + $0xa8c] sm:$0xf] }
 0x41a   :  { %7374 = vmatpush.bf16.msra.mxu2 %v14078_v15  ;;  %v12869_v15 = vld [vmem:[#allocation7 + $0x210] sm:$0xf]  ;;  %v13382_v29 = vor.u32 %v16546_v33, %v13381_v53  ;;  %v13951_v57 = vld [vmem:[#allocation7 + $0xac8] sm:$0xf0]  ;;  %v16586_v53 = vld [vmem:[#allocation7 + $0x794] sm:$0xf] }
 0x41b   :  { %v12805_v31 = vld [vmem:[#allocation7 + $0x190] sm:$0xf]  ;;  %v13954_v19 = vor.u32 %v16681_v39, %v13951_v57  ;;  %v13575_v33 = vld [vmem:[#allocation7 + $0x7d0] sm:$0xf0] }
 0x41c   :  { %7402 = vmatpush.bf16.msrb.mxu0 %v12930_v62  ;;  %7415 = vmatpush.bf16.msrb.mxu1 %v13442_v42  ;;  %v16345_v62 = vld [vmem:[#allocation7 + $0xc] sm:$0xf]  ;;  %v12806_v40 = vor.u32 %v16402_v34, %v12805_v31  ;;  %v14461_v34 = vld [vmem:[#allocation7 + $0xe88] sm:$0xf]  ;;  %v16538_v49 = vld [vmem:[#allocation7 + $0x614] sm:$0xf] }
 0x41d   :  { %v12607_v42 = vld [vmem:[#allocation7 + $0x48] sm:$0xf0]  ;;  %7342 = vmatpush.bf16.msrb.mxu3 %v14138_v37  ;;  %v16530_v37 = vld [vmem:[#allocation7 + $0x5cc] sm:$0xf0] }
 0x41e   :  { %7375 = vmatpush.bf16.msra.mxu2 %v14014_v10  ;;  %v12610_v58 = vor.u32 %v16345_v62, %v12607_v42  ;;  %v16609_v62 = vld [vmem:[#allocation7 + $0x844] sm:$0xf0]  ;;  %v16713_v42 = vld [vmem:[#allocation7 + $0xb8c] sm:$0xf]  ;;  %v13318_v43 = vor.u32 %v16530_v37, %v13317_v0  ;;  %v13578_v0 = vor.u32 %v16586_v53, %v13575_v33  ;;  %v16442_v37 = vld [vmem:[#allocation7 + $0x314] sm:$0xf] }
 0x41f   :  { %v14085_v53 = vld [vmem:[#allocation7 + $0xb90] sm:$0xf] }
 0x420   :  { %7403 = vmatpush.bf16.msrb.mxu0 %v12866_v50  ;;  %7416 = vmatpush.bf16.msrb.mxu1 %v13378_v9  ;;  %v4113_v50 = vpop.f32.mrf.mxu2  ;;  %v4126_v9 = vpop.f32.mrf.mxu3  ;;  %v16722_v33 = vld [vmem:[#allocation7 + $0xbcc] sm:$0xf0] }
 0x421   :  { %v14082_v50 = vor.u32 %v16713_v42, %v14079_v44  ;;  %v12742_v9 = vor.u32 %v16386_v61, %v12741_v45  ;;  %v16801_v44 = vld [vmem:[#allocation7 + $0xe44] sm:$0xf0]  ;;  %v16426_v61 = vld [vmem:[#allocation7 + $0x294] sm:$0xf] }
 0x422   :  { %7376 = vmatpush.bf16.msra.mxu2 %v13950_v11 }
 0x424   :  { %7404 = vmatpush.bf16.msrb.mxu0 %v12802_v59  ;;  %7417 = vmatpush.bf16.msrb.mxu1 %v13314_v60  ;;  %v13821_v59 = vld [vmem:[#allocation7 + $0x988] sm:$0xf] }
 0x425   :  { %v16657_v60 = vld [vmem:[#allocation7 + $0x9c4] sm:$0xf0] }
 0x426   :  { %7377 = vmatpush.bf16.msra.mxu2 %v13886_v14  ;;  %v13822_v5 = vor.u32 %v16657_v60, %v13821_v59  ;;  %v16498_v59 = vld [vmem:[#allocation7 + $0x4cc] sm:$0xf0] }
 0x428   :  { %7405 = vmatpush.bf16.msrb.mxu0 %v12738_v32  ;;  %7418 = vmatpush.bf16.msrb.mxu1 %v13250_v35  ;;  %v16418_v32 = vld [vmem:[#allocation7 + $0x24c] sm:$0xf0]  ;;  %v13758_v35 = vor.u32 %v16641_v13, %v13757_v22 }
 0x429   :  { %7330 = vmatmul.bf16.vlgmr.msrb.gmra.mxu2 %v17590_v20  ;;  %v12870_v23 = vor.u32 %v16418_v32, %v12869_v15  ;;  %v16354_v22 = vld [vmem:[#allocation7 + $0x4c] sm:$0xf0]  ;;  %v16458_v15 = vld [vmem:[#allocation7 + $0x394] sm:$0xf] }
 0x42a   :  { %7378 = vmatpush.bf16.msra.mxu2 %v13822_v5  ;;  %v13125_v13 = vld [vmem:[#allocation7 + $0x410] sm:$0xf]  ;;  %v13063_v32 = vld [vmem:[#allocation7 + $0x3d0] sm:$0xf0] }
 0x42b   :  { %v13066_v31 = vor.u32 %v16458_v15, %v13063_v32  ;;  %v13631_v15 = vld [vmem:[#allocation7 + $0x848] sm:$0xf0] }
 0x42c   :  { %7406 = vmatpush.bf16.msrb.mxu0 %v12674_v38  ;;  %7419 = vmatpush.bf16.msrb.mxu1 %v13186_v41  ;;  %v13694_v38 = vor.u32 %v16625_v28, %v13693_v2  ;;  %v13629_v41 = vld [vmem:[#allocation7 + $0x808] sm:$0xf]  ;;  %v16665_v2 = vld [vmem:[#allocation7 + $0xa0c] sm:$0xf] }
 0x42d   :  { %v13630_v11 = vor.u32 %v16609_v62, %v13629_v41  ;;  %v13887_v28 = vld [vmem:[#allocation7 + $0xa48] sm:$0xf0] }
 0x42e   :  { %7379 = vmatpush.bf16.msra.mxu2 %v13758_v35  ;;  %v16649_v41 = vld [vmem:[#allocation7 + $0x98c] sm:$0xf] }
 0x42f   :  { %v13823_v62 = vld [vmem:[#allocation7 + $0x9c8] sm:$0xf0] }
 0x430   :  { %7407 = vmatpush.bf16.msrb.mxu0 %v12610_v58  ;;  %7420 = vmatpush.bf16.msrb.mxu1 %v13122_v51  ;;  %v4085_v10 = vpop.f32.mrf.mxu0  ;;  %v4098_v16 = vpop.f32.mrf.mxu1  ;;  %v13254_v51 = vor.u32 %v16514_v47, %v13253_v48  ;;  %v13826_v48 = vor.u32 %v16649_v41, %v13823_v62  ;;  %v16554_v47 = vld [vmem:[#allocation7 + $0x694] sm:$0xf]  ;;  %v14591_v41 = vld [vmem:[#allocation7 + $0xfc8] sm:$0xf0] }
 0x431   :  { %v4086_v26 = vadd.f32 %v4085_v10, %v4073_v36  ;;  %v16817_v36 = vld [vmem:[#allocation7 + $0xec4] sm:$0xf0]  ;;  %v12999_v10 = vld [vmem:[#allocation7 + $0x350] sm:$0xf0] }
 0x432   :  { %7380 = vmatpush.bf16.msra.mxu2 %v13694_v38  ;;  %v16570_v38 = vld [vmem:[#allocation7 + $0x714] sm:$0xf]  ;;  %v13002_v42 = vor.u32 %v16442_v37, %v12999_v10  ;;  %v16737_v37 = vld [vmem:[#allocation7 + $0xc44] sm:$0xf0] }
 0x433   :  { %7408 = vmatmul.bf16.vlgmr.msrb.gmra.mxu0 %v17554_v21  ;;  %7421 = vmatmul.bf16.vlgmr.msrb.gmra.mxu1 %v17570_v27  ;;  %v4099_v46 = vadd.f32 %v4098_v16, %v4086_v26  ;;  %v13890_v16 = vor.u32 %v16665_v2, %v13887_v28  ;;  %v13511_v26 = vld [vmem:[#allocation7 + $0x750] sm:$0xf0] }
 0x434   :  { %7452 = vmatpush.bf16.msra.mxu0 %v13062_v52  ;;  %7465 = vmatpush.bf16.msra.mxu1 %v13574_v55  ;;  %v14589_v52 = vld [vmem:[#allocation7 + $0xf88] sm:$0xf]  ;;  %v13514_v45 = vor.u32 %v16570_v38, %v13511_v26  ;;  %v12743_v2 = vld [vmem:[#allocation7 + $0x150] sm:$0xf0]  ;;  %v14021_v38 = vld [vmem:[#allocation7 + $0xb10] sm:$0xf] }
 0x435   :  { %v4112_v58 = vadd.f32 %v17592_v24, %v4099_v46  ;;  %v14018_v24 = vor.u32 %v16697_v54, %v14015_v30  ;;  %v14590_v6 = vor.u32 %v16849_v17, %v14589_v52  ;;  %v12935_v46 = vld [vmem:[#allocation7 + $0x2d0] sm:$0xf0]  ;;  %v14333_v52 = vld [vmem:[#allocation7 + $0xd88] sm:$0xf]  ;;  %v16706_v26 = vld [vmem:[#allocation7 + $0xb4c] sm:$0xf0] }
 0x436   :  { %7381 = vmatpush.bf16.msra.mxu2 %v13630_v11  ;;  %v13447_v11 = vld [vmem:[#allocation7 + $0x6d0] sm:$0xf0]  ;;  %v16785_v54 = vld [vmem:[#allocation7 + $0xdc4] sm:$0xf0] }
 0x437   :  { %v4125_v55 = vadd.f32 %v17594_v8, %v4112_v58  ;;  %v13450_v30 = vor.u32 %v16554_v47, %v13447_v11  ;;  %v12871_v17 = vld [vmem:[#allocation7 + $0x250] sm:$0xf0] }
 0x438   :  { %7453 = vmatpush.bf16.msra.mxu0 %v12998_v18  ;;  %7466 = vmatpush.bf16.msra.mxu1 %v13510_v63  ;;  %v4087_v56 = vpop.f32.mrf.mxu0  ;;  %v4100_v14 = vpop.f32.mrf.mxu1  ;;  %v13189_v18 = vld [vmem:[#allocation7 + $0x490] sm:$0xf]  ;;  %v14525_v63 = vld [vmem:[#allocation7 + $0xf08] sm:$0xf]  ;;  %v16362_v62 = vld [vmem:[#allocation7 + $0x94] sm:$0xf] }
 0x439   :  { %v4131_v60 = vmax.f32 %v4125_v55, 0.0  ;;  %7382 = vmatmul.bf16.vlgmr.msra.gmra.mxu2 %v17590_v20  ;;  %v13190_v5 = vor.u32 %v16498_v59, %v13189_v18  ;;  %v14526_v35 = vor.u32 %v16833_v7, %v14525_v63  ;;  %v16410_v55 = vld [vmem:[#allocation7 + $0x214] sm:$0xf]  ;;  %v14334_v14 = vor.u32 %v16785_v54, %v14333_v52  ;;  %v16617_v18 = vld [vmem:[#allocation7 + $0x88c] sm:$0xf] }
 0x43a   :  { %7426 = vmatpush.bf16.msrb.mxu2 %v14082_v50  ;;  %v16633_v50 = vld [vmem:[#allocation7 + $0x90c] sm:$0xf]  ;;  %v13383_v56 = vld [vmem:[#allocation7 + $0x650] sm:$0xf0]  ;;  %v16769_v63 = vld [vmem:[#allocation7 + $0xd44] sm:$0xf0] }
 0x43b   :  { %v17605_v8 = vpack.c.bf16 %v4131_v60, %v4131_v60  ;;  %v13695_v59 = vld [vmem:[#allocation7 + $0x8c8] sm:$0xf0]  ;;  %v12874_v60 = vor.u32 %v16410_v55, %v12871_v17  ;;  %v12807_v7 = vld [vmem:[#allocation7 + $0x1d0] sm:$0xf0] }
 0x43c   :  { %7454 = vmatpush.bf16.msra.mxu0 %v12934_v4  ;;  %7467 = vmatpush.bf16.msra.mxu1 %v13446_v1  ;;  %v12613_v4 = vld [vmem:[#allocation7 + $0x10] sm:$0xf]  ;;  %v13698_v57 = vor.u32 %v16617_v18, %v13695_v59  ;;  %v16346_v54 = vld [vmem:[#allocation7 + $0x14] sm:$0xf]  ;;  %v16595_v18 = vld [vmem:[#allocation7 + $0x7d4] sm:$0xf0] }
 0x43d   :  { %v16482_v1 = vld [vmem:[#allocation7 + $0x44c] sm:$0xf0]  ;;  %7291 = vmatmul.bf16.vlgmr.msra.gmra.mxu3 %v17605_v8  ;;  %v16474_v55 = vld [vmem:[#allocation7 + $0x414] sm:$0xf] }
 0x43e   :  { %7427 = vmatpush.bf16.msrb.mxu2 %v14018_v24  ;;  %7387 = vmatpush.bf16.msra.mxu3 %v14590_v6  ;;  %v14269_v24 = vld [vmem:[#allocation7 + $0xd08] sm:$0xf]  ;;  %v13386_v6 = vor.u32 %v16538_v49, %v13383_v56  ;;  %v17614_v47 = vld [vmem:[#allocation9 + $0xd] sm:$0xff]  ;;  %v16467_v49 = vld [vmem:[#allocation7 + $0x3d4] sm:$0xf0] }
 0x43f   :  { %v13127_v17 = vld [vmem:[#allocation7 + $0x450] sm:$0xf0] }
 0x440   :  { %7455 = vmatpush.bf16.msra.mxu0 %v12870_v23  ;;  %7468 = vmatpush.bf16.msra.mxu1 %v13382_v29  ;;  %v12614_v23 = vor.u32 %v16354_v22, %v12613_v4  ;;  %v13126_v29 = vor.u32 %v16482_v1, %v13125_v13  ;;  %v13319_v4 = vld [vmem:[#allocation7 + $0x5d0] sm:$0xf0]  ;;  %v14270_v22 = vor.u32 %v16769_v63, %v14269_v24  ;;  %v14205_v13 = vld [vmem:[#allocation7 + $0xc88] sm:$0xf]  ;;  %v16601_v1 = vld [vmem:[#allocation7 + $0x80c] sm:$0xf] }
 0x441   :  { %v13634_v28 = vor.u32 %v16601_v1, %v13631_v15  ;;  %v13893_v24 = vld [vmem:[#allocation7 + $0xa10] sm:$0xf]  ;;  %v13517_v15 = vld [vmem:[#allocation7 + $0x718] sm:$0xf] }
 0x442   :  { %7428 = vmatpush.bf16.msrb.mxu2 %v13954_v19  ;;  %7388 = vmatpush.bf16.msra.mxu3 %v14526_v35  ;;  %v16753_v19 = vld [vmem:[#allocation7 + $0xcc4] sm:$0xf0]  ;;  %v16674_v63 = vld [vmem:[#allocation7 + $0xa4c] sm:$0xf0] }
 0x443   :  { %v13894_v1 = vor.u32 %v16674_v63, %v13893_v24  ;;  %v16610_v24 = vld [vmem:[#allocation7 + $0x84c] sm:$0xf0] }
 0x444   :  { %7456 = vmatpush.bf16.msra.mxu0 %v12806_v40  ;;  %7469 = vmatpush.bf16.msra.mxu1 %v13318_v43  ;;  %v14462_v40 = vor.u32 %v16817_v36, %v14461_v34  ;;  %v14397_v43 = vld [vmem:[#allocation7 + $0xe08] sm:$0xf]  ;;  %v14206_v34 = vor.u32 %v16753_v19, %v14205_v13  ;;  %v14086_v36 = vor.u32 %v16722_v33, %v14085_v53  ;;  %v16451_v13 = vld [vmem:[#allocation7 + $0x354] sm:$0xf0]  ;;  %v13829_v53 = vld [vmem:[#allocation7 + $0x990] sm:$0xf] }
 0x445   :  { %v14398_v58 = vor.u32 %v16801_v44, %v14397_v43  ;;  %v16490_v44 = vld [vmem:[#allocation7 + $0x494] sm:$0xf]  ;;  %v16658_v33 = vld [vmem:[#allocation7 + $0x9cc] sm:$0xf0] }
 0x446   :  { %7429 = vmatpush.bf16.msrb.mxu2 %v13890_v16  ;;  %7389 = vmatpush.bf16.msra.mxu3 %v14462_v40  ;;  %v16841_v16 = vld [vmem:[#allocation7 + $0xf8c] sm:$0xf] }
 0x447   :  { %v14594_v11 = vor.u32 %v16841_v16, %v14591_v41  ;;  %v16563_v16 = vld [vmem:[#allocation7 + $0x6d4] sm:$0xf0]  ;;  %v16777_v41 = vld [vmem:[#allocation7 + $0xd8c] sm:$0xf] }
 0x448   :  { %7457 = vmatpush.bf16.msra.mxu0 %v12742_v9  ;;  %7470 = vmatpush.bf16.msra.mxu1 %v13254_v51  ;;  %v13759_v9 = vld [vmem:[#allocation7 + $0x948] sm:$0xf0]  ;;  %v12938_v51 = vor.u32 %v16426_v61, %v12935_v46  ;;  %v14022_v46 = vor.u32 %v16706_v26, %v14021_v38  ;;  %v13765_v38 = vld [vmem:[#allocation7 + $0x910] sm:$0xf] }
 0x449   :  { %v13762_v25 = vor.u32 %v16633_v50, %v13759_v9  ;;  %v14527_v50 = vld [vmem:[#allocation7 + $0xf48] sm:$0xf0]  ;;  %v13957_v9 = vld [vmem:[#allocation7 + $0xa90] sm:$0xf] }
 0x44a   :  { %7430 = vmatpush.bf16.msrb.mxu2 %v13826_v48  ;;  %7390 = vmatpush.bf16.msra.mxu3 %v14398_v58  ;;  %v16825_v48 = vld [vmem:[#allocation7 + $0xf0c] sm:$0xf]  ;;  %v16642_v26 = vld [vmem:[#allocation7 + $0x94c] sm:$0xf0] }
 0x44b   :  { %v14530_v59 = vor.u32 %v16825_v48, %v14527_v50 }
 0x44c   :  { %7458 = vmatpush.bf16.msra.mxu0 %v12678_v3  ;;  %7471 = vmatpush.bf16.msra.mxu1 %v13190_v5  ;;  %v16394_v3 = vld [vmem:[#allocation7 + $0x194] sm:$0xf] }
 0x44d   :  { %7343 = vmatmul.bf16.vlgmr.msrb.gmra.mxu3 %v17605_v8  ;;  %v16522_v5 = vld [vmem:[#allocation7 + $0x594] sm:$0xf]  ;;  %v12810_v32 = vor.u32 %v16394_v3, %v12807_v7  ;;  %v13130_v3 = vor.u32 %v16474_v55, %v13127_v17  ;;  %v16403_v55 = vld [vmem:[#allocation7 + $0x1d4] sm:$0xf0]  ;;  %v4653_v17 = vperm.slane %v17614_v47, 1 }
 0x44e   :  { %7431 = vmatpush.bf16.msrb.mxu2 %v13762_v25  ;;  %7391 = vmatpush.bf16.msra.mxu3 %v14334_v14  ;;  %v13322_v35 = vor.u32 %v16522_v5, %v13319_v4  ;;  %v13069_v25 = vld [vmem:[#allocation7 + $0x398] sm:$0xf]  ;;  %v14463_v5 = vld [vmem:[#allocation7 + $0xec8] sm:$0xf0] }
 0x44f   :  { %v13581_v14 = vld [vmem:[#allocation7 + $0x798] sm:$0xf]  ;;  %v13070_v7 = vor.u32 %v16467_v49, %v13069_v25 }
 0x450   :  { %7459 = vmatpush.bf16.msra.mxu0 %v12614_v23  ;;  %7472 = vmatpush.bf16.msra.mxu1 %v13126_v29  ;;  %v17612_v39 = vpop.f32.mrf.mxu0  ;;  %v16378_v23 = vld [vmem:[#allocation7 + $0x114] sm:$0xf]  ;;  %v13582_v4 = vor.u32 %v16595_v18, %v13581_v14  ;;  %v16531_v14 = vld [vmem:[#allocation7 + $0x5d4] sm:$0xf0] }
 0x451   :  { %v16506_v29 = vld [vmem:[#allocation7 + $0x514] sm:$0xf]  ;;  %v12746_v10 = vor.u32 %v16378_v23, %v12743_v2  ;;  %v16793_v2 = vld [vmem:[#allocation7 + $0xe0c] sm:$0xf] }
 0x452   :  { %7432 = vmatpush.bf16.msrb.mxu2 %v13698_v57  ;;  %7392 = vmatpush.bf16.msra.mxu3 %v14270_v22  ;;  %v16809_v57 = vld [vmem:[#allocation7 + $0xe8c] sm:$0xf]  ;;  %v13005_v22 = vld [vmem:[#allocation7 + $0x318] sm:$0xf] }
 0x453   :  { %7460 = vmatmul.bf16.vlgmr.msra.gmra.mxu0 %v17554_v21  ;;  %7473 = vmatmul.bf16.vlgmr.msra.gmra.mxu1 %v17570_v27  ;;  %v14466_v19 = vor.u32 %v16809_v57, %v14463_v5  ;;  %v13006_v23 = vor.u32 %v16451_v13, %v13005_v22  ;;  %v12749_v5 = vld [vmem:[#allocation7 + $0x118] sm:$0xf] }
 0x454   :  { %7504 = vmatpush.bf16.msrb.mxu0 %v13066_v31  ;;  %7517 = vmatpush.bf16.msrb.mxu1 %v13578_v0  ;;  %v13255_v31 = vld [vmem:[#allocation7 + $0x550] sm:$0xf0]  ;;  %v14141_v0 = vld [vmem:[#allocation7 + $0xc08] sm:$0xf]  ;;  %v13261_v13 = vld [vmem:[#allocation7 + $0x518] sm:$0xf] }
 0x455   :  { %v13258_v40 = vor.u32 %v16506_v29, %v13255_v31  ;;  %v14142_v61 = vor.u32 %v16737_v37, %v14141_v0  ;;  %v13830_v37 = vor.u32 %v16658_v33, %v13829_v53  ;;  %v14143_v53 = vld [vmem:[#allocation7 + $0xc48] sm:$0xf0] }
 0x456   :  { %7433 = vmatpush.bf16.msrb.mxu2 %v13634_v28  ;;  %7393 = vmatpush.bf16.msra.mxu3 %v14206_v34  ;;  %v14399_v28 = vld [vmem:[#allocation7 + $0xe48] sm:$0xf0]  ;;  %v12941_v34 = vld [vmem:[#allocation7 + $0x298] sm:$0xf] }
 0x458   :  { %7505 = vmatpush.bf16.msrb.mxu0 %v13002_v42  ;;  %7518 = vmatpush.bf16.msrb.mxu1 %v13514_v45  ;;  %v12679_v42 = vld [vmem:[#allocation7 + $0xd0] sm:$0xf0]  ;;  %v7255_v43 = vpop.f32.mrf.mxu0 }
 0x459   :  { %v13191_v45 = vld [vmem:[#allocation7 + $0x4d0] sm:$0xf0]  ;;  %v12682_v58 = vor.u32 %v16362_v62, %v12679_v42  ;;  %7434 = vmatmul.bf16.vlgmr.msrb.gmra.mxu2 %v17590_v20  ;;  %v14335_v62 = vld [vmem:[#allocation7 + $0xdc8] sm:$0xf0]  ;;  %v12877_v43 = vld [vmem:[#allocation7 + $0x218] sm:$0xf] }
 0x45a   :  { %7478 = vmatpush.bf16.msra.mxu2 %v14086_v36  ;;  %v13194_v52 = vor.u32 %v16490_v44, %v13191_v45  ;;  %7394 = vmatpush.bf16.msra.mxu3 %v14142_v61  ;;  %v7266_v31 = vpop.f32.mrf.mxu1  ;;  %v16435_v36 = vld [vmem:[#allocation7 + $0x2d4] sm:$0xf0]  ;;  %v13766_v45 = vor.u32 %v16642_v26, %v13765_v38  ;;  %v14338_v48 = vor.u32 %v16777_v41, %v14335_v62  ;;  %v14533_v41 = vld [vmem:[#allocation7 + $0xf10] sm:$0xf] }
 0x45b   :  { %v16419_v44 = vld [vmem:[#allocation7 + $0x254] sm:$0xf0] }
 0x45c   :  { %7506 = vmatpush.bf16.msrb.mxu0 %v12938_v51  ;;  %7519 = vmatpush.bf16.msrb.mxu1 %v13450_v30  ;;  %v16690_v51 = vld [vmem:[#allocation7 + $0xacc] sm:$0xf0]  ;;  %v12615_v30 = vld [vmem:[#allocation7 + $0x50] sm:$0xf0]  ;;  %v13389_v61 = vld [vmem:[#allocation7 + $0x618] sm:$0xf]  ;;  %v12878_v50 = vor.u32 %v16419_v44, %v12877_v43 }
 0x45d   :  { %v13958_v56 = vor.u32 %v16690_v51, %v13957_v9  ;;  %7395 = vmatmul.bf16.vlgmr.msra.gmra.mxu3 %v17605_v8  ;;  %v16761_v9 = vld [vmem:[#allocation7 + $0xd0c] sm:$0xf]  ;;  %v16499_v38 = vld [vmem:[#allocation7 + $0x4d4] sm:$0xf0]  ;;  %v16834_v43 = vld [vmem:[#allocation7 + $0xf4c] sm:$0xf0] }
 0x45e   :  { %7479 = vmatpush.bf16.msra.mxu2 %v14022_v46  ;;  %7439 = vmatpush.bf16.msrb.mxu3 %v14594_v11  ;;  %v16547_v46 = vld [vmem:[#allocation7 + $0x654] sm:$0xf0]  ;;  %v13701_v11 = vld [vmem:[#allocation7 + $0x890] sm:$0xf]  ;;  %v14271_v51 = vld [vmem:[#allocation7 + $0xd48] sm:$0xf0] }
 0x45f   :  { %v14274_v18 = vor.u32 %v16761_v9, %v14271_v51  ;;  %v16682_v44 = vld [vmem:[#allocation7 + $0xa94] sm:$0xf]  ;;  %v13071_v9 = vld [vmem:[#allocation7 + $0x3d8] sm:$0xf0] }
 0x460   :  { %7507 = vmatpush.bf16.msrb.mxu0 %v12874_v60  ;;  %7520 = vmatpush.bf16.msrb.mxu1 %v13386_v6  ;;  %v12618_v60 = vor.u32 %v16346_v54, %v12615_v30  ;;  %v4652_v6 = vperm.slane %v17614_v47, 0  ;;  %v12813_v30 = vld [vmem:[#allocation7 + $0x198] sm:$0xf] }
 0x461   :  { %v12814_v63 = vor.u32 %v16403_v55, %v12813_v30  ;;  %v14534_v30 = vor.u32 %v16834_v43, %v14533_v41 }
 0x462   :  { %7480 = vmatpush.bf16.msra.mxu2 %v13958_v56  ;;  %7440 = vmatpush.bf16.msrb.mxu3 %v14530_v59  ;;  %v7268_v54 = vpop.f32.mrf.mxu1  ;;  %v13325_v56 = vld [vmem:[#allocation7 + $0x598] sm:$0xf]  ;;  %v16745_v59 = vld [vmem:[#allocation7 + $0xc8c] sm:$0xf] }
 0x463   :  { %v13326_v57 = vor.u32 %v16531_v14, %v13325_v56  ;;  %v13583_v54 = vld [vmem:[#allocation7 + $0x7d8] sm:$0xf0] }
 0x464   :  { %7508 = vmatpush.bf16.msrb.mxu0 %v12810_v32  ;;  %7521 = vmatpush.bf16.msrb.mxu1 %v13322_v35  ;;  %v16579_v32 = vld [vmem:[#allocation7 + $0x754] sm:$0xf0]  ;;  %v7254_v35 = vadd.f32 %v17612_v39, %v4652_v6  ;;  %v14402_v39 = vor.u32 %v16793_v2, %v14399_v28  ;;  %v14207_v6 = vld [vmem:[#allocation7 + $0xcc8] sm:$0xf0]  ;;  %v16698_v2 = vld [vmem:[#allocation7 + $0xb14] sm:$0xf] }
 0x465   :  { %v13518_v29 = vor.u32 %v16579_v32, %v13517_v15  ;;  %v14210_v15 = vor.u32 %v16745_v59, %v14207_v6  ;;  %v14023_v28 = vld [vmem:[#allocation7 + $0xb50] sm:$0xf0]  ;;  %v16818_v59 = vld [vmem:[#allocation7 + $0xecc] sm:$0xf0] }
 0x466   :  { %7481 = vmatpush.bf16.msra.mxu2 %v13894_v1  ;;  %v17621_v0 = vadd.f32 %v7266_v31, %v7254_v35  ;;  %7441 = vmatpush.bf16.msrb.mxu3 %v14466_v19  ;;  %v16515_v1 = vld [vmem:[#allocation7 + $0x554] sm:$0xf0]  ;;  %v16729_v19 = vld [vmem:[#allocation7 + $0xc0c] sm:$0xf] }
 0x467   :  { %v14146_v26 = vor.u32 %v16729_v19, %v14143_v53  ;;  %v12943_v19 = vld [vmem:[#allocation7 + $0x2d8] sm:$0xf0] }
 0x468   :  { %7509 = vmatpush.bf16.msrb.mxu0 %v12746_v10  ;;  %7522 = vmatpush.bf16.msrb.mxu1 %v13258_v40  ;;  %v13453_v10 = vld [vmem:[#allocation7 + $0x698] sm:$0xf]  ;;  %v12942_v40 = vor.u32 %v16435_v36, %v12941_v34  ;;  %v16850_v34 = vld [vmem:[#allocation7 + $0xfcc] sm:$0xf0] }
 0x469   :  { %v13454_v42 = vor.u32 %v16563_v16, %v13453_v10  ;;  %v12685_v36 = vld [vmem:[#allocation7 + $0x98] sm:$0xf] }
 0x46a   :  { %7482 = vmatpush.bf16.msra.mxu2 %v13830_v37  ;;  %7442 = vmatpush.bf16.msrb.mxu3 %v14402_v39  ;;  %v16371_v37 = vld [vmem:[#allocation7 + $0xd4] sm:$0xf0] }
 0x46b   :  { %v13197_v39 = vld [vmem:[#allocation7 + $0x498] sm:$0xf] }
 0x46c   :  { %7510 = vmatpush.bf16.msrb.mxu0 %v12682_v58  ;;  %7523 = vmatpush.bf16.msrb.mxu1 %v13194_v52  ;;  %v16626_v58 = vld [vmem:[#allocation7 + $0x8cc] sm:$0xf0]  ;;  %v13390_v52 = vor.u32 %v16547_v46, %v13389_v61  ;;  %v13198_v61 = vor.u32 %v16499_v38, %v13197_v39  ;;  %v12621_v46 = vld [vmem:[#allocation7 + $0x18] sm:$0xf]  ;;  %v16539_v38 = vld [vmem:[#allocation7 + $0x61c] sm:$0xf] }
 0x46d   :  { %v13702_v49 = vor.u32 %v16626_v58, %v13701_v11  ;;  %v13133_v11 = vld [vmem:[#allocation7 + $0x418] sm:$0xf] }
 0x46e   :  { %7483 = vmatpush.bf16.msra.mxu2 %v13766_v45  ;;  %7443 = vmatpush.bf16.msrb.mxu3 %v14338_v48  ;;  %v13959_v45 = vld [vmem:[#allocation7 + $0xad0] sm:$0xf0]  ;;  %v16355_v48 = vld [vmem:[#allocation7 + $0x54] sm:$0xf0] }
 0x46f   :  { %v16483_v58 = vld [vmem:[#allocation7 + $0x454] sm:$0xf0]  ;;  %v13962_v51 = vor.u32 %v16682_v44, %v13959_v45  ;;  %v12622_v55 = vor.u32 %v16355_v48, %v12621_v46  ;;  %v14277_v44 = vld [vmem:[#allocation7 + $0xd10] sm:$0xf]  ;;  %v16395_v46 = vld [vmem:[#allocation7 + $0x19c] sm:$0xf] }
 0x470   :  { %7511 = vmatpush.bf16.msrb.mxu0 %v12618_v60  ;;  %7524 = vmatpush.bf16.msrb.mxu1 %v13130_v3  ;;  %v7305_v25 = vpop.f32.mrf.mxu0  ;;  %v13637_v60 = vld [vmem:[#allocation7 + $0x810] sm:$0xf]  ;;  %v16714_v3 = vld [vmem:[#allocation7 + $0xb94] sm:$0xf]  ;;  %v7318_v31 = vpop.f32.mrf.mxu1  ;;  %v12815_v48 = vld [vmem:[#allocation7 + $0x1d8] sm:$0xf0] }
 0x471   :  { %v13638_v22 = vor.u32 %v16610_v24, %v13637_v60  ;;  %v7306_v33 = vadd.f32 %v7305_v25, %v4653_v17  ;;  %v16666_v17 = vld [vmem:[#allocation7 + $0xa14] sm:$0xf]  ;;  %v16443_v24 = vld [vmem:[#allocation7 + $0x31c] sm:$0xf]  ;;  %v16770_v45 = vld [vmem:[#allocation7 + $0xd4c] sm:$0xf0] }
 0x472   :  { %7484 = vmatpush.bf16.msra.mxu2 %v13702_v49  ;;  %7444 = vmatpush.bf16.msrb.mxu3 %v14274_v18  ;;  %v13895_v25 = vld [vmem:[#allocation7 + $0xa50] sm:$0xf0]  ;;  %v13134_v49 = vor.u32 %v16483_v58, %v13133_v11  ;;  %v14469_v18 = vld [vmem:[#allocation7 + $0xe90] sm:$0xf] }
 0x473   :  { %7512 = vmatmul.bf16.vlgmr.msrb.gmra.mxu0 %v17554_v21  ;;  %7525 = vmatmul.bf16.vlgmr.msrb.gmra.mxu1 %v17570_v27  ;;  %v17625_v16 = vadd.f32 %v7318_v31, %v7306_v33  ;;  %v13898_v6 = vor.u32 %v16666_v17, %v13895_v25  ;;  %v16555_v33 = vld [vmem:[#allocation7 + $0x69c] sm:$0xf]  ;;  %v14341_v31 = vld [vmem:[#allocation7 + $0xd90] sm:$0xf]  ;;  %v13639_v17 = vld [vmem:[#allocation7 + $0x850] sm:$0xf0]  ;;  %v12818_v25 = vor.u32 %v16395_v46, %v12815_v48 }
 0x474   :  { %7556 = vmatpush.bf16.msra.mxu0 %v13070_v7  ;;  %7569 = vmatpush.bf16.msra.mxu1 %v13582_v4  ;;  %v14087_v7 = vld [vmem:[#allocation7 + $0xbd0] sm:$0xf0]  ;;  %v16387_v4 = vld [vmem:[#allocation7 + $0x154] sm:$0xf0]  ;;  %v16596_v46 = vld [vmem:[#allocation7 + $0x7dc] sm:$0xf0] }
 0x475   :  { %v14090_v32 = vor.u32 %v16714_v3, %v14087_v7  ;;  %v12750_v35 = vor.u32 %v16387_v4, %v12749_v5  ;;  %v16571_v3 = vld [vmem:[#allocation7 + $0x71c] sm:$0xf]  ;;  %v16650_v5 = vld [vmem:[#allocation7 + $0x994] sm:$0xf] }
 0x476   :  { %7485 = vmatpush.bf16.msra.mxu2 %v13638_v22  ;;  %7445 = vmatpush.bf16.msrb.mxu3 %v14210_v15  ;;  %v13519_v7 = vld [vmem:[#allocation7 + $0x758] sm:$0xf0]  ;;  %v13831_v4 = vld [vmem:[#allocation7 + $0x9d0] sm:$0xf0] }
 0x477   :  { %v13522_v15 = vor.u32 %v16571_v3, %v13519_v7  ;;  %v13834_v53 = vor.u32 %v16650_v5, %v13831_v4  ;;  %v13263_v3 = vld [vmem:[#allocation7 + $0x558] sm:$0xf0]  ;;  %v14149_v5 = vld [vmem:[#allocation7 + $0xc10] sm:$0xf] }
 0x478   :  { %7557 = vmatpush.bf16.msra.mxu0 %v13006_v23  ;;  %7570 = vmatpush.bf16.msra.mxu1 %v13518_v29  ;;  %v14597_v23 = vld [vmem:[#allocation7 + $0xf90] sm:$0xf]  ;;  %v13262_v29 = vor.u32 %v16515_v1, %v13261_v13  ;;  %v7307_v10 = vpop.f32.mrf.mxu0  ;;  %v7320_v56 = vpop.f32.mrf.mxu1 }
 0x479   :  { %v14598_v62 = vor.u32 %v16850_v34, %v14597_v23  ;;  %7486 = vmatmul.bf16.vlgmr.msra.gmra.mxu2 %v17590_v20  ;;  %v14405_v13 = vld [vmem:[#allocation7 + $0xe10] sm:$0xf]  ;;  %v12879_v10 = vld [vmem:[#allocation7 + $0x258] sm:$0xf0]  ;;  %v14093_v56 = vld [vmem:[#allocation7 + $0xb98] sm:$0xf] }
 0x47a   :  { %7530 = vmatpush.bf16.msrb.mxu2 %v14090_v32  ;;  %7446 = vmatpush.bf16.msrb.mxu3 %v14146_v26  ;;  %v16802_v1 = vld [vmem:[#allocation7 + $0xe4c] sm:$0xf0]  ;;  %v16427_v32 = vld [vmem:[#allocation7 + $0x29c] sm:$0xf] }
 0x47b   :  { %v14406_v23 = vor.u32 %v16802_v1, %v14405_v13  ;;  %v16786_v34 = vld [vmem:[#allocation7 + $0xdcc] sm:$0xf0]  ;;  %v13391_v26 = vld [vmem:[#allocation7 + $0x658] sm:$0xf0]  ;;  %v16842_v13 = vld [vmem:[#allocation7 + $0xf94] sm:$0xf] }
 0x47c   :  { %7558 = vmatpush.bf16.msra.mxu0 %v12942_v40  ;;  %7571 = vmatpush.bf16.msra.mxu1 %v13454_v42  ;;  %v14026_v40 = vor.u32 %v16698_v2, %v14023_v28  ;;  %v12686_v42 = vor.u32 %v16371_v37, %v12685_v36  ;;  %v16634_v2 = vld [vmem:[#allocation7 + $0x914] sm:$0xf]  ;;  %v16411_v37 = vld [vmem:[#allocation7 + $0x21c] sm:$0xf]  ;;  %v14342_v41 = vor.u32 %v16786_v34, %v14341_v31  ;;  %v16738_v4 = vld [vmem:[#allocation7 + $0xc4c] sm:$0xf0] }
 0x47d   :  { %7447 = vmatmul.bf16.vlgmr.msrb.gmra.mxu3 %v17605_v8  ;;  %v13767_v28 = vld [vmem:[#allocation7 + $0x950] sm:$0xf0]  ;;  %v12882_v43 = vor.u32 %v16411_v37, %v12879_v10  ;;  %v14029_v1 = vld [vmem:[#allocation7 + $0xb18] sm:$0xf] }
 0x47e   :  { %7531 = vmatpush.bf16.msrb.mxu2 %v14026_v40  ;;  %7491 = vmatpush.bf16.msra.mxu3 %v14598_v62  ;;  %v13770_v39 = vor.u32 %v16634_v2, %v13767_v28  ;;  %v4654_v40 = vperm.slane %v17614_v47, 2  ;;  %v16618_v62 = vld [vmem:[#allocation7 + $0x894] sm:$0xf]  ;;  %v16491_v2 = vld [vmem:[#allocation7 + $0x49c] sm:$0xf] }
 0x47f   :  { %v13199_v28 = vld [vmem:[#allocation7 + $0x4d8] sm:$0xf0]  ;;  %v16826_v34 = vld [vmem:[#allocation7 + $0xf14] sm:$0xf] }
 0x480   :  { %7559 = vmatpush.bf16.msra.mxu0 %v12878_v50  ;;  %7572 = vmatpush.bf16.msra.mxu1 %v13390_v52  ;;  %v16459_v50 = vld [vmem:[#allocation7 + $0x39c] sm:$0xf]  ;;  %v14535_v10 = vld [vmem:[#allocation7 + $0xf50] sm:$0xf0] }
 0x481   :  { %v16587_v52 = vld [vmem:[#allocation7 + $0x79c] sm:$0xf]  ;;  %v13074_v14 = vor.u32 %v16459_v50, %v13071_v9  ;;  %v14538_v48 = vor.u32 %v16826_v34, %v14535_v10  ;;  %v16548_v34 = vld [vmem:[#allocation7 + $0x65c] sm:$0xf0]  ;;  %v13709_v10 = vld [vmem:[#allocation7 + $0x898] sm:$0xf] }
 0x482   :  { %v13586_v60 = vor.u32 %v16587_v52, %v13583_v54  ;;  %7532 = vmatpush.bf16.msrb.mxu2 %v13962_v51  ;;  %7492 = vmatpush.bf16.msra.mxu3 %v14534_v30  ;;  %v16523_v9 = vld [vmem:[#allocation7 + $0x59c] sm:$0xf]  ;;  %v14278_v54 = vor.u32 %v16770_v45, %v14277_v44  ;;  %v14213_v30 = vld [vmem:[#allocation7 + $0xc90] sm:$0xf]  ;;  %v16468_v44 = vld [vmem:[#allocation7 + $0x3dc] sm:$0xf0] }
 0x483   :  { %v13327_v51 = vld [vmem:[#allocation7 + $0x5d8] sm:$0xf0] }
 0x484   :  { %7560 = vmatpush.bf16.msra.mxu0 %v12814_v63  ;;  %7573 = vmatpush.bf16.msra.mxu1 %v13326_v57  ;;  %v13007_v63 = vld [vmem:[#allocation7 + $0x358] sm:$0xf0]  ;;  %v14470_v57 = vor.u32 %v16818_v59, %v14469_v18  ;;  %v13330_v59 = vor.u32 %v16523_v9, %v13327_v51 }
 0x485   :  { %v13010_v22 = vor.u32 %v16443_v24, %v13007_v63  ;;  %v12751_v24 = vld [vmem:[#allocation7 + $0x158] sm:$0xf0] }
 0x486   :  { %7533 = vmatpush.bf16.msrb.mxu2 %v13898_v6  ;;  %7493 = vmatpush.bf16.msra.mxu3 %v14470_v57  ;;  %v16507_v6 = vld [vmem:[#allocation7 + $0x51c] sm:$0xf] }
 0x488   :  { %7561 = vmatpush.bf16.msra.mxu0 %v12750_v35  ;;  %7574 = vmatpush.bf16.msra.mxu1 %v13262_v29  ;;  %v13455_v35 = vld [vmem:[#allocation7 + $0x6d8] sm:$0xf0]  ;;  %v12946_v29 = vor.u32 %v16427_v32, %v12943_v19  ;;  %v13266_v32 = vor.u32 %v16507_v6, %v13263_v3  ;;  %v14599_v19 = vld [vmem:[#allocation7 + $0xfd0] sm:$0xf0] }
 0x489   :  { %v13458_v36 = vor.u32 %v16555_v33, %v13455_v35  ;;  %v12687_v33 = vld [vmem:[#allocation7 + $0xd8] sm:$0xf0]  ;;  %v14407_v6 = vld [vmem:[#allocation7 + $0xe50] sm:$0xf0] }
 0x48a   :  { %7534 = vmatpush.bf16.msrb.mxu2 %v13834_v53  ;;  %7494 = vmatpush.bf16.msra.mxu3 %v14406_v23  ;;  %v16363_v53 = vld [vmem:[#allocation7 + $0x9c] sm:$0xf] }
 0x48b   :  { %v12690_v37 = vor.u32 %v16363_v53, %v12687_v33  ;;  %v16778_v53 = vld [vmem:[#allocation7 + $0xd94] sm:$0xf] }
 0x48c   :  { %7562 = vmatpush.bf16.msra.mxu0 %v12686_v42  ;;  %7575 = vmatpush.bf16.msra.mxu1 %v13198_v61  ;;  %v13703_v42 = vld [vmem:[#allocation7 + $0x8d0] sm:$0xf0]  ;;  %v13394_v61 = vor.u32 %v16539_v38, %v13391_v26  ;;  %v16691_v38 = vld [vmem:[#allocation7 + $0xad4] sm:$0xf0]  ;;  %v13202_v26 = vor.u32 %v16491_v2, %v13199_v28  ;;  %v12885_v2 = vld [vmem:[#allocation7 + $0x220] sm:$0xf] }
 0x48d   :  { %v13706_v50 = vor.u32 %v16618_v62, %v13703_v42  ;;  %v16475_v62 = vld [vmem:[#allocation7 + $0x41c] sm:$0xf]  ;;  %v14343_v33 = vld [vmem:[#allocation7 + $0xdd0] sm:$0xf0]  ;;  %v16420_v28 = vld [vmem:[#allocation7 + $0x25c] sm:$0xf0] }
 0x48e   :  { %7535 = vmatpush.bf16.msrb.mxu2 %v13770_v39  ;;  %7495 = vmatpush.bf16.msra.mxu3 %v14342_v41  ;;  %v13965_v39 = vld [vmem:[#allocation7 + $0xa98] sm:$0xf]  ;;  %v12623_v41 = vld [vmem:[#allocation7 + $0x58] sm:$0xf0] }
 0x48f   :  { %v13135_v42 = vld [vmem:[#allocation7 + $0x458] sm:$0xf0]  ;;  %v13966_v45 = vor.u32 %v16691_v38, %v13965_v39  ;;  %v16627_v39 = vld [vmem:[#allocation7 + $0x8d4] sm:$0xf0]  ;;  %v12886_v38 = vor.u32 %v16420_v28, %v12885_v2 }
 0x490   :  { %7563 = vmatpush.bf16.msra.mxu0 %v12622_v55  ;;  %7576 = vmatpush.bf16.msra.mxu1 %v13134_v49  ;;  %v7357_v11 = vpop.f32.mrf.mxu0  ;;  %v7370_v58 = vpop.f32.mrf.mxu1  ;;  %v16602_v55 = vld [vmem:[#allocation7 + $0x814] sm:$0xf]  ;;  %v16754_v49 = vld [vmem:[#allocation7 + $0xccc] sm:$0xf0]  ;;  %v13138_v9 = vor.u32 %v16475_v62, %v13135_v42  ;;  %v16404_v62 = vld [vmem:[#allocation7 + $0x1dc] sm:$0xf0] }
 0x491   :  { %v7358_v52 = vadd.f32 %v7357_v11, %v4654_v40  ;;  %v13642_v63 = vor.u32 %v16602_v55, %v13639_v17  ;;  %v14214_v7 = vor.u32 %v16754_v49, %v14213_v30  ;;  %v16347_v40 = vld [vmem:[#allocation7 + $0x1c] sm:$0xf]  ;;  %v13013_v55 = vld [vmem:[#allocation7 + $0x320] sm:$0xf]  ;;  %v14541_v2 = vld [vmem:[#allocation7 + $0xf18] sm:$0xf] }
 0x492   :  { %7536 = vmatpush.bf16.msrb.mxu2 %v13706_v50  ;;  %7496 = vmatpush.bf16.msra.mxu3 %v14278_v54  ;;  %v12626_v11 = vor.u32 %v16347_v40, %v12623_v41  ;;  %v16675_v50 = vld [vmem:[#allocation7 + $0xa54] sm:$0xf0]  ;;  %v14471_v54 = vld [vmem:[#allocation7 + $0xed0] sm:$0xf0]  ;;  %v16452_v17 = vld [vmem:[#allocation7 + $0x35c] sm:$0xf0] }
 0x493   :  { %7564 = vmatmul.bf16.vlgmr.msra.gmra.mxu0 %v17554_v21  ;;  %7577 = vmatmul.bf16.vlgmr.msra.gmra.mxu1 %v17570_v27  ;;  %v17632_v18 = vadd.f32 %v7370_v58, %v7358_v52  ;;  %v13901_v58 = vld [vmem:[#allocation7 + $0xa18] sm:$0xf]  ;;  %v16810_v52 = vld [vmem:[#allocation7 + $0xe94] sm:$0xf]  ;;  %v13525_v49 = vld [vmem:[#allocation7 + $0x720] sm:$0xf] }
 0x494   :  { %7608 = vmatpush.bf16.msrb.mxu0 %v13074_v14  ;;  %7621 = vmatpush.bf16.msrb.mxu1 %v13586_v60  ;;  %v16723_v14 = vld [vmem:[#allocation7 + $0xbd4] sm:$0xf0]  ;;  %v16379_v60 = vld [vmem:[#allocation7 + $0x11c] sm:$0xf]  ;;  %v14279_v40 = vld [vmem:[#allocation7 + $0xd50] sm:$0xf0] }
 0x495   :  { %v14094_v57 = vor.u32 %v16723_v14, %v14093_v56  ;;  %v16580_v56 = vld [vmem:[#allocation7 + $0x75c] sm:$0xf0]  ;;  %v14474_v14 = vor.u32 %v16810_v52, %v14471_v54  ;;  %v14215_v52 = vld [vmem:[#allocation7 + $0xcd0] sm:$0xf0]  ;;  %v16715_v54 = vld [vmem:[#allocation7 + $0xb9c] sm:$0xf] }
 0x496   :  { %7537 = vmatpush.bf16.msrb.mxu2 %v13642_v63  ;;  %7497 = vmatpush.bf16.msra.mxu3 %v14214_v7  ;;  %v16794_v63 = vld [vmem:[#allocation7 + $0xe14] sm:$0xf]  ;;  %v13526_v3 = vor.u32 %v16580_v56, %v13525_v49  ;;  %v12949_v7 = vld [vmem:[#allocation7 + $0x2a0] sm:$0xf] }
 0x497   :  { %v12821_v41 = vld [vmem:[#allocation7 + $0x1a0] sm:$0xf] }
 0x498   :  { %7609 = vmatpush.bf16.msrb.mxu0 %v13010_v22  ;;  %7622 = vmatpush.bf16.msrb.mxu1 %v13522_v15  ;;  %v12754_v22 = vor.u32 %v16379_v60, %v12751_v24  ;;  %v16707_v15 = vld [vmem:[#allocation7 + $0xb54] sm:$0xf0]  ;;  %v7359_v35 = vpop.f32.mrf.mxu0  ;;  %v7372_v23 = vpop.f32.mrf.mxu1  ;;  %v13014_v24 = vor.u32 %v16452_v17, %v13013_v55  ;;  %v16388_v49 = vld [vmem:[#allocation7 + $0x15c] sm:$0xf0] }
 0x499   :  { %v14030_v31 = vor.u32 %v16707_v15, %v14029_v1  ;;  %7538 = vmatmul.bf16.vlgmr.msrb.gmra.mxu2 %v17590_v20  ;;  %v16659_v60 = vld [vmem:[#allocation7 + $0x9d4] sm:$0xf0] }
 0x49a   :  { %7582 = vmatpush.bf16.msra.mxu2 %v14094_v57  ;;  %v16436_v57 = vld [vmem:[#allocation7 + $0x2dc] sm:$0xf0]  ;;  %v13773_v1 = vld [vmem:[#allocation7 + $0x918] sm:$0xf] }
 0x49b   :  { %v16643_v15 = vld [vmem:[#allocation7 + $0x954] sm:$0xf0] }
 0x49c   :  { %7610 = vmatpush.bf16.msrb.mxu0 %v12946_v29  ;;  %7623 = vmatpush.bf16.msrb.mxu1 %v13458_v36  ;;  %v14150_v29 = vor.u32 %v16738_v4, %v14149_v5  ;;  %v14602_v36 = vor.u32 %v16842_v13, %v14599_v19  ;;  %v13461_v4 = vld [vmem:[#allocation7 + $0x6a0] sm:$0xf]  ;;  %v14410_v13 = vor.u32 %v16794_v63, %v14407_v6  ;;  %v16730_v63 = vld [vmem:[#allocation7 + $0xc14] sm:$0xf] }
 0x49d   :  { %v12950_v19 = vor.u32 %v16436_v57, %v12949_v7  ;;  %v14151_v6 = vld [vmem:[#allocation7 + $0xc50] sm:$0xf0]  ;;  %v14605_v7 = vld [vmem:[#allocation7 + $0xf98] sm:$0xf]  ;;  %v16699_v57 = vld [vmem:[#allocation7 + $0xb1c] sm:$0xf] }
 0x49e   :  { %7498 = vmatpush.bf16.msra.mxu3 %v14150_v29  ;;  %7583 = vmatpush.bf16.msra.mxu2 %v14030_v31  ;;  %v13774_v29 = vor.u32 %v16643_v15, %v13773_v1  ;;  %v13397_v31 = vld [vmem:[#allocation7 + $0x620] sm:$0xf] }
 0x49f   :  { %v16372_v1 = vld [vmem:[#allocation7 + $0xdc] sm:$0xf0] }
 0x4a0   :  { %7611 = vmatpush.bf16.msrb.mxu0 %v12882_v43  ;;  %7624 = vmatpush.bf16.msrb.mxu1 %v13394_v61  ;;  %v13077_v43 = vld [vmem:[#allocation7 + $0x3a0] sm:$0xf] }
 0x4a1   :  { %v13589_v61 = vld [vmem:[#allocation7 + $0x7a0] sm:$0xf]  ;;  %v13078_v51 = vor.u32 %v16468_v44, %v13077_v43  ;;  %7499 = vmatmul.bf16.vlgmr.msra.gmra.mxu3 %v17605_v8  ;;  %v13710_v43 = vor.u32 %v16627_v39, %v13709_v10 }
 0x4a2   :  { %7543 = vmatpush.bf16.msrb.mxu3 %v14602_v36  ;;  %v13590_v30 = vor.u32 %v16596_v46, %v13589_v61  ;;  %7584 = vmatpush.bf16.msra.mxu2 %v13966_v45  ;;  %v4655_v36 = vperm.slane %v17614_v47, 3  ;;  %v13333_v44 = vld [vmem:[#allocation7 + $0x5a0] sm:$0xf] }
 0x4a3   :  { %v16532_v45 = vld [vmem:[#allocation7 + $0x5dc] sm:$0xf0] }
 0x4a4   :  { %7612 = vmatpush.bf16.msrb.mxu0 %v12818_v25  ;;  %7625 = vmatpush.bf16.msrb.mxu1 %v13330_v59  ;;  %v13902_v25 = vor.u32 %v16675_v50, %v13901_v58  ;;  %v13837_v59 = vld [vmem:[#allocation7 + $0x998] sm:$0xf]  ;;  %v13334_v17 = vor.u32 %v16532_v45, %v13333_v44  ;;  %v13591_v44 = vld [vmem:[#allocation7 + $0x7e0] sm:$0xf0] }
 0x4a5   :  { %v13838_v5 = vor.u32 %v16659_v60, %v13837_v59  ;;  %v13645_v58 = vld [vmem:[#allocation7 + $0x818] sm:$0xf]  ;;  %v16516_v59 = vld [vmem:[#allocation7 + $0x55c] sm:$0xf0] }
 0x4a6   :  { %7544 = vmatpush.bf16.msrb.mxu3 %v14538_v48  ;;  %7585 = vmatpush.bf16.msra.mxu2 %v13902_v25  ;;  %v16611_v50 = vld [vmem:[#allocation7 + $0x854] sm:$0xf0]  ;;  %v12757_v25 = vld [vmem:[#allocation7 + $0x120] sm:$0xf] }
 0x4a7   :  { %v13646_v56 = vor.u32 %v16611_v50, %v13645_v58  ;;  %v14477_v58 = vld [vmem:[#allocation7 + $0xe98] sm:$0xf] }
 0x4a8   :  { %7613 = vmatpush.bf16.msrb.mxu0 %v12754_v22  ;;  %7626 = vmatpush.bf16.msrb.mxu1 %v13266_v32  ;;  %v16564_v22 = vld [vmem:[#allocation7 + $0x6dc] sm:$0xf0]  ;;  %v7279_v32 = vpop.f32.mrf.mxu2  ;;  %v16819_v50 = vld [vmem:[#allocation7 + $0xed4] sm:$0xf0] }
 0x4a9   :  { %v17639_v35 = vadd.f32 %v7279_v32, %v17621_v0  ;;  %v13462_v23 = vor.u32 %v16564_v22, %v13461_v4  ;;  %v13398_v0 = vor.u32 %v16548_v34, %v13397_v31  ;;  %v16851_v22 = vld [vmem:[#allocation7 + $0xfd4] sm:$0xf0]  ;;  %v13205_v32 = vld [vmem:[#allocation7 + $0x4a0] sm:$0xf] }
 0x4aa   :  { %7545 = vmatpush.bf16.msrb.mxu3 %v14474_v14  ;;  %7586 = vmatpush.bf16.msra.mxu2 %v13838_v5  ;;  %v13269_v14 = vld [vmem:[#allocation7 + $0x520] sm:$0xf]  ;;  %v14031_v5 = vld [vmem:[#allocation7 + $0xb58] sm:$0xf0]  ;;  %v16835_v34 = vld [vmem:[#allocation7 + $0xf54] sm:$0xf0] }
 0x4ab   :  { %v13270_v4 = vor.u32 %v16516_v59, %v13269_v14  ;;  %v14542_v45 = vor.u32 %v16835_v34, %v14541_v2  ;;  %v13839_v14 = vld [vmem:[#allocation7 + $0x9d8] sm:$0xf0]  ;;  %v16540_v2 = vld [vmem:[#allocation7 + $0x624] sm:$0xf] }
 0x4ac   :  { %7614 = vmatpush.bf16.msrb.mxu0 %v12690_v37  ;;  %7627 = vmatpush.bf16.msrb.mxu1 %v13202_v26  ;;  %v14346_v37 = vor.u32 %v16778_v53, %v14343_v33  ;;  %v16762_v26 = vld [vmem:[#allocation7 + $0xd14] sm:$0xf]  ;;  %v14154_v33 = vor.u32 %v16730_v63, %v14151_v6  ;;  %v16428_v6 = vld [vmem:[#allocation7 + $0x2a4] sm:$0xf]  ;;  %v16619_v34 = vld [vmem:[#allocation7 + $0x89c] sm:$0xf] }
 0x4ad   :  { %v14282_v48 = vor.u32 %v16762_v26, %v14279_v40  ;;  %v16356_v26 = vld [vmem:[#allocation7 + $0x5c] sm:$0xf0] }
 0x4ae   :  { %7546 = vmatpush.bf16.msrb.mxu3 %v14410_v13  ;;  %7587 = vmatpush.bf16.msra.mxu2 %v13774_v29  ;;  %v12693_v13 = vld [vmem:[#allocation7 + $0xa0] sm:$0xf]  ;;  %v14606_v29 = vor.u32 %v16851_v22, %v14605_v7  ;;  %v16635_v22 = vld [vmem:[#allocation7 + $0x91c] sm:$0xf] }
 0x4af   :  { %v12694_v31 = vor.u32 %v16372_v1, %v12693_v13  ;;  %v13141_v40 = vld [vmem:[#allocation7 + $0x420] sm:$0xf]  ;;  %v13775_v13 = vld [vmem:[#allocation7 + $0x958] sm:$0xf0] }
 0x4b0   :  { %7615 = vmatpush.bf16.msrb.mxu0 %v12626_v11  ;;  %7628 = vmatpush.bf16.msrb.mxu1 %v13138_v9  ;;  %v7409_v42 = vpop.f32.mrf.mxu0  ;;  %v7422_v46 = vpop.f32.mrf.mxu1  ;;  %v16746_v11 = vld [vmem:[#allocation7 + $0xc94] sm:$0xf] }
 0x4b1   :  { %v7410_v61 = vadd.f32 %v7409_v42, %v4655_v36  ;;  %v7281_v9 = vpop.f32.mrf.mxu2  ;;  %v14218_v60 = vor.u32 %v16746_v11, %v14215_v52  ;;  %v16683_v36 = vld [vmem:[#allocation7 + $0xa9c] sm:$0xf]  ;;  %v13015_v52 = vld [vmem:[#allocation7 + $0x360] sm:$0xf0] }
 0x4b2   :  { %7547 = vmatpush.bf16.msrb.mxu3 %v14346_v37  ;;  %7588 = vmatpush.bf16.msra.mxu2 %v13710_v43  ;;  %v13967_v37 = vld [vmem:[#allocation7 + $0xad8] sm:$0xf0]  ;;  %v16588_v43 = vld [vmem:[#allocation7 + $0x7a4] sm:$0xf] }
 0x4b3   :  { %7616 = vmatmul.bf16.vlgmr.msrb.gmra.mxu0 %v17554_v21  ;;  %7629 = vmatmul.bf16.vlgmr.msrb.gmra.mxu1 %v17570_v27  ;;  %v17642_v55 = vadd.f32 %v7422_v46, %v7410_v61  ;;  %v13970_v42 = vor.u32 %v16683_v36, %v13967_v37  ;;  %v13903_v46 = vld [vmem:[#allocation7 + $0xa58] sm:$0xf0]  ;;  %v13594_v9 = vor.u32 %v16588_v43, %v13591_v44 }
 0x4b4   :  { %7660 = vmatpush.bf16.msra.mxu0 %v13078_v51  ;;  %7673 = vmatpush.bf16.msra.mxu1 %v13590_v30  ;;  %v12822_v51 = vor.u32 %v16404_v62, %v12821_v41  ;;  %v14095_v30 = vld [vmem:[#allocation7 + $0xbd8] sm:$0xf0]  ;;  %v16460_v41 = vld [vmem:[#allocation7 + $0x3a4] sm:$0xf] }
 0x4b5   :  { %v13079_v62 = vld [vmem:[#allocation7 + $0x3e0] sm:$0xf0]  ;;  %v13711_v36 = vld [vmem:[#allocation7 + $0x8d8] sm:$0xf0] }
 0x4b6   :  { %7548 = vmatpush.bf16.msrb.mxu3 %v14282_v48  ;;  %7589 = vmatpush.bf16.msra.mxu2 %v13646_v56  ;;  %v13082_v11 = vor.u32 %v16460_v41, %v13079_v62  ;;  %v16651_v56 = vld [vmem:[#allocation7 + $0x99c] sm:$0xf]  ;;  %v16396_v62 = vld [vmem:[#allocation7 + $0x1a4] sm:$0xf]  ;;  %v13714_v44 = vor.u32 %v16619_v34, %v13711_v36  ;;  %v13973_v34 = vld [vmem:[#allocation7 + $0xaa0] sm:$0xf] }
 0x4b7   :  { %v13842_v7 = vor.u32 %v16651_v56, %v13839_v14  ;;  %v13271_v56 = vld [vmem:[#allocation7 + $0x560] sm:$0xf0]  ;;  %v16692_v36 = vld [vmem:[#allocation7 + $0xadc] sm:$0xf0] }
 0x4b8   :  { %7661 = vmatpush.bf16.msra.mxu0 %v13014_v24  ;;  %7674 = vmatpush.bf16.msra.mxu1 %v13526_v3  ;;  %v14098_v24 = vor.u32 %v16715_v54, %v14095_v30  ;;  %v12758_v3 = vor.u32 %v16388_v49, %v12757_v25  ;;  %v7411_v15 = vpop.f32.mrf.mxu0  ;;  %v7424_v53 = vpop.f32.mrf.mxu1  ;;  %v16572_v30 = vld [vmem:[#allocation7 + $0x724] sm:$0xf]  ;;  %v14478_v49 = vor.u32 %v16819_v50, %v14477_v58 }
 0x4b9   :  { %v7331_v28 = vpop.f32.mrf.mxu2  ;;  %7590 = vmatmul.bf16.vlgmr.msra.gmra.mxu2 %v17590_v20  ;;  %v14349_v15 = vld [vmem:[#allocation7 + $0xd98] sm:$0xf]  ;;  %v16412_v53 = vld [vmem:[#allocation7 + $0x224] sm:$0xf] }
 0x4ba   :  { %7549 = vmatpush.bf16.msrb.mxu3 %v14218_v60  ;;  %7634 = vmatpush.bf16.msrb.mxu2 %v14098_v24  ;;  %v17645_v10 = vadd.f32 %v7331_v28, %v17625_v16  ;;  %v16667_v16 = vld [vmem:[#allocation7 + $0xa1c] sm:$0xf]  ;;  %v14413_v60 = vld [vmem:[#allocation7 + $0xe18] sm:$0xf]  ;;  %v13399_v28 = vld [vmem:[#allocation7 + $0x660] sm:$0xf0] }
 0x4bb   :  { %v13906_v54 = vor.u32 %v16667_v16, %v13903_v46  ;;  %v16803_v24 = vld [vmem:[#allocation7 + $0xe54] sm:$0xf0]  ;;  %v13402_v41 = vor.u32 %v16540_v2, %v13399_v28 }
 0x4bc   :  { %7662 = vmatpush.bf16.msra.mxu0 %v12950_v19  ;;  %7675 = vmatpush.bf16.msra.mxu1 %v13462_v23  ;;  %v16500_v19 = vld [vmem:[#allocation7 + $0x4dc] sm:$0xf0]  ;;  %v14034_v23 = vor.u32 %v16699_v57, %v14031_v5  ;;  %v16556_v57 = vld [vmem:[#allocation7 + $0x6a4] sm:$0xf]  ;;  %v14221_v46 = vld [vmem:[#allocation7 + $0xc98] sm:$0xf] }
 0x4bd   :  { %v13206_v39 = vor.u32 %v16500_v19, %v13205_v32  ;;  %v13463_v5 = vld [vmem:[#allocation7 + $0x6e0] sm:$0xf0]  ;;  %v16787_v32 = vld [vmem:[#allocation7 + $0xdd4] sm:$0xf0] }
 0x4be   :  { %7550 = vmatpush.bf16.msrb.mxu3 %v14154_v33  ;;  %7635 = vmatpush.bf16.msrb.mxu2 %v14034_v23  ;;  %v13466_v19 = vor.u32 %v16556_v57, %v13463_v5  ;;  %v12887_v33 = vld [vmem:[#allocation7 + $0x260] sm:$0xf0]  ;;  %v13778_v23 = vor.u32 %v16635_v22, %v13775_v13  ;;  %v16708_v57 = vld [vmem:[#allocation7 + $0xb5c] sm:$0xf0]  ;;  %v14607_v22 = vld [vmem:[#allocation7 + $0xfd8] sm:$0xf0] }
 0x4bf   :  { %v16364_v13 = vld [vmem:[#allocation7 + $0xa4] sm:$0xf] }
 0x4c0   :  { %7663 = vmatpush.bf16.msra.mxu0 %v12886_v38  ;;  %7676 = vmatpush.bf16.msra.mxu1 %v13398_v0  ;;  %v12629_v38 = vld [vmem:[#allocation7 + $0x20] sm:$0xf] }
 0x4c1   :  { %v16484_v0 = vld [vmem:[#allocation7 + $0x45c] sm:$0xf0]  ;;  %v12630_v61 = vor.u32 %v16356_v26, %v12629_v38  ;;  %7551 = vmatmul.bf16.vlgmr.msrb.gmra.mxu3 %v17605_v8  ;;  %v7333_v25 = vpop.f32.mrf.mxu2  ;;  %v12890_v38 = vor.u32 %v16412_v53, %v12887_v33  ;;  %v14285_v26 = vld [vmem:[#allocation7 + $0xd18] sm:$0xf] }
 0x4c2   :  { %7595 = vmatpush.bf16.msra.mxu3 %v14606_v29  ;;  %v13142_v48 = vor.u32 %v16484_v0, %v13141_v40  ;;  %7636 = vmatpush.bf16.msrb.mxu2 %v13970_v42  ;;  %v16771_v40 = vld [vmem:[#allocation7 + $0xd54] sm:$0xf0]  ;;  %v7292_v0 = vpop.f32.mrf.mxu3  ;;  %v12823_v42 = vld [vmem:[#allocation7 + $0x1e0] sm:$0xf0] }
 0x4c3   :  { %v17656_v43 = vadd.f32 %v7292_v0, %v17639_v35  ;;  %v12826_v50 = vor.u32 %v16396_v62, %v12823_v42  ;;  %v13143_v0 = vld [vmem:[#allocation7 + $0x460] sm:$0xf0]  ;;  %v16469_v62 = vld [vmem:[#allocation7 + $0x3e4] sm:$0xf0]  ;;  %v13974_v42 = vor.u32 %v16692_v36, %v13973_v34  ;;  %v13717_v34 = vld [vmem:[#allocation7 + $0x8a0] sm:$0xf] }
 0x4c4   :  { %7664 = vmatpush.bf16.msra.mxu0 %v12822_v51  ;;  %7677 = vmatpush.bf16.msra.mxu1 %v13334_v17  ;;  %v16444_v51 = vld [vmem:[#allocation7 + $0x324] sm:$0xf]  ;;  %v16628_v36 = vld [vmem:[#allocation7 + $0x8dc] sm:$0xf0] }
 0x4c5   :  { %v13527_v17 = vld [vmem:[#allocation7 + $0x760] sm:$0xf0]  ;;  %v13018_v59 = vor.u32 %v16444_v51, %v13015_v52  ;;  %v14101_v51 = vld [vmem:[#allocation7 + $0xba0] sm:$0xf] }
 0x4c6   :  { %7596 = vmatpush.bf16.msra.mxu3 %v14542_v45  ;;  %v13530_v63 = vor.u32 %v16572_v30, %v13527_v17  ;;  %7637 = vmatpush.bf16.msrb.mxu2 %v13906_v54  ;;  %v16524_v45 = vld [vmem:[#allocation7 + $0x5a4] sm:$0xf]  ;;  %v16724_v52 = vld [vmem:[#allocation7 + $0xbdc] sm:$0xf0] }
 0x4c7   :  { %v16380_v54 = vld [vmem:[#allocation7 + $0x124] sm:$0xf] }
 0x4c8   :  { %7665 = vmatpush.bf16.msra.mxu0 %v12758_v3  ;;  %7678 = vmatpush.bf16.msra.mxu1 %v13270_v4  ;;  %v12951_v3 = vld [vmem:[#allocation7 + $0x2e0] sm:$0xf0]  ;;  %v14414_v4 = vor.u32 %v16803_v24, %v14413_v60  ;;  %v14102_v60 = vor.u32 %v16724_v52, %v14101_v51  ;;  %v14157_v24 = vld [vmem:[#allocation7 + $0xc18] sm:$0xf]  ;;  %v13021_v52 = vld [vmem:[#allocation7 + $0x328] sm:$0xf] }
 0x4c9   :  { %v12954_v1 = vor.u32 %v16428_v6, %v12951_v3  ;;  %v7383_v29 = vpop.f32.mrf.mxu2  ;;  %v12759_v30 = vld [vmem:[#allocation7 + $0x160] sm:$0xf0]  ;;  %v16843_v3 = vld [vmem:[#allocation7 + $0xf9c] sm:$0xf] }
 0x4ca   :  { %7597 = vmatpush.bf16.msra.mxu3 %v14478_v49  ;;  %7638 = vmatpush.bf16.msrb.mxu2 %v13842_v7  ;;  %v17652_v37 = vadd.f32 %v7383_v29, %v17632_v18  ;;  %v14286_v18 = vor.u32 %v16771_v40, %v14285_v26  ;;  %v16508_v49 = vld [vmem:[#allocation7 + $0x524] sm:$0xf]  ;;  %v12762_v6 = vor.u32 %v16380_v54, %v12759_v30  ;;  %v14037_v7 = vld [vmem:[#allocation7 + $0xb20] sm:$0xf]  ;;  %v7294_v5 = vpop.f32.mrf.mxu3  ;;  %v13533_v30 = vld [vmem:[#allocation7 + $0x728] sm:$0xf] }
 0x4cb   :  { %v14038_v33 = vor.u32 %v16708_v57, %v14037_v7  ;;  %v14610_v28 = vor.u32 %v16843_v3, %v14607_v22  ;;  %v12631_v26 = vld [vmem:[#allocation7 + $0x60] sm:$0xf0]  ;;  %v13469_v7 = vld [vmem:[#allocation7 + $0x6a8] sm:$0xf]  ;;  %v16644_v22 = vld [vmem:[#allocation7 + $0x95c] sm:$0xf0] }
 0x4cc   :  { %7666 = vmatpush.bf16.msra.mxu0 %v12694_v31  ;;  %7679 = vmatpush.bf16.msra.mxu1 %v13206_v39  ;;  %v14350_v31 = vor.u32 %v16787_v32, %v14349_v15  ;;  %v4656_v39 = vperm.slane %v17614_v47, 4  ;;  %v16603_v47 = vld [vmem:[#allocation7 + $0x81c] sm:$0xf]  ;;  %v16492_v15 = vld [vmem:[#allocation7 + $0x4a4] sm:$0xf] }
 0x4cd   :  { %v13207_v32 = vld [vmem:[#allocation7 + $0x4e0] sm:$0xf0]  ;;  %v16565_v57 = vld [vmem:[#allocation7 + $0x6e4] sm:$0xf0] }
 0x4ce   :  { %7598 = vmatpush.bf16.msra.mxu3 %v14414_v4  ;;  %7639 = vmatpush.bf16.msrb.mxu2 %v13778_v23  ;;  %v13274_v4 = vor.u32 %v16508_v49, %v13271_v56  ;;  %v16827_v23 = vld [vmem:[#allocation7 + $0xf1c] sm:$0xf]  ;;  %v16476_v40 = vld [vmem:[#allocation7 + $0x424] sm:$0xf]  ;;  %v13845_v56 = vld [vmem:[#allocation7 + $0x9a0] sm:$0xf] }
 0x4d0   :  { %7667 = vmatpush.bf16.msra.mxu0 %v12630_v61  ;;  %7680 = vmatpush.bf16.msra.mxu1 %v13142_v48  ;;  %v13335_v61 = vld [vmem:[#allocation7 + $0x5e0] sm:$0xf0]  ;;  %v7461_v16 = vpop.f32.mrf.mxu0  ;;  %v13647_v48 = vld [vmem:[#allocation7 + $0x858] sm:$0xf0]  ;;  %v7474_v58 = vpop.f32.mrf.mxu1 }
 0x4d1   :  { %v13338_v35 = vor.u32 %v16524_v45, %v13335_v61  ;;  %v13650_v25 = vor.u32 %v16603_v47, %v13647_v48  ;;  %v7385_v14 = vpop.f32.mrf.mxu2  ;;  %v16597_v45 = vld [vmem:[#allocation7 + $0x7e4] sm:$0xf0]  ;;  %v13146_v48 = vor.u32 %v16476_v40, %v13143_v0  ;;  %v16763_v0 = vld [vmem:[#allocation7 + $0xd1c] sm:$0xf] }
 0x4d2   :  { %7599 = vmatpush.bf16.msra.mxu3 %v14350_v31  ;;  %7640 = vmatpush.bf16.msrb.mxu2 %v13714_v44  ;;  %v14543_v31 = vld [vmem:[#allocation7 + $0xf58] sm:$0xf0]  ;;  %v13597_v44 = vld [vmem:[#allocation7 + $0x7a8] sm:$0xf]  ;;  %v7344_v47 = vpop.f32.mrf.mxu3  ;;  %v16660_v14 = vld [vmem:[#allocation7 + $0x9dc] sm:$0xf0] }
 0x4d3   :  { %7668 = vmatmul.bf16.vlgmr.msra.gmra.mxu0 %v17554_v21  ;;  %7681 = vmatmul.bf16.vlgmr.msra.gmra.mxu1 %v17570_v27  ;;  %v14546_v61 = vor.u32 %v16827_v23, %v14543_v31  ;;  %v13598_v51 = vor.u32 %v16597_v45, %v13597_v44  ;;  %v13846_v3 = vor.u32 %v16660_v14, %v13845_v56  ;;  %v16405_v44 = vld [vmem:[#allocation7 + $0x1e4] sm:$0xf0] }
 0x4d4   :  { %7712 = vmatpush.bf16.msrb.mxu0 %v13082_v11  ;;  %7725 = vmatpush.bf16.msrb.mxu1 %v13594_v9  ;;  %v7462_v11 = vadd.f32 %v7461_v16, %v4656_v39  ;;  %v16755_v9 = vld [vmem:[#allocation7 + $0xcd4] sm:$0xf0]  ;;  %v13210_v39 = vor.u32 %v16492_v15, %v13207_v32  ;;  %v16779_v15 = vld [vmem:[#allocation7 + $0xd9c] sm:$0xf]  ;;  %v13718_v45 = vor.u32 %v16628_v36, %v13717_v34  ;;  %v16389_v56 = vld [vmem:[#allocation7 + $0x164] sm:$0xf0] }
 0x4d5   :  { %v14351_v32 = vld [vmem:[#allocation7 + $0xdd8] sm:$0xf0]  ;;  %v16836_v36 = vld [vmem:[#allocation7 + $0xf5c] sm:$0xf0] }
 0x4d6   :  { %v17658_v17 = vadd.f32 %v7474_v58, %v7462_v11  ;;  %7600 = vmatpush.bf16.msra.mxu3 %v14286_v18  ;;  %7641 = vmatpush.bf16.msrb.mxu2 %v13650_v25  ;;  %v13909_v18 = vld [vmem:[#allocation7 + $0xa20] sm:$0xf]  ;;  %v16811_v58 = vld [vmem:[#allocation7 + $0xe9c] sm:$0xf]  ;;  %v16581_v25 = vld [vmem:[#allocation7 + $0x764] sm:$0xf0]  ;;  %v14354_v31 = vor.u32 %v16779_v15, %v14351_v32 }
 0x4d7   :  { %v16373_v15 = vld [vmem:[#allocation7 + $0xe4] sm:$0xf0] }
 0x4d8   :  { %7713 = vmatpush.bf16.msrb.mxu0 %v13018_v59  ;;  %7726 = vmatpush.bf16.msrb.mxu1 %v13530_v63  ;;  %v14222_v59 = vor.u32 %v16755_v9, %v14221_v46  ;;  %v16739_v63 = vld [vmem:[#allocation7 + $0xc54] sm:$0xf0]  ;;  %v7476_v2 = vpop.f32.mrf.mxu1  ;;  %v16676_v46 = vld [vmem:[#allocation7 + $0xa5c] sm:$0xf0]  ;;  %v17662_v9 = vadd.f32 %v7344_v47, %v17645_v10  ;;  %v14415_v10 = vld [vmem:[#allocation7 + $0xe58] sm:$0xf0] }
 0x4d9   :  { %v14158_v53 = vor.u32 %v16739_v63, %v14157_v24  ;;  %7642 = vmatmul.bf16.vlgmr.msrb.gmra.mxu2 %v17590_v20  ;;  %v13910_v54 = vor.u32 %v16676_v46, %v13909_v18  ;;  %v13534_v24 = vor.u32 %v16581_v25, %v13533_v30  ;;  %v12957_v63 = vld [vmem:[#allocation7 + $0x2a8] sm:$0xf]  ;;  %v16747_v46 = vld [vmem:[#allocation7 + $0xc9c] sm:$0xf]  ;;  %v13653_v47 = vld [vmem:[#allocation7 + $0x820] sm:$0xf] }
 0x4da   :  { %7601 = vmatpush.bf16.msra.mxu3 %v14222_v59  ;;  %7686 = vmatpush.bf16.msra.mxu2 %v14102_v60  ;;  %v16795_v60 = vld [vmem:[#allocation7 + $0xe1c] sm:$0xf]  ;;  %v13405_v2 = vld [vmem:[#allocation7 + $0x628] sm:$0xf] }
 0x4db   :  { %v14418_v5 = vor.u32 %v16795_v60, %v14415_v10  ;;  %v13277_v60 = vld [vmem:[#allocation7 + $0x528] sm:$0xf] }
 0x4dc   :  { %7714 = vmatpush.bf16.msrb.mxu0 %v12954_v1  ;;  %7727 = vmatpush.bf16.msrb.mxu1 %v13466_v19  ;;  %v12695_v1 = vld [vmem:[#allocation7 + $0xe0] sm:$0xf0]  ;;  %v7463_v19 = vpop.f32.mrf.mxu0  ;;  %v16517_v10 = vld [vmem:[#allocation7 + $0x564] sm:$0xf0] }
 0x4dd   :  { %v12698_v29 = vor.u32 %v16364_v13, %v12695_v1  ;;  %v7346_v13 = vpop.f32.mrf.mxu3  ;;  %v13470_v19 = vor.u32 %v16565_v57, %v13469_v7  ;;  %v14159_v7 = vld [vmem:[#allocation7 + $0xc58] sm:$0xf0]  ;;  %v13213_v32 = vld [vmem:[#allocation7 + $0x4a8] sm:$0xf] }
 0x4de   :  { %7602 = vmatpush.bf16.msra.mxu3 %v14158_v53  ;;  %7687 = vmatpush.bf16.msra.mxu2 %v14038_v33  ;;  %v12893_v53 = vld [vmem:[#allocation7 + $0x228] sm:$0xf]  ;;  %v16852_v13 = vld [vmem:[#allocation7 + $0xfdc] sm:$0xf0] }
 0x4df   :  { %v16421_v33 = vld [vmem:[#allocation7 + $0x264] sm:$0xf0] }
 0x4e0   :  { %7715 = vmatpush.bf16.msrb.mxu0 %v12890_v38  ;;  %7728 = vmatpush.bf16.msrb.mxu1 %v13402_v41  ;;  %v16348_v38 = vld [vmem:[#allocation7 + $0x24] sm:$0xf]  ;;  %v13085_v41 = vld [vmem:[#allocation7 + $0x3a8] sm:$0xf]  ;;  %v12894_v40 = vor.u32 %v16421_v33, %v12893_v53 }
 0x4e1   :  { %v12634_v16 = vor.u32 %v16348_v38, %v12631_v26  ;;  %v13086_v11 = vor.u32 %v16469_v62, %v13085_v41  ;;  %7603 = vmatmul.bf16.vlgmr.msra.gmra.mxu3 %v17605_v8  ;;  %v17670_v38 = vld [vmem:[#allocation9 + $0xd] sm:$0xff]  ;;  %v14287_v41 = vld [vmem:[#allocation7 + $0xd58] sm:$0xf0] }
 0x4e2   :  { %7647 = vmatpush.bf16.msrb.mxu3 %v14610_v28  ;;  %7688 = vmatpush.bf16.msra.mxu2 %v13974_v42  ;;  %v16549_v28 = vld [vmem:[#allocation7 + $0x664] sm:$0xf0]  ;;  %v4657_v26 = vperm.slane %v17670_v38, 5 }
 0x4e3   :  { %v13406_v62 = vor.u32 %v16549_v28, %v13405_v2  ;;  %v12829_v42 = vld [vmem:[#allocation7 + $0x1a8] sm:$0xf]  ;;  %v14549_v2 = vld [vmem:[#allocation7 + $0xf20] sm:$0xf] }
 0x4e4   :  { %7716 = vmatpush.bf16.msrb.mxu0 %v12826_v50  ;;  %7729 = vmatpush.bf16.msrb.mxu1 %v13338_v35  ;;  %v14479_v50 = vld [vmem:[#allocation7 + $0xed8] sm:$0xf0]  ;;  %v16453_v35 = vld [vmem:[#allocation7 + $0x364] sm:$0xf0] }
 0x4e5   :  { %v14482_v49 = vor.u32 %v16811_v58, %v14479_v50  ;;  %v13022_v59 = vor.u32 %v16453_v35, %v13021_v52  ;;  %v7396_v50 = vpop.f32.mrf.mxu3  ;;  %v14223_v52 = vld [vmem:[#allocation7 + $0xcd8] sm:$0xf0]  ;;  %v16716_v35 = vld [vmem:[#allocation7 + $0xba4] sm:$0xf] }
 0x4e6   :  { %7648 = vmatpush.bf16.msrb.mxu3 %v14546_v61  ;;  %7689 = vmatpush.bf16.msra.mxu2 %v13910_v54  ;;  %v13341_v61 = vld [vmem:[#allocation7 + $0x5a8] sm:$0xf]  ;;  %v14103_v54 = vld [vmem:[#allocation7 + $0xbe0] sm:$0xf0]  ;;  %v17674_v30 = vadd.f32 %v7396_v50, %v17652_v37 }
 0x4e7   :  { %v16700_v37 = vld [vmem:[#allocation7 + $0xb24] sm:$0xf] }
 0x4e8   :  { %7717 = vmatpush.bf16.msrb.mxu0 %v12762_v6  ;;  %7730 = vmatpush.bf16.msrb.mxu1 %v13274_v4  ;;  %v16437_v6 = vld [vmem:[#allocation7 + $0x2e4] sm:$0xf0]  ;;  %v13781_v4 = vld [vmem:[#allocation7 + $0x920] sm:$0xf] }
 0x4e9   :  { %v12958_v1 = vor.u32 %v16437_v6, %v12957_v63  ;;  %v13782_v23 = vor.u32 %v16644_v22, %v13781_v4  ;;  %v14226_v63 = vor.u32 %v16747_v46, %v14223_v52  ;;  %v14106_v6 = vor.u32 %v16716_v35, %v14103_v54  ;;  %v14039_v4 = vld [vmem:[#allocation7 + $0xb60] sm:$0xf0]  ;;  %v16820_v52 = vld [vmem:[#allocation7 + $0xedc] sm:$0xf0]  ;;  %v16445_v54 = vld [vmem:[#allocation7 + $0x32c] sm:$0xf] }
 0x4ea   :  { %7649 = vmatpush.bf16.msrb.mxu3 %v14482_v49  ;;  %7690 = vmatpush.bf16.msra.mxu2 %v13846_v3  ;;  %v12765_v49 = vld [vmem:[#allocation7 + $0x128] sm:$0xf]  ;;  %v16731_v3 = vld [vmem:[#allocation7 + $0xc1c] sm:$0xf]  ;;  %v13278_v22 = vor.u32 %v16517_v10, %v13277_v60  ;;  %v14550_v46 = vor.u32 %v16836_v36, %v14549_v2  ;;  %v16652_v10 = vld [vmem:[#allocation7 + $0x9a4] sm:$0xf] }
 0x4eb   :  { %v12766_v57 = vor.u32 %v16389_v56, %v12765_v49  ;;  %v14162_v33 = vor.u32 %v16731_v3, %v14159_v7  ;;  %v16573_v56 = vld [vmem:[#allocation7 + $0x72c] sm:$0xf]  ;;  %v16804_v3 = vld [vmem:[#allocation7 + $0xe5c] sm:$0xf0] }
 0x4ec   :  { %7718 = vmatpush.bf16.msrb.mxu0 %v12698_v29  ;;  %7731 = vmatpush.bf16.msrb.mxu1 %v13210_v39  ;;  %v7435_v29 = vpop.f32.mrf.mxu2  ;;  %v12895_v2 = vld [vmem:[#allocation7 + $0x268] sm:$0xf0] }
 0x4ed   :  { %v17668_v39 = vadd.f32 %v7435_v29, %v17642_v55  ;;  %v14290_v55 = vor.u32 %v16763_v0, %v14287_v41  ;;  %v7398_v29 = vpop.f32.mrf.mxu3  ;;  %v12637_v41 = vld [vmem:[#allocation7 + $0x28] sm:$0xf] }
 0x4ee   :  { %7650 = vmatpush.bf16.msrb.mxu3 %v14418_v5  ;;  %7691 = vmatpush.bf16.msra.mxu2 %v13782_v23  ;;  %v14613_v5 = vld [vmem:[#allocation7 + $0xfa0] sm:$0xf]  ;;  %v14042_v23 = vor.u32 %v16700_v37, %v14039_v4  ;;  %v16557_v4 = vld [vmem:[#allocation7 + $0x6ac] sm:$0xf] }
 0x4ef   :  { %v16541_v29 = vld [vmem:[#allocation7 + $0x62c] sm:$0xf] }
 0x4f0   :  { %7719 = vmatpush.bf16.msrb.mxu0 %v12634_v16  ;;  %7732 = vmatpush.bf16.msrb.mxu1 %v13146_v48  ;;  %v16533_v16 = vld [vmem:[#allocation7 + $0x5e4] sm:$0xf0]  ;;  %v7513_v18 = vpop.f32.mrf.mxu0  ;;  %v16612_v48 = vld [vmem:[#allocation7 + $0x85c] sm:$0xf0]  ;;  %v7526_v58 = vpop.f32.mrf.mxu1 }
 0x4f1   :  { %v13342_v25 = vor.u32 %v16533_v16, %v13341_v61  ;;  %v13087_v61 = vld [vmem:[#allocation7 + $0x3e8] sm:$0xf0] }
 0x4f2   :  { %7651 = vmatpush.bf16.msrb.mxu3 %v14354_v31  ;;  %7692 = vmatpush.bf16.msra.mxu2 %v13718_v45  ;;  %v14614_v31 = vor.u32 %v16852_v13, %v14613_v5  ;;  %v16461_v45 = vld [vmem:[#allocation7 + $0x3ac] sm:$0xf] }
 0x4f3   :  { %7720 = vmatmul.bf16.vlgmr.msrb.gmra.mxu0 %v17554_v21  ;;  %7733 = vmatmul.bf16.vlgmr.msrb.gmra.mxu1 %v17570_v27  ;;  %v13090_v50 = vor.u32 %v16461_v45, %v13087_v61  ;;  %v12959_v5 = vld [vmem:[#allocation7 + $0x2e8] sm:$0xf0] }
 0x4f4   :  { %7764 = vmatpush.bf16.msra.mxu0 %v13086_v11  ;;  %7777 = vmatpush.bf16.msra.mxu1 %v13598_v51  ;;  %v7514_v11 = vadd.f32 %v7513_v18, %v4657_v26  ;;  %v12830_v51 = vor.u32 %v16405_v44, %v12829_v42  ;;  %v16684_v26 = vld [vmem:[#allocation7 + $0xaa4] sm:$0xf]  ;;  %v13149_v42 = vld [vmem:[#allocation7 + $0x428] sm:$0xf]  ;;  %v16589_v18 = vld [vmem:[#allocation7 + $0x7ac] sm:$0xf] }
 0x4f5   :  { %v16485_v44 = vld [vmem:[#allocation7 + $0x464] sm:$0xf0]  ;;  %v16397_v61 = vld [vmem:[#allocation7 + $0x1ac] sm:$0xf] }
 0x4f6   :  { %v17676_v14 = vadd.f32 %v7526_v58, %v7514_v11  ;;  %7652 = vmatpush.bf16.msrb.mxu3 %v14290_v55  ;;  %v13599_v55 = vld [vmem:[#allocation7 + $0x7e8] sm:$0xf0]  ;;  %v13911_v11 = vld [vmem:[#allocation7 + $0xa60] sm:$0xf0]  ;;  %v13150_v58 = vor.u32 %v16485_v44, %v13149_v42  ;;  %v14293_v42 = vld [vmem:[#allocation7 + $0xd20] sm:$0xf] }
 0x4f7   :  { %v13602_v35 = vor.u32 %v16589_v18, %v13599_v55  ;;  %v16772_v44 = vld [vmem:[#allocation7 + $0xd5c] sm:$0xf0]  ;;  %v16525_v55 = vld [vmem:[#allocation7 + $0x5ac] sm:$0xf] }
 0x4f8   :  { %7765 = vmatpush.bf16.msra.mxu0 %v13022_v59  ;;  %7778 = vmatpush.bf16.msra.mxu1 %v13534_v24  ;;  %v13654_v59 = vor.u32 %v16612_v48, %v13653_v47  ;;  %v7437_v24 = vpop.f32.mrf.mxu2  ;;  %v7515_v53 = vpop.f32.mrf.mxu0  ;;  %v16668_v48 = vld [vmem:[#allocation7 + $0xa24] sm:$0xf] }
 0x4f9   :  { %v7528_v28 = vpop.f32.mrf.mxu1  ;;  %v13914_v49 = vor.u32 %v16668_v48, %v13911_v11  ;;  %v13847_v24 = vld [vmem:[#allocation7 + $0x9e0] sm:$0xf0]  ;;  %v16788_v53 = vld [vmem:[#allocation7 + $0xddc] sm:$0xf0]  ;;  %v14294_v48 = vor.u32 %v16772_v44, %v14293_v42  ;;  %v16693_v42 = vld [vmem:[#allocation7 + $0xae4] sm:$0xf0] }
 0x4fa   :  { %7693 = vmatpush.bf16.msra.mxu2 %v13654_v59  ;;  %7653 = vmatpush.bf16.msrb.mxu3 %v14226_v63  ;;  %v13535_v59 = vld [vmem:[#allocation7 + $0x768] sm:$0xf0]  ;;  %v13850_v37 = vor.u32 %v16652_v10, %v13847_v24  ;;  %v14229_v11 = vld [vmem:[#allocation7 + $0xca0] sm:$0xf] }
 0x4fb   :  { %v13538_v7 = vor.u32 %v16573_v56, %v13535_v59  ;;  %v12767_v10 = vld [vmem:[#allocation7 + $0x168] sm:$0xf0] }
 0x4fc   :  { %7766 = vmatpush.bf16.msra.mxu0 %v12958_v1  ;;  %7779 = vmatpush.bf16.msra.mxu1 %v13470_v19  ;;  %v12701_v1 = vld [vmem:[#allocation7 + $0xa8] sm:$0xf] }
 0x4fd   :  { %v16501_v19 = vld [vmem:[#allocation7 + $0x4e4] sm:$0xf0]  ;;  %v12702_v34 = vor.u32 %v16373_v15, %v12701_v1  ;;  %7694 = vmatmul.bf16.vlgmr.msra.gmra.mxu2 %v17590_v20  ;;  %v16636_v1 = vld [vmem:[#allocation7 + $0x924] sm:$0xf] }
 0x4fe   :  { %7738 = vmatpush.bf16.msrb.mxu2 %v14106_v6  ;;  %v13214_v0 = vor.u32 %v16501_v19, %v13213_v32  ;;  %7654 = vmatpush.bf16.msrb.mxu3 %v14162_v33  ;;  %v14421_v6 = vld [vmem:[#allocation7 + $0xe20] sm:$0xf]  ;;  %v13783_v15 = vld [vmem:[#allocation7 + $0x960] sm:$0xf0] }
 0x4ff   :  { %v14422_v13 = vor.u32 %v16804_v3, %v14421_v6  ;;  %v14357_v19 = vld [vmem:[#allocation7 + $0xda0] sm:$0xf]  ;;  %v13786_v28 = vor.u32 %v16636_v1, %v13783_v15  ;;  %v16509_v6 = vld [vmem:[#allocation7 + $0x52c] sm:$0xf]  ;;  %v16709_v1 = vld [vmem:[#allocation7 + $0xb64] sm:$0xf0] }
 0x500   :  { %7767 = vmatpush.bf16.msra.mxu0 %v12894_v40  ;;  %7780 = vmatpush.bf16.msra.mxu1 %v13406_v62  ;;  %v13975_v40 = vld [vmem:[#allocation7 + $0xae0] sm:$0xf0]  ;;  %v16357_v62 = vld [vmem:[#allocation7 + $0x64] sm:$0xf0]  ;;  %v14358_v36 = vor.u32 %v16788_v53, %v14357_v19  ;;  %v13279_v3 = vld [vmem:[#allocation7 + $0x568] sm:$0xf0] }
 0x501   :  { %v13978_v16 = vor.u32 %v16684_v26, %v13975_v40  ;;  %v12638_v47 = vor.u32 %v16357_v62, %v12637_v41  ;;  %7655 = vmatmul.bf16.vlgmr.msrb.gmra.mxu3 %v17605_v8  ;;  %v16620_v26 = vld [vmem:[#allocation7 + $0x8a4] sm:$0xf]  ;;  %v4658_v41 = vperm.slane %v17670_v38, 6  ;;  %v13282_v15 = vor.u32 %v16509_v6, %v13279_v3  ;;  %v16365_v19 = vld [vmem:[#allocation7 + $0xac] sm:$0xf] }
 0x502   :  { %7739 = vmatpush.bf16.msrb.mxu2 %v14042_v23  ;;  %7699 = vmatpush.bf16.msra.mxu3 %v14614_v31  ;;  %v16413_v23 = vld [vmem:[#allocation7 + $0x22c] sm:$0xf]  ;;  %v13719_v40 = vld [vmem:[#allocation7 + $0x8e0] sm:$0xf0]  ;;  %v16582_v6 = vld [vmem:[#allocation7 + $0x76c] sm:$0xf0] }
 0x503   :  { %v13407_v31 = vld [vmem:[#allocation7 + $0x668] sm:$0xf0]  ;;  %v12898_v62 = vor.u32 %v16413_v23, %v12895_v2  ;;  %v13722_v18 = vor.u32 %v16620_v26, %v13719_v40 }
 0x504   :  { %7768 = vmatpush.bf16.msra.mxu0 %v12830_v51  ;;  %7781 = vmatpush.bf16.msra.mxu1 %v13342_v25  ;;  %v14485_v51 = vld [vmem:[#allocation7 + $0xea0] sm:$0xf]  ;;  %v13023_v25 = vld [vmem:[#allocation7 + $0x368] sm:$0xf0]  ;;  %v13410_v45 = vor.u32 %v16541_v29, %v13407_v31  ;;  %v16828_v31 = vld [vmem:[#allocation7 + $0xf24] sm:$0xf] }
 0x505   :  { %v14486_v60 = vor.u32 %v16820_v52, %v14485_v51  ;;  %v13026_v63 = vor.u32 %v16445_v54, %v13023_v25  ;;  %v7448_v52 = vpop.f32.mrf.mxu3  ;;  %v16756_v54 = vld [vmem:[#allocation7 + $0xcdc] sm:$0xf0]  ;;  %v14109_v25 = vld [vmem:[#allocation7 + $0xba8] sm:$0xf]  ;;  %v12703_v53 = vld [vmem:[#allocation7 + $0xe8] sm:$0xf0] }
 0x506   :  { %7740 = vmatpush.bf16.msrb.mxu2 %v13978_v16  ;;  %7700 = vmatpush.bf16.msra.mxu3 %v14550_v46  ;;  %v12831_v16 = vld [vmem:[#allocation7 + $0x1e8] sm:$0xf0]  ;;  %v17687_v56 = vadd.f32 %v7448_v52, %v17668_v39  ;;  %v16844_v39 = vld [vmem:[#allocation7 + $0xfa4] sm:$0xf]  ;;  %v12706_v40 = vor.u32 %v16365_v19, %v12703_v53  ;;  %v13789_v53 = vld [vmem:[#allocation7 + $0x928] sm:$0xf] }
 0x507   :  { %v13343_v46 = vld [vmem:[#allocation7 + $0x5e8] sm:$0xf0] }
 0x508   :  { %7769 = vmatpush.bf16.msra.mxu0 %v12766_v57  ;;  %7782 = vmatpush.bf16.msra.mxu1 %v13278_v22  ;;  %v16429_v57 = vld [vmem:[#allocation7 + $0x2ac] sm:$0xf]  ;;  %v13346_v59 = vor.u32 %v16525_v55, %v13343_v46  ;;  %v13093_v55 = vld [vmem:[#allocation7 + $0x3b0] sm:$0xf] }
 0x509   :  { %v13471_v22 = vld [vmem:[#allocation7 + $0x6e8] sm:$0xf0]  ;;  %v12962_v32 = vor.u32 %v16429_v57, %v12959_v5  ;;  %v14230_v57 = vor.u32 %v16756_v54, %v14229_v11  ;;  %v16470_v46 = vld [vmem:[#allocation7 + $0x3ec] sm:$0xf0]  ;;  %v16812_v54 = vld [vmem:[#allocation7 + $0xea4] sm:$0xf] }
 0x50a   :  { %7741 = vmatpush.bf16.msrb.mxu2 %v13914_v49  ;;  %7701 = vmatpush.bf16.msra.mxu3 %v14486_v60  ;;  %v13474_v33 = vor.u32 %v16557_v4, %v13471_v22  ;;  %v16725_v49 = vld [vmem:[#allocation7 + $0xbe4] sm:$0xf0]  ;;  %v16381_v60 = vld [vmem:[#allocation7 + $0x12c] sm:$0xf]  ;;  %v16740_v4 = vld [vmem:[#allocation7 + $0xc5c] sm:$0xf0] }
 0x50b   :  { %v14110_v5 = vor.u32 %v16725_v49, %v14109_v25  ;;  %v12770_v22 = vor.u32 %v16381_v60, %v12767_v10  ;;  %v13215_v23 = vld [vmem:[#allocation7 + $0x4e8] sm:$0xf0]  ;;  %v16598_v11 = vld [vmem:[#allocation7 + $0x7ec] sm:$0xf0]  ;;  %v14487_v25 = vld [vmem:[#allocation7 + $0xee0] sm:$0xf0] }
 0x50c   :  { %7770 = vmatpush.bf16.msra.mxu0 %v12702_v34  ;;  %7783 = vmatpush.bf16.msra.mxu1 %v13214_v0  ;;  %v7487_v34 = vpop.f32.mrf.mxu2  ;;  %v16454_v60 = vld [vmem:[#allocation7 + $0x36c] sm:$0xf0]  ;;  %v14490_v3 = vor.u32 %v16812_v54, %v14487_v25 }
 0x50d   :  { %v17683_v0 = vadd.f32 %v7487_v34, %v17658_v17  ;;  %v16604_v17 = vld [vmem:[#allocation7 + $0x824] sm:$0xf] }
 0x50e   :  { %7742 = vmatpush.bf16.msrb.mxu2 %v13850_v37  ;;  %7702 = vmatpush.bf16.msra.mxu3 %v14422_v13  ;;  %v14165_v37 = vld [vmem:[#allocation7 + $0xc20] sm:$0xf]  ;;  %v14045_v13 = vld [vmem:[#allocation7 + $0xb28] sm:$0xf] }
 0x50f   :  { %v14046_v29 = vor.u32 %v16709_v1, %v14045_v13  ;;  %v16438_v13 = vld [vmem:[#allocation7 + $0x2ec] sm:$0xf0] }
 0x510   :  { %7771 = vmatpush.bf16.msra.mxu0 %v12638_v47  ;;  %7784 = vmatpush.bf16.msra.mxu1 %v13150_v58  ;;  %v7565_v47 = vpop.f32.mrf.mxu0  ;;  %v13655_v58 = vld [vmem:[#allocation7 + $0x860] sm:$0xf0]  ;;  %v7578_v51 = vpop.f32.mrf.mxu1 }
 0x512   :  { %7743 = vmatpush.bf16.msrb.mxu2 %v13786_v28  ;;  %7703 = vmatpush.bf16.msra.mxu3 %v14358_v36  ;;  %v14166_v28 = vor.u32 %v16740_v4, %v14165_v37  ;;  %v7450_v36 = vpop.f32.mrf.mxu3  ;;  %v16796_v37 = vld [vmem:[#allocation7 + $0xe24] sm:$0xf] }
 0x513   :  { %7772 = vmatmul.bf16.vlgmr.msra.gmra.mxu0 %v17554_v21  ;;  %7785 = vmatmul.bf16.vlgmr.msra.gmra.mxu1 %v17570_v27  ;;  %v14423_v4 = vld [vmem:[#allocation7 + $0xe60] sm:$0xf0] }
 0x514   :  { %7816 = vmatpush.bf16.msrb.mxu0 %v13090_v50  ;;  %7829 = vmatpush.bf16.msrb.mxu1 %v13602_v35  ;;  %v7566_v50 = vadd.f32 %v7565_v47, %v4658_v41  ;;  %v12834_v35 = vor.u32 %v16397_v61, %v12831_v16  ;;  %v14551_v41 = vld [vmem:[#allocation7 + $0xf60] sm:$0xf0]  ;;  %v12639_v61 = vld [vmem:[#allocation7 + $0x68] sm:$0xf0]  ;;  %v14426_v19 = vor.u32 %v16796_v37, %v14423_v4  ;;  %v13285_v37 = vld [vmem:[#allocation7 + $0x530] sm:$0xf] }
 0x515   :  { %v16477_v16 = vld [vmem:[#allocation7 + $0x42c] sm:$0xf]  ;;  %v16518_v4 = vld [vmem:[#allocation7 + $0x56c] sm:$0xf0] }
 0x516   :  { %v17689_v24 = vadd.f32 %v7578_v51, %v7566_v50  ;;  %7744 = vmatpush.bf16.msrb.mxu2 %v13722_v18  ;;  %7704 = vmatpush.bf16.msra.mxu3 %v14294_v48  ;;  %v13151_v18 = vld [vmem:[#allocation7 + $0x468] sm:$0xf0]  ;;  %v13605_v48 = vld [vmem:[#allocation7 + $0x7b0] sm:$0xf]  ;;  %v13917_v50 = vld [vmem:[#allocation7 + $0xa28] sm:$0xf] }
 0x517   :  { %v16677_v51 = vld [vmem:[#allocation7 + $0xa64] sm:$0xf0]  ;;  %v13154_v52 = vor.u32 %v16477_v16, %v13151_v18  ;;  %v13606_v49 = vor.u32 %v16598_v11, %v13605_v48  ;;  %v16764_v18 = vld [vmem:[#allocation7 + $0xd24] sm:$0xf]  ;;  %v16406_v48 = vld [vmem:[#allocation7 + $0x1ec] sm:$0xf0] }
 0x518   :  { %7817 = vmatpush.bf16.msrb.mxu0 %v13026_v63  ;;  %7830 = vmatpush.bf16.msrb.mxu1 %v13538_v7  ;;  %v13658_v63 = vor.u32 %v16604_v17, %v13655_v58  ;;  %v7489_v7 = vpop.f32.mrf.mxu2  ;;  %v7567_v2 = vpop.f32.mrf.mxu0  ;;  %v14554_v17 = vor.u32 %v16828_v31, %v14551_v41  ;;  %v13918_v10 = vor.u32 %v16677_v51, %v13917_v50  ;;  %v12901_v31 = vld [vmem:[#allocation7 + $0x230] sm:$0xf] }
 0x519   :  { %v7580_v34 = vpop.f32.mrf.mxu1  ;;  %v13853_v7 = vld [vmem:[#allocation7 + $0x9a8] sm:$0xf]  ;;  %v16780_v2 = vld [vmem:[#allocation7 + $0xda4] sm:$0xf] }
 0x51a   :  { %7745 = vmatpush.bf16.msrb.mxu2 %v13658_v63  ;;  %7705 = vmatpush.bf16.msra.mxu3 %v14230_v57  ;;  %v13541_v63 = vld [vmem:[#allocation7 + $0x730] sm:$0xf]  ;;  %v16661_v57 = vld [vmem:[#allocation7 + $0x9e4] sm:$0xf0] }
 0x51b   :  { %v13854_v1 = vor.u32 %v16661_v57, %v13853_v7  ;;  %v16422_v34 = vld [vmem:[#allocation7 + $0x26c] sm:$0xf0] }
 0x51c   :  { %7818 = vmatpush.bf16.msrb.mxu0 %v12962_v32  ;;  %7831 = vmatpush.bf16.msrb.mxu1 %v13474_v33  ;;  %v14615_v32 = vld [vmem:[#allocation7 + $0xfe0] sm:$0xf0]  ;;  %v16493_v33 = vld [vmem:[#allocation7 + $0x4ac] sm:$0xf]  ;;  %v12902_v16 = vor.u32 %v16422_v34, %v12901_v31  ;;  %v16390_v7 = vld [vmem:[#allocation7 + $0x16c] sm:$0xf0] }
 0x51d   :  { %v14618_v26 = vor.u32 %v16844_v39, %v14615_v32  ;;  %7746 = vmatmul.bf16.vlgmr.msrb.gmra.mxu2 %v17590_v20  ;;  %v13218_v44 = vor.u32 %v16493_v33, %v13215_v23  ;;  %v12965_v39 = vld [vmem:[#allocation7 + $0x2b0] sm:$0xf]  ;;  %v16645_v33 = vld [vmem:[#allocation7 + $0x964] sm:$0xf0] }
 0x51e   :  { %7790 = vmatpush.bf16.msra.mxu2 %v14110_v5  ;;  %7706 = vmatpush.bf16.msra.mxu3 %v14166_v28  ;;  %v16566_v32 = vld [vmem:[#allocation7 + $0x6ec] sm:$0xf0]  ;;  %v12966_v23 = vor.u32 %v16438_v13, %v12965_v39  ;;  %v14359_v28 = vld [vmem:[#allocation7 + $0xde0] sm:$0xf0]  ;;  %v13790_v36 = vor.u32 %v16645_v33, %v13789_v53  ;;  %v14047_v53 = vld [vmem:[#allocation7 + $0xb68] sm:$0xf0]  ;;  %v13286_v33 = vor.u32 %v16518_v4, %v13285_v37 }
 0x51f   :  { %v16502_v31 = vld [vmem:[#allocation7 + $0x4ec] sm:$0xf0]  ;;  %v13543_v37 = vld [vmem:[#allocation7 + $0x770] sm:$0xf0] }
 0x520   :  { %7819 = vmatpush.bf16.msrb.mxu0 %v12898_v62  ;;  %7832 = vmatpush.bf16.msrb.mxu1 %v13410_v45  ;;  %v13981_v62 = vld [vmem:[#allocation7 + $0xaa8] sm:$0xf]  ;;  %v16349_v45 = vld [vmem:[#allocation7 + $0x2c] sm:$0xf]  ;;  %v7539_v41 = vpop.f32.mrf.mxu2 }
 0x521   :  { %v13982_v47 = vor.u32 %v16693_v42, %v13981_v62  ;;  %v12642_v58 = vor.u32 %v16349_v45, %v12639_v61  ;;  %7707 = vmatmul.bf16.vlgmr.msra.gmra.mxu3 %v17605_v8  ;;  %v14362_v62 = vor.u32 %v16780_v2, %v14359_v28  ;;  %v13725_v42 = vld [vmem:[#allocation7 + $0x8a8] sm:$0xf]  ;;  %v17696_v45 = vadd.f32 %v7539_v41, %v17676_v14  ;;  %v12709_v2 = vld [vmem:[#allocation7 + $0xb0] sm:$0xf] }
 0x522   :  { %7791 = vmatpush.bf16.msra.mxu2 %v14046_v29  ;;  %7751 = vmatpush.bf16.msrb.mxu3 %v14618_v26  ;;  %v13413_v26 = vld [vmem:[#allocation7 + $0x630] sm:$0xf]  ;;  %v4659_v61 = vperm.slane %v17670_v38, 7  ;;  %v13661_v14 = vld [vmem:[#allocation7 + $0x828] sm:$0xf] }
 0x523   :  { %v16374_v28 = vld [vmem:[#allocation7 + $0xec] sm:$0xf0] }
 0x524   :  { %7820 = vmatpush.bf16.msrb.mxu0 %v12834_v35  ;;  %7833 = vmatpush.bf16.msrb.mxu1 %v13346_v59  ;;  %v13094_v35 = vor.u32 %v16470_v46, %v13093_v55  ;;  %v13029_v59 = vld [vmem:[#allocation7 + $0x330] sm:$0xf]  ;;  %v14295_v55 = vld [vmem:[#allocation7 + $0xd60] sm:$0xf0]  ;;  %v7500_v38 = vpop.f32.mrf.mxu3 }
 0x525   :  { %v13030_v5 = vor.u32 %v16454_v60, %v13029_v59  ;;  %v14298_v51 = vor.u32 %v16764_v18, %v14295_v55  ;;  %v14231_v59 = vld [vmem:[#allocation7 + $0xce0] sm:$0xf0]  ;;  %v16717_v60 = vld [vmem:[#allocation7 + $0xbac] sm:$0xf] }
 0x526   :  { %7792 = vmatpush.bf16.msra.mxu2 %v13982_v47  ;;  %7752 = vmatpush.bf16.msrb.mxu3 %v14554_v17  ;;  %v12837_v47 = vld [vmem:[#allocation7 + $0x1b0] sm:$0xf]  ;;  %v13983_v18 = vld [vmem:[#allocation7 + $0xae8] sm:$0xf0] }
 0x527   :  { %v13349_v17 = vld [vmem:[#allocation7 + $0x5b0] sm:$0xf] }
 0x528   :  { %7821 = vmatpush.bf16.msrb.mxu0 %v12770_v22  ;;  %7834 = vmatpush.bf16.msrb.mxu1 %v13282_v15  ;;  %v13542_v22 = vor.u32 %v16582_v6, %v13541_v63  ;;  %v13477_v15 = vld [vmem:[#allocation7 + $0x6b0] sm:$0xf]  ;;  %v17700_v63 = vadd.f32 %v7500_v38, %v17683_v0  ;;  %v14621_v0 = vld [vmem:[#allocation7 + $0xfa8] sm:$0xf] }
 0x529   :  { %v13478_v29 = vor.u32 %v16566_v32, %v13477_v15  ;;  %v14167_v15 = vld [vmem:[#allocation7 + $0xc60] sm:$0xf0] }
 0x52a   :  { %7793 = vmatpush.bf16.msra.mxu2 %v13918_v10  ;;  %7753 = vmatpush.bf16.msrb.mxu3 %v14490_v3  ;;  %v14111_v10 = vld [vmem:[#allocation7 + $0xbe8] sm:$0xf0]  ;;  %v12773_v3 = vld [vmem:[#allocation7 + $0x130] sm:$0xf] }
 0x52b   :  { %v14114_v13 = vor.u32 %v16717_v60, %v14111_v10  ;;  %v12774_v32 = vor.u32 %v16390_v7, %v12773_v3  ;;  %v16821_v60 = vld [vmem:[#allocation7 + $0xee4] sm:$0xf0]  ;;  %v13031_v3 = vld [vmem:[#allocation7 + $0x370] sm:$0xf0] }
 0x52c   :  { %7822 = vmatpush.bf16.msrb.mxu0 %v12706_v40  ;;  %7835 = vmatpush.bf16.msrb.mxu1 %v13218_v44  ;;  %v16550_v40 = vld [vmem:[#allocation7 + $0x66c] sm:$0xf0]  ;;  %v16629_v44 = vld [vmem:[#allocation7 + $0x8e4] sm:$0xf0] }
 0x52d   :  { %v13414_v46 = vor.u32 %v16550_v40, %v13413_v26  ;;  %v13726_v11 = vor.u32 %v16629_v44, %v13725_v42  ;;  %v14557_v40 = vld [vmem:[#allocation7 + $0xf28] sm:$0xf]  ;;  %v12710_v44 = vor.u32 %v16374_v28, %v12709_v2  ;;  %v16637_v28 = vld [vmem:[#allocation7 + $0x92c] sm:$0xf] }
 0x52e   :  { %7794 = vmatpush.bf16.msra.mxu2 %v13854_v1  ;;  %7754 = vmatpush.bf16.msrb.mxu3 %v14426_v19  ;;  %v16732_v1 = vld [vmem:[#allocation7 + $0xc24] sm:$0xf]  ;;  %v16701_v19 = vld [vmem:[#allocation7 + $0xb2c] sm:$0xf] }
 0x52f   :  { %v14050_v26 = vor.u32 %v16701_v19, %v14047_v53  ;;  %v12967_v19 = vld [vmem:[#allocation7 + $0x2f0] sm:$0xf0] }
 0x530   :  { %7823 = vmatpush.bf16.msrb.mxu0 %v12642_v58  ;;  %7836 = vmatpush.bf16.msrb.mxu1 %v13154_v52  ;;  %v16534_v58 = vld [vmem:[#allocation7 + $0x5ec] sm:$0xf0]  ;;  %v7617_v50 = vpop.f32.mrf.mxu0  ;;  %v16748_v52 = vld [vmem:[#allocation7 + $0xca4] sm:$0xf]  ;;  %v7630_v25 = vpop.f32.mrf.mxu1 }
 0x531   :  { %v7618_v54 = vadd.f32 %v7617_v50, %v4659_v61  ;;  %v13350_v6 = vor.u32 %v16534_v58, %v13349_v17  ;;  %v14234_v39 = vor.u32 %v16748_v52, %v14231_v59  ;;  %v16837_v61 = vld [vmem:[#allocation7 + $0xf64] sm:$0xf0]  ;;  %v16462_v17 = vld [vmem:[#allocation7 + $0x3b4] sm:$0xf] }
 0x532   :  { %7795 = vmatpush.bf16.msra.mxu2 %v13790_v36  ;;  %7755 = vmatpush.bf16.msrb.mxu3 %v14362_v62  ;;  %v14170_v36 = vor.u32 %v16732_v1, %v14167_v15  ;;  %v7502_v62 = vpop.f32.mrf.mxu3  ;;  %v13095_v58 = vld [vmem:[#allocation7 + $0x3f0] sm:$0xf0]  ;;  %v14493_v59 = vld [vmem:[#allocation7 + $0xea8] sm:$0xf] }
 0x533   :  { %7824 = vmatmul.bf16.vlgmr.msrb.gmra.mxu0 %v17554_v21  ;;  %7837 = vmatmul.bf16.vlgmr.msrb.gmra.mxu1 %v17570_v27  ;;  %v17702_v57 = vadd.f32 %v7630_v25, %v7618_v54  ;;  %v13607_v52 = vld [vmem:[#allocation7 + $0x7f0] sm:$0xf0]  ;;  %v16669_v54 = vld [vmem:[#allocation7 + $0xa2c] sm:$0xf]  ;;  %v14494_v4 = vor.u32 %v16821_v60, %v14493_v59  ;;  %v14429_v1 = vld [vmem:[#allocation7 + $0xe28] sm:$0xf] }
 0x534   :  { %7868 = vmatpush.bf16.msra.mxu0 %v13094_v35  ;;  %7881 = vmatpush.bf16.msra.mxu1 %v13606_v49  ;;  %v16613_v35 = vld [vmem:[#allocation7 + $0x864] sm:$0xf0]  ;;  %v12838_v49 = vor.u32 %v16406_v48, %v12837_v47  ;;  %v16358_v47 = vld [vmem:[#allocation7 + $0x6c] sm:$0xf0]  ;;  %v13919_v25 = vld [vmem:[#allocation7 + $0xa68] sm:$0xf0] }
 0x535   :  { %v13157_v48 = vld [vmem:[#allocation7 + $0x430] sm:$0xf]  ;;  %v13922_v7 = vor.u32 %v16669_v54, %v13919_v25  ;;  %v16805_v15 = vld [vmem:[#allocation7 + $0xe64] sm:$0xf0]  ;;  %v12903_v62 = vld [vmem:[#allocation7 + $0x270] sm:$0xf0] }
 0x536   :  { %7796 = vmatpush.bf16.msra.mxu2 %v13726_v11  ;;  %7756 = vmatpush.bf16.msrb.mxu3 %v14298_v51  ;;  %v16486_v11 = vld [vmem:[#allocation7 + $0x46c] sm:$0xf0]  ;;  %v16590_v51 = vld [vmem:[#allocation7 + $0x7b4] sm:$0xf]  ;;  %v14430_v2 = vor.u32 %v16805_v15, %v14429_v1  ;;  %v13663_v59 = vld [vmem:[#allocation7 + $0x868] sm:$0xf0] }
 0x537   :  { %v13158_v38 = vor.u32 %v16486_v11, %v13157_v48  ;;  %v13610_v10 = vor.u32 %v16590_v51, %v13607_v52  ;;  %v16398_v51 = vld [vmem:[#allocation7 + $0x1b4] sm:$0xf] }
 0x538   :  { %7869 = vmatpush.bf16.msra.mxu0 %v13030_v5  ;;  %7882 = vmatpush.bf16.msra.mxu1 %v13542_v22  ;;  %v13662_v5 = vor.u32 %v16613_v35, %v13661_v14  ;;  %v7541_v22 = vpop.f32.mrf.mxu2  ;;  %v7619_v34 = vpop.f32.mrf.mxu0  ;;  %v14558_v14 = vor.u32 %v16837_v61, %v14557_v40  ;;  %v17708_v40 = vld [vmem:[#allocation9 + $0x15] sm:$0xff] }
 0x539   :  { %v7632_v41 = vpop.f32.mrf.mxu1  ;;  %v16653_v22 = vld [vmem:[#allocation7 + $0x9ac] sm:$0xf]  ;;  %v14365_v34 = vld [vmem:[#allocation7 + $0xda8] sm:$0xf]  ;;  %v13415_v61 = vld [vmem:[#allocation7 + $0x670] sm:$0xf0] }
 0x53a   :  { %7797 = vmatpush.bf16.msra.mxu2 %v13662_v5  ;;  %7757 = vmatpush.bf16.msrb.mxu3 %v14234_v39  ;;  %v16574_v5 = vld [vmem:[#allocation7 + $0x734] sm:$0xf]  ;;  %v13855_v39 = vld [vmem:[#allocation7 + $0x9e8] sm:$0xf0]  ;;  %v4660_v48 = vperm.slane %v17708_v40, 0 }
 0x53b   :  { %v13858_v53 = vor.u32 %v16653_v22, %v13855_v39  ;;  %v16414_v41 = vld [vmem:[#allocation7 + $0x234] sm:$0xf] }
 0x53c   :  { %7870 = vmatpush.bf16.msra.mxu0 %v12966_v23  ;;  %7883 = vmatpush.bf16.msra.mxu1 %v13478_v29  ;;  %v16853_v23 = vld [vmem:[#allocation7 + $0xfe4] sm:$0xf0]  ;;  %v13221_v29 = vld [vmem:[#allocation7 + $0x4b0] sm:$0xf]  ;;  %v12906_v11 = vor.u32 %v16414_v41, %v12903_v62  ;;  %v12839_v52 = vld [vmem:[#allocation7 + $0x1f0] sm:$0xf0] }
 0x53d   :  { %v14622_v42 = vor.u32 %v16853_v23, %v14621_v0  ;;  %7798 = vmatmul.bf16.vlgmr.msra.gmra.mxu2 %v17590_v20  ;;  %v13222_v55 = vor.u32 %v16502_v31, %v13221_v29  ;;  %v16430_v0 = vld [vmem:[#allocation7 + $0x2b4] sm:$0xf]  ;;  %v13791_v29 = vld [vmem:[#allocation7 + $0x968] sm:$0xf0] }
 0x53e   :  { %7842 = vmatpush.bf16.msrb.mxu2 %v14114_v13  ;;  %7758 = vmatpush.bf16.msrb.mxu3 %v14170_v36  ;;  %v13479_v23 = vld [vmem:[#allocation7 + $0x6f0] sm:$0xf0]  ;;  %v12970_v31 = vor.u32 %v16430_v0, %v12967_v19  ;;  %v16789_v36 = vld [vmem:[#allocation7 + $0xde4] sm:$0xf0] }
 0x53f   :  { %v13351_v54 = vld [vmem:[#allocation7 + $0x5f0] sm:$0xf0] }
 0x540   :  { %7871 = vmatpush.bf16.msra.mxu0 %v12902_v16  ;;  %7884 = vmatpush.bf16.msra.mxu1 %v13414_v46  ;;  %v16685_v16 = vld [vmem:[#allocation7 + $0xaac] sm:$0xf]  ;;  %v12645_v46 = vld [vmem:[#allocation7 + $0x30] sm:$0xf]  ;;  %v16382_v39 = vld [vmem:[#allocation7 + $0x134] sm:$0xf] }
 0x541   :  { %v13986_v50 = vor.u32 %v16685_v16, %v13983_v18  ;;  %v12646_v35 = vor.u32 %v16358_v47, %v12645_v46  ;;  %7759 = vmatmul.bf16.vlgmr.msrb.gmra.mxu3 %v17605_v8  ;;  %v7591_v16 = vpop.f32.mrf.mxu2  ;;  %v14366_v18 = vor.u32 %v16789_v36, %v14365_v34  ;;  %v13727_v46 = vld [vmem:[#allocation7 + $0x8e8] sm:$0xf0]  ;;  %v13287_v0 = vld [vmem:[#allocation7 + $0x570] sm:$0xf0] }
 0x542   :  { %7843 = vmatpush.bf16.msrb.mxu2 %v14050_v26  ;;  %7803 = vmatpush.bf16.msra.mxu3 %v14622_v42  ;;  %v13794_v42 = vor.u32 %v16637_v28, %v13791_v29  ;;  %v17711_v47 = vadd.f32 %v7591_v16, %v17689_v24  ;;  %v16605_v24 = vld [vmem:[#allocation7 + $0x82c] sm:$0xf]  ;;  %v14053_v29 = vld [vmem:[#allocation7 + $0xb30] sm:$0xf]  ;;  %v12711_v41 = vld [vmem:[#allocation7 + $0xf0] sm:$0xf0] }
 0x543   :  { %v13666_v15 = vor.u32 %v16605_v24, %v13663_v59  ;;  %v14623_v36 = vld [vmem:[#allocation7 + $0xfe8] sm:$0xf0]  ;;  %v16494_v62 = vld [vmem:[#allocation7 + $0x4b4] sm:$0xf]  ;;  %v13613_v24 = vld [vmem:[#allocation7 + $0x7b8] sm:$0xf] }
 0x544   :  { %7872 = vmatpush.bf16.msra.mxu0 %v12838_v49  ;;  %7885 = vmatpush.bf16.msra.mxu1 %v13350_v6  ;;  %v13098_v49 = vor.u32 %v16462_v17, %v13095_v58  ;;  %v16446_v6 = vld [vmem:[#allocation7 + $0x334] sm:$0xf]  ;;  %v14301_v17 = vld [vmem:[#allocation7 + $0xd28] sm:$0xf]  ;;  %v16599_v59 = vld [vmem:[#allocation7 + $0x7f4] sm:$0xf0] }
 0x545   :  { %v13034_v13 = vor.u32 %v16446_v6, %v13031_v3  ;;  %v16773_v58 = vld [vmem:[#allocation7 + $0xd64] sm:$0xf0]  ;;  %v7552_v6 = vpop.f32.mrf.mxu3  ;;  %v12842_v3 = vor.u32 %v16398_v51, %v12839_v52  ;;  %v16350_v52 = vld [vmem:[#allocation7 + $0x34] sm:$0xf] }
 0x546   :  { %7844 = vmatpush.bf16.msrb.mxu2 %v13986_v50  ;;  %7804 = vmatpush.bf16.msra.mxu3 %v14558_v14 }
 0x548   :  { %7873 = vmatpush.bf16.msra.mxu0 %v12774_v32  ;;  %7886 = vmatpush.bf16.msra.mxu1 %v13286_v33  ;;  %v13546_v32 = vor.u32 %v16574_v5, %v13543_v37  ;;  %v16558_v33 = vld [vmem:[#allocation7 + $0x6b4] sm:$0xf]  ;;  %v14117_v5 = vld [vmem:[#allocation7 + $0xbb0] sm:$0xf] }
 0x549   :  { %v13482_v26 = vor.u32 %v16558_v33, %v13479_v23  ;;  %v16726_v37 = vld [vmem:[#allocation7 + $0xbec] sm:$0xf0]  ;;  %v7593_v19 = vpop.f32.mrf.mxu2  ;;  %v14173_v23 = vld [vmem:[#allocation7 + $0xc28] sm:$0xf] }
 0x54a   :  { %7845 = vmatpush.bf16.msrb.mxu2 %v13922_v7  ;;  %7805 = vmatpush.bf16.msra.mxu3 %v14494_v4  ;;  %v16757_v7 = vld [vmem:[#allocation7 + $0xce4] sm:$0xf0]  ;;  %v17715_v4 = vadd.f32 %v7552_v6, %v17696_v45  ;;  %v14118_v33 = vor.u32 %v16726_v37, %v14117_v5  ;;  %v16845_v45 = vld [vmem:[#allocation7 + $0xfac] sm:$0xf]  ;;  %v13925_v6 = vld [vmem:[#allocation7 + $0xa30] sm:$0xf] }
 0x54b   :  { %v16813_v37 = vld [vmem:[#allocation7 + $0xeac] sm:$0xf]  ;;  %v16583_v19 = vld [vmem:[#allocation7 + $0x774] sm:$0xf0] }
 0x54c   :  { %7874 = vmatpush.bf16.msra.mxu0 %v12710_v44  ;;  %7887 = vmatpush.bf16.msra.mxu1 %v13222_v55  ;;  %v16542_v44 = vld [vmem:[#allocation7 + $0x634] sm:$0xf]  ;;  %v16621_v55 = vld [vmem:[#allocation7 + $0x8ac] sm:$0xf] }
 0x54d   :  { %v13418_v50 = vor.u32 %v16542_v44, %v13415_v61  ;;  %v13730_v14 = vor.u32 %v16621_v55, %v13727_v46  ;;  %v7554_v46 = vpop.f32.mrf.mxu3 }
 0x54e   :  { %7846 = vmatpush.bf16.msrb.mxu2 %v13858_v53  ;;  %7806 = vmatpush.bf16.msra.mxu3 %v14430_v2  ;;  %v16741_v2 = vld [vmem:[#allocation7 + $0xc64] sm:$0xf0]  ;;  %v12909_v46 = vld [vmem:[#allocation7 + $0x238] sm:$0xf] }
 0x54f   :  { %v14174_v61 = vor.u32 %v16741_v2, %v14173_v23  ;;  %v16662_v23 = vld [vmem:[#allocation7 + $0x9ec] sm:$0xf0] }
 0x550   :  { %7875 = vmatpush.bf16.msra.mxu0 %v12646_v35  ;;  %7888 = vmatpush.bf16.msra.mxu1 %v13158_v38  ;;  %v16526_v35 = vld [vmem:[#allocation7 + $0x5b4] sm:$0xf]  ;;  %v7669_v25 = vpop.f32.mrf.mxu0  ;;  %v14302_v38 = vor.u32 %v16773_v58, %v14301_v17  ;;  %v14559_v17 = vld [vmem:[#allocation7 + $0xf68] sm:$0xf0]  ;;  %v13989_v58 = vld [vmem:[#allocation7 + $0xab0] sm:$0xf] }
 0x551   :  { %v7670_v60 = vadd.f32 %v7669_v25, %v4660_v48  ;;  %v13354_v22 = vor.u32 %v16526_v35, %v13351_v54  ;;  %v14626_v48 = vor.u32 %v16845_v45, %v14623_v36  ;;  %v16478_v35 = vld [vmem:[#allocation7 + $0x434] sm:$0xf]  ;;  %v13101_v25 = vld [vmem:[#allocation7 + $0x3b8] sm:$0xf]  ;;  %v14431_v45 = vld [vmem:[#allocation7 + $0xe68] sm:$0xf0] }
 0x552   :  { %7847 = vmatpush.bf16.msrb.mxu2 %v13794_v42  ;;  %7807 = vmatpush.bf16.msra.mxu3 %v14366_v18  ;;  %v13223_v42 = vld [vmem:[#allocation7 + $0x4f0] sm:$0xf0]  ;;  %v16829_v18 = vld [vmem:[#allocation7 + $0xf2c] sm:$0xf] }
 0x553   :  { %7876 = vmatmul.bf16.vlgmr.msra.gmra.mxu0 %v17554_v21  ;;  %7889 = vmatmul.bf16.vlgmr.msra.gmra.mxu1 %v17570_v27  ;;  %v13226_v51 = vor.u32 %v16494_v62, %v13223_v42  ;;  %v13159_v54 = vld [vmem:[#allocation7 + $0x470] sm:$0xf0]  ;;  %v13797_v42 = vld [vmem:[#allocation7 + $0x930] sm:$0xf] }
 0x554   :  { %7920 = vmatpush.bf16.msrb.mxu0 %v13098_v49  ;;  %7933 = vmatpush.bf16.msrb.mxu1 %v13610_v10  ;;  %v14237_v49 = vld [vmem:[#allocation7 + $0xca8] sm:$0xf]  ;;  %v7682_v10 = vpop.f32.mrf.mxu1 }
 0x555   :  { %v17717_v1 = vadd.f32 %v7682_v10, %v7670_v60  ;;  %v14238_v53 = vor.u32 %v16757_v7, %v14237_v49  ;;  %v14562_v60 = vor.u32 %v16829_v18, %v14559_v17  ;;  %v13162_v7 = vor.u32 %v16478_v35, %v13159_v54  ;;  %v14367_v18 = vld [vmem:[#allocation7 + $0xde8] sm:$0xf0]  ;;  %v13421_v17 = vld [vmem:[#allocation7 + $0x638] sm:$0xf] }
 0x556   :  { %7848 = vmatpush.bf16.msrb.mxu2 %v13730_v14  ;;  %7808 = vmatpush.bf16.msra.mxu3 %v14302_v38  ;;  %v12647_v14 = vld [vmem:[#allocation7 + $0x70] sm:$0xf0]  ;;  %v16471_v38 = vld [vmem:[#allocation7 + $0x3f4] sm:$0xf0]  ;;  %v4661_v54 = vperm.slane %v17708_v40, 1 }
 0x557   :  { %v12650_v10 = vor.u32 %v16350_v52, %v12647_v14  ;;  %v13102_v5 = vor.u32 %v16471_v38, %v13101_v25  ;;  %v13733_v52 = vld [vmem:[#allocation7 + $0x8b0] sm:$0xf]  ;;  %v16765_v38 = vld [vmem:[#allocation7 + $0xd2c] sm:$0xf] }
 0x558   :  { %7921 = vmatpush.bf16.msrb.mxu0 %v13034_v13  ;;  %7934 = vmatpush.bf16.msrb.mxu1 %v13546_v32  ;;  %v12775_v13 = vld [vmem:[#allocation7 + $0x170] sm:$0xf0]  ;;  %v7671_v44 = vpop.f32.mrf.mxu0  ;;  %v16630_v14 = vld [vmem:[#allocation7 + $0x8ec] sm:$0xf0] }
 0x559   :  { %v16510_v32 = vld [vmem:[#allocation7 + $0x534] sm:$0xf]  ;;  %v12778_v28 = vor.u32 %v16382_v39, %v12775_v13  ;;  %v13614_v39 = vor.u32 %v16599_v59, %v13613_v24  ;;  %v13037_v13 = vld [vmem:[#allocation7 + $0x338] sm:$0xf]  ;;  %v16646_v44 = vld [vmem:[#allocation7 + $0x96c] sm:$0xf0] }
 0x55a   :  { %v13290_v34 = vor.u32 %v16510_v32, %v13287_v0  ;;  %7849 = vmatpush.bf16.msrb.mxu2 %v13666_v15  ;;  %7809 = vmatpush.bf16.msra.mxu3 %v14238_v53  ;;  %v16455_v15 = vld [vmem:[#allocation7 + $0x374] sm:$0xf0] }
 0x55b   :  { %v13549_v0 = vld [vmem:[#allocation7 + $0x738] sm:$0xf]  ;;  %v13038_v2 = vor.u32 %v16455_v15, %v13037_v13 }
 0x55c   :  { %7922 = vmatpush.bf16.msrb.mxu0 %v12970_v31  ;;  %7935 = vmatpush.bf16.msrb.mxu1 %v13482_v26  ;;  %v16710_v31 = vld [vmem:[#allocation7 + $0xb6c] sm:$0xf0]  ;;  %v16366_v26 = vld [vmem:[#allocation7 + $0xb4] sm:$0xf]  ;;  %v7684_v55 = vpop.f32.mrf.mxu1  ;;  %v12845_v59 = vld [vmem:[#allocation7 + $0x1b8] sm:$0xf] }
 0x55d   :  { %v14054_v16 = vor.u32 %v16710_v31, %v14053_v29  ;;  %7850 = vmatmul.bf16.vlgmr.msrb.gmra.mxu2 %v17590_v20  ;;  %v13550_v29 = vor.u32 %v16583_v19, %v13549_v0  ;;  %v12973_v31 = vld [vmem:[#allocation7 + $0x2b8] sm:$0xf]  ;;  %v14239_v0 = vld [vmem:[#allocation7 + $0xce8] sm:$0xf0]  ;;  %v16718_v19 = vld [vmem:[#allocation7 + $0xbb4] sm:$0xf] }
 0x55e   :  { %7894 = vmatpush.bf16.msra.mxu2 %v14118_v33  ;;  %7810 = vmatpush.bf16.msra.mxu3 %v14174_v61  ;;  %v13861_v33 = vld [vmem:[#allocation7 + $0x9b0] sm:$0xf] }
 0x55f   :  { %v13862_v36 = vor.u32 %v16662_v23, %v13861_v33 }
 0x560   :  { %7923 = vmatpush.bf16.msrb.mxu0 %v12906_v11  ;;  %7936 = vmatpush.bf16.msrb.mxu1 %v13418_v50  ;;  %v12714_v11 = vor.u32 %v16366_v26, %v12711_v41  ;;  %v16694_v50 = vld [vmem:[#allocation7 + $0xaec] sm:$0xf0]  ;;  %v13485_v26 = vld [vmem:[#allocation7 + $0x6b8] sm:$0xf] }
 0x561   :  { %v13990_v49 = vor.u32 %v16694_v50, %v13989_v58  ;;  %7811 = vmatmul.bf16.vlgmr.msra.gmra.mxu3 %v17605_v8  ;;  %v16567_v41 = vld [vmem:[#allocation7 + $0x6f4] sm:$0xf0]  ;;  %v7643_v50 = vpop.f32.mrf.mxu2 }
 0x562   :  { %7895 = vmatpush.bf16.msra.mxu2 %v14054_v16  ;;  %7855 = vmatpush.bf16.msrb.mxu3 %v14626_v48  ;;  %v16781_v16 = vld [vmem:[#allocation7 + $0xdac] sm:$0xf]  ;;  %v13486_v55 = vor.u32 %v16567_v41, %v13485_v26  ;;  %v16423_v48 = vld [vmem:[#allocation7 + $0x274] sm:$0xf0]  ;;  %v17724_v35 = vadd.f32 %v7643_v50, %v17702_v57  ;;  %v13669_v57 = vld [vmem:[#allocation7 + $0x830] sm:$0xf] }
 0x563   :  { %v16551_v58 = vld [vmem:[#allocation7 + $0x674] sm:$0xf0]  ;;  %v12910_v25 = vor.u32 %v16423_v48, %v12909_v46 }
 0x564   :  { %7924 = vmatpush.bf16.msrb.mxu0 %v12842_v3  ;;  %7937 = vmatpush.bf16.msrb.mxu1 %v13354_v22  ;;  %v16678_v3 = vld [vmem:[#allocation7 + $0xa6c] sm:$0xf0]  ;;  %v14495_v22 = vld [vmem:[#allocation7 + $0xee8] sm:$0xf0]  ;;  %v13422_v24 = vor.u32 %v16551_v58, %v13421_v17  ;;  %v7604_v15 = vpop.f32.mrf.mxu3  ;;  %v12717_v46 = vld [vmem:[#allocation7 + $0xb8] sm:$0xf] }
 0x565   :  { %v13926_v32 = vor.u32 %v16678_v3, %v13925_v6  ;;  %v14498_v53 = vor.u32 %v16813_v37, %v14495_v22  ;;  %v13357_v6 = vld [vmem:[#allocation7 + $0x5b8] sm:$0xf]  ;;  %v16749_v37 = vld [vmem:[#allocation7 + $0xcac] sm:$0xf]  ;;  %v16614_v22 = vld [vmem:[#allocation7 + $0x86c] sm:$0xf0]  ;;  %v17728_v33 = vadd.f32 %v7604_v15, %v17711_v47 }
 0x566   :  { %7896 = vmatpush.bf16.msra.mxu2 %v13990_v49  ;;  %7856 = vmatpush.bf16.msrb.mxu3 %v14562_v60  ;;  %v14303_v49 = vld [vmem:[#allocation7 + $0xd68] sm:$0xf0]  ;;  %v16407_v60 = vld [vmem:[#allocation7 + $0x1f4] sm:$0xf0]  ;;  %v14242_v26 = vor.u32 %v16749_v37, %v14239_v0  ;;  %v14629_v47 = vld [vmem:[#allocation7 + $0xfb0] sm:$0xf] }
 0x567   :  { %v16535_v3 = vld [vmem:[#allocation7 + $0x5f4] sm:$0xf0]  ;;  %v13103_v37 = vld [vmem:[#allocation7 + $0x3f8] sm:$0xf0]  ;;  %v13927_v0 = vld [vmem:[#allocation7 + $0xa70] sm:$0xf0] }
 0x568   :  { %7925 = vmatpush.bf16.msrb.mxu0 %v12778_v28  ;;  %7938 = vmatpush.bf16.msrb.mxu1 %v13290_v34  ;;  %v16797_v28 = vld [vmem:[#allocation7 + $0xe2c] sm:$0xf]  ;;  %v16439_v34 = vld [vmem:[#allocation7 + $0x2f4] sm:$0xf0]  ;;  %v13358_v23 = vor.u32 %v16535_v3, %v13357_v6 }
 0x569   :  { %v14434_v62 = vor.u32 %v16797_v28, %v14431_v45  ;;  %v12974_v61 = vor.u32 %v16439_v34, %v12973_v31  ;;  %v16391_v28 = vld [vmem:[#allocation7 + $0x174] sm:$0xf0] }
 0x56a   :  { %7897 = vmatpush.bf16.msra.mxu2 %v13926_v32  ;;  %7857 = vmatpush.bf16.msrb.mxu3 %v14498_v53  ;;  %v12846_v32 = vor.u32 %v16407_v60, %v12845_v59  ;;  %v14119_v53 = vld [vmem:[#allocation7 + $0xbf0] sm:$0xf0]  ;;  %v13293_v31 = vld [vmem:[#allocation7 + $0x538] sm:$0xf] }
 0x56b   :  { %v16519_v34 = vld [vmem:[#allocation7 + $0x574] sm:$0xf0]  ;;  %v14122_v41 = vor.u32 %v16718_v19, %v14119_v53  ;;  %v13991_v59 = vld [vmem:[#allocation7 + $0xaf0] sm:$0xf0] }
 0x56c   :  { %7926 = vmatpush.bf16.msrb.mxu0 %v12714_v11  ;;  %7939 = vmatpush.bf16.msrb.mxu1 %v13226_v51  ;;  %v13798_v11 = vor.u32 %v16646_v44, %v13797_v42  ;;  %v14370_v51 = vor.u32 %v16781_v16, %v14367_v18  ;;  %v14175_v42 = vld [vmem:[#allocation7 + $0xc68] sm:$0xf0]  ;;  %v14055_v16 = vld [vmem:[#allocation7 + $0xb70] sm:$0xf0]  ;;  %v13294_v18 = vor.u32 %v16519_v34, %v13293_v31  ;;  %v16375_v48 = vld [vmem:[#allocation7 + $0xf4] sm:$0xf0] }
 0x56d   :  { %v16503_v17 = vld [vmem:[#allocation7 + $0x4f4] sm:$0xf0]  ;;  %v13039_v31 = vld [vmem:[#allocation7 + $0x378] sm:$0xf0] }
 0x56e   :  { %7898 = vmatpush.bf16.msra.mxu2 %v13862_v36  ;;  %7858 = vmatpush.bf16.msrb.mxu3 %v14434_v62  ;;  %v7645_v36 = vpop.f32.mrf.mxu2  ;;  %v16733_v62 = vld [vmem:[#allocation7 + $0xc2c] sm:$0xf]  ;;  %v16359_v6 = vld [vmem:[#allocation7 + $0x74] sm:$0xf0] }
 0x56f   :  { %v14178_v50 = vor.u32 %v16733_v62, %v14175_v42  ;;  %v13165_v3 = vld [vmem:[#allocation7 + $0x438] sm:$0xf]  ;;  %v16575_v36 = vld [vmem:[#allocation7 + $0x73c] sm:$0xf]  ;;  %v16654_v62 = vld [vmem:[#allocation7 + $0x9b4] sm:$0xf] }
 0x570   :  { %7927 = vmatpush.bf16.msrb.mxu0 %v12650_v10  ;;  %7940 = vmatpush.bf16.msrb.mxu1 %v13162_v7  ;;  %v13734_v10 = vor.u32 %v16630_v14, %v13733_v52  ;;  %v7721_v7 = vpop.f32.mrf.mxu0  ;;  %v7734_v13 = vpop.f32.mrf.mxu1  ;;  %v14565_v52 = vld [vmem:[#allocation7 + $0xf30] sm:$0xf]  ;;  %v13863_v42 = vld [vmem:[#allocation7 + $0x9f0] sm:$0xf0] }
 0x572   :  { %7899 = vmatpush.bf16.msra.mxu2 %v13798_v11  ;;  %7859 = vmatpush.bf16.msrb.mxu3 %v14370_v51  ;;  %v13229_v11 = vld [vmem:[#allocation7 + $0x4b8] sm:$0xf] }
 0x573   :  { %7928 = vmatmul.bf16.vlgmr.msrb.gmra.mxu0 %v17554_v21  ;;  %7941 = vmatmul.bf16.vlgmr.msrb.gmra.mxu1 %v17570_v27  ;;  %v13230_v60 = vor.u32 %v16503_v17, %v13229_v11  ;;  %v13487_v11 = vld [vmem:[#allocation7 + $0x6f8] sm:$0xf0] }
 0x574   :  { %7972 = vmatpush.bf16.msra.mxu0 %v13102_v5  ;;  %7985 = vmatpush.bf16.msra.mxu1 %v13614_v39  ;;  %v14306_v5 = vor.u32 %v16765_v38, %v14303_v49  ;;  %v7722_v39 = vadd.f32 %v7721_v7, %v4661_v54  ;;  %v7606_v54 = vpop.f32.mrf.mxu3  ;;  %v12718_v38 = vor.u32 %v16375_v48, %v12717_v46  ;;  %v16838_v49 = vld [vmem:[#allocation7 + $0xf6c] sm:$0xf0]  ;;  %v16487_v7 = vld [vmem:[#allocation7 + $0x474] sm:$0xf0]  ;;  %v16559_v48 = vld [vmem:[#allocation7 + $0x6bc] sm:$0xf] }
 0x575   :  { %v13166_v19 = vor.u32 %v16487_v7, %v13165_v3  ;;  %v13866_v46 = vor.u32 %v16654_v62, %v13863_v42  ;;  %v13490_v54 = vor.u32 %v16559_v48, %v13487_v11  ;;  %v13735_v3 = vld [vmem:[#allocation7 + $0x8f0] sm:$0xf0]  ;;  %v16727_v62 = vld [vmem:[#allocation7 + $0xbf4] sm:$0xf0] }
 0x576   :  { %v17730_v45 = vadd.f32 %v7734_v13, %v7722_v39  ;;  %7900 = vmatpush.bf16.msra.mxu2 %v13734_v10  ;;  %7860 = vmatpush.bf16.msrb.mxu3 %v14306_v5  ;;  %v12653_v10 = vld [vmem:[#allocation7 + $0x38] sm:$0xf]  ;;  %v16463_v5 = vld [vmem:[#allocation7 + $0x3bc] sm:$0xf]  ;;  %v14566_v13 = vor.u32 %v16838_v49, %v14565_v52  ;;  %v14373_v52 = vld [vmem:[#allocation7 + $0xdb0] sm:$0xf] }
 0x577   :  { %v13615_v39 = vld [vmem:[#allocation7 + $0x7f8] sm:$0xf0]  ;;  %v12654_v15 = vor.u32 %v16359_v6, %v12653_v10  ;;  %v13106_v53 = vor.u32 %v16463_v5, %v13103_v37  ;;  %v16622_v6 = vld [vmem:[#allocation7 + $0x8b4] sm:$0xf]  ;;  %v4662_v5 = vperm.slane %v17708_v40, 2 }
 0x578   :  { %7973 = vmatpush.bf16.msra.mxu0 %v13038_v2  ;;  %7986 = vmatpush.bf16.msra.mxu1 %v13550_v29  ;;  %v12781_v2 = vld [vmem:[#allocation7 + $0x138] sm:$0xf]  ;;  %v13670_v29 = vor.u32 %v16614_v22, %v13669_v57  ;;  %v7723_v58 = vpop.f32.mrf.mxu0  ;;  %v7736_v14 = vpop.f32.mrf.mxu1  ;;  %v16591_v22 = vld [vmem:[#allocation7 + $0x7bc] sm:$0xf] }
 0x579   :  { %v12782_v44 = vor.u32 %v16391_v28, %v12781_v2  ;;  %v16822_v2 = vld [vmem:[#allocation7 + $0xeec] sm:$0xf0]  ;;  %v13618_v28 = vor.u32 %v16591_v22, %v13615_v39  ;;  %v16638_v58 = vld [vmem:[#allocation7 + $0x934] sm:$0xf] }
 0x57a   :  { %7901 = vmatpush.bf16.msra.mxu2 %v13670_v29  ;;  %7861 = vmatpush.bf16.msrb.mxu3 %v14242_v26  ;;  %v16447_v29 = vld [vmem:[#allocation7 + $0x33c] sm:$0xf]  ;;  %v16790_v14 = vld [vmem:[#allocation7 + $0xdec] sm:$0xf0] }
 0x57b   :  { %v13551_v26 = vld [vmem:[#allocation7 + $0x778] sm:$0xf0]  ;;  %v14374_v10 = vor.u32 %v16790_v14, %v14373_v52  ;;  %v16774_v22 = vld [vmem:[#allocation7 + $0xd6c] sm:$0xf0]  ;;  %v14061_v52 = vld [vmem:[#allocation7 + $0xb38] sm:$0xf] }
 0x57c   :  { %7974 = vmatpush.bf16.msra.mxu0 %v12974_v61  ;;  %7987 = vmatpush.bf16.msra.mxu1 %v13486_v55  ;;  %v16702_v61 = vld [vmem:[#allocation7 + $0xb34] sm:$0xf]  ;;  %v16854_v55 = vld [vmem:[#allocation7 + $0xfec] sm:$0xf0]  ;;  %v16711_v14 = vld [vmem:[#allocation7 + $0xb74] sm:$0xf0] }
 0x57d   :  { %v14058_v51 = vor.u32 %v16702_v61, %v14055_v16  ;;  %7902 = vmatmul.bf16.vlgmr.msra.gmra.mxu2 %v17590_v20  ;;  %v16806_v61 = vld [vmem:[#allocation7 + $0xe6c] sm:$0xf0]  ;;  %v13554_v16 = vor.u32 %v16575_v36, %v13551_v26 }
 0x57e   :  { %7946 = vmatpush.bf16.msrb.mxu2 %v14122_v41  ;;  %7862 = vmatpush.bf16.msrb.mxu3 %v14178_v50  ;;  %v13799_v50 = vld [vmem:[#allocation7 + $0x970] sm:$0xf0]  ;;  %v16758_v26 = vld [vmem:[#allocation7 + $0xcec] sm:$0xf0] }
 0x57f   :  { %v13802_v49 = vor.u32 %v16638_v58, %v13799_v50  ;;  %v14181_v58 = vld [vmem:[#allocation7 + $0xc30] sm:$0xf] }
 0x580   :  { %7975 = vmatpush.bf16.msra.mxu0 %v12910_v25  ;;  %7988 = vmatpush.bf16.msra.mxu1 %v13422_v24  ;;  %v14630_v25 = vor.u32 %v16854_v55, %v14629_v47  ;;  %v16686_v24 = vld [vmem:[#allocation7 + $0xab4] sm:$0xf]  ;;  %v14437_v47 = vld [vmem:[#allocation7 + $0xe30] sm:$0xf]  ;;  %v12975_v55 = vld [vmem:[#allocation7 + $0x2f8] sm:$0xf0] }
 0x581   :  { %v13994_v57 = vor.u32 %v16686_v24, %v13991_v59  ;;  %7863 = vmatmul.bf16.vlgmr.msrb.gmra.mxu3 %v17605_v8  ;;  %v14438_v17 = vor.u32 %v16806_v61, %v14437_v47  ;;  %v16543_v24 = vld [vmem:[#allocation7 + $0x63c] sm:$0xf]  ;;  %v16742_v50 = vld [vmem:[#allocation7 + $0xc6c] sm:$0xf0] }
 0x582   :  { %7947 = vmatpush.bf16.msrb.mxu2 %v14058_v51  ;;  %7907 = vmatpush.bf16.msra.mxu3 %v14630_v25  ;;  %v16415_v25 = vld [vmem:[#allocation7 + $0x23c] sm:$0xf] }
 0x583   :  { %v13423_v59 = vld [vmem:[#allocation7 + $0x678] sm:$0xf0] }
 0x584   :  { %7976 = vmatpush.bf16.msra.mxu0 %v12846_v32  ;;  %7989 = vmatpush.bf16.msra.mxu1 %v13358_v23  ;;  %v16670_v32 = vld [vmem:[#allocation7 + $0xa34] sm:$0xf]  ;;  %v14501_v23 = vld [vmem:[#allocation7 + $0xeb0] sm:$0xf]  ;;  %v13426_v39 = vor.u32 %v16543_v24, %v13423_v59  ;;  %v16383_v47 = vld [vmem:[#allocation7 + $0x13c] sm:$0xf] }
 0x585   :  { %v13930_v34 = vor.u32 %v16670_v32, %v13927_v0  ;;  %v14502_v41 = vor.u32 %v16822_v2, %v14501_v23  ;;  %v13738_v32 = vor.u32 %v16622_v6, %v13735_v3  ;;  %v16527_v0 = vld [vmem:[#allocation7 + $0x5bc] sm:$0xf]  ;;  %v14245_v2 = vld [vmem:[#allocation7 + $0xcb0] sm:$0xf]  ;;  %v14062_v6 = vor.u32 %v16711_v14, %v14061_v52  ;;  %v16830_v3 = vld [vmem:[#allocation7 + $0xf34] sm:$0xf] }
 0x586   :  { %7948 = vmatpush.bf16.msrb.mxu2 %v13994_v57  ;;  %7908 = vmatpush.bf16.msra.mxu3 %v14566_v13  ;;  %v14309_v57 = vld [vmem:[#allocation7 + $0xd30] sm:$0xf]  ;;  %v16399_v13 = vld [vmem:[#allocation7 + $0x1bc] sm:$0xf]  ;;  %v14246_v11 = vor.u32 %v16758_v26, %v14245_v2  ;;  %v13933_v26 = vld [vmem:[#allocation7 + $0xa38] sm:$0xf] }
 0x587   :  { %v14310_v23 = vor.u32 %v16774_v22, %v14309_v57  ;;  %v12783_v61 = vld [vmem:[#allocation7 + $0x178] sm:$0xf0]  ;;  %v14701_v2 = vld [vmem:[#allocation4 + $0x3f0] sm:$0xf]  ;;  %v16798_v52 = vld [vmem:[#allocation7 + $0xe34] sm:$0xf] }
 0x588   :  { %7977 = vmatpush.bf16.msra.mxu0 %v12782_v44  ;;  %7990 = vmatpush.bf16.msra.mxu1 %v13294_v18  ;;  %v13042_v44 = vor.u32 %v16447_v29, %v13039_v31  ;;  %v16431_v18 = vld [vmem:[#allocation7 + $0x2bc] sm:$0xf]  ;;  %v14439_v14 = vld [vmem:[#allocation7 + $0xe70] sm:$0xf0] }
 0x589   :  { %v12978_v51 = vor.u32 %v16431_v18, %v12975_v55  ;;  %v16511_v55 = vld [vmem:[#allocation7 + $0x53c] sm:$0xf] }
 0x58a   :  { %7949 = vmatpush.bf16.msrb.mxu2 %v13930_v34  ;;  %7909 = vmatpush.bf16.msra.mxu3 %v14502_v41  ;;  %v7656_v34 = vpop.f32.mrf.mxu3  ;;  %v14125_v41 = vld [vmem:[#allocation7 + $0xbb8] sm:$0xf]  ;;  %v16495_v24 = vld [vmem:[#allocation7 + $0x4bc] sm:$0xf] }
 0x58b   :  { %v17741_v42 = vadd.f32 %v7656_v34, %v17724_v35  ;;  %v16846_v35 = vld [vmem:[#allocation7 + $0xfb4] sm:$0xf]  ;;  %v13231_v59 = vld [vmem:[#allocation7 + $0x4f8] sm:$0xf0] }
 0x58c   :  { %7978 = vmatpush.bf16.msra.mxu0 %v12718_v38  ;;  %7991 = vmatpush.bf16.msra.mxu1 %v13230_v60  ;;  %v12911_v38 = vld [vmem:[#allocation7 + $0x278] sm:$0xf0]  ;;  %v7695_v60 = vpop.f32.mrf.mxu2 }
 0x58d   :  { %v17737_v7 = vadd.f32 %v7695_v60, %v17717_v1  ;;  %v12914_v37 = vor.u32 %v16415_v25, %v12911_v38  ;;  %v16606_v1 = vld [vmem:[#allocation7 + $0x834] sm:$0xf]  ;;  %v16367_v38 = vld [vmem:[#allocation7 + $0xbc] sm:$0xf] }
 0x58e   :  { %7950 = vmatpush.bf16.msrb.mxu2 %v13866_v46  ;;  %7910 = vmatpush.bf16.msra.mxu3 %v14438_v17  ;;  %v13295_v46 = vld [vmem:[#allocation7 + $0x578] sm:$0xf0]  ;;  %v14126_v17 = vor.u32 %v16727_v62, %v14125_v41  ;;  %v14631_v25 = vld [vmem:[#allocation7 + $0xff0] sm:$0xf0]  ;;  %v16679_v41 = vld [vmem:[#allocation7 + $0xa74] sm:$0xf0] }
 0x58f   :  { %v14634_v57 = vor.u32 %v16846_v35, %v14631_v25  ;;  %v14685_v25 = vld [vmem:[#allocation4 + $0x3d0] sm:$0xf] }
 0x590   :  { %7979 = vmatpush.bf16.msra.mxu0 %v12654_v15  ;;  %7992 = vmatpush.bf16.msra.mxu1 %v13166_v19  ;;  %v12847_v15 = vld [vmem:[#allocation7 + $0x1f8] sm:$0xf0]  ;;  %v7786_v31 = vpop.f32.mrf.mxu1 }
 0x591   :  { %v13359_v19 = vld [vmem:[#allocation7 + $0x5f8] sm:$0xf0]  ;;  %v12850_v36 = vor.u32 %v16399_v13, %v12847_v15  ;;  %v13997_v13 = vld [vmem:[#allocation7 + $0xab8] sm:$0xf] }
 0x592   :  { %7951 = vmatpush.bf16.msrb.mxu2 %v13802_v49  ;;  %7911 = vmatpush.bf16.msra.mxu3 %v14374_v10  ;;  %v12719_v49 = vld [vmem:[#allocation7 + $0xf8] sm:$0xf0]  ;;  %v14182_v10 = vor.u32 %v16742_v50, %v14181_v58  ;;  %v16695_v15 = vld [vmem:[#allocation7 + $0xaf4] sm:$0xf0] }
 0x593   :  { %7980 = vmatmul.bf16.vlgmr.msra.gmra.mxu0 %v17554_v21  ;;  %7993 = vmatmul.bf16.vlgmr.msra.gmra.mxu1 %v17570_v27  ;;  %v12722_v22 = vor.u32 %v16367_v38, %v12719_v49  ;;  %v13869_v50 = vld [vmem:[#allocation7 + $0x9b8] sm:$0xf] }
 0x594   :  { %8024 = vmatpush.bf16.msrb.mxu0 %v13106_v53  ;;  %8037 = vmatpush.bf16.msrb.mxu1 %v13618_v28  ;;  %v7773_v53 = vpop.f32.mrf.mxu0  ;;  %v13671_v28 = vld [vmem:[#allocation7 + $0x870] sm:$0xf0]  ;;  %v7697_v48 = vpop.f32.mrf.mxu2  ;;  %v16867_v38 = vld [vmem:[#allocation4 + $0x3d4] sm:$0xf0] }
 0x595   :  { %v7774_v29 = vadd.f32 %v7773_v53, %v4662_v5  ;;  %v13674_v18 = vor.u32 %v16606_v1, %v13671_v28  ;;  %v16479_v53 = vld [vmem:[#allocation7 + $0x43c] sm:$0xf]  ;;  %v16871_v1 = vld [vmem:[#allocation4 + $0x3f4] sm:$0xf0]  ;;  %v13998_v28 = vor.u32 %v16695_v15, %v13997_v13  ;;  %v13934_v48 = vor.u32 %v16679_v41, %v13933_v26  ;;  %v14741_v13 = vld [vmem:[#allocation4 + $0x440] sm:$0xf] }
 0x596   :  { %7952 = vmatpush.bf16.msrb.mxu2 %v13738_v32  ;;  %7912 = vmatpush.bf16.msra.mxu3 %v14310_v23  ;;  %v13234_v32 = vor.u32 %v16495_v24, %v13231_v59  ;;  %v13167_v23 = vld [vmem:[#allocation7 + $0x478] sm:$0xf0]  ;;  %v14749_v24 = vld [vmem:[#allocation4 + $0x450] sm:$0xf]  ;;  %v16883_v59 = vld [vmem:[#allocation4 + $0x454] sm:$0xf0] }
 0x597   :  { %v13170_v62 = vor.u32 %v16479_v53, %v13167_v23  ;;  %v16881_v15 = vld [vmem:[#allocation4 + $0x444] sm:$0xf0]  ;;  %v4663_v23 = vperm.slane %v17708_v40, 3  ;;  %v14733_v26 = vld [vmem:[#allocation4 + $0x430] sm:$0xf] }
 0x598   :  { %8025 = vmatpush.bf16.msrb.mxu0 %v13042_v44  ;;  %8038 = vmatpush.bf16.msrb.mxu1 %v13554_v16  ;;  %v13362_v44 = vor.u32 %v16527_v0, %v13359_v19  ;;  %v17743_v16 = vadd.f32 %v7786_v31, %v7774_v29  ;;  %v7788_v5 = vpop.f32.mrf.mxu1  ;;  %v16351_v0 = vld [vmem:[#allocation7 + $0x3c] sm:$0xf]  ;;  %v14765_v29 = vld [vmem:[#allocation4 + $0x470] sm:$0xf]  ;;  %v16887_v31 = vld [vmem:[#allocation4 + $0x474] sm:$0xf0] }
 0x599   :  { %v12655_v19 = vld [vmem:[#allocation7 + $0x78] sm:$0xf0]  ;;  %v16782_v5 = vld [vmem:[#allocation7 + $0xdb4] sm:$0xf]  ;;  %v16879_v41 = vld [vmem:[#allocation4 + $0x434] sm:$0xf0] }
 0x59a   :  { %7953 = vmatpush.bf16.msrb.mxu2 %v13674_v18  ;;  %7913 = vmatpush.bf16.msra.mxu3 %v14246_v11  ;;  %v14766_v18 = vor.u32 %v16887_v31, %v14765_v29  ;;  %v14757_v11 = vld [vmem:[#allocation4 + $0x460] sm:$0xf]  ;;  %v14742_v29 = vor.u32 %v16881_v15, %v14741_v13  ;;  %v14669_v31 = vld [vmem:[#allocation4 + $0x3b0] sm:$0xf] }
 0x59c   :  { %8026 = vmatpush.bf16.msrb.mxu0 %v12978_v51  ;;  %8039 = vmatpush.bf16.msrb.mxu1 %v13490_v54  ;;  %v12786_v51 = vor.u32 %v16383_v47, %v12783_v61  ;;  %v13298_v54 = vor.u32 %v16511_v55, %v13295_v46  ;;  %v7775_v60 = vpop.f32.mrf.mxu0  ;;  %v16814_v47 = vld [vmem:[#allocation7 + $0xeb4] sm:$0xf]  ;;  %v14693_v55 = vld [vmem:[#allocation4 + $0x3e0] sm:$0xf]  ;;  %v16869_v46 = vld [vmem:[#allocation4 + $0x3e4] sm:$0xf0] }
 0x59d   :  { %7954 = vmatmul.bf16.vlgmr.msrb.gmra.mxu2 %v17590_v20  ;;  %v14503_v61 = vld [vmem:[#allocation7 + $0xef0] sm:$0xf0]  ;;  %v14694_v35 = vor.u32 %v16869_v46, %v14693_v55  ;;  %v14442_v60 = vor.u32 %v16798_v52, %v14439_v14 }
 0x59e   :  { %7998 = vmatpush.bf16.msra.mxu2 %v14126_v17  ;;  %7914 = vmatpush.bf16.msra.mxu3 %v14182_v10  ;;  %v16885_v17 = vld [vmem:[#allocation4 + $0x464] sm:$0xf0]  ;;  %v14506_v58 = vor.u32 %v16814_v47, %v14503_v61  ;;  %v13805_v10 = vld [vmem:[#allocation7 + $0x938] sm:$0xf]  ;;  %v16750_v47 = vld [vmem:[#allocation7 + $0xcb4] sm:$0xf] }
 0x59f   :  { %v16615_v61 = vld [vmem:[#allocation7 + $0x874] sm:$0xf0] }
 0x5a0   :  { %8027 = vmatpush.bf16.msrb.mxu0 %v12914_v37  ;;  %8040 = vmatpush.bf16.msrb.mxu1 %v13426_v39  ;;  %v7658_v37 = vpop.f32.mrf.mxu3  ;;  %v14567_v39 = vld [vmem:[#allocation7 + $0xf70] sm:$0xf0] }
 0x5a1   :  { %v14570_v34 = vor.u32 %v16830_v3, %v14567_v39  ;;  %7915 = vmatmul.bf16.vlgmr.msra.gmra.mxu3 %v17605_v8  ;;  %v14686_v3 = vor.u32 %v16867_v38, %v14685_v25  ;;  %v14375_v37 = vld [vmem:[#allocation7 + $0xdf0] sm:$0xf0]  ;;  %v16865_v39 = vld [vmem:[#allocation4 + $0x3c4] sm:$0xf0] }
 0x5a2   :  { %7999 = vmatpush.bf16.msra.mxu2 %v14062_v6  ;;  %7959 = vmatpush.bf16.msrb.mxu3 %v14634_v57  ;;  %v16647_v6 = vld [vmem:[#allocation7 + $0x974] sm:$0xf0]  ;;  %v14750_v57 = vor.u32 %v16883_v59, %v14749_v24  ;;  %v16877_v25 = vld [vmem:[#allocation4 + $0x424] sm:$0xf0]  ;;  %v16734_v59 = vld [vmem:[#allocation7 + $0xc34] sm:$0xf] }
 0x5a4   :  { %8028 = vmatpush.bf16.msrb.mxu0 %v12850_v36  ;;  %8041 = vmatpush.bf16.msrb.mxu1 %v13362_v44  ;;  %v12658_v36 = vor.u32 %v16351_v0, %v12655_v19  ;;  %v14702_v44 = vor.u32 %v16871_v1, %v14701_v2  ;;  %v14378_v0 = vor.u32 %v16782_v5, %v14375_v37  ;;  %v16631_v19 = vld [vmem:[#allocation7 + $0x8f4] sm:$0xf0]  ;;  %v16766_v1 = vld [vmem:[#allocation7 + $0xd34] sm:$0xf] }
 0x5a5   :  { %v16855_v37 = vld [vmem:[#allocation7 + $0xff4] sm:$0xf0] }
 0x5a6   :  { %8000 = vmatpush.bf16.msra.mxu2 %v13998_v28  ;;  %7960 = vmatpush.bf16.msrb.mxu3 %v14570_v34  ;;  %v14311_v28 = vld [vmem:[#allocation7 + $0xd70] sm:$0xf0]  ;;  %v16863_v34 = vld [vmem:[#allocation4 + $0x3b4] sm:$0xf0] }
 0x5a7   :  { %v14670_v46 = vor.u32 %v16863_v34, %v14669_v31  ;;  %v14645_v34 = vld [vmem:[#allocation4 + $0x380] sm:$0xf] }
 0x5a8   :  { %8029 = vmatpush.bf16.msrb.mxu0 %v12786_v51  ;;  %8042 = vmatpush.bf16.msrb.mxu1 %v13298_v54  ;;  %v16663_v51 = vld [vmem:[#allocation7 + $0x9f4] sm:$0xf0]  ;;  %v14758_v54 = vor.u32 %v16885_v17, %v14757_v11  ;;  %v7708_v40 = vpop.f32.mrf.mxu3  ;;  %v16719_v11 = vld [vmem:[#allocation7 + $0xbbc] sm:$0xf] }
 0x5a9   :  { %v13870_v49 = vor.u32 %v16663_v51, %v13869_v50  ;;  %v14127_v17 = vld [vmem:[#allocation7 + $0xbf8] sm:$0xf0]  ;;  %v14734_v50 = vor.u32 %v16879_v41, %v14733_v26  ;;  %v14661_v51 = vld [vmem:[#allocation4 + $0x3a0] sm:$0xf]  ;;  %v16873_v41 = vld [vmem:[#allocation4 + $0x404] sm:$0xf0] }
 0x5aa   :  { %8001 = vmatpush.bf16.msra.mxu2 %v13934_v48  ;;  %7961 = vmatpush.bf16.msrb.mxu3 %v14506_v58  ;;  %v14247_v48 = vld [vmem:[#allocation7 + $0xcf0] sm:$0xf0]  ;;  %v17754_v58 = vadd.f32 %v7708_v40, %v17737_v7  ;;  %v14130_v24 = vor.u32 %v16719_v11, %v14127_v17  ;;  %v14637_v7 = vld [vmem:[#allocation7 + $0xfb8] sm:$0xf]  ;;  %v14709_v26 = vld [vmem:[#allocation4 + $0x400] sm:$0xf] }
 0x5ab   :  { %v16671_v40 = vld [vmem:[#allocation7 + $0xa3c] sm:$0xf]  ;;  %v14710_v11 = vor.u32 %v16873_v41, %v14709_v26 }
 0x5ac   :  { %8030 = vmatpush.bf16.msrb.mxu0 %v12722_v22  ;;  %8043 = vmatpush.bf16.msrb.mxu1 %v13234_v32  ;;  %v14677_v22 = vld [vmem:[#allocation4 + $0x3c0] sm:$0xf]  ;;  %v7747_v32 = vpop.f32.mrf.mxu2  ;;  %v16623_v26 = vld [vmem:[#allocation7 + $0x8bc] sm:$0xf] }
 0x5ad   :  { %v17750_v53 = vadd.f32 %v7747_v32, %v17730_v45  ;;  %v14678_v2 = vor.u32 %v16865_v39, %v14677_v22  ;;  %v13677_v45 = vld [vmem:[#allocation7 + $0x838] sm:$0xf]  ;;  %v14717_v39 = vld [vmem:[#allocation4 + $0x410] sm:$0xf]  ;;  %v13743_v41 = vld [vmem:[#allocation7 + $0x8f8] sm:$0xf0] }
 0x5ae   :  { %8002 = vmatpush.bf16.msra.mxu2 %v13870_v49  ;;  %7962 = vmatpush.bf16.msrb.mxu3 %v14442_v60  ;;  %v13678_v14 = vor.u32 %v16615_v61, %v13677_v45  ;;  %v14250_v49 = vor.u32 %v16750_v47, %v14247_v48  ;;  %v14183_v60 = vld [vmem:[#allocation7 + $0xc70] sm:$0xf0]  ;;  %v16859_v22 = vld [vmem:[#allocation4 + $0x394] sm:$0xf0]  ;;  %v15021_v45 = vld [vmem:[#allocation4 + $0x670] sm:$0xf] }
 0x5af   :  { %v14186_v15 = vor.u32 %v16734_v59, %v14183_v60  ;;  %v16951_v61 = vld [vmem:[#allocation4 + $0x674] sm:$0xf0]  ;;  %v8076_v48 = vmax.f32 %v17656_v43, 0.0  ;;  %v16655_v43 = vld [vmem:[#allocation7 + $0x9bc] sm:$0xf] }
 0x5b0   :  { %8031 = vmatpush.bf16.msrb.mxu0 %v12658_v36  ;;  %8044 = vmatpush.bf16.msrb.mxu1 %v13170_v62  ;;  %v7825_v62 = vpop.f32.mrf.mxu0  ;;  %v7838_v55 = vpop.f32.mrf.mxu1  ;;  %v13871_v60 = vld [vmem:[#allocation7 + $0x9f8] sm:$0xf0] }
 0x5b2   :  { %7963 = vmatpush.bf16.msrb.mxu3 %v14378_v0  ;;  %v14573_v0 = vld [vmem:[#allocation7 + $0xf38] sm:$0xf] }
 0x5b3   :  { %8032 = vmatmul.bf16.vlgmr.msrb.gmra.mxu0 %v17554_v21  ;;  %8045 = vmatmul.bf16.vlgmr.msrb.gmra.mxu1 %v17570_v27  ;;  %v13806_v21 = vor.u32 %v16647_v6, %v13805_v10  ;;  %v13741_v27 = vld [vmem:[#allocation7 + $0x8b8] sm:$0xf]  ;;  %v16703_v6 = vld [vmem:[#allocation7 + $0xb3c] sm:$0xf] }
 0x5b4   :  { %9650 = vmatpush.bf16.msra.mxu0 %v14702_v44  ;;  %9663 = vmatpush.bf16.msra.mxu1 %v14766_v18  ;;  %v13742_v36 = vor.u32 %v16631_v19, %v13741_v27  ;;  %v14314_v44 = vor.u32 %v16766_v1, %v14311_v28  ;;  %v7826_v18 = vadd.f32 %v7825_v62, %v4663_v23  ;;  %v7749_v38 = vpop.f32.mrf.mxu2  ;;  %v7710_v19 = vpop.f32.mrf.mxu3  ;;  %v16839_v1 = vld [vmem:[#allocation7 + $0xf74] sm:$0xf0]  ;;  %v16687_v28 = vld [vmem:[#allocation7 + $0xabc] sm:$0xf]  ;;  %v14957_v62 = vld [vmem:[#allocation4 + $0x5f0] sm:$0xf] }
 0x5b5   :  { %8003 = vmatpush.bf16.msra.mxu2 %v13806_v21  ;;  %v16875_v21 = vld [vmem:[#allocation4 + $0x414] sm:$0xf0]  ;;  %v14638_v23 = vor.u32 %v16855_v37, %v14637_v7  ;;  %v14941_v37 = vld [vmem:[#allocation4 + $0x5d0] sm:$0xf] }
 0x5b6   :  { %v17756_v52 = vadd.f32 %v7838_v55, %v7826_v18  ;;  %7964 = vmatpush.bf16.msrb.mxu3 %v14314_v44  ;;  %v14718_v31 = vor.u32 %v16875_v21, %v14717_v39  ;;  %v16935_v44 = vld [vmem:[#allocation4 + $0x5f4] sm:$0xf0]  ;;  %v14574_v18 = vor.u32 %v16839_v1, %v14573_v0  ;;  %v15005_v39 = vld [vmem:[#allocation4 + $0x650] sm:$0xf]  ;;  %v16929_v1 = vld [vmem:[#allocation4 + $0x5c4] sm:$0xf0] }
 0x5b7   :  { %v14958_v17 = vor.u32 %v16935_v44, %v14957_v62  ;;  %v16947_v21 = vld [vmem:[#allocation4 + $0x654] sm:$0xf0] }
 0x5b8   :  { %9651 = vmatpush.bf16.msra.mxu0 %v14694_v35  ;;  %9664 = vmatpush.bf16.msra.mxu1 %v14758_v54  ;;  %v16861_v35 = vld [vmem:[#allocation4 + $0x3a4] sm:$0xf0]  ;;  %v14725_v54 = vld [vmem:[#allocation4 + $0x420] sm:$0xf]  ;;  %v7827_v13 = vpop.f32.mrf.mxu0  ;;  %v7840_v27 = vpop.f32.mrf.mxu1  ;;  %v16791_v19 = vld [vmem:[#allocation7 + $0xdf4] sm:$0xf0] }
 0x5b9   :  { %8004 = vmatpush.bf16.msra.mxu2 %v13742_v36  ;;  %v14662_v10 = vor.u32 %v16861_v35, %v14661_v51  ;;  %v14726_v5 = vor.u32 %v16877_v25, %v14725_v54  ;;  %v16857_v36 = vld [vmem:[#allocation4 + $0x384] sm:$0xf0]  ;;  %v16823_v51 = vld [vmem:[#allocation7 + $0xef4] sm:$0xf0]  ;;  %v8077_v35 = vmax.f32 %v17662_v9, 0.0 }
 0x5ba   :  { %7965 = vmatpush.bf16.msrb.mxu3 %v14250_v49  ;;  %v14646_v55 = vor.u32 %v16857_v36, %v14645_v34  ;;  %v14949_v54 = vld [vmem:[#allocation4 + $0x5e0] sm:$0xf]  ;;  %v16933_v25 = vld [vmem:[#allocation4 + $0x5e4] sm:$0xf0]  ;;  %v14445_v9 = vld [vmem:[#allocation7 + $0xe38] sm:$0xf] }
 0x5bb   :  { %v15013_v49 = vld [vmem:[#allocation4 + $0x660] sm:$0xf]  ;;  %v14950_v7 = vor.u32 %v16933_v25, %v14949_v54  ;;  %v14381_v27 = vld [vmem:[#allocation7 + $0xdb8] sm:$0xf] }
 0x5bc   :  { %9652 = vmatpush.bf16.msra.mxu0 %v14686_v3  ;;  %9665 = vmatpush.bf16.msra.mxu1 %v14750_v57  ;;  %v14063_v3 = vld [vmem:[#allocation7 + $0xb78] sm:$0xf0]  ;;  %v14653_v57 = vld [vmem:[#allocation4 + $0x390] sm:$0xf]  ;;  %v14382_v36 = vor.u32 %v16791_v19, %v14381_v27  ;;  %v14821_v27 = vld [vmem:[#allocation4 + $0x4e0] sm:$0xf] }
 0x5bd   :  { %8005 = vmatpush.bf16.msra.mxu2 %v13678_v14  ;;  %v14066_v32 = vor.u32 %v16703_v6, %v14063_v3  ;;  %v15022_v14 = vor.u32 %v16951_v61, %v15021_v45  ;;  %v16807_v6 = vld [vmem:[#allocation7 + $0xe74] sm:$0xf0]  ;;  %v17764_v3 = vpack.c.bf16 %v8077_v35, %v8077_v35  ;;  %v16607_v35 = vld [vmem:[#allocation7 + $0x83c] sm:$0xf]  ;;  %v16901_v19 = vld [vmem:[#allocation4 + $0x4e4] sm:$0xf0] }
 0x5be   :  { %7966 = vmatpush.bf16.msrb.mxu3 %v14186_v15  ;;  %v14446_v13 = vor.u32 %v16807_v6, %v14445_v9  ;;  %v16639_v15 = vld [vmem:[#allocation7 + $0x93c] sm:$0xf]  ;;  %v14317_v61 = vld [vmem:[#allocation7 + $0xd38] sm:$0xf]  ;;  %v16925_v9 = vld [vmem:[#allocation4 + $0x5a4] sm:$0xf0] }
 0x5bf   :  { %v17771_v44 = vld [vmem:[#allocation9 + $0x15] sm:$0xff] }
 0x5c0   :  { %9653 = vmatpush.bf16.msra.mxu0 %v14678_v2  ;;  %9666 = vmatpush.bf16.msra.mxu1 %v14742_v29  ;;  %v14654_v2 = vor.u32 %v16859_v22, %v14653_v57  ;;  %v13999_v29 = vld [vmem:[#allocation7 + $0xaf8] sm:$0xf0]  ;;  %v16931_v57 = vld [vmem:[#allocation4 + $0x5d4] sm:$0xf0]  ;;  %v13874_v22 = vor.u32 %v16655_v43, %v13871_v60  ;;  %v7799_v34 = vpop.f32.mrf.mxu2 }
 0x5c1   :  { %8050 = vmatpush.bf16.msrb.mxu2 %v14130_v24  ;;  %v14002_v47 = vor.u32 %v16687_v28, %v13999_v29  ;;  %7967 = vmatmul.bf16.vlgmr.msrb.gmra.mxu3 %v17605_v8  ;;  %v16949_v24 = vld [vmem:[#allocation4 + $0x664] sm:$0xf0]  ;;  %v14942_v0 = vor.u32 %v16931_v57, %v14941_v37  ;;  %v14997_v29 = vld [vmem:[#allocation4 + $0x640] sm:$0xf]  ;;  %v17769_v62 = vadd.f32 %v7799_v34, %v17743_v16  ;;  %v16903_v43 = vld [vmem:[#allocation4 + $0x4f4] sm:$0xf0] }
 0x5c2   :  { %8006 = vmatmul.bf16.vlgmr.msra.gmra.mxu2 %v17590_v20  ;;  %8011 = vmatpush.bf16.msra.mxu3 %v14638_v23  ;;  %v15006_v23 = vor.u32 %v16947_v21, %v15005_v39  ;;  %v14981_v37 = vld [vmem:[#allocation4 + $0x620] sm:$0xf]  ;;  %v16941_v57 = vld [vmem:[#allocation4 + $0x624] sm:$0xf0] }
 0x5c4   :  { %9654 = vmatpush.bf16.msra.mxu0 %v14670_v46  ;;  %9667 = vmatpush.bf16.msra.mxu1 %v14734_v50  ;;  %v13935_v46 = vld [vmem:[#allocation7 + $0xa78] sm:$0xf0]  ;;  %v14509_v50 = vld [vmem:[#allocation7 + $0xeb8] sm:$0xf] }
 0x5c5   :  { %8051 = vmatpush.bf16.msrb.mxu2 %v14066_v32  ;;  %v13938_v38 = vor.u32 %v16671_v40, %v13935_v46  ;;  %v14510_v59 = vor.u32 %v16823_v51, %v14509_v50  ;;  %v13807_v32 = vld [vmem:[#allocation7 + $0x978] sm:$0xf0]  ;;  %v14925_v40 = vld [vmem:[#allocation4 + $0x5b0] sm:$0xf]  ;;  %v16927_v46 = vld [vmem:[#allocation4 + $0x5b4] sm:$0xf0] }
 0x5c6   :  { %8012 = vmatpush.bf16.msra.mxu3 %v14574_v18  ;;  %v13810_v28 = vor.u32 %v16639_v15, %v13807_v32  ;;  %v16775_v18 = vld [vmem:[#allocation7 + $0xd74] sm:$0xf0] }
 0x5c7   :  { %v14318_v16 = vor.u32 %v16775_v18, %v14317_v61  ;;  %v14253_v51 = vld [vmem:[#allocation7 + $0xcb8] sm:$0xf] }
 0x5c8   :  { %9655 = vmatpush.bf16.msra.mxu0 %v14662_v10  ;;  %9668 = vmatpush.bf16.msra.mxu1 %v14726_v5  ;;  %v17762_v10 = vpack.c.bf16 %v8076_v48, %v8076_v48  ;;  %v15014_v5 = vor.u32 %v16949_v24, %v15013_v49  ;;  %v13746_v48 = vor.u32 %v16623_v26, %v13743_v41  ;;  %v16759_v24 = vld [vmem:[#allocation7 + $0xcf4] sm:$0xf0]  ;;  %v16831_v41 = vld [vmem:[#allocation7 + $0xf3c] sm:$0xf] }
 0x5c9   :  { %8052 = vmatpush.bf16.msrb.mxu2 %v14002_v47  ;;  %v4664_v47 = vperm.slane %v17771_v44, 4  ;;  %v14926_v49 = vor.u32 %v16927_v46, %v14925_v40  ;;  %v14254_v39 = vor.u32 %v16759_v24, %v14253_v51  ;;  %v16743_v15 = vld [vmem:[#allocation7 + $0xc74] sm:$0xf0]  ;;  %v14822_v26 = vor.u32 %v16901_v19, %v14821_v27  ;;  %v14813_v40 = vld [vmem:[#allocation4 + $0x4d0] sm:$0xf] }
 0x5ca   :  { %8013 = vmatpush.bf16.msra.mxu3 %v14510_v59  ;;  %v14829_v59 = vld [vmem:[#allocation4 + $0x4f0] sm:$0xf]  ;;  %v16899_v46 = vld [vmem:[#allocation4 + $0x4d4] sm:$0xf0] }
 0x5cb   :  { %v14830_v21 = vor.u32 %v16903_v43, %v14829_v59  ;;  %v15213_v51 = vld [vmem:[#allocation4 + $0x7f0] sm:$0xf]  ;;  %v14805_v59 = vld [vmem:[#allocation4 + $0x4c0] sm:$0xf]  ;;  %v16897_v43 = vld [vmem:[#allocation4 + $0x4c4] sm:$0xf0] }
 0x5cc   :  { %9656 = vmatpush.bf16.msra.mxu0 %v14654_v2  ;;  %9669 = vmatpush.bf16.msra.mxu1 %v14718_v31  ;;  %v14933_v2 = vld [vmem:[#allocation4 + $0x5c0] sm:$0xf]  ;;  %v16945_v31 = vld [vmem:[#allocation4 + $0x644] sm:$0xf0] }
 0x5cd   :  { %8053 = vmatpush.bf16.msrb.mxu2 %v13938_v38  ;;  %v14934_v45 = vor.u32 %v16929_v1, %v14933_v2  ;;  %v17774_v38 = vpop.f32.mrf.mxu3  ;;  %v14639_v2 = vld [vmem:[#allocation7 + $0xff8] sm:$0xf0]  ;;  %v14909_v1 = vld [vmem:[#allocation4 + $0x590] sm:$0xf] }
 0x5ce   :  { %8014 = vmatpush.bf16.msra.mxu3 %v14446_v13  ;;  %v14189_v13 = vld [vmem:[#allocation7 + $0xc38] sm:$0xf] }
 0x5d0   :  { %9657 = vmatpush.bf16.msra.mxu0 %v14646_v55  ;;  %9670 = vmatpush.bf16.msra.mxu1 %v14710_v11  ;;  %v14998_v55 = vor.u32 %v16945_v31, %v14997_v29  ;;  %v14989_v11 = vld [vmem:[#allocation4 + $0x630] sm:$0xf]  ;;  %v7877_v50 = vpop.f32.mrf.mxu0  ;;  %v7890_v25 = vpop.f32.mrf.mxu1  ;;  %v16939_v31 = vld [vmem:[#allocation4 + $0x614] sm:$0xf0] }
 0x5d1   :  { %8054 = vmatpush.bf16.msrb.mxu2 %v13874_v22  ;;  %v7878_v54 = vadd.f32 %v7877_v50, %v4664_v47  ;;  %v7801_v22 = vpop.f32.mrf.mxu2  ;;  %v14973_v29 = vld [vmem:[#allocation4 + $0x610] sm:$0xf]  ;;  %v14965_v50 = vld [vmem:[#allocation4 + $0x600] sm:$0xf] }
 0x5d2   :  { %8015 = vmatpush.bf16.msra.mxu3 %v14382_v36  ;;  %v14190_v36 = vor.u32 %v16743_v15, %v14189_v13  ;;  %v15205_v22 = vld [vmem:[#allocation4 + $0x7e0] sm:$0xf]  ;;  %v17013_v15 = vld [vmem:[#allocation4 + $0x864] sm:$0xf0] }
 0x5d3   :  { %9658 = vmatmul.bf16.vlgmr.msra.gmra.mxu0 %v17762_v10  ;;  %9671 = vmatmul.bf16.vlgmr.msra.gmra.mxu1 %v17764_v3  ;;  %v17776_v6 = vadd.f32 %v7890_v25, %v7878_v54  ;;  %v15277_v54 = vld [vmem:[#allocation4 + $0x870] sm:$0xf]  ;;  %v17015_v25 = vld [vmem:[#allocation4 + $0x874] sm:$0xf0]  ;;  %v15269_v13 = vld [vmem:[#allocation4 + $0x860] sm:$0xf] }
 0x5d4   :  { %9702 = vmatpush.bf16.msrb.mxu0 %v14958_v17  ;;  %9715 = vmatpush.bf16.msrb.mxu1 %v15022_v14  ;;  %v16943_v17 = vld [vmem:[#allocation4 + $0x634] sm:$0xf0]  ;;  %v13679_v14 = vld [vmem:[#allocation7 + $0x878] sm:$0xf0] }
 0x5d5   :  { %8055 = vmatpush.bf16.msrb.mxu2 %v13810_v28  ;;  %v14990_v60 = vor.u32 %v16943_v17, %v14989_v11  ;;  %v16923_v28 = vld [vmem:[#allocation4 + $0x594] sm:$0xf0]  ;;  %v14901_v11 = vld [vmem:[#allocation4 + $0x580] sm:$0xf]  ;;  %v16921_v17 = vld [vmem:[#allocation4 + $0x584] sm:$0xf0] }
 0x5d6   :  { %8016 = vmatpush.bf16.msra.mxu3 %v14318_v16  ;;  %v14910_v18 = vor.u32 %v16923_v28, %v14909_v1  ;;  %v16937_v16 = vld [vmem:[#allocation4 + $0x604] sm:$0xf0]  ;;  %v14902_v24 = vor.u32 %v16921_v17, %v14901_v11  ;;  %v15270_v1 = vor.u32 %v17013_v15, %v15269_v13  ;;  %v15197_v28 = vld [vmem:[#allocation4 + $0x7d0] sm:$0xf]  ;;  %v15253_v11 = vld [vmem:[#allocation4 + $0x840] sm:$0xf] }
 0x5d7   :  { %v17009_v17 = vld [vmem:[#allocation4 + $0x844] sm:$0xf0] }
 0x5d8   :  { %9703 = vmatpush.bf16.msrb.mxu0 %v14950_v7  ;;  %9716 = vmatpush.bf16.msrb.mxu1 %v15014_v5  ;;  %v14917_v7 = vld [vmem:[#allocation4 + $0x5a0] sm:$0xf]  ;;  %v13682_v5 = vor.u32 %v16607_v35, %v13679_v14  ;;  %v7879_v34 = vpop.f32.mrf.mxu0  ;;  %v7892_v47 = vpop.f32.mrf.mxu1  ;;  %v16999_v35 = vld [vmem:[#allocation4 + $0x7f4] sm:$0xf0]  ;;  %v14814_v14 = vor.u32 %v16899_v46, %v14813_v40  ;;  %v16993_v46 = vld [vmem:[#allocation4 + $0x7c4] sm:$0xf0] }
 0x5d9   :  { %8056 = vmatpush.bf16.msrb.mxu2 %v13746_v48  ;;  %v14918_v32 = vor.u32 %v16925_v9, %v14917_v7  ;;  %v14974_v48 = vor.u32 %v16939_v31, %v14973_v29  ;;  %v15214_v7 = vor.u32 %v16999_v35, %v15213_v51  ;;  %v16815_v9 = vld [vmem:[#allocation7 + $0xebc] sm:$0xf]  ;;  %v16995_v29 = vld [vmem:[#allocation4 + $0x7d4] sm:$0xf0]  ;;  %v15261_v34 = vld [vmem:[#allocation4 + $0x850] sm:$0xf] }
 0x5da   :  { %8017 = vmatpush.bf16.msra.mxu3 %v14254_v39  ;;  %v16997_v39 = vld [vmem:[#allocation4 + $0x7e4] sm:$0xf0]  ;;  %v15189_v40 = vld [vmem:[#allocation4 + $0x7c0] sm:$0xf]  ;;  %v14781_v51 = vld [vmem:[#allocation4 + $0x490] sm:$0xf] }
 0x5db   :  { %v15206_v19 = vor.u32 %v16997_v39, %v15205_v22  ;;  %v16893_v47 = vld [vmem:[#allocation4 + $0x4a4] sm:$0xf0]  ;;  %v16891_v35 = vld [vmem:[#allocation4 + $0x494] sm:$0xf0] }
 0x5dc   :  { %9704 = vmatpush.bf16.msrb.mxu0 %v14942_v0  ;;  %9717 = vmatpush.bf16.msrb.mxu1 %v15006_v23  ;;  %v16847_v0 = vld [vmem:[#allocation7 + $0xfbc] sm:$0xf]  ;;  %v14982_v23 = vor.u32 %v16941_v57, %v14981_v37  ;;  %v8081_v37 = vmax.f32 %v17715_v4, 0.0  ;;  %v15278_v57 = vor.u32 %v17015_v25, %v15277_v54  ;;  %v4665_v54 = vperm.slane %v17771_v44, 5  ;;  %v16889_v22 = vld [vmem:[#allocation4 + $0x484] sm:$0xf0] }
 0x5dd   :  { %8057 = vmatpush.bf16.msrb.mxu2 %v13682_v5  ;;  %v14642_v61 = vor.u32 %v16847_v0, %v14639_v2  ;;  %v14511_v5 = vld [vmem:[#allocation7 + $0xef8] sm:$0xf0]  ;;  %v16895_v0 = vld [vmem:[#allocation4 + $0x4b4] sm:$0xf0]  ;;  %v15190_v25 = vor.u32 %v16993_v46, %v15189_v40  ;;  %v16965_v40 = vld [vmem:[#allocation4 + $0x6e4] sm:$0xf0] }
 0x5de   :  { %8018 = vmatpush.bf16.msra.mxu3 %v14190_v36  ;;  %v16799_v4 = vld [vmem:[#allocation7 + $0xe3c] sm:$0xf]  ;;  %v17784_v2 = vpack.c.bf16 %v8081_v37, %v8081_v37  ;;  %v17011_v36 = vld [vmem:[#allocation4 + $0x854] sm:$0xf0] }
 0x5e0   :  { %9705 = vmatpush.bf16.msrb.mxu0 %v14934_v45  ;;  %9718 = vmatpush.bf16.msrb.mxu1 %v14998_v55  ;;  %v7762_v45 = vpop.f32.mrf.mxu3  ;;  %v14575_v55 = vld [vmem:[#allocation7 + $0xf78] sm:$0xf0] }
 0x5e1   :  { %9676 = vmatpush.bf16.msra.mxu2 %v14830_v21  ;;  %8019 = vmatmul.bf16.vlgmr.msra.gmra.mxu3 %v17605_v8  ;;  %v14806_v21 = vor.u32 %v16897_v43, %v14805_v59  ;;  %v15198_v45 = vor.u32 %v16995_v29, %v15197_v28  ;;  %v15254_v59 = vor.u32 %v17009_v17, %v15253_v11  ;;  %v15181_v43 = vld [vmem:[#allocation4 + $0x7b0] sm:$0xf]  ;;  %v15237_v29 = vld [vmem:[#allocation4 + $0x820] sm:$0xf]  ;;  %v16987_v17 = vld [vmem:[#allocation4 + $0x794] sm:$0xf0] }
 0x5e2   :  { %8058 = vmatmul.bf16.vlgmr.msrb.gmra.mxu2 %v17590_v20  ;;  %8063 = vmatpush.bf16.msrb.mxu3 %v14642_v61  ;;  %v8080_v20 = vmax.f32 %v17700_v63, 0.0  ;;  %v14797_v63 = vld [vmem:[#allocation4 + $0x4b0] sm:$0xf]  ;;  %v16783_v61 = vld [vmem:[#allocation7 + $0xdbc] sm:$0xf] }
 0x5e3   :  { %v14798_v31 = vor.u32 %v16895_v0, %v14797_v63  ;;  %v15085_v63 = vld [vmem:[#allocation4 + $0x6f0] sm:$0xf]  ;;  %v16967_v0 = vld [vmem:[#allocation4 + $0x6f4] sm:$0xf0] }
 0x5e4   :  { %9706 = vmatpush.bf16.msrb.mxu0 %v14926_v49  ;;  %9719 = vmatpush.bf16.msrb.mxu1 %v14990_v60  ;;  %v14578_v49 = vor.u32 %v16831_v41, %v14575_v55  ;;  %v14966_v60 = vor.u32 %v16937_v16, %v14965_v50  ;;  %v17782_v27 = vpack.c.bf16 %v8080_v20, %v8080_v20  ;;  %v14789_v41 = vld [vmem:[#allocation4 + $0x4a0] sm:$0xf]  ;;  %v7851_v50 = vpop.f32.mrf.mxu2  ;;  %v16991_v20 = vld [vmem:[#allocation4 + $0x7b4] sm:$0xf0]  ;;  %v15165_v11 = vld [vmem:[#allocation4 + $0x790] sm:$0xf] }
 0x5e5   :  { %9677 = vmatpush.bf16.msra.mxu2 %v14822_v26  ;;  %v15262_v55 = vor.u32 %v17011_v36, %v15261_v34  ;;  %v15182_v15 = vor.u32 %v16991_v20, %v15181_v43  ;;  %v8078_v34 = vmax.f32 %v17674_v30, 0.0  ;;  %v15166_v43 = vor.u32 %v16987_v17, %v15165_v11  ;;  %v16917_v20 = vld [vmem:[#allocation4 + $0x564] sm:$0xf0]  ;;  %v15453_v17 = vld [vmem:[#allocation4 + $0x9d0] sm:$0xf] }
 0x5e6   :  { %8064 = vmatpush.bf16.msrb.mxu3 %v14578_v49  ;;  %v16767_v49 = vld [vmem:[#allocation7 + $0xd3c] sm:$0xf]  ;;  %v16913_v11 = vld [vmem:[#allocation4 + $0x544] sm:$0xf0] }
 0x5e7   :  { %v17797_v30 = vpack.c.bf16 %v8078_v34, %v8078_v34 }
 0x5e8   :  { %9707 = vmatpush.bf16.msrb.mxu0 %v14918_v32  ;;  %9720 = vmatpush.bf16.msrb.mxu1 %v14982_v23  ;;  %v14514_v32 = vor.u32 %v16815_v9, %v14511_v5  ;;  %v14447_v23 = vld [vmem:[#allocation7 + $0xe78] sm:$0xf0]  ;;  %v17007_v9 = vld [vmem:[#allocation4 + $0x834] sm:$0xf0]  ;;  %v17792_v13 = vpop.f32.mrf.mxu3 }
 0x5e9   :  { %9678 = vmatpush.bf16.msra.mxu2 %v14814_v14  ;;  %v14450_v26 = vor.u32 %v16799_v4, %v14447_v23  ;;  %v17789_v14 = vadd.f32 %v7851_v50, %v17756_v52  ;;  %v14773_v52 = vld [vmem:[#allocation4 + $0x480] sm:$0xf]  ;;  %v16989_v23 = vld [vmem:[#allocation4 + $0x7a4] sm:$0xf0]  ;;  %v15229_v50 = vld [vmem:[#allocation4 + $0x810] sm:$0xf] }
 0x5ea   :  { %8065 = vmatpush.bf16.msrb.mxu3 %v14514_v32  ;;  %v14255_v32 = vld [vmem:[#allocation7 + $0xcf8] sm:$0xf0]  ;;  %v15173_v4 = vld [vmem:[#allocation4 + $0x7a0] sm:$0xf]  ;;  %v14774_v28 = vor.u32 %v16889_v22, %v14773_v52  ;;  %v7761_v52 = vadd.f32 %v17774_v38, %v17750_v53  ;;  %v17001_v22 = vld [vmem:[#allocation4 + $0x804] sm:$0xf0] }
 0x5eb   :  { %v14877_v53 = vld [vmem:[#allocation4 + $0x550] sm:$0xf]  ;;  %v16915_v38 = vld [vmem:[#allocation4 + $0x554] sm:$0xf0] }
 0x5ec   :  { %9708 = vmatpush.bf16.msrb.mxu0 %v14910_v18  ;;  %9721 = vmatpush.bf16.msrb.mxu1 %v14974_v48  ;;  %v14383_v18 = vld [vmem:[#allocation7 + $0xdf8] sm:$0xf0]  ;;  %v14790_v48 = vor.u32 %v16893_v47, %v14789_v41  ;;  %v7853_v36 = vpop.f32.mrf.mxu2  ;;  %v15086_v41 = vor.u32 %v16967_v0, %v15085_v63  ;;  %v17079_v63 = vld [vmem:[#allocation4 + $0xa74] sm:$0xf0]  ;;  %v8085_v34 = vmax.f32 %v7761_v52, 0.0 }
 0x5ed   :  { %9679 = vmatpush.bf16.msra.mxu2 %v14806_v21  ;;  %v14386_v16 = vor.u32 %v16783_v61, %v14383_v18  ;;  %v16735_v47 = vld [vmem:[#allocation7 + $0xc3c] sm:$0xf]  ;;  %v15174_v61 = vor.u32 %v16989_v23, %v15173_v4  ;;  %v14893_v18 = vld [vmem:[#allocation4 + $0x570] sm:$0xf]  ;;  %v15061_v4 = vld [vmem:[#allocation4 + $0x6c0] sm:$0xf] }
 0x5ee   :  { %8066 = vmatpush.bf16.msrb.mxu3 %v14450_v26  ;;  %v16961_v23 = vld [vmem:[#allocation4 + $0x6c4] sm:$0xf0]  ;;  %v15461_v36 = vld [vmem:[#allocation4 + $0x9e0] sm:$0xf] }
 0x5f0   :  { %9709 = vmatpush.bf16.msrb.mxu0 %v14902_v24  ;;  %9722 = vmatpush.bf16.msrb.mxu1 %v14966_v60  ;;  %v14319_v24 = vld [vmem:[#allocation7 + $0xd78] sm:$0xf0]  ;;  %v14782_v60 = vor.u32 %v16891_v35, %v14781_v51  ;;  %v7929_v5 = vpop.f32.mrf.mxu0  ;;  %v7942_v21 = vpop.f32.mrf.mxu1 }
 0x5f1   :  { %9680 = vmatpush.bf16.msra.mxu2 %v14798_v31  ;;  %v14322_v37 = vor.u32 %v16767_v49, %v14319_v24  ;;  %v7930_v39 = vadd.f32 %v7929_v5, %v4665_v54  ;;  %v17005_v31 = vld [vmem:[#allocation4 + $0x824] sm:$0xf0]  ;;  %v7814_v24 = vpop.f32.mrf.mxu3  ;;  %v15157_v5 = vld [vmem:[#allocation4 + $0x780] sm:$0xf] }
 0x5f2   :  { %8067 = vmatpush.bf16.msrb.mxu3 %v14386_v16  ;;  %v15238_v46 = vor.u32 %v17005_v31, %v15237_v29  ;;  %v17003_v16 = vld [vmem:[#allocation4 + $0x814] sm:$0xf0]  ;;  %v16957_v24 = vld [vmem:[#allocation4 + $0x6a4] sm:$0xf0] }
 0x5f3   :  { %9710 = vmatmul.bf16.vlgmr.msrb.gmra.mxu0 %v17782_v27  ;;  %9723 = vmatmul.bf16.vlgmr.msrb.gmra.mxu1 %v17784_v2 }
 0x5f4   :  { %9754 = vmatpush.bf16.msra.mxu0 %v15214_v7  ;;  %9767 = vmatpush.bf16.msra.mxu1 %v15278_v57  ;;  %v15245_v7 = vld [vmem:[#allocation4 + $0x830] sm:$0xf]  ;;  %v16751_v57 = vld [vmem:[#allocation7 + $0xcbc] sm:$0xf] }
 0x5f5   :  { %9681 = vmatpush.bf16.msra.mxu2 %v14790_v48  ;;  %v14258_v26 = vor.u32 %v16751_v57, %v14255_v32  ;;  %v16919_v48 = vld [vmem:[#allocation4 + $0x574] sm:$0xf0]  ;;  %v15221_v57 = vld [vmem:[#allocation4 + $0x800] sm:$0xf]  ;;  %v15533_v32 = vld [vmem:[#allocation4 + $0xa70] sm:$0xf] }
 0x5f6   :  { %8068 = vmatpush.bf16.msrb.mxu3 %v14322_v37  ;;  %v16985_v37 = vld [vmem:[#allocation4 + $0x784] sm:$0xf0]  ;;  %v15222_v29 = vor.u32 %v17001_v22, %v15221_v57 }
 0x5f7   :  { %v17073_v57 = vld [vmem:[#allocation4 + $0xa44] sm:$0xf0] }
 0x5f8   :  { %9755 = vmatpush.bf16.msra.mxu0 %v15206_v19  ;;  %9768 = vmatpush.bf16.msra.mxu1 %v15270_v1  ;;  %v15246_v19 = vor.u32 %v17007_v9, %v15245_v7  ;;  %v17794_v1 = vadd.f32 %v7942_v21, %v7930_v39  ;;  %v7931_v51 = vpop.f32.mrf.mxu0  ;;  %v7944_v49 = vpop.f32.mrf.mxu1  ;;  %v16963_v7 = vld [vmem:[#allocation4 + $0x6d4] sm:$0xf0]  ;;  %v15230_v9 = vor.u32 %v17003_v16, %v15229_v50  ;;  %v15469_v39 = vld [vmem:[#allocation4 + $0x9f0] sm:$0xf] }
 0x5f9   :  { %9682 = vmatpush.bf16.msra.mxu2 %v14782_v60  ;;  %v15069_v60 = vld [vmem:[#allocation4 + $0x6d0] sm:$0xf]  ;;  %v17063_v21 = vld [vmem:[#allocation4 + $0x9f4] sm:$0xf0]  ;;  %v15045_v49 = vld [vmem:[#allocation4 + $0x6a0] sm:$0xf] }
 0x5fa   :  { %8069 = vmatpush.bf16.msrb.mxu3 %v14258_v26  ;;  %v15470_v31 = vor.u32 %v17063_v21, %v15469_v39  ;;  %v17061_v26 = vld [vmem:[#allocation4 + $0x9e4] sm:$0xf0]  ;;  %v17059_v50 = vld [vmem:[#allocation4 + $0x9d4] sm:$0xf0]  ;;  %v15037_v39 = vld [vmem:[#allocation4 + $0x690] sm:$0xf] }
 0x5fb   :  { %v16955_v21 = vld [vmem:[#allocation4 + $0x694] sm:$0xf0] }
 0x5fc   :  { %9756 = vmatpush.bf16.msra.mxu0 %v15198_v45  ;;  %9769 = vmatpush.bf16.msra.mxu1 %v15262_v55  ;;  %v14191_v45 = vld [vmem:[#allocation7 + $0xc78] sm:$0xf0]  ;;  %v15077_v55 = vld [vmem:[#allocation4 + $0x6e0] sm:$0xf] }
 0x5fd   :  { %9683 = vmatpush.bf16.msra.mxu2 %v14774_v28  ;;  %v14194_v35 = vor.u32 %v16735_v47, %v14191_v45  ;;  %v15078_v54 = vor.u32 %v16965_v40, %v15077_v55  ;;  %v8084_v28 = vmax.f32 %v17754_v58, 0.0  ;;  %v15062_v47 = vor.u32 %v16961_v23, %v15061_v4  ;;  %v15525_v45 = vld [vmem:[#allocation4 + $0xa60] sm:$0xf]  ;;  %v15053_v55 = vld [vmem:[#allocation4 + $0x6b0] sm:$0xf] }
 0x5fe   :  { %v16959_v58 = vld [vmem:[#allocation4 + $0x6b4] sm:$0xf0] }
 0x5ff   :  { %8070 = vmatpush.bf16.msrb.mxu3 %v14194_v35  ;;  %v17804_v40 = vpack.c.bf16 %v8084_v28, %v8084_v28  ;;  %v15054_v51 = vor.u32 %v16959_v58, %v15053_v55  ;;  %v15517_v35 = vld [vmem:[#allocation4 + $0xa50] sm:$0xf]  ;;  %v17055_v4 = vld [vmem:[#allocation4 + $0x9b4] sm:$0xf0]  ;;  %v15038_v28 = vor.u32 %v16955_v21, %v15037_v39 }
 0x600   :  { %9757 = vmatpush.bf16.msra.mxu0 %v15190_v25  ;;  %9770 = vmatpush.bf16.msra.mxu1 %v15254_v59  ;;  %v14885_v25 = vld [vmem:[#allocation4 + $0x560] sm:$0xf]  ;;  %v14894_v59 = vor.u32 %v16919_v48, %v14893_v18  ;;  %v14878_v18 = vor.u32 %v16915_v38, %v14877_v53  ;;  %v17810_v52 = vpop.f32.mrf.mxu2  ;;  %v15341_v55 = vld [vmem:[#allocation4 + $0x8f0] sm:$0xf]  ;;  %v17031_v58 = vld [vmem:[#allocation4 + $0x8f4] sm:$0xf0] }
 0x601   :  { %9728 = vmatpush.bf16.msrb.mxu2 %v15086_v41  ;;  %v14886_v0 = vor.u32 %v16917_v20, %v14885_v25  ;;  %v15534_v41 = vor.u32 %v17079_v63, %v15533_v32  ;;  %v14869_v48 = vld [vmem:[#allocation4 + $0x540] sm:$0xf]  ;;  %v16911_v20 = vld [vmem:[#allocation4 + $0x534] sm:$0xf0] }
 0x602   :  { %9684 = vmatmul.bf16.vlgmr.msra.gmra.mxu2 %v17797_v30  ;;  %8071 = vmatmul.bf16.vlgmr.msrb.gmra.mxu3 %v17605_v8  ;;  %v17806_v8 = vpack.c.bf16 %v8085_v34, %v8085_v34  ;;  %v14870_v25 = vor.u32 %v16913_v11, %v14869_v48  ;;  %v14853_v63 = vld [vmem:[#allocation4 + $0x520] sm:$0xf]  ;;  %v14845_v34 = vld [vmem:[#allocation4 + $0x510] sm:$0xf]  ;;  %v17053_v11 = vld [vmem:[#allocation4 + $0x9a4] sm:$0xf0] }
 0x603   :  { %9689 = vmatpush.bf16.msra.mxu3 %v14894_v59  ;;  %v15454_v59 = vor.u32 %v17059_v50, %v15453_v17  ;;  %v15429_v48 = vld [vmem:[#allocation4 + $0x9a0] sm:$0xf]  ;;  %v17067_v39 = vld [vmem:[#allocation4 + $0xa14] sm:$0xf0] }
 0x604   :  { %9758 = vmatpush.bf16.msra.mxu0 %v15182_v15  ;;  %9771 = vmatpush.bf16.msra.mxu1 %v15246_v19  ;;  %v15070_v15 = vor.u32 %v16963_v7, %v15069_v60  ;;  %v15158_v19 = vor.u32 %v16985_v37, %v15157_v5  ;;  %v15445_v60 = vld [vmem:[#allocation4 + $0x9c0] sm:$0xf]  ;;  %v17057_v7 = vld [vmem:[#allocation4 + $0x9c4] sm:$0xf0]  ;;  %v15046_v5 = vor.u32 %v16957_v24, %v15045_v49 }
 0x605   :  { %9729 = vmatpush.bf16.msrb.mxu2 %v15078_v54  ;;  %v17075_v54 = vld [vmem:[#allocation4 + $0xa54] sm:$0xf0]  ;;  %v15509_v37 = vld [vmem:[#allocation4 + $0xa40] sm:$0xf]  ;;  %v15446_v32 = vor.u32 %v17057_v7, %v15445_v60  ;;  %v15342_v24 = vor.u32 %v17031_v58, %v15341_v55  ;;  %v17029_v7 = vld [vmem:[#allocation4 + $0x8e4] sm:$0xf0] }
 0x606   :  { %v15510_v23 = vor.u32 %v17073_v57, %v15509_v37  ;;  %v15333_v60 = vld [vmem:[#allocation4 + $0x8e0] sm:$0xf]  ;;  %v17051_v37 = vld [vmem:[#allocation4 + $0x994] sm:$0xf0] }
 0x607   :  { %9690 = vmatpush.bf16.msra.mxu3 %v14886_v0  ;;  %v16909_v0 = vld [vmem:[#allocation4 + $0x524] sm:$0xf0] }
 0x608   :  { %9759 = vmatpush.bf16.msra.mxu0 %v15174_v61  ;;  %9772 = vmatpush.bf16.msra.mxu1 %v15238_v46  ;;  %v17077_v61 = vld [vmem:[#allocation4 + $0xa64] sm:$0xf0]  ;;  %v15462_v46 = vor.u32 %v17061_v26, %v15461_v36  ;;  %v14854_v38 = vor.u32 %v16909_v0, %v14853_v63  ;;  %v15029_v36 = vld [vmem:[#allocation4 + $0x680] sm:$0xf]  ;;  %v15334_v63 = vor.u32 %v17029_v7, %v15333_v60  ;;  %v15309_v60 = vld [vmem:[#allocation4 + $0x8b0] sm:$0xf] }
 0x609   :  { %9730 = vmatpush.bf16.msrb.mxu2 %v15070_v15  ;;  %v15526_v16 = vor.u32 %v17077_v61, %v15525_v45  ;;  %v4666_v15 = vperm.slane %v17771_v44, 6  ;;  %v16953_v26 = vld [vmem:[#allocation4 + $0x684] sm:$0xf0]  ;;  %v7864_v45 = vpop.f32.mrf.mxu3  ;;  %v15141_v0 = vld [vmem:[#allocation4 + $0x760] sm:$0xf] }
 0x60a   :  { %v17023_v7 = vld [vmem:[#allocation4 + $0x8b4] sm:$0xf0] }
 0x60b   :  { %9691 = vmatpush.bf16.msra.mxu3 %v14878_v18  ;;  %v16907_v18 = vld [vmem:[#allocation4 + $0x514] sm:$0xf0] }
 0x60c   :  { %9760 = vmatpush.bf16.msra.mxu0 %v15166_v43  ;;  %9773 = vmatpush.bf16.msra.mxu1 %v15230_v9  ;;  %v14861_v43 = vld [vmem:[#allocation4 + $0x530] sm:$0xf]  ;;  %v15518_v9 = vor.u32 %v17075_v54, %v15517_v35  ;;  %v17069_v35 = vld [vmem:[#allocation4 + $0xa24] sm:$0xf0]  ;;  %v8082_v54 = vmax.f32 %v17728_v33, 0.0  ;;  %v14846_v49 = vor.u32 %v16907_v18, %v14845_v34  ;;  %v8079_v33 = vmax.f32 %v17687_v56, 0.0 }
 0x60d   :  { %9731 = vmatpush.bf16.msrb.mxu2 %v15062_v47  ;;  %v14862_v22 = vor.u32 %v16911_v20, %v14861_v43  ;;  %v16905_v43 = vld [vmem:[#allocation4 + $0x504] sm:$0xf0]  ;;  %v15149_v20 = vld [vmem:[#allocation4 + $0x770] sm:$0xf]  ;;  %v16870_v34 = vld [vmem:[#allocation4 + $0x3f4] sm:$0xf] }
 0x60e   :  { %v17820_v21 = vpack.c.bf16 %v8082_v54, %v8082_v54  ;;  %v17049_v56 = vld [vmem:[#allocation4 + $0x984] sm:$0xf0]  ;;  %v14767_v18 = vld [vmem:[#allocation4 + $0x478] sm:$0xf0]  ;;  %v17823_v55 = vpack.c.bf16 %v8079_v33, %v8079_v33  ;;  %v15310_v33 = vor.u32 %v17023_v7, %v15309_v60  ;;  %v15101_v7 = vld [vmem:[#allocation4 + $0x710] sm:$0xf] }
 0x60f   :  { %9692 = vmatpush.bf16.msra.mxu3 %v14870_v25  ;;  %v7905_v25 = vpop.f32.mrf.mxu2 }
 0x610   :  { %9761 = vmatpush.bf16.msra.mxu0 %v15158_v19  ;;  %9774 = vmatpush.bf16.msra.mxu1 %v15222_v29  ;;  %v15437_v19 = vld [vmem:[#allocation4 + $0x9b0] sm:$0xf]  ;;  %v7981_v53 = vpop.f32.mrf.mxu0  ;;  %v7994_v47 = vpop.f32.mrf.mxu1  ;;  %v16868_v25 = vld [vmem:[#allocation4 + $0x3e4] sm:$0xf] }
 0x611   :  { %9732 = vmatpush.bf16.msrb.mxu2 %v15054_v51  ;;  %v15501_v29 = vld [vmem:[#allocation4 + $0xa30] sm:$0xf]  ;;  %v15438_v61 = vor.u32 %v17055_v4, %v15437_v19  ;;  %v15493_v51 = vld [vmem:[#allocation4 + $0xa20] sm:$0xf]  ;;  %v7866_v4 = vpop.f32.mrf.mxu3 }
 0x612   :  { %v15494_v57 = vor.u32 %v17069_v35, %v15493_v51  ;;  %v15133_v51 = vld [vmem:[#allocation4 + $0x750] sm:$0xf]  ;;  %v16979_v35 = vld [vmem:[#allocation4 + $0x754] sm:$0xf0] }
 0x613   :  { %9762 = vmatmul.bf16.vlgmr.msra.gmra.mxu0 %v17804_v40  ;;  %9775 = vmatmul.bf16.vlgmr.msra.gmra.mxu1 %v17806_v8 }
 0x614   :  { %9806 = vmatpush.bf16.msrb.mxu0 %v15470_v31  ;;  %9819 = vmatpush.bf16.msrb.mxu1 %v15534_v41  ;;  %v17071_v31 = vld [vmem:[#allocation4 + $0xa34] sm:$0xf0]  ;;  %v7982_v41 = vadd.f32 %v7981_v53, %v4666_v15 }
 0x615   :  { %9733 = vmatpush.bf16.msrb.mxu2 %v15046_v5  ;;  %9693 = vmatpush.bf16.msra.mxu3 %v14862_v22  ;;  %v15502_v17 = vor.u32 %v17071_v31, %v15501_v29  ;;  %v15421_v5 = vld [vmem:[#allocation4 + $0x990] sm:$0xf]  ;;  %v16981_v29 = vld [vmem:[#allocation4 + $0x764] sm:$0xf0]  ;;  %v17027_v53 = vld [vmem:[#allocation4 + $0x8d4] sm:$0xf0] }
 0x616   :  { %v17816_v50 = vadd.f32 %v7994_v47, %v7982_v41  ;;  %v15485_v22 = vld [vmem:[#allocation4 + $0xa10] sm:$0xf]  ;;  %v15477_v41 = vld [vmem:[#allocation4 + $0xa00] sm:$0xf]  ;;  %v17065_v47 = vld [vmem:[#allocation4 + $0xa04] sm:$0xf0]  ;;  %v15142_v58 = vor.u32 %v16981_v29, %v15141_v0 }
 0x617   :  { %v15325_v31 = vld [vmem:[#allocation4 + $0x8d0] sm:$0xf]  ;;  %v15478_v54 = vor.u32 %v17065_v47, %v15477_v41  ;;  %v15301_v0 = vld [vmem:[#allocation4 + $0x8a0] sm:$0xf]  ;;  %v16864_v29 = vld [vmem:[#allocation4 + $0x3c4] sm:$0xf] }
 0x618   :  { %9807 = vmatpush.bf16.msrb.mxu0 %v15462_v46  ;;  %9820 = vmatpush.bf16.msrb.mxu1 %v15526_v16  ;;  %v17814_v46 = vadd.f32 %v7864_v45, %v17789_v14  ;;  %v15030_v16 = vor.u32 %v16953_v26, %v15029_v36  ;;  %v15430_v14 = vor.u32 %v17053_v11, %v15429_v48  ;;  %v7983_v15 = vpop.f32.mrf.mxu0  ;;  %v7996_v19 = vpop.f32.mrf.mxu1  ;;  %v14703_v26 = vld [vmem:[#allocation4 + $0x3f8] sm:$0xf0]  ;;  %v15317_v11 = vld [vmem:[#allocation4 + $0x8c0] sm:$0xf]  ;;  %v15293_v41 = vld [vmem:[#allocation4 + $0x890] sm:$0xf] }
 0x619   :  { %9734 = vmatpush.bf16.msrb.mxu2 %v15038_v28  ;;  %9694 = vmatpush.bf16.msra.mxu3 %v14854_v38  ;;  %v15422_v28 = vor.u32 %v17051_v37, %v15421_v5  ;;  %v15413_v38 = vld [vmem:[#allocation4 + $0x980] sm:$0xf]  ;;  %v15486_v36 = vor.u32 %v17067_v39, %v15485_v22  ;;  %v15326_v45 = vor.u32 %v17027_v53, %v15325_v31  ;;  %v16977_v37 = vld [vmem:[#allocation4 + $0x744] sm:$0xf0]  ;;  %v14687_v22 = vld [vmem:[#allocation4 + $0x3d8] sm:$0xf0] }
 0x61a   :  { %v15414_v48 = vor.u32 %v17049_v56, %v15413_v38  ;;  %v15125_v5 = vld [vmem:[#allocation4 + $0x740] sm:$0xf]  ;;  %v16882_v15 = vld [vmem:[#allocation4 + $0x454] sm:$0xf]  ;;  %v17021_v19 = vld [vmem:[#allocation4 + $0x8a4] sm:$0xf0] }
 0x61b   :  { %v14679_v31 = vld [vmem:[#allocation4 + $0x3c8] sm:$0xf0]  ;;  %v15302_v38 = vor.u32 %v17021_v19, %v15301_v0  ;;  %v16880_v56 = vld [vmem:[#allocation4 + $0x444] sm:$0xf]  ;;  %v17019_v47 = vld [vmem:[#allocation4 + $0x894] sm:$0xf0] }
 0x61c   :  { %9808 = vmatpush.bf16.msrb.mxu0 %v15454_v59  ;;  %9821 = vmatpush.bf16.msrb.mxu1 %v15518_v9  ;;  %v14837_v59 = vld [vmem:[#allocation4 + $0x500] sm:$0xf]  ;;  %v16983_v9 = vld [vmem:[#allocation4 + $0x774] sm:$0xf0] }
 0x61d   :  { %9735 = vmatpush.bf16.msrb.mxu2 %v15030_v16  ;;  %9695 = vmatpush.bf16.msra.mxu3 %v14846_v49  ;;  %v14706_v16 = vor.u32 %v16870_v34, %v14703_v26  ;;  %v14695_v49 = vld [vmem:[#allocation4 + $0x3e8] sm:$0xf0]  ;;  %v15093_v19 = vld [vmem:[#allocation4 + $0x700] sm:$0xf] }
 0x61e   :  { %v14743_v34 = vld [vmem:[#allocation4 + $0x448] sm:$0xf0] }
 0x620   :  { %9809 = vmatpush.bf16.msrb.mxu0 %v15446_v32  ;;  %9822 = vmatpush.bf16.msrb.mxu1 %v15510_v23  ;;  %v14838_v32 = vor.u32 %v16905_v43, %v14837_v59  ;;  %v15150_v23 = vor.u32 %v16983_v9, %v15149_v20  ;;  %v16884_v43 = vld [vmem:[#allocation4 + $0x464] sm:$0xf]  ;;  %v15134_v20 = vor.u32 %v16979_v35, %v15133_v51  ;;  %v16878_v51 = vld [vmem:[#allocation4 + $0x434] sm:$0xf]  ;;  %v14735_v35 = vld [vmem:[#allocation4 + $0x438] sm:$0xf0] }
 0x621   :  { %9780 = vmatpush.bf16.msra.mxu2 %v15342_v24  ;;  %v14698_v9 = vor.u32 %v16868_v25, %v14695_v49  ;;  %v7904_v25 = vadd.f32 %v17810_v52, %v17776_v6 }
 0x622   :  { %9736 = vmatmul.bf16.vlgmr.msrb.gmra.mxu2 %v17820_v21  ;;  %9696 = vmatpush.bf16.msra.mxu3 %v14838_v32  ;;  %v14751_v32 = vld [vmem:[#allocation4 + $0x458] sm:$0xf0] }
 0x623   :  { %v14754_v53 = vor.u32 %v16882_v15, %v14751_v32 }
 0x624   :  { %9810 = vmatpush.bf16.msrb.mxu0 %v15438_v61  ;;  %9823 = vmatpush.bf16.msrb.mxu1 %v15502_v17  ;;  %v16886_v61 = vld [vmem:[#allocation4 + $0x474] sm:$0xf]  ;;  %v17025_v17 = vld [vmem:[#allocation4 + $0x8c4] sm:$0xf0] }
 0x625   :  { %9781 = vmatpush.bf16.msra.mxu2 %v15334_v63  ;;  %9697 = vmatmul.bf16.vlgmr.msra.gmra.mxu3 %v17823_v55  ;;  %v14770_v24 = vor.u32 %v16886_v61, %v14767_v18  ;;  %v15318_v59 = vor.u32 %v17025_v17, %v15317_v11  ;;  %v15126_v63 = vor.u32 %v16977_v37, %v15125_v5  ;;  %v15109_v18 = vld [vmem:[#allocation4 + $0x720] sm:$0xf]  ;;  %v14671_v11 = vld [vmem:[#allocation4 + $0x3b8] sm:$0xf0]  ;;  %v15597_v5 = vld [vmem:[#allocation4 + $0xaf0] sm:$0xf] }
 0x626   :  { %9741 = vmatpush.bf16.msrb.mxu3 %v15150_v23  ;;  %v15117_v23 = vld [vmem:[#allocation4 + $0x730] sm:$0xf]  ;;  %v14682_v61 = vor.u32 %v16864_v29, %v14679_v31  ;;  %v14746_v17 = vor.u32 %v16880_v56, %v14743_v34  ;;  %v17047_v31 = vld [vmem:[#allocation4 + $0x974] sm:$0xf0]  ;;  %v17093_v56 = vld [vmem:[#allocation4 + $0xae4] sm:$0xf0] }
 0x627   :  { %v15405_v29 = vld [vmem:[#allocation4 + $0x970] sm:$0xf]  ;;  %v16858_v34 = vld [vmem:[#allocation4 + $0x394] sm:$0xf] }
 0x628   :  { %9811 = vmatpush.bf16.msrb.mxu0 %v15430_v14  ;;  %9824 = vmatpush.bf16.msrb.mxu1 %v15494_v57  ;;  %v14759_v14 = vld [vmem:[#allocation4 + $0x468] sm:$0xf0]  ;;  %v16866_v57 = vld [vmem:[#allocation4 + $0x3d4] sm:$0xf] }
 0x629   :  { %9782 = vmatpush.bf16.msra.mxu2 %v15326_v45  ;;  %v14762_v39 = vor.u32 %v16884_v43, %v14759_v14  ;;  %v14690_v4 = vor.u32 %v16866_v57, %v14687_v22  ;;  %v4667_v45 = vperm.slane %v17771_v44, 7  ;;  %v17095_v57 = vld [vmem:[#allocation4 + $0xaf4] sm:$0xf0]  ;;  %v16860_v22 = vld [vmem:[#allocation4 + $0x3a4] sm:$0xf] }
 0x62a   :  { %9742 = vmatpush.bf16.msrb.mxu3 %v15142_v58  ;;  %v16973_v58 = vld [vmem:[#allocation4 + $0x724] sm:$0xf0] }
 0x62b   :  { %v15110_v44 = vor.u32 %v16973_v58, %v15109_v18 }
 0x62c   :  { %9812 = vmatpush.bf16.msrb.mxu0 %v15422_v28  ;;  %9825 = vmatpush.bf16.msrb.mxu1 %v15486_v36  ;;  %v16975_v28 = vld [vmem:[#allocation4 + $0x734] sm:$0xf0]  ;;  %v17826_v36 = vpop.f32.mrf.mxu2 }
 0x62d   :  { %9783 = vmatpush.bf16.msra.mxu2 %v15318_v59  ;;  %v15118_v26 = vor.u32 %v16975_v28, %v15117_v23  ;;  %v17017_v59 = vld [vmem:[#allocation4 + $0x884] sm:$0xf0] }
 0x62e   :  { %9743 = vmatpush.bf16.msrb.mxu3 %v15134_v20  ;;  %v7916_v20 = vpop.f32.mrf.mxu3  ;;  %v16969_v28 = vld [vmem:[#allocation4 + $0x704] sm:$0xf0] }
 0x62f   :  { %v7917_v37 = vadd.f32 %v7916_v20, %v7904_v25  ;;  %v15094_v58 = vor.u32 %v16969_v28, %v15093_v19  ;;  %v14711_v20 = vld [vmem:[#allocation4 + $0x408] sm:$0xf0]  ;;  %v17041_v19 = vld [vmem:[#allocation4 + $0x944] sm:$0xf0] }
 0x630   :  { %9813 = vmatpush.bf16.msrb.mxu0 %v15414_v48  ;;  %9826 = vmatpush.bf16.msrb.mxu1 %v15478_v54  ;;  %v16862_v48 = vld [vmem:[#allocation4 + $0x3b4] sm:$0xf]  ;;  %v7813_v54 = vadd.f32 %v17792_v13, %v17769_v62  ;;  %v8033_v49 = vpop.f32.mrf.mxu0  ;;  %v8046_v14 = vpop.f32.mrf.mxu1  ;;  %v14663_v62 = vld [vmem:[#allocation4 + $0x3a8] sm:$0xf0]  ;;  %v14738_v13 = vor.u32 %v16878_v51, %v14735_v35  ;;  %v15397_v35 = vld [vmem:[#allocation4 + $0x960] sm:$0xf] }
 0x631   :  { %9784 = vmatpush.bf16.msra.mxu2 %v15310_v33  ;;  %v8034_v43 = vadd.f32 %v8033_v49, %v4667_v45  ;;  %v14674_v60 = vor.u32 %v16862_v48, %v14671_v11  ;;  %v14727_v33 = vld [vmem:[#allocation4 + $0x428] sm:$0xf0]  ;;  %v8088_v32 = vmax.f32 %v7917_v37, 0.0  ;;  %v14666_v23 = vor.u32 %v16860_v22, %v14663_v62  ;;  %v14719_v45 = vld [vmem:[#allocation4 + $0x418] sm:$0xf0] }
 0x632   :  { %9744 = vmatpush.bf16.msrb.mxu3 %v15126_v63  ;;  %v8086_v15 = vmax.f32 %v7813_v54, 0.0  ;;  %v8083_v48 = vmax.f32 %v17741_v42, 0.0  ;;  %v17045_v54 = vld [vmem:[#allocation4 + $0x964] sm:$0xf0]  ;;  %v15581_v49 = vld [vmem:[#allocation4 + $0xad0] sm:$0xf] }
 0x633   :  { %v17833_v6 = vadd.f32 %v8046_v14, %v8034_v43  ;;  %v14647_v43 = vld [vmem:[#allocation4 + $0x388] sm:$0xf0]  ;;  %v16872_v14 = vld [vmem:[#allocation4 + $0x404] sm:$0xf]  ;;  %v16934_v42 = vld [vmem:[#allocation4 + $0x5f4] sm:$0xf] }
 0x634   :  { %9858 = vmatpush.bf16.msra.mxu0 %v14706_v16  ;;  %9871 = vmatpush.bf16.msra.mxu1 %v14770_v24  ;;  %v15294_v16 = vor.u32 %v17019_v47, %v15293_v41  ;;  %v15285_v24 = vld [vmem:[#allocation4 + $0x880] sm:$0xf]  ;;  %v7957_v63 = vpop.f32.mrf.mxu2  ;;  %v14655_v41 = vld [vmem:[#allocation4 + $0x398] sm:$0xf0]  ;;  %v16874_v47 = vld [vmem:[#allocation4 + $0x414] sm:$0xf] }
 0x635   :  { %9785 = vmatpush.bf16.msra.mxu2 %v15302_v38  ;;  %v15286_v52 = vor.u32 %v17017_v59, %v15285_v24  ;;  %v15589_v38 = vld [vmem:[#allocation4 + $0xae0] sm:$0xf]  ;;  %v14658_v25 = vor.u32 %v16858_v34, %v14655_v41  ;;  %v16856_v24 = vld [vmem:[#allocation4 + $0x384] sm:$0xf]  ;;  %v14722_v59 = vor.u32 %v16874_v47, %v14719_v45  ;;  %v15389_v37 = vld [vmem:[#allocation4 + $0x950] sm:$0xf] }
 0x636   :  { %9745 = vmatpush.bf16.msrb.mxu3 %v15118_v26  ;;  %v15590_v51 = vor.u32 %v17093_v56, %v15589_v38  ;;  %v17043_v22 = vld [vmem:[#allocation4 + $0x954] sm:$0xf0]  ;;  %v15573_v62 = vld [vmem:[#allocation4 + $0xac0] sm:$0xf]  ;;  %v8364_v34 = vld [vmem:[#allocation9 + $0x1d] sm:$0x3] }
 0x637   :  { %v17039_v41 = vld [vmem:[#allocation4 + $0x934] sm:$0xf0]  ;;  %v15557_v47 = vld [vmem:[#allocation4 + $0xaa0] sm:$0xf]  ;;  %v17085_v45 = vld [vmem:[#allocation4 + $0xaa4] sm:$0xf0] }
 0x638   :  { %9859 = vmatpush.bf16.msra.mxu0 %v14698_v9  ;;  %9872 = vmatpush.bf16.msra.mxu1 %v14762_v39  ;;  %v16971_v9 = vld [vmem:[#allocation4 + $0x714] sm:$0xf0]  ;;  %v16876_v39 = vld [vmem:[#allocation4 + $0x424] sm:$0xf]  ;;  %v8035_v18 = vpop.f32.mrf.mxu0  ;;  %v8048_v11 = vpop.f32.mrf.mxu1 }
 0x639   :  { %9786 = vmatpush.bf16.msra.mxu2 %v15294_v16  ;;  %v15102_v0 = vor.u32 %v16971_v9, %v15101_v7  ;;  %v14730_v26 = vor.u32 %v16876_v39, %v14727_v33  ;;  %v15406_v16 = vor.u32 %v17047_v31, %v15405_v29  ;;  %v17842_v7 = vpack.c.bf16 %v8083_v48, %v8083_v48  ;;  %v16932_v33 = vld [vmem:[#allocation4 + $0x5e4] sm:$0xf]  ;;  %v16930_v29 = vld [vmem:[#allocation4 + $0x5d4] sm:$0xf]  ;;  %v14943_v31 = vld [vmem:[#allocation4 + $0x5d8] sm:$0xf0] }
 0x63a   :  { %9746 = vmatpush.bf16.msrb.mxu3 %v15110_v44  ;;  %v17091_v44 = vld [vmem:[#allocation4 + $0xad4] sm:$0xf0]  ;;  %v15398_v9 = vor.u32 %v17045_v54, %v15397_v35  ;;  %v14946_v18 = vor.u32 %v16930_v29, %v14943_v31  ;;  %v14935_v48 = vld [vmem:[#allocation4 + $0x5c8] sm:$0xf0]  ;;  %v15365_v35 = vld [vmem:[#allocation4 + $0x920] sm:$0xf] }
 0x63b   :  { %v17037_v54 = vld [vmem:[#allocation4 + $0x924] sm:$0xf0]  ;;  %v16948_v31 = vld [vmem:[#allocation4 + $0x664] sm:$0xf] }
 0x63c   :  { %9860 = vmatpush.bf16.msra.mxu0 %v14690_v4  ;;  %9873 = vmatpush.bf16.msra.mxu1 %v14754_v53  ;;  %v15598_v4 = vor.u32 %v17095_v57, %v15597_v5  ;;  %v17835_v53 = vpack.c.bf16 %v8088_v32, %v8088_v32  ;;  %v15582_v5 = vor.u32 %v17091_v44, %v15581_v49  ;;  %v17083_v49 = vld [vmem:[#allocation4 + $0xa94] sm:$0xf0]  ;;  %v17033_v29 = vld [vmem:[#allocation4 + $0x904] sm:$0xf0] }
 0x63d   :  { %9787 = vmatpush.bf16.msra.mxu2 %v15286_v52  ;;  %v14650_v57 = vor.u32 %v16856_v24, %v14647_v43  ;;  %v14714_v52 = vor.u32 %v16872_v14, %v14711_v20  ;;  %v15390_v32 = vor.u32 %v17043_v22, %v15389_v37  ;;  %v16926_v24 = vld [vmem:[#allocation4 + $0x5b4] sm:$0xf]  ;;  %v15366_v14 = vor.u32 %v17037_v54, %v15365_v35  ;;  %v17035_v37 = vld [vmem:[#allocation4 + $0x914] sm:$0xf0]  ;;  %v17081_v22 = vld [vmem:[#allocation4 + $0xa84] sm:$0xf0] }
 0x63e   :  { %9747 = vmatpush.bf16.msrb.mxu3 %v15102_v0  ;;  %9814 = vmatmul.bf16.vlgmr.msrb.gmra.mxu0 %v17835_v53  ;;  %v15381_v0 = vld [vmem:[#allocation4 + $0x940] sm:$0xf] }
 0x63f   :  { %v15382_v38 = vor.u32 %v17041_v19, %v15381_v0 }
 0x640   :  { %9861 = vmatpush.bf16.msra.mxu0 %v14682_v61  ;;  %9874 = vmatpush.bf16.msra.mxu1 %v14746_v17  ;;  %v17837_v61 = vpack.c.bf16 %v8086_v15, %v8086_v15  ;;  %v7918_v17 = vpop.f32.mrf.mxu3  ;;  %v14951_v15 = vld [vmem:[#allocation4 + $0x5e8] sm:$0xf0] }
 0x641   :  { %9832 = vmatpush.bf16.msrb.mxu2 %v15598_v4  ;;  %v15565_v4 = vld [vmem:[#allocation4 + $0xab0] sm:$0xf]  ;;  %v14954_v28 = vor.u32 %v16932_v33, %v14951_v15  ;;  %v8366_v17 = vperm.slane %v8364_v34, 0  ;;  %v16902_v33 = vld [vmem:[#allocation4 + $0x4f4] sm:$0xf] }
 0x642   :  { %9788 = vmatmul.bf16.vlgmr.msra.gmra.mxu2 %v17837_v61  ;;  %9748 = vmatpush.bf16.msrb.mxu3 %v15094_v58  ;;  %v16928_v58 = vld [vmem:[#allocation4 + $0x5c4] sm:$0xf] }
 0x643   :  { %v14938_v44 = vor.u32 %v16928_v58, %v14935_v48  ;;  %v16922_v58 = vld [vmem:[#allocation4 + $0x594] sm:$0xf]  ;;  %v14911_v48 = vld [vmem:[#allocation4 + $0x598] sm:$0xf0] }
 0x644   :  { %9862 = vmatpush.bf16.msra.mxu0 %v14674_v60  ;;  %9875 = vmatpush.bf16.msra.mxu1 %v14738_v13  ;;  %v14959_v60 = vld [vmem:[#allocation4 + $0x5f8] sm:$0xf0]  ;;  %v17089_v13 = vld [vmem:[#allocation4 + $0xac4] sm:$0xf0] }
 0x645   :  { %9833 = vmatpush.bf16.msrb.mxu2 %v15590_v51  ;;  %9749 = vmatmul.bf16.vlgmr.msrb.gmra.mxu3 %v17842_v7  ;;  %v14962_v39 = vor.u32 %v16934_v42, %v14959_v60  ;;  %v15574_v63 = vor.u32 %v17089_v13, %v15573_v62  ;;  %v17846_v11 = vpop.f32.mrf.mxu2  ;;  %v15558_v51 = vor.u32 %v17085_v45, %v15557_v47  ;;  %v15357_v42 = vld [vmem:[#allocation4 + $0x910] sm:$0xf]  ;;  %v17111_v47 = vld [vmem:[#allocation4 + $0xb74] sm:$0xf0]  ;;  %v16900_v45 = vld [vmem:[#allocation4 + $0x4e4] sm:$0xf] }
 0x646   :  { %9793 = vmatpush.bf16.msra.mxu3 %v15406_v16  ;;  %v15358_v19 = vor.u32 %v17035_v37, %v15357_v42  ;;  %v14815_v42 = vld [vmem:[#allocation4 + $0x4d8] sm:$0xf0] }
 0x648   :  { %9863 = vmatpush.bf16.msra.mxu0 %v14666_v23  ;;  %9876 = vmatpush.bf16.msra.mxu1 %v14730_v26  ;;  %v17087_v23 = vld [vmem:[#allocation4 + $0xab4] sm:$0xf0]  ;;  %v15373_v26 = vld [vmem:[#allocation4 + $0x930] sm:$0xf] }
 0x649   :  { %9834 = vmatpush.bf16.msrb.mxu2 %v15582_v5  ;;  %v15566_v56 = vor.u32 %v17087_v23, %v15565_v4  ;;  %v15374_v16 = vor.u32 %v17039_v41, %v15373_v26  ;;  %v7968_v5 = vpop.f32.mrf.mxu3  ;;  %v15349_v4 = vld [vmem:[#allocation4 + $0x900] sm:$0xf]  ;;  %v15661_v41 = vld [vmem:[#allocation4 + $0xb70] sm:$0xf] }
 0x64a   :  { %9794 = vmatpush.bf16.msra.mxu3 %v15398_v9 }
 0x64c   :  { %9864 = vmatpush.bf16.msra.mxu0 %v14658_v25  ;;  %9877 = vmatpush.bf16.msra.mxu1 %v14722_v59  ;;  %v15549_v25 = vld [vmem:[#allocation4 + $0xa90] sm:$0xf]  ;;  %v14927_v59 = vld [vmem:[#allocation4 + $0x5b8] sm:$0xf0] }
 0x64d   :  { %9835 = vmatpush.bf16.msrb.mxu2 %v15574_v63  ;;  %v15550_v20 = vor.u32 %v17083_v49, %v15549_v25  ;;  %v14930_v13 = vor.u32 %v16926_v24, %v14927_v59  ;;  %v8009_v0 = vpop.f32.mrf.mxu2  ;;  %v15662_v49 = vor.u32 %v17111_v47, %v15661_v41  ;;  %v15007_v24 = vld [vmem:[#allocation4 + $0x658] sm:$0xf0]  ;;  %v16894_v41 = vld [vmem:[#allocation4 + $0x4b4] sm:$0xf] }
 0x64e   :  { %9795 = vmatpush.bf16.msra.mxu3 %v15390_v32  ;;  %v14919_v32 = vld [vmem:[#allocation4 + $0x5a8] sm:$0xf0]  ;;  %v16996_v0 = vld [vmem:[#allocation4 + $0x7e4] sm:$0xf]  ;;  %v14799_v47 = vld [vmem:[#allocation4 + $0x4b8] sm:$0xf0] }
 0x650   :  { %9865 = vmatpush.bf16.msra.mxu0 %v14650_v57  ;;  %9878 = vmatpush.bf16.msra.mxu1 %v14714_v52  ;;  %v9659_v43 = vpop.f32.mrf.mxu0  ;;  %v9672_v9 = vpop.f32.mrf.mxu1  ;;  %v15541_v57 = vld [vmem:[#allocation4 + $0xa80] sm:$0xf]  ;;  %v16950_v52 = vld [vmem:[#allocation4 + $0x674] sm:$0xf] }
 0x651   :  { %9836 = vmatpush.bf16.msrb.mxu2 %v15566_v56  ;;  %v9660_v60 = vadd.f32 %v9659_v43, %v8366_v17  ;;  %v15542_v23 = vor.u32 %v17081_v22, %v15541_v57  ;;  %v7970_v54 = vpop.f32.mrf.mxu3  ;;  %v15653_v43 = vld [vmem:[#allocation4 + $0xb60] sm:$0xf] }
 0x652   :  { %9796 = vmatpush.bf16.msra.mxu3 %v15382_v38  ;;  %v15015_v38 = vld [vmem:[#allocation4 + $0x668] sm:$0xf0] }
 0x653   :  { %9866 = vmatmul.bf16.vlgmr.msra.gmra.mxu0 %v17762_v10  ;;  %v7956_v10 = vadd.f32 %v17826_v36, %v17794_v1  ;;  %v17850_v15 = vadd.f32 %v9672_v9, %v9660_v60  ;;  %v14831_v1 = vld [vmem:[#allocation4 + $0x4f8] sm:$0xf0]  ;;  %v16924_v36 = vld [vmem:[#allocation4 + $0x5a4] sm:$0xf]  ;;  %v15018_v25 = vor.u32 %v16948_v31, %v15015_v38  ;;  %v14903_v9 = vld [vmem:[#allocation4 + $0x588] sm:$0xf0] }
 0x654   :  { %9910 = vmatpush.bf16.msrb.mxu0 %v14962_v39  ;;  %v15023_v39 = vld [vmem:[#allocation4 + $0x678] sm:$0xf0]  ;;  %v14834_v34 = vor.u32 %v16902_v33, %v14831_v1  ;;  %v14922_v26 = vor.u32 %v16924_v36, %v14919_v32  ;;  %v16920_v60 = vld [vmem:[#allocation4 + $0x584] sm:$0xf]  ;;  %v15645_v33 = vld [vmem:[#allocation4 + $0xb50] sm:$0xf] }
 0x655   :  { %9837 = vmatpush.bf16.msrb.mxu2 %v15558_v51  ;;  %v7969_v62 = vadd.f32 %v7968_v5, %v7956_v10  ;;  %v8087_v51 = vmax.f32 %v17814_v46, 0.0  ;;  %v14914_v10 = vor.u32 %v16922_v58, %v14911_v48  ;;  %v16998_v46 = vld [vmem:[#allocation4 + $0x7f4] sm:$0xf]  ;;  %v15215_v5 = vld [vmem:[#allocation4 + $0x7f8] sm:$0xf0] }
 0x656   :  { %9797 = vmatpush.bf16.msra.mxu3 %v15374_v16  ;;  %v15350_v16 = vor.u32 %v17033_v29, %v15349_v4  ;;  %v15218_v1 = vor.u32 %v16998_v46, %v15215_v5  ;;  %v17107_v36 = vld [vmem:[#allocation4 + $0xb54] sm:$0xf0]  ;;  %v16896_v32 = vld [vmem:[#allocation4 + $0x4c4] sm:$0xf]  ;;  %v16942_v29 = vld [vmem:[#allocation4 + $0x634] sm:$0xf] }
 0x657   :  { %v8089_v63 = vmax.f32 %v7969_v62, 0.0  ;;  %v17856_v37 = vpack.c.bf16 %v8087_v51, %v8087_v51  ;;  %v14991_v31 = vld [vmem:[#allocation4 + $0x638] sm:$0xf0]  ;;  %v15637_v38 = vld [vmem:[#allocation4 + $0xb40] sm:$0xf] }
 0x658   :  { %9911 = vmatpush.bf16.msrb.mxu0 %v14954_v28  ;;  %v15026_v28 = vor.u32 %v16950_v52, %v15023_v39  ;;  %v9661_v17 = vpop.f32.mrf.mxu0  ;;  %v9674_v35 = vpop.f32.mrf.mxu1  ;;  %v16944_v52 = vld [vmem:[#allocation4 + $0x644] sm:$0xf]  ;;  %v14999_v39 = vld [vmem:[#allocation4 + $0x648] sm:$0xf0]  ;;  %v14994_v58 = vor.u32 %v16942_v29, %v14991_v31  ;;  %v17101_v46 = vld [vmem:[#allocation4 + $0xb24] sm:$0xf0] }
 0x659   :  { %9838 = vmatpush.bf16.msrb.mxu2 %v15550_v20  ;;  %v17852_v56 = vpack.c.bf16 %v8089_v63, %v8089_v63  ;;  %v16898_v20 = vld [vmem:[#allocation4 + $0x4d4] sm:$0xf]  ;;  %v14807_v63 = vld [vmem:[#allocation4 + $0x4c8] sm:$0xf0]  ;;  %v15002_v4 = vor.u32 %v16944_v52, %v14999_v39  ;;  %v14802_v17 = vor.u32 %v16894_v41, %v14799_v47  ;;  %v15629_v35 = vld [vmem:[#allocation4 + $0xb30] sm:$0xf] }
 0x65a   :  { %9798 = vmatpush.bf16.msra.mxu3 %v15366_v14  ;;  %v17109_v14 = vld [vmem:[#allocation4 + $0xb64] sm:$0xf0]  ;;  %v14818_v62 = vor.u32 %v16898_v20, %v14815_v42  ;;  %v14983_v51 = vld [vmem:[#allocation4 + $0x628] sm:$0xf0]  ;;  %v16938_v20 = vld [vmem:[#allocation4 + $0x614] sm:$0xf] }
 0x65b   :  { %9827 = vmatmul.bf16.vlgmr.msrb.gmra.mxu1 %v17852_v56  ;;  %v15654_v22 = vor.u32 %v17109_v14, %v15653_v43  ;;  %v14975_v42 = vld [vmem:[#allocation4 + $0x618] sm:$0xf0]  ;;  %v16890_v5 = vld [vmem:[#allocation4 + $0x494] sm:$0xf]  ;;  %v16936_v39 = vld [vmem:[#allocation4 + $0x604] sm:$0xf] }
 0x65c   :  { %9912 = vmatpush.bf16.msrb.mxu0 %v14946_v18  ;;  %v14823_v18 = vld [vmem:[#allocation4 + $0x4e8] sm:$0xf0]  ;;  %9923 = vmatpush.bf16.msrb.mxu1 %v15026_v28  ;;  %v14810_v28 = vor.u32 %v16896_v32, %v14807_v63  ;;  %v14978_v52 = vor.u32 %v16938_v20, %v14975_v42  ;;  %v15279_v29 = vld [vmem:[#allocation4 + $0x878] sm:$0xf0]  ;;  %v16966_v31 = vld [vmem:[#allocation4 + $0x6f4] sm:$0xf] }
 0x65d   :  { %9839 = vmatpush.bf16.msrb.mxu2 %v15542_v23  ;;  %v14826_v59 = vor.u32 %v16900_v45, %v14823_v18  ;;  %v15646_v23 = vor.u32 %v17107_v36, %v15645_v33  ;;  %v16994_v45 = vld [vmem:[#allocation4 + $0x7d4] sm:$0xf]  ;;  %v15199_v18 = vld [vmem:[#allocation4 + $0x7d8] sm:$0xf0]  ;;  %v14967_v63 = vld [vmem:[#allocation4 + $0x608] sm:$0xf0] }
 0x65e   :  { %9799 = vmatpush.bf16.msra.mxu3 %v15358_v19  ;;  %v15207_v19 = vld [vmem:[#allocation4 + $0x7e8] sm:$0xf0]  ;;  %v15202_v54 = vor.u32 %v16994_v45, %v15199_v18  ;;  %v14970_v41 = vor.u32 %v16936_v39, %v14967_v63  ;;  %v16988_v47 = vld [vmem:[#allocation4 + $0x7a4] sm:$0xf]  ;;  %v15167_v20 = vld [vmem:[#allocation4 + $0x798] sm:$0xf0] }
 0x65f   :  { %v15175_v45 = vld [vmem:[#allocation4 + $0x7a8] sm:$0xf0] }
 0x660   :  { %9913 = vmatpush.bf16.msrb.mxu0 %v14938_v44  ;;  %v16946_v44 = vld [vmem:[#allocation4 + $0x654] sm:$0xf]  ;;  %9924 = vmatpush.bf16.msrb.mxu1 %v15018_v25  ;;  %v17103_v25 = vld [vmem:[#allocation4 + $0xb34] sm:$0xf0]  ;;  %v14887_v39 = vld [vmem:[#allocation4 + $0x568] sm:$0xf0] }
 0x661   :  { %9884 = vmatpush.bf16.msra.mxu2 %v14834_v34  ;;  %v15010_v57 = vor.u32 %v16946_v44, %v15007_v24  ;;  %v15210_v34 = vor.u32 %v16996_v0, %v15207_v19  ;;  %v14791_v44 = vld [vmem:[#allocation4 + $0x4a8] sm:$0xf0]  ;;  %v16992_v24 = vld [vmem:[#allocation4 + $0x7c4] sm:$0xf]  ;;  %v15630_v43 = vor.u32 %v17103_v25, %v15629_v35  ;;  %v15613_v0 = vld [vmem:[#allocation4 + $0xb10] sm:$0xf] }
 0x662   :  { %9800 = vmatpush.bf16.msra.mxu3 %v15350_v16  ;;  %v16940_v16 = vld [vmem:[#allocation4 + $0x624] sm:$0xf]  ;;  %v17099_v19 = vld [vmem:[#allocation4 + $0xb14] sm:$0xf0]  ;;  %v17097_v35 = vld [vmem:[#allocation4 + $0xb04] sm:$0xf0] }
 0x663   :  { %v15614_v18 = vor.u32 %v17099_v19, %v15613_v0  ;;  %v15271_v25 = vld [vmem:[#allocation4 + $0x868] sm:$0xf0]  ;;  %v17062_v0 = vld [vmem:[#allocation4 + $0x9f4] sm:$0xf]  ;;  %v15471_v19 = vld [vmem:[#allocation4 + $0x9f8] sm:$0xf0] }
 0x664   :  { %9914 = vmatpush.bf16.msrb.mxu0 %v14930_v13  ;;  %v14906_v13 = vor.u32 %v16920_v60, %v14903_v9  ;;  %9925 = vmatpush.bf16.msrb.mxu1 %v15010_v57  ;;  %v15621_v60 = vld [vmem:[#allocation4 + $0xb20] sm:$0xf]  ;;  %v14783_v57 = vld [vmem:[#allocation4 + $0x498] sm:$0xf0]  ;;  %v15159_v63 = vld [vmem:[#allocation4 + $0x788] sm:$0xf0] }
 0x665   :  { %9885 = vmatpush.bf16.msra.mxu2 %v14826_v59  ;;  %9801 = vmatmul.bf16.vlgmr.msra.gmra.mxu3 %v17856_v37  ;;  %v15191_v59 = vld [vmem:[#allocation4 + $0x7c8] sm:$0xf0]  ;;  %v15622_v36 = vor.u32 %v17101_v46, %v15621_v60  ;;  %v14786_v32 = vor.u32 %v16890_v5, %v14783_v57  ;;  %v17010_v57 = vld [vmem:[#allocation4 + $0x854] sm:$0xf] }
 0x666   :  { %9845 = vmatpush.bf16.msrb.mxu3 %v15662_v49  ;;  %v16892_v49 = vld [vmem:[#allocation4 + $0x4a4] sm:$0xf]  ;;  %v15194_v9 = vor.u32 %v16992_v24, %v15191_v59  ;;  %v14895_v24 = vld [vmem:[#allocation4 + $0x578] sm:$0xf0] }
 0x667   :  { %v14794_v14 = vor.u32 %v16892_v49, %v14791_v44  ;;  %v15178_v49 = vor.u32 %v16988_v47, %v15175_v45  ;;  %v16918_v44 = vld [vmem:[#allocation4 + $0x574] sm:$0xf]  ;;  %v16964_v59 = vld [vmem:[#allocation4 + $0x6e4] sm:$0xf]  ;;  %v15463_v47 = vld [vmem:[#allocation4 + $0x9e8] sm:$0xf0] }
 0x668   :  { %9915 = vmatpush.bf16.msrb.mxu0 %v14922_v26  ;;  %v17105_v26 = vld [vmem:[#allocation4 + $0xb44] sm:$0xf0]  ;;  %9926 = vmatpush.bf16.msrb.mxu1 %v15002_v4  ;;  %v14898_v5 = vor.u32 %v16918_v44, %v14895_v24  ;;  %v17058_v44 = vld [vmem:[#allocation4 + $0x9d4] sm:$0xf]  ;;  %v15455_v24 = vld [vmem:[#allocation4 + $0x9d8] sm:$0xf0] }
 0x669   :  { %9886 = vmatpush.bf16.msra.mxu2 %v14818_v62  ;;  %v15638_v48 = vor.u32 %v17105_v26, %v15637_v38  ;;  %v8008_v62 = vadd.f32 %v17846_v11, %v17816_v50  ;;  %v14775_v50 = vld [vmem:[#allocation4 + $0x488] sm:$0xf0]  ;;  %v17014_v11 = vld [vmem:[#allocation4 + $0x874] sm:$0xf]  ;;  %v15087_v38 = vld [vmem:[#allocation4 + $0x6f8] sm:$0xf0] }
 0x66a   :  { %9846 = vmatpush.bf16.msrb.mxu3 %v15654_v22  ;;  %v16990_v22 = vld [vmem:[#allocation4 + $0x7b4] sm:$0xf] }
 0x66b   :  { %9879 = vmatmul.bf16.vlgmr.msra.gmra.mxu1 %v17764_v3  ;;  %v15183_v3 = vld [vmem:[#allocation4 + $0x7b8] sm:$0xf0] }
 0x66c   :  { %9916 = vmatpush.bf16.msrb.mxu0 %v14914_v10  ;;  %9927 = vmatpush.bf16.msrb.mxu1 %v14994_v58  ;;  %v14986_v10 = vor.u32 %v16940_v16, %v14983_v51  ;;  %v15282_v16 = vor.u32 %v17014_v11, %v15279_v29  ;;  %v15090_v51 = vor.u32 %v16966_v31, %v15087_v38  ;;  %v15255_v11 = vld [vmem:[#allocation4 + $0x848] sm:$0xf0]  ;;  %v16914_v29 = vld [vmem:[#allocation4 + $0x554] sm:$0xf]  ;;  %v14879_v38 = vld [vmem:[#allocation4 + $0x558] sm:$0xf0] }
 0x66d   :  { %9887 = vmatpush.bf16.msra.mxu2 %v14810_v28  ;;  %v16888_v28 = vld [vmem:[#allocation4 + $0x484] sm:$0xf]  ;;  %v15474_v31 = vor.u32 %v17062_v0, %v15471_v19  ;;  %v16954_v0 = vld [vmem:[#allocation4 + $0x694] sm:$0xf]  ;;  %v15039_v19 = vld [vmem:[#allocation4 + $0x698] sm:$0xf0] }
 0x66e   :  { %9847 = vmatpush.bf16.msrb.mxu3 %v15646_v23  ;;  %v15186_v23 = vor.u32 %v16990_v22, %v15183_v3  ;;  %v14778_v58 = vor.u32 %v16888_v28, %v14775_v50  ;;  %v15263_v22 = vld [vmem:[#allocation4 + $0x858] sm:$0xf0] }
 0x670   :  { %9917 = vmatpush.bf16.msrb.mxu0 %v14906_v13  ;;  %9928 = vmatpush.bf16.msrb.mxu1 %v14986_v10  ;;  %v17865_v13 = vpop.f32.mrf.mxu0  ;;  %v17867_v33 = vpop.f32.mrf.mxu1 }
 0x671   :  { %9888 = vmatpush.bf16.msra.mxu2 %v14802_v17 }
 0x672   :  { %9848 = vmatpush.bf16.msrb.mxu3 %v15638_v48  ;;  %v15605_v48 = vld [vmem:[#allocation4 + $0xb00] sm:$0xf] }
 0x673   :  { %9918 = vmatmul.bf16.vlgmr.msrb.gmra.mxu0 %v17782_v27  ;;  %v17861_v27 = vpop.f32.mrf.mxu2 }
 0x674   :  { %9962 = vmatpush.bf16.msra.mxu0 %v15218_v1  ;;  %v8020_v1 = vpop.f32.mrf.mxu3  ;;  %9929 = vmatpush.bf16.msrb.mxu1 %v14978_v52  ;;  %v16916_v52 = vld [vmem:[#allocation4 + $0x564] sm:$0xf] }
 0x675   :  { %9889 = vmatpush.bf16.msra.mxu2 %v14794_v14  ;;  %v8021_v4 = vadd.f32 %v8020_v1, %v8008_v62  ;;  %v16986_v14 = vld [vmem:[#allocation4 + $0x794] sm:$0xf] }
 0x676   :  { %9849 = vmatpush.bf16.msrb.mxu3 %v15630_v43  ;;  %v15079_v43 = vld [vmem:[#allocation4 + $0x6e8] sm:$0xf0]  ;;  %v15170_v62 = vor.u32 %v16986_v14, %v15167_v20  ;;  %v16962_v1 = vld [vmem:[#allocation4 + $0x6d4] sm:$0xf]  ;;  %v17004_v14 = vld [vmem:[#allocation4 + $0x824] sm:$0xf] }
 0x677   :  { %v15082_v3 = vor.u32 %v16964_v59, %v15079_v43  ;;  %v15239_v20 = vld [vmem:[#allocation4 + $0x828] sm:$0xf0] }
 0x678   :  { %9963 = vmatpush.bf16.msra.mxu0 %v15210_v34  ;;  %v8090_v34 = vmax.f32 %v8021_v4, 0.0  ;;  %9930 = vmatpush.bf16.msrb.mxu1 %v14970_v41  ;;  %v9713_v10 = vpop.f32.mrf.mxu0  ;;  %v9726_v42 = vpop.f32.mrf.mxu1  ;;  %v15266_v4 = vor.u32 %v17010_v57, %v15263_v22  ;;  %v17060_v41 = vld [vmem:[#allocation4 + $0x9e4] sm:$0xf] }
 0x679   :  { %9890 = vmatpush.bf16.msra.mxu2 %v14786_v32  ;;  %v16984_v32 = vld [vmem:[#allocation4 + $0x784] sm:$0xf]  ;;  %v16910_v42 = vld [vmem:[#allocation4 + $0x534] sm:$0xf] }
 0x67a   :  { %9850 = vmatpush.bf16.msrb.mxu3 %v15622_v36  ;;  %v17869_v17 = vpack.c.bf16 %v8090_v34, %v8090_v34  ;;  %v15071_v36 = vld [vmem:[#allocation4 + $0x6d8] sm:$0xf0]  ;;  %v15162_v50 = vor.u32 %v16984_v32, %v15159_v63  ;;  %v16960_v34 = vld [vmem:[#allocation4 + $0x6c4] sm:$0xf]  ;;  %v14855_v63 = vld [vmem:[#allocation4 + $0x528] sm:$0xf0] }
 0x67b   :  { %v8061_v26 = vpop.f32.mrf.mxu2  ;;  %9931 = vmatmul.bf16.vlgmr.msrb.gmra.mxu1 %v17784_v2  ;;  %v15074_v28 = vor.u32 %v16962_v1, %v15071_v36  ;;  %v17008_v2 = vld [vmem:[#allocation4 + $0x844] sm:$0xf]  ;;  %v17002_v1 = vld [vmem:[#allocation4 + $0x814] sm:$0xf]  ;;  %v15231_v36 = vld [vmem:[#allocation4 + $0x818] sm:$0xf0] }
 0x67c   :  { %9964 = vmatpush.bf16.msra.mxu0 %v15202_v54  ;;  %v17012_v54 = vld [vmem:[#allocation4 + $0x864] sm:$0xf]  ;;  %9840 = vmatmul.bf16.vlgmr.msrb.gmra.mxu2 %v17869_v17  ;;  %v8022_v60 = vpop.f32.mrf.mxu3  ;;  %v15063_v26 = vld [vmem:[#allocation4 + $0x6c8] sm:$0xf0]  ;;  %v15258_v45 = vor.u32 %v17008_v2, %v15255_v11  ;;  %v15234_v11 = vor.u32 %v17002_v1, %v15231_v36  ;;  %v15423_v1 = vld [vmem:[#allocation4 + $0x998] sm:$0xf0] }
 0x67d   :  { %9891 = vmatpush.bf16.msra.mxu2 %v14778_v58  ;;  %9975 = vmatpush.bf16.msra.mxu1 %v15282_v16  ;;  %v15274_v46 = vor.u32 %v17012_v54, %v15271_v25  ;;  %v15066_v58 = vor.u32 %v16960_v34, %v15063_v26  ;;  %v15247_v16 = vld [vmem:[#allocation4 + $0x838] sm:$0xf0]  ;;  %v14871_v54 = vld [vmem:[#allocation4 + $0x548] sm:$0xf0]  ;;  %v16958_v25 = vld [vmem:[#allocation4 + $0x6b4] sm:$0xf]  ;;  %v15458_v60 = vor.u32 %v17058_v44, %v15455_v24 }
 0x67e   :  { %9851 = vmatpush.bf16.msrb.mxu3 %v15614_v18  ;;  %v14882_v18 = vor.u32 %v16914_v29, %v14879_v38  ;;  %v17056_v22 = vld [vmem:[#allocation4 + $0x9c4] sm:$0xf]  ;;  %v15042_v26 = vor.u32 %v16954_v0, %v15039_v19  ;;  %v15519_v0 = vld [vmem:[#allocation4 + $0xa58] sm:$0xf0] }
 0x67f   :  { %v16908_v32 = vld [vmem:[#allocation4 + $0x524] sm:$0xf] }
 0x680   :  { %9965 = vmatpush.bf16.msra.mxu0 %v15194_v9  ;;  %v15606_v9 = vor.u32 %v17097_v35, %v15605_v48  ;;  %v17006_v48 = vld [vmem:[#allocation4 + $0x834] sm:$0xf]  ;;  %v15466_v35 = vor.u32 %v17060_v41, %v15463_v47  ;;  %v17000_v29 = vld [vmem:[#allocation4 + $0x804] sm:$0xf]  ;;  %v14858_v34 = vor.u32 %v16908_v32, %v14855_v63  ;;  %v14847_v47 = vld [vmem:[#allocation4 + $0x518] sm:$0xf0] }
 0x681   :  { %9936 = vmatpush.bf16.msrb.mxu2 %v15090_v51  ;;  %9976 = vmatpush.bf16.msra.mxu1 %v15274_v46  ;;  %v16912_v51 = vld [vmem:[#allocation4 + $0x544] sm:$0xf]  ;;  %v15250_v59 = vor.u32 %v17006_v48, %v15247_v16  ;;  %v16906_v41 = vld [vmem:[#allocation4 + $0x514] sm:$0xf] }
 0x682   :  { %9852 = vmatpush.bf16.msrb.mxu3 %v15606_v9  ;;  %v14874_v10 = vor.u32 %v16912_v51, %v14871_v54  ;;  %v14863_v9 = vld [vmem:[#allocation4 + $0x538] sm:$0xf0]  ;;  %v16956_v46 = vld [vmem:[#allocation4 + $0x6a4] sm:$0xf]  ;;  %v17030_v51 = vld [vmem:[#allocation4 + $0x8f4] sm:$0xf]  ;;  %v14850_v24 = vor.u32 %v16906_v41, %v14847_v47  ;;  %v10070_v47 = vpop.permute.xlu0 %10069 }
 0x683   :  { %v17074_v63 = vld [vmem:[#allocation4 + $0xa54] sm:$0xf] }
 0x684   :  { %9966 = vmatpush.bf16.msra.mxu0 %v15186_v23  ;;  %v14890_v23 = vor.u32 %v16916_v52, %v14887_v39  ;;  %v14866_v52 = vor.u32 %v16910_v42, %v14863_v9  ;;  %v17076_v42 = vld [vmem:[#allocation4 + $0xa64] sm:$0xf] }
 0x685   :  { %9937 = vmatpush.bf16.msrb.mxu2 %v15082_v3  ;;  %9977 = vmatpush.bf16.msra.mxu1 %v15266_v4  ;;  %v9685_v57 = vpop.f32.mrf.mxu2  ;;  %v15447_v3 = vld [vmem:[#allocation4 + $0x9c8] sm:$0xf0]  ;;  %v8060_v4 = vadd.f32 %v17861_v27, %v17833_v6  ;;  %v8072_v2 = vpop.f32.mrf.mxu3 }
 0x686   :  { %9897 = vmatpush.bf16.msra.mxu3 %v14898_v5  ;;  %v15047_v5 = vld [vmem:[#allocation4 + $0x6a8] sm:$0xf0] }
 0x687   :  { %v15050_v39 = vor.u32 %v16956_v46, %v15047_v5  ;;  %v8073_v38 = vadd.f32 %v8072_v2, %v8060_v4  ;;  %v15031_v27 = vld [vmem:[#allocation4 + $0x688] sm:$0xf0]  ;;  %v16982_v5 = vld [vmem:[#allocation4 + $0x774] sm:$0xf] }
 0x688   :  { %9967 = vmatpush.bf16.msra.mxu0 %v15178_v49  ;;  %v15055_v49 = vld [vmem:[#allocation4 + $0x6b8] sm:$0xf0]  ;;  %v17026_v2 = vld [vmem:[#allocation4 + $0x8d4] sm:$0xf] }
 0x689   :  { %9938 = vmatpush.bf16.msrb.mxu2 %v15074_v28  ;;  %9978 = vmatpush.bf16.msra.mxu1 %v15258_v45  ;;  %v15058_v43 = vor.u32 %v16958_v25, %v15055_v49  ;;  %v15439_v28 = vld [vmem:[#allocation4 + $0x9b8] sm:$0xf0]  ;;  %v16952_v45 = vld [vmem:[#allocation4 + $0x684] sm:$0xf]  ;;  %v8091_v48 = vmax.f32 %v8073_v38, 0.0 }
 0x68a   :  { %9898 = vmatpush.bf16.msra.mxu3 %v14890_v23  ;;  %v17052_v25 = vld [vmem:[#allocation4 + $0x9a4] sm:$0xf]  ;;  %v15431_v49 = vld [vmem:[#allocation4 + $0x9a8] sm:$0xf0]  ;;  %v15685_v38 = vld [vmem:[#allocation2 + $0xc20] sm:$0xf] }
 0x68b   :  { %v17884_v44 = vpack.c.bf16 %v8091_v48, %v8091_v48  ;;  %v15434_v46 = vor.u32 %v17052_v25, %v15431_v49  ;;  %v15319_v48 = vld [vmem:[#allocation4 + $0x8c8] sm:$0xf0] }
 0x68c   :  { %9968 = vmatpush.bf16.msra.mxu0 %v15170_v62  ;;  %9892 = vmatmul.bf16.vlgmr.msra.gmra.mxu2 %v17797_v30  ;;  %v15242_v62 = vor.u32 %v17004_v14, %v15239_v20  ;;  %v15450_v30 = vor.u32 %v17056_v22, %v15447_v3  ;;  %v14839_v20 = vld [vmem:[#allocation4 + $0x508] sm:$0xf0]  ;;  %v17028_v22 = vld [vmem:[#allocation4 + $0x8e4] sm:$0xf] }
 0x68d   :  { %9939 = vmatpush.bf16.msrb.mxu2 %v15066_v58  ;;  %9979 = vmatpush.bf16.msra.mxu1 %v15250_v59  ;;  %v15535_v58 = vld [vmem:[#allocation4 + $0xa78] sm:$0xf0]  ;;  %v9687_v16 = vpop.f32.mrf.mxu2  ;;  %v15034_v59 = vor.u32 %v16952_v45, %v15031_v27  ;;  %v15511_v27 = vld [vmem:[#allocation4 + $0xa48] sm:$0xf0] }
 0x68e   :  { %9899 = vmatpush.bf16.msra.mxu3 %v14882_v18  ;;  %v17078_v18 = vld [vmem:[#allocation4 + $0xa74] sm:$0xf] }
 0x68f   :  { %9853 = vmatmul.bf16.vlgmr.msrb.gmra.mxu3 %v17884_v44 }
 0x690   :  { %9969 = vmatpush.bf16.msra.mxu0 %v15162_v50  ;;  %v17880_v23 = vpop.f32.mrf.mxu0  ;;  %v17882_v50 = vpop.f32.mrf.mxu1 }
 0x691   :  { %9940 = vmatpush.bf16.msrb.mxu2 %v15058_v43  ;;  %9980 = vmatpush.bf16.msra.mxu1 %v15242_v62  ;;  %v15538_v43 = vor.u32 %v17078_v18, %v15535_v58  ;;  %v8074_v62 = vpop.f32.mrf.mxu3  ;;  %v16978_v18 = vld [vmem:[#allocation4 + $0x754] sm:$0xf]  ;;  %v15135_v58 = vld [vmem:[#allocation4 + $0x758] sm:$0xf0] }
 0x692   :  { %9900 = vmatpush.bf16.msra.mxu3 %v14874_v10  ;;  %v16904_v10 = vld [vmem:[#allocation4 + $0x504] sm:$0xf]  ;;  %v15138_v25 = vor.u32 %v16978_v18, %v15135_v58  ;;  %v15119_v62 = vld [vmem:[#allocation4 + $0x738] sm:$0xf0]  ;;  %v15287_v18 = vld [vmem:[#allocation4 + $0x888] sm:$0xf0] }
 0x693   :  { %9970 = vmatmul.bf16.vlgmr.msra.gmra.mxu0 %v17804_v40  ;;  %v17876_v40 = vadd.f32 %v9685_v57, %v17850_v15  ;;  %v17054_v15 = vld [vmem:[#allocation4 + $0x9b4] sm:$0xf]  ;;  %v15151_v57 = vld [vmem:[#allocation4 + $0x778] sm:$0xf0]  ;;  %v14842_v36 = vor.u32 %v16904_v10, %v14839_v20  ;;  %v16976_v10 = vld [vmem:[#allocation4 + $0x744] sm:$0xf] }
 0x694   :  { %10014 = vmatpush.bf16.msrb.mxu0 %v15474_v31  ;;  %v15223_v31 = vld [vmem:[#allocation4 + $0x808] sm:$0xf0]  ;;  %v15442_v6 = vor.u32 %v17054_v15, %v15439_v28  ;;  %v16980_v15 = vld [vmem:[#allocation4 + $0x764] sm:$0xf]  ;;  %v15311_v20 = vld [vmem:[#allocation4 + $0x8b8] sm:$0xf0] }
 0x695   :  { %9941 = vmatpush.bf16.msrb.mxu2 %v15050_v39  ;;  %9981 = vmatpush.bf16.msra.mxu1 %v15234_v11  ;;  %v15226_v54 = vor.u32 %v17000_v29, %v15223_v31  ;;  %v17050_v39 = vld [vmem:[#allocation4 + $0x994] sm:$0xf]  ;;  %v15143_v28 = vld [vmem:[#allocation4 + $0x768] sm:$0xf0]  ;;  %v15327_v11 = vld [vmem:[#allocation4 + $0x8d8] sm:$0xf0] }
 0x696   :  { %9901 = vmatpush.bf16.msra.mxu3 %v14866_v52  ;;  %v15335_v52 = vld [vmem:[#allocation4 + $0x8e8] sm:$0xf0]  ;;  %v15426_v4 = vor.u32 %v17050_v39, %v15423_v1  ;;  %v17048_v29 = vld [vmem:[#allocation4 + $0x984] sm:$0xf]  ;;  %v15146_v41 = vor.u32 %v16980_v15, %v15143_v28  ;;  %v10074_v1 = vpop.permute.xlu0 %10073  ;;  %v15295_v28 = vld [vmem:[#allocation4 + $0x898] sm:$0xf0] }
 0x697   :  { %v15338_v19 = vor.u32 %v17028_v22, %v15335_v52  ;;  %v15415_v31 = vld [vmem:[#allocation4 + $0x988] sm:$0xf0]  ;;  %v16974_v22 = vld [vmem:[#allocation4 + $0x734] sm:$0xf]  ;;  %v17020_v52 = vld [vmem:[#allocation4 + $0x8a4] sm:$0xf] }
 0x698   :  { %10015 = vmatpush.bf16.msrb.mxu0 %v15466_v35  ;;  %v15343_v35 = vld [vmem:[#allocation4 + $0x8f8] sm:$0xf0]  ;;  %v9765_v9 = vpop.f32.mrf.mxu0  ;;  %v9778_v3 = vpop.f32.mrf.mxu1  ;;  %v15418_v45 = vor.u32 %v17048_v29, %v15415_v31  ;;  %v15303_v39 = vld [vmem:[#allocation4 + $0x8a8] sm:$0xf0]  ;;  %v17064_v31 = vld [vmem:[#allocation4 + $0xa04] sm:$0xf] }
 0x699   :  { %9942 = vmatpush.bf16.msrb.mxu2 %v15042_v26  ;;  %v15346_v14 = vor.u32 %v17030_v51, %v15343_v35  ;;  %9982 = vmatpush.bf16.msra.mxu1 %v15226_v54  ;;  %v15522_v26 = vor.u32 %v17074_v63, %v15519_v0  ;;  %v15669_v51 = vld [vmem:[#allocation2 + $0xc00] sm:$0xf]  ;;  %v17114_v35 = vld [vmem:[#allocation2 + $0xc0c] sm:$0xf0]  ;;  %v17066_v63 = vld [vmem:[#allocation4 + $0xa14] sm:$0xf] }
 0x69a   :  { %9902 = vmatpush.bf16.msra.mxu3 %v14858_v34  ;;  %v17118_v34 = vld [vmem:[#allocation2 + $0xc2c] sm:$0xf0]  ;;  %v15487_v0 = vld [vmem:[#allocation4 + $0xa18] sm:$0xf0]  ;;  %v15111_v15 = vld [vmem:[#allocation4 + $0x728] sm:$0xf0] }
 0x69b   :  { %v15686_v16 = vor.u32 %v17118_v34, %v15685_v38  ;;  %v15490_v29 = vor.u32 %v17066_v63, %v15487_v0  ;;  %v17094_v58 = vld [vmem:[#allocation4 + $0xaf4] sm:$0xf]  ;;  %v17088_v63 = vld [vmem:[#allocation4 + $0xac4] sm:$0xf]  ;;  %v15575_v0 = vld [vmem:[#allocation4 + $0xac8] sm:$0xf0] }
 0x69c   :  { %10016 = vmatpush.bf16.msrb.mxu0 %v15458_v60  ;;  %v15527_v60 = vld [vmem:[#allocation4 + $0xa68] sm:$0xf0]  ;;  %9983 = vmatmul.bf16.vlgmr.msra.gmra.mxu1 %v17806_v8  ;;  %v15330_v8 = vor.u32 %v17026_v2, %v15327_v11 }
 0x69d   :  { %9943 = vmatpush.bf16.msrb.mxu2 %v15034_v59  ;;  %10027 = vmatpush.bf16.msrb.mxu1 %v15538_v43  ;;  %v15530_v32 = vor.u32 %v17076_v42, %v15527_v60  ;;  %v15503_v59 = vld [vmem:[#allocation4 + $0xa38] sm:$0xf0]  ;;  %v15127_v43 = vld [vmem:[#allocation4 + $0x748] sm:$0xf0]  ;;  %v15670_v42 = vor.u32 %v17114_v35, %v15669_v51 }
 0x69e   :  { %9903 = vmatpush.bf16.msra.mxu3 %v14850_v24  ;;  %v17070_v24 = vld [vmem:[#allocation4 + $0xa34] sm:$0xf]  ;;  %v15130_v9 = vor.u32 %v16976_v10, %v15127_v43 }
 0x69f   :  { %v15506_v60 = vor.u32 %v17070_v24, %v15503_v59  ;;  %v15095_v24 = vld [vmem:[#allocation4 + $0x708] sm:$0xf0]  ;;  %v17046_v59 = vld [vmem:[#allocation4 + $0x974] sm:$0xf] }
 0x6a0   :  { %10017 = vmatpush.bf16.msrb.mxu0 %v15450_v30  ;;  %v15154_v30 = vor.u32 %v16982_v5, %v15151_v57  ;;  %9944 = vmatmul.bf16.vlgmr.msrb.gmra.mxu2 %v17820_v21  ;;  %v17024_v21 = vld [vmem:[#allocation4 + $0x8c4] sm:$0xf]  ;;  %v15495_v57 = vld [vmem:[#allocation4 + $0xa28] sm:$0xf0] }
 0x6a1   :  { %9988 = vmatpush.bf16.msra.mxu2 %v15346_v14  ;;  %10028 = vmatpush.bf16.msrb.mxu1 %v15530_v32  ;;  %v15322_v49 = vor.u32 %v17024_v21, %v15319_v48  ;;  %v17022_v14 = vld [vmem:[#allocation4 + $0x8b4] sm:$0xf]  ;;  %v17068_v5 = vld [vmem:[#allocation4 + $0xa24] sm:$0xf]  ;;  %v15122_v32 = vor.u32 %v16974_v22, %v15119_v62  ;;  %v15599_v21 = vld [vmem:[#allocation4 + $0xaf8] sm:$0xf0] }
 0x6a2   :  { %9904 = vmatpush.bf16.msra.mxu3 %v14842_v36  ;;  %v10072_v36 = vmax.f32 %v17496_v12, %v10070_v47  ;;  %v10078_v12 = vpop.permute.xlu1 %10077  ;;  %v15103_v47 = vld [vmem:[#allocation4 + $0x718] sm:$0xf0]  ;;  %v17116_v48 = vld [vmem:[#allocation2 + $0xc24] sm:$0xf]  ;;  %v17090_v62 = vld [vmem:[#allocation4 + $0xad4] sm:$0xf] }
 0x6a3   :  { %v17044_v22 = vld [vmem:[#allocation4 + $0x964] sm:$0xf] }
 0x6a4   :  { %10018 = vmatpush.bf16.msrb.mxu0 %v15442_v6  ;;  %v17072_v6 = vld [vmem:[#allocation4 + $0xa44] sm:$0xf] }
 0x6a5   :  { %9989 = vmatpush.bf16.msra.mxu2 %v15338_v19  ;;  %10029 = vmatpush.bf16.msrb.mxu1 %v15522_v26  ;;  %v15514_v54 = vor.u32 %v17072_v6, %v15511_v27  ;;  %v9737_v3 = vpop.f32.mrf.mxu2  ;;  %v16972_v19 = vld [vmem:[#allocation4 + $0x724] sm:$0xf]  ;;  %v15479_v26 = vld [vmem:[#allocation4 + $0xa08] sm:$0xf0] }
 0x6a6   :  { %9949 = vmatpush.bf16.msrb.mxu3 %v15154_v30  ;;  %v15306_v30 = vor.u32 %v17020_v52, %v15303_v39  ;;  %v15114_v38 = vor.u32 %v16972_v19, %v15111_v15  ;;  %v17016_v27 = vld [vmem:[#allocation4 + $0x884] sm:$0xf]  ;;  %v15583_v52 = vld [vmem:[#allocation4 + $0xad8] sm:$0xf0]  ;;  %v15578_v19 = vor.u32 %v17088_v63, %v15575_v0  ;;  %v17086_v15 = vld [vmem:[#allocation4 + $0xab4] sm:$0xf] }
 0x6a7   :  { %9905 = vmatmul.bf16.vlgmr.msra.gmra.mxu3 %v17823_v55  ;;  %v17018_v55 = vld [vmem:[#allocation4 + $0x894] sm:$0xf]  ;;  %v15639_v63 = vld [vmem:[#allocation4 + $0xb48] sm:$0xf0] }
 0x6a8   :  { %10019 = vmatpush.bf16.msrb.mxu0 %v15434_v46  ;;  %v15314_v46 = vor.u32 %v17022_v14, %v15311_v20  ;;  %v9698_v2 = vpop.f32.mrf.mxu3  ;;  %v15298_v34 = vor.u32 %v17018_v55, %v15295_v28  ;;  %v15407_v20 = vld [vmem:[#allocation4 + $0x978] sm:$0xf0] }
 0x6a9   :  { %9990 = vmatpush.bf16.msra.mxu2 %v15330_v8  ;;  %10030 = vmatpush.bf16.msrb.mxu1 %v15514_v54  ;;  %v9699_v11 = vadd.f32 %v9698_v2, %v17876_v40  ;;  %v15687_v40 = vld [vmem:[#allocation2 + $0xc30] sm:$0xf0]  ;;  %v15290_v54 = vor.u32 %v17016_v27, %v15287_v18  ;;  %v15567_v55 = vld [vmem:[#allocation4 + $0xab8] sm:$0xf0] }
 0x6aa   :  { %9950 = vmatpush.bf16.msrb.mxu3 %v15146_v41  ;;  %v16970_v41 = vld [vmem:[#allocation4 + $0x714] sm:$0xf]  ;;  %v15690_v10 = vor.u32 %v17116_v48, %v15687_v40  ;;  %v15570_v2 = vor.u32 %v17086_v15, %v15567_v55  ;;  %v17100_v55 = vld [vmem:[#allocation4 + $0xb24] sm:$0xf] }
 0x6ab   :  { %v15106_v35 = vor.u32 %v16970_v41, %v15103_v47  ;;  %v17036_v41 = vld [vmem:[#allocation4 + $0x924] sm:$0xf]  ;;  %v15367_v47 = vld [vmem:[#allocation4 + $0x928] sm:$0xf0] }
 0x6ac   :  { %10020 = vmatpush.bf16.msrb.mxu0 %v15426_v4  ;;  %v10076_v4 = vmax.f32 %v10072_v36, %v10074_v1  ;;  %v15586_v36 = vor.u32 %v17090_v62, %v15583_v52  ;;  %v15370_v18 = vor.u32 %v17036_v41, %v15367_v47  ;;  %v15655_v62 = vld [vmem:[#allocation4 + $0xb68] sm:$0xf0]  ;;  %v17096_v47 = vld [vmem:[#allocation4 + $0xb04] sm:$0xf] }
 0x6ad   :  { %9991 = vmatpush.bf16.msra.mxu2 %v15322_v49  ;;  %10031 = vmatpush.bf16.msrb.mxu1 %v15506_v60  ;;  %v9739_v6 = vpop.f32.mrf.mxu2  ;;  %v15602_v49 = vor.u32 %v17094_v58, %v15599_v21  ;;  %v15591_v60 = vld [vmem:[#allocation4 + $0xae8] sm:$0xf0]  ;;  %v17034_v21 = vld [vmem:[#allocation4 + $0x914] sm:$0xf] }
 0x6ae   :  { %9951 = vmatpush.bf16.msrb.mxu3 %v15138_v25  ;;  %v10080_v8 = vmax.f32 %v10076_v4, %v10078_v12  ;;  %v17040_v4 = vld [vmem:[#allocation4 + $0x944] sm:$0xf]  ;;  %v15375_v12 = vld [vmem:[#allocation4 + $0x938] sm:$0xf0] }
 0x6b0   :  { %10021 = vmatpush.bf16.msrb.mxu0 %v15418_v45  ;;  %v9712_v45 = vadd.f32 %v17865_v13, %v9699_v11  ;;  %v17895_v25 = vpack.c.bf16 %v10080_v8, %v10080_v8  ;;  %v16968_v13 = vld [vmem:[#allocation4 + $0x704] sm:$0xf]  ;;  %v9700_v14 = vpop.f32.mrf.mxu3  ;;  %v17038_v11 = vld [vmem:[#allocation4 + $0x934] sm:$0xf] }
 0x6b1   :  { %9992 = vmatpush.bf16.msra.mxu2 %v15314_v46  ;;  %v15098_v46 = vor.u32 %v16968_v13, %v15095_v24  ;;  %v17082_v8 = vld [vmem:[#allocation4 + $0xa94] sm:$0xf]  ;;  %v17119_v13 = vld [vmem:[#allocation2 + $0xc34] sm:$0xf0]  ;;  %v15351_v14 = vld [vmem:[#allocation4 + $0x908] sm:$0xf0] }
 0x6b2   :  { %9952 = vmatpush.bf16.msrb.mxu3 %v15130_v9  ;;  %v9725_v51 = vadd.f32 %v17867_v33, %v9712_v45  ;;  %v17112_v33 = vld [vmem:[#allocation2 + $0xc04] sm:$0xf]  ;;  %v15671_v9 = vld [vmem:[#allocation2 + $0xc10] sm:$0xf0]  ;;  %v15551_v45 = vld [vmem:[#allocation4 + $0xa98] sm:$0xf0] }
 0x6b3   :  { %10022 = vmatmul.bf16.vlgmr.msrb.gmra.mxu0 %v17835_v53  ;;  %v15498_v53 = vor.u32 %v17068_v5, %v15495_v57  ;;  %v15410_v5 = vor.u32 %v17046_v59, %v15407_v20  ;;  %v15674_v39 = vor.u32 %v17112_v33, %v15671_v9  ;;  %v15554_v58 = vor.u32 %v17082_v8, %v15551_v45  ;;  %v17110_v20 = vld [vmem:[#allocation4 + $0xb74] sm:$0xf]  ;;  %v15677_v9 = vld [vmem:[#allocation2 + $0xc08] sm:$0xf]  ;;  %v15607_v8 = vld [vmem:[#allocation4 + $0xb08] sm:$0xf0] }
 0x6b4   :  { %10150 = vmatpush.bf16.msra.mxu0 %v15686_v16  ;;  %v15482_v16 = vor.u32 %v17064_v31, %v15479_v26  ;;  %v17897_v43 = vadd.f32 %v9737_v3, %v9725_v51  ;;  %v15399_v3 = vld [vmem:[#allocation4 + $0x968] sm:$0xf0]  ;;  %v15359_v51 = vld [vmem:[#allocation4 + $0x918] sm:$0xf0] }
 0x6b5   :  { %10032 = vmatpush.bf16.msrb.mxu1 %v15498_v53  ;;  %9993 = vmatpush.bf16.msra.mxu2 %v15306_v30  ;;  %v15402_v1 = vor.u32 %v17044_v22, %v15399_v3  ;;  %v17042_v53 = vld [vmem:[#allocation4 + $0x954] sm:$0xf]  ;;  %v15391_v30 = vld [vmem:[#allocation4 + $0x958] sm:$0xf0]  ;;  %v15362_v59 = vor.u32 %v17034_v21, %v15359_v51  ;;  %v17108_v3 = vld [vmem:[#allocation4 + $0xb64] sm:$0xf] }
 0x6b6   :  { %9953 = vmatpush.bf16.msrb.mxu3 %v15122_v32  ;;  %v15658_v52 = vor.u32 %v17108_v3, %v15655_v62  ;;  %v17127_v51 = vld [vmem:[#allocation6 + $0xb8] sm:$0xff] }
 0x6b8   :  { %10151 = vmatpush.bf16.msra.mxu0 %v15670_v42  ;;  %v17092_v42 = vld [vmem:[#allocation4 + $0xae4] sm:$0xf] }
 0x6b9   :  { %10033 = vmatpush.bf16.msrb.mxu1 %v15490_v29  ;;  %9994 = vmatpush.bf16.msra.mxu2 %v15298_v34  ;;  %v15594_v57 = vor.u32 %v17092_v42, %v15591_v60  ;;  %v15559_v34 = vld [vmem:[#allocation4 + $0xaa8] sm:$0xf0] }
 0x6ba   :  { %9954 = vmatpush.bf16.msrb.mxu3 %v15114_v38  ;;  %v17084_v38 = vld [vmem:[#allocation4 + $0xaa4] sm:$0xf] }
 0x6bb   :  { %v17903_v32 = vpop.f32.mrf.mxu0  ;;  %v15562_v26 = vor.u32 %v17084_v38, %v15559_v34  ;;  %v17098_v34 = vld [vmem:[#allocation4 + $0xb14] sm:$0xf] }
 0x6bc   :  { %10464 = vmatpush.bf16.msrb.mxu0 %v17127_v51 }
 0x6bd   :  { %10034 = vmatpush.bf16.msrb.mxu1 %v15482_v16  ;;  %9995 = vmatpush.bf16.msra.mxu2 %v15290_v54  ;;  %v15543_v54 = vld [vmem:[#allocation4 + $0xa88] sm:$0xf0] }
 0x6be   :  { %9955 = vmatpush.bf16.msrb.mxu3 %v15106_v35  ;;  %v17080_v35 = vld [vmem:[#allocation4 + $0xa84] sm:$0xf] }
 0x6c0   :  { %10035 = vmatmul.bf16.vlgmr.msrb.gmra.mxu1 %v17852_v56  ;;  %9996 = vmatmul.bf16.vlgmr.msra.gmra.mxu2 %v17837_v61  ;;  %v15394_v56 = vor.u32 %v17042_v53, %v15391_v30  ;;  %v15383_v61 = vld [vmem:[#allocation4 + $0x948] sm:$0xf0]  ;;  %v17104_v30 = vld [vmem:[#allocation4 + $0xb44] sm:$0xf] }
 0x6c1   :  { %10040 = vmatpush.bf16.msrb.mxu2 %v15602_v49  ;;  %10163 = vmatpush.bf16.msra.mxu1 %v15690_v10  ;;  %v15386_v28 = vor.u32 %v17040_v4, %v15383_v61  ;;  %v15693_v49 = vld [vmem:[#allocation2 + $0xc28] sm:$0xf]  ;;  %v15546_v10 = vor.u32 %v17080_v35, %v15543_v54  ;;  %v15642_v0 = vor.u32 %v17104_v30, %v15639_v63  ;;  %v15631_v4 = vld [vmem:[#allocation4 + $0xb38] sm:$0xf0]  ;;  %v17130_v30 = vld [vmem:[#allocation6 + $0xd0] sm:$0xff] }
 0x6c2   :  { %9956 = vmatpush.bf16.msrb.mxu3 %v15098_v46  ;;  %v15694_v42 = vor.u32 %v17119_v13, %v15693_v49  ;;  %v17115_v46 = vld [vmem:[#allocation2 + $0xc14] sm:$0xf0]  ;;  %v17126_v49 = vld [vmem:[#allocation6 + $0xb0] sm:$0xff]  ;;  %v17125_v13 = vld [vmem:[#allocation6 + $0xa8] sm:$0xff] }
 0x6c3   :  { %15699 = vmatmul.msk.bf16.vlgmr.msra.gmra.mxu0 %vm10140_vm0, %v17895_v25  ;;  %v9817_v29 = vpop.f32.mrf.mxu0 }
 0x6c4   :  { %10465 = vmatpush.bf16.msrb.mxu0 %v17126_v49 }
 0x6c5   :  { %10041 = vmatpush.bf16.msrb.mxu2 %v15594_v57  ;;  %10164 = vmatpush.bf16.msra.mxu1 %v15674_v39  ;;  %v9789_v31 = vpop.f32.mrf.mxu2 }
 0x6c6   :  { %10001 = vmatpush.bf16.msra.mxu3 %v15410_v5 }
 0x6c7   :  { %9957 = vmatmul.bf16.vlgmr.msrb.gmra.mxu3 %v17842_v7  ;;  %v15378_v7 = vor.u32 %v17038_v11, %v15375_v12 }
 0x6c8   :  { %v9750_v6 = vpop.f32.mrf.mxu3  ;;  %10466 = vmatpush.bf16.msrb.mxu0 %v17125_v13 }
 0x6c9   :  { %10042 = vmatpush.bf16.msrb.mxu2 %v15586_v36  ;;  %v9751_v27 = vadd.f32 %v9750_v6, %v17897_v43  ;;  %v17032_v43 = vld [vmem:[#allocation4 + $0x904] sm:$0xf]  ;;  %v15647_v36 = vld [vmem:[#allocation4 + $0xb58] sm:$0xf0] }
 0x6ca   :  { %10002 = vmatpush.bf16.msra.mxu3 %v15402_v1  ;;  %v15354_v5 = vor.u32 %v17032_v43, %v15351_v14  ;;  %v17106_v1 = vld [vmem:[#allocation4 + $0xb54] sm:$0xf]  ;;  %v17123_v14 = vld [vmem:[#allocation6 + $0x98] sm:$0xff] }
 0x6cb   :  { %v9764_v48 = vadd.f32 %v17880_v23, %v9751_v27  ;;  %v15663_v23 = vld [vmem:[#allocation4 + $0xb78] sm:$0xf0]  ;;  %v15650_v53 = vor.u32 %v17106_v1, %v15647_v36  ;;  %v17117_v27 = vld [vmem:[#allocation2 + $0xc2c] sm:$0xf] }
 0x6cc   :  { %v15666_v22 = vor.u32 %v17110_v20, %v15663_v23  ;;  %v17134_v23 = vld [vmem:[#allocation6 + $0xf0] sm:$0xff]  ;;  %v17131_v1 = vld [vmem:[#allocation6 + $0xd8] sm:$0xff] }
 0x6cd   :  { %10043 = vmatpush.bf16.msrb.mxu2 %v15578_v19  ;;  %v9791_v16 = vpop.f32.mrf.mxu2  ;;  %v9777_v24 = vadd.f32 %v17882_v50, %v9764_v48  ;;  %v15678_v50 = vor.u32 %v17115_v46, %v15677_v9  ;;  %v17102_v19 = vld [vmem:[#allocation4 + $0xb34] sm:$0xf]  ;;  %v17121_v9 = vld [vmem:[#allocation6 + $0x88] sm:$0xff] }
 0x6ce   :  { %10003 = vmatpush.bf16.msra.mxu3 %v15394_v56  ;;  %v15634_v15 = vor.u32 %v17102_v19, %v15631_v4  ;;  %v15679_v16 = vld [vmem:[#allocation2 + $0xc18] sm:$0xf0]  ;;  %v17133_v46 = vld [vmem:[#allocation6 + $0xe8] sm:$0xff]  ;;  %v17128_v19 = vld [vmem:[#allocation6 + $0xc0] sm:$0xff] }
 0x6cf   :  { %v9790_v60 = vadd.f32 %v9789_v31, %v9777_v24 }
 0x6d0   :  { %15700 = vmatmul.msk.bf16.vlgmr.msra.gmra.mxu1 %vm10140_vm0, %v17895_v25  ;;  %v9867_v40 = vpop.f32.mrf.mxu0  ;;  %v9752_v33 = vpop.f32.mrf.mxu3 }
 0x6d1   :  { %10044 = vmatpush.bf16.msrb.mxu2 %v15570_v2 }
 0x6d2   :  { %10004 = vmatpush.bf16.msra.mxu3 %v15386_v28  ;;  %v15623_v28 = vld [vmem:[#allocation4 + $0xb28] sm:$0xf0] }
 0x6d3   :  { %v15626_v31 = vor.u32 %v17100_v55, %v15623_v28  ;;  %v17143_v28 = vld [vmem:[#allocation6 + $0x138] sm:$0xff] }
 0x6d5   :  { %10045 = vmatpush.bf16.msrb.mxu2 %v15562_v26 }
 0x6d6   :  { %10005 = vmatpush.bf16.msra.mxu3 %v15378_v7  ;;  %v15615_v7 = vld [vmem:[#allocation4 + $0xb18] sm:$0xf0] }
 0x6d7   :  { %v15618_v41 = vor.u32 %v17098_v34, %v15615_v7 }
 0x6d8   :  { %v9869_v57 = vpop.f32.mrf.mxu0  ;;  %v17912_v39 = vpop.f32.mrf.mxu1 }
 0x6d9   :  { %10046 = vmatpush.bf16.msrb.mxu2 %v15554_v58  ;;  %v15610_v58 = vor.u32 %v17096_v47, %v15607_v8  ;;  %v17120_v57 = vld [vmem:[#allocation6 + $0x80] sm:$0xff]  ;;  %v17141_v47 = vld [vmem:[#allocation6 + $0x128] sm:$0xff] }
 0x6da   :  { %10006 = vmatpush.bf16.msra.mxu3 %v15370_v18  ;;  %v15695_v18 = vld [vmem:[#allocation2 + $0xc38] sm:$0xf0] }
 0x6db   :  { %v15698_v48 = vor.u32 %v17117_v27, %v15695_v18  ;;  %v17139_v27 = vld [vmem:[#allocation6 + $0x118] sm:$0xff] }
 0x6dd   :  { %10047 = vmatpush.bf16.msrb.mxu2 %v15546_v10 }
 0x6de   :  { %10007 = vmatpush.bf16.msra.mxu3 %v15362_v59  ;;  %v17124_v59 = vld [vmem:[#allocation6 + $0xa0] sm:$0xff] }
 0x6df   :  { %10467 = vmatpush.bf16.msrb.mxu0 %v17124_v59  ;;  %v17136_v59 = vld [vmem:[#allocation6 + $0x100] sm:$0xff] }
 0x6e0   :  { %10048 = vmatmul.bf16.vlgmr.msrb.gmra.mxu2 %v17869_v17  ;;  %v9830_v56 = vpop.f32.mrf.mxu1  ;;  %v17174_v17 = vld [vmem:[#allocation9 + $0x1d] sm:$0x3] }
 0x6e1   :  { %10176 = vmatpush.bf16.msra.mxu2 %v15694_v42  ;;  %v8367_v61 = vperm.slane %v17174_v17, 1 }
 0x6e2   :  { %10008 = vmatpush.bf16.msra.mxu3 %v15354_v5 }
 0x6e3   :  { %v9868_v29 = vadd.f32 %v9867_v40, %v8367_v61  ;;  %v17113_v40 = vld [vmem:[#allocation2 + $0xc0c] sm:$0xf]  ;;  %10468 = vmatpush.bf16.msrb.mxu0 %v17123_v14  ;;  %v17151_v14 = vld [vmem:[#allocation6 + $0x178] sm:$0xff] }
 0x6e5   :  { %10177 = vmatpush.bf16.msra.mxu2 %v15678_v50  ;;  %10009 = vmatmul.bf16.vlgmr.msra.gmra.mxu3 %v17856_v37  ;;  %v17132_v50 = vld [vmem:[#allocation6 + $0xe0] sm:$0xff] }
 0x6e6   :  { %10053 = vmatpush.bf16.msrb.mxu3 %v15666_v22 }
 0x6e8   :  { %v9802_v37 = vpop.f32.mrf.mxu3  ;;  %v9880_v38 = vpop.f32.mrf.mxu1 }
 0x6e9   :  { %v9803_v11 = vadd.f32 %v9802_v37, %v9790_v60  ;;  %v9881_v26 = vadd.f32 %v9880_v38, %v9868_v29  ;;  %v17122_v60 = vld [vmem:[#allocation6 + $0x90] sm:$0xff]  ;;  %10490 = vmatpush.bf16.msrb.mxu2 %v17143_v28 }
 0x6ea   :  { %10054 = vmatpush.bf16.msrb.mxu3 %v15658_v52  ;;  %10469 = vmatpush.bf16.msrb.mxu0 %v17122_v60  ;;  %v17142_v29 = vld [vmem:[#allocation6 + $0x130] sm:$0xff]  ;;  %v17148_v60 = vld [vmem:[#allocation6 + $0x160] sm:$0xff] }
 0x6eb   :  { %v9816_v12 = vadd.f32 %v17903_v32, %v9803_v11  ;;  %v15682_v32 = vor.u32 %v17113_v40, %v15679_v16  ;;  %v17138_v40 = vld [vmem:[#allocation6 + $0x110] sm:$0xff] }
 0x6ed   :  { %v9829_v22 = vadd.f32 %v17912_v39, %v9816_v12  ;;  %v17129_v39 = vld [vmem:[#allocation6 + $0xc8] sm:$0xff]  ;;  %10491 = vmatpush.bf16.msrb.mxu2 %v17142_v29  ;;  %v17167_v29 = vld [vmem:[#allocation9 + $0x23] ss:$0 sm:$0xff] }
 0x6ee   :  { %10055 = vmatpush.bf16.msrb.mxu3 %v15650_v53  ;;  %10470 = vmatpush.bf16.msrb.mxu0 %v17121_v9 }
 0x6f0   :  { %15701 = vmatmul.msk.bf16.vlgmr.msra.gmra.mxu2 %vm10140_vm0, %v17895_v25  ;;  %v17917_v2 = vpop.f32.mrf.mxu0  ;;  %v9804_v6 = vpop.f32.mrf.mxu3 }
 0x6f1   :  { %v9882_v21 = vpop.f32.mrf.mxu1  ;;  %10492 = vmatpush.bf16.msrb.mxu2 %v17141_v47 }
 0x6f2   :  { %10056 = vmatpush.bf16.msrb.mxu3 %v15642_v0  ;;  %10471 = vmatpush.bf16.msrb.mxu0 %v17120_v57 }
 0x6f6   :  { %10057 = vmatpush.bf16.msrb.mxu3 %v15634_v15  ;;  %v17931_v15 = vld [vmem:[#allocation9 + $0x1f] sm:$0xf] }
 0x6f7   :  { %v10092_v37 = vperm.slane %v17931_v15, 0  ;;  %v10093_v21 = vperm.slane %v17931_v15, 1 }
 0x6f8   :  { %v9921_v45 = vpop.f32.mrf.mxu0 }
 0x6f9   :  { %v9932_v35 = vpop.f32.mrf.mxu1  ;;  %v17140_v45 = vld [vmem:[#allocation6 + $0x120] sm:$0xff] }
 0x6fa   :  { %10058 = vmatpush.bf16.msrb.mxu3 %v15626_v31  ;;  %10493 = vmatpush.bf16.msrb.mxu2 %v17140_v45 }
 0x6fe   :  { %10059 = vmatpush.bf16.msrb.mxu3 %v15618_v41  ;;  %10494 = vmatpush.bf16.msrb.mxu2 %v17139_v27 }
 0x6ff   :  { %v9841_v54 = vpop.f32.mrf.mxu2 }
 0x700   :  { %v9842_v3 = vadd.f32 %v9841_v54, %v9829_v22  ;;  %v17137_v54 = vld [vmem:[#allocation6 + $0x108] sm:$0xff]  ;;  %v17146_v22 = vld [vmem:[#allocation6 + $0x150] sm:$0xff] }
 0x701   :  { %v9934_v24 = vpop.f32.mrf.mxu1 }
 0x702   :  { %10060 = vmatpush.bf16.msrb.mxu3 %v15610_v58  ;;  %10495 = vmatpush.bf16.msrb.mxu2 %v17138_v40 }
 0x705   :  { %10061 = vmatmul.bf16.vlgmr.msrb.gmra.mxu3 %v17884_v44  ;;  %v17135_v44 = vld [vmem:[#allocation6 + $0xf8] sm:$0xff] }
 0x706   :  { %10189 = vmatpush.bf16.msra.mxu3 %v15698_v48  ;;  %10477 = vmatpush.bf16.msrb.mxu1 %v17135_v44  ;;  %v17150_v44 = vld [vmem:[#allocation6 + $0x170] sm:$0xff] }
 0x707   :  { %v9843_v43 = vpop.f32.mrf.mxu2  ;;  %10496 = vmatpush.bf16.msrb.mxu2 %v17137_v54 }
 0x70a   :  { %10190 = vmatpush.bf16.msra.mxu3 %v15682_v32  ;;  %10478 = vmatpush.bf16.msrb.mxu1 %v17134_v23 }
 0x70b   :  { %10497 = vmatpush.bf16.msrb.mxu2 %v17136_v59 }
 0x70e   :  { %10479 = vmatpush.bf16.msrb.mxu1 %v17133_v46  ;;  %10503 = vmatpush.bf16.msrb.mxu3 %v17151_v14  ;;  %v17147_v46 = vld [vmem:[#allocation6 + $0x158] sm:$0xff] }
 0x70f   :  { %v9893_v42 = vpop.f32.mrf.mxu2 }
 0x710   :  { %v17921_v10 = vpop.f32.mrf.mxu0  ;;  %v9894_v33 = vadd.f32 %v9893_v42, %v9881_v26 }
 0x712   :  { %v9854_v62 = vpop.f32.mrf.mxu3  ;;  %10480 = vmatpush.bf16.msrb.mxu1 %v17132_v50  ;;  %10504 = vmatpush.bf16.msrb.mxu3 %v17150_v44  ;;  %v10094_v50 = vperm.slane %v17931_v15, 2 }
 0x713   :  { %v9855_v52 = vadd.f32 %v9854_v62, %v9842_v3  ;;  %v17145_v3 = vld [vmem:[#allocation6 + $0x148] sm:$0xff] }
 0x715   :  { %15702 = vmatmul.msk.bf16.vlgmr.msra.gmra.mxu3 %vm10140_vm0, %v17895_v25  ;;  %10066 = vst [vmem:[%s17952_s6] sm:$0xff] %v9855_v52 }
 0x716   :  { %10481 = vmatpush.bf16.msrb.mxu1 %v17131_v1 }
 0x717   :  { %v9895_v5 = vpop.f32.mrf.mxu2 }
 0x718   :  { %v9973_v20 = vpop.f32.mrf.mxu0 }
 0x719   :  { %v9984_v25 = vpop.f32.mrf.mxu1 }
 0x71a   :  { %v9856_v63 = vpop.f32.mrf.mxu3  ;;  %10482 = vmatpush.bf16.msrb.mxu1 %v17130_v30 }
 0x71e   :  { %10483 = vmatpush.bf16.msrb.mxu1 %v17129_v39 }
 0x721   :  { %v9986_v53 = vpop.f32.mrf.mxu1 }
 0x722   :  { %10484 = vmatpush.bf16.msrb.mxu1 %v17128_v19  ;;  %v10095_v19 = vperm.slane %v17931_v15, 3 }
 0x723   :  { %v9945_v36 = vpop.f32.mrf.mxu2 }
 0x72a   :  { %v9906_v17 = vpop.f32.mrf.mxu3 }
 0x72b   :  { %v9947_v56 = vpop.f32.mrf.mxu2  ;;  %v9907_v61 = vadd.f32 %v9906_v17, %v9894_v33 }
 0x72d   :  { %v9920_v55 = vadd.f32 %v17917_v2, %v9907_v61 }
 0x72f   :  { %v9933_v11 = vadd.f32 %v9932_v35, %v9920_v55 }
 0x730   :  { %v17929_v0 = vpop.f32.mrf.mxu0 }
 0x731   :  { %v9946_v31 = vadd.f32 %v9945_v36, %v9933_v11  ;;  %v17144_v36 = vld [vmem:[#allocation6 + $0x140] sm:$0xff] }
 0x732   :  { %v9908_v38 = vpop.f32.mrf.mxu3 }
 0x738   :  { %v10025_v4 = vpop.f32.mrf.mxu0 }
 0x73d   :  { %v10036_v26 = vpop.f32.mrf.mxu1 }
 0x740   :  { %v10153_v12 = vpop.f32.mrf.mxu0 }
 0x741   :  { %v10154_v34 = vadd.f32 %v10153_v12, %v10092_v37 }
 0x743   :  { %v10196_v7 = vmax.f32 %v10154_v34, 0.0  ;;  %v9997_v2 = vpop.f32.mrf.mxu2 }
 0x745   :  { %v10200_v41 = vpack.c.bf16 %v10196_v7, %v10196_v7  ;;  %v10038_v6 = vpop.f32.mrf.mxu1 }
 0x747   :  { %10472 = vmatmul.bf16.vlgmr.msrb.gmra.mxu0 %v10200_v41 }
 0x748   :  { %v10155_v8 = vpop.f32.mrf.mxu0 }
 0x74a   :  { %v9958_v18 = vpop.f32.mrf.mxu3 }
 0x74b   :  { %v9959_v58 = vadd.f32 %v9958_v18, %v9946_v31  ;;  %v9999_v16 = vpop.f32.mrf.mxu2 }
 0x74d   :  { %v9972_v48 = vadd.f32 %v17921_v10, %v9959_v58  ;;  %v10166_v32 = vpop.f32.mrf.mxu1  ;;  %v17149_v10 = vld [vmem:[#allocation6 + $0x168] sm:$0xff] }
 0x74e   :  { %v10167_v35 = vadd.f32 %v10166_v32, %v10093_v21  ;;  %10505 = vmatpush.bf16.msrb.mxu3 %v17149_v10 }
 0x74f   :  { %v9985_v51 = vadd.f32 %v9984_v25, %v9972_v48 }
 0x750   :  { %v10197_v49 = vmax.f32 %v10167_v35, 0.0 }
 0x751   :  { %v9998_v42 = vadd.f32 %v9997_v2, %v9985_v51 }
 0x752   :  { %v9960_v13 = vpop.f32.mrf.mxu3  ;;  %v10201_v24 = vpack.c.bf16 %v10197_v49, %v10197_v49  ;;  %10506 = vmatpush.bf16.msrb.mxu3 %v17148_v60 }
 0x754   :  { %10485 = vmatmul.bf16.vlgmr.msrb.gmra.mxu1 %v10201_v24 }
 0x755   :  { %v10168_v43 = vpop.f32.mrf.mxu1 }
 0x756   :  { %10507 = vmatpush.bf16.msrb.mxu3 %v17147_v46 }
 0x75a   :  { %10508 = vmatpush.bf16.msrb.mxu3 %v17146_v22 }
 0x75e   :  { %10509 = vmatpush.bf16.msrb.mxu3 %v17145_v3 }
 0x762   :  { %10510 = vmatpush.bf16.msrb.mxu3 %v17144_v36 }
 0x763   :  { %v10049_v20 = vpop.f32.mrf.mxu2 }
 0x768   :  { %v10010_v33 = vpop.f32.mrf.mxu3 }
 0x769   :  { %v10011_v23 = vadd.f32 %v10010_v33, %v9998_v42 }
 0x76b   :  { %v10024_v9 = vadd.f32 %v17929_v0, %v10011_v23  ;;  %v10051_v5 = vpop.f32.mrf.mxu2 }
 0x76d   :  { %v10037_v57 = vadd.f32 %v10036_v26, %v10024_v9 }
 0x76f   :  { %v10050_v63 = vadd.f32 %v10049_v20, %v10037_v57 }
 0x770   :  { %v10012_v25 = vpop.f32.mrf.mxu3 }
 0x773   :  { %v10179_v62 = vpop.f32.mrf.mxu2 }
 0x774   :  { %v10180_v52 = vadd.f32 %v10179_v62, %v10094_v50 }
 0x776   :  { %v10198_v1 = vmax.f32 %v10180_v52, 0.0 }
 0x778   :  { %v10202_v53 = vpack.c.bf16 %v10198_v1, %v10198_v1 }
 0x77a   :  { %10498 = vmatmul.bf16.vlgmr.msrb.gmra.mxu2 %v10202_v53 }
 0x77b   :  { %v10181_v30 = vpop.f32.mrf.mxu2 }
 0x788   :  { %v10062_v0 = vpop.f32.mrf.mxu3 }
 0x789   :  { %v10063_v39 = vadd.f32 %v10062_v0, %v10050_v63 }
 0x78b   :  { %10067 = vst [vmem:[%s17952_s6 + $0x8] sm:$0xff] %v10063_v39 }
 0x790   :  { %v10064_v56 = vpop.f32.mrf.mxu3 }
 0x798   :  { %v10192_v4 = vpop.f32.mrf.mxu3 }
 0x799   :  { %v10193_v17 = vadd.f32 %v10192_v4, %v10095_v19 }
 0x79b   :  { %v10199_v61 = vmax.f32 %v10193_v17, 0.0 }
 0x79d   :  { %v10203_v55 = vpack.c.bf16 %v10199_v61, %v10199_v61 }
 0x79f   :  { %10511 = vmatmul.bf16.vlgmr.msrb.gmra.mxu3 %v10203_v55 }
 0x7a0   :  { %v10194_v28 = vpop.f32.mrf.mxu3 }
 0x7c4   :  { %v10473_v37 = vpop.f32.mrf.mxu0 }
 0x7c5   :  { %v10474_v31 = vadd.f32 %v17167_v29, %v10473_v37 }
 0x7cc   :  { %v10475_v11 = vpop.f32.mrf.mxu0 }
 0x7d1   :  { %v10486_v12 = vpop.f32.mrf.mxu1 }
 0x7d2   :  { %v10487_v38 = vadd.f32 %v10486_v12, %v10474_v31 }
 0x7d9   :  { %v10488_v34 = vpop.f32.mrf.mxu1 }
 0x7fd   :  { %v10499_v7 = vpop.f32.mrf.mxu2 }
 0x7fe   :  { %v10500_v41 = vadd.f32 %v10499_v7, %v10487_v38 }
 0x805   :  { %v10501_v26 = vpop.f32.mrf.mxu2 }
 0x822   :  { %v10512_v47 = vpop.f32.mrf.mxu3 }
 0x823   :  { %v10513_v8 = vadd.f32 %v10512_v47, %v10500_v41 }
 0x825   :  { %v15831_v45 = vmul.f32 -1.442695, %v10513_v8 }
 0x827   :  { %17168 = vpow2.f32 %v15831_v45 }
 0x82a   :  { %v10514_v15 = vpop.f32.mrf.mxu3 }
 0x82d   :  { %v17169_v2 = vpop.eup %17168 }
 0x82e   :  { %v10519_v6 = vadd.f32 1.0, %v17169_v2 }
 0x830   :  { %17170 = vrcp.f32 %v10519_v6  ;;  %v10531_v21 = vand.u32 2147483648, %v10519_v6  ;;  %v10529_v40 = vand.u32 2147483647, %v10519_v6  ;;  %vm10525_vm2 = vweird.f32 %v10519_v6 }
 0x832   :  { %v10532_v32 = vor.u32 1.1754944e-38, %v10531_v21  ;;  %vm10530_vm4 = vcmp.eq.f32.partialorder %v10529_v40, 8.507059e+37 }
 0x836   :  { %v17171_v27 = vpop.eup %17170 }
 0x837   :  { %v10521_v18 = vmul.f32 %v17171_v27, %v10519_v6  ;;  %vm10526_vm1 = vweird.f32 %v17171_v27 }
 0x838   :  { %vm10527_vm3 = vmor %vm10525_vm2, %vm10526_vm1 }
 0x839   :  { %v10522_v58 = vsub.f32 1.0, %v10521_v18 }
 0x83b   :  { %v10523_v48 = vmul.f32 %v17171_v27, %v10522_v58 }
 0x83d   :  { %v10524_v16 = vadd.f32 %v17171_v27, %v10523_v48 }
 0x83f   :  { %v10528_v51 = vsel %vm10527_vm3, %v17171_v27, %v10524_v16 }
 0x840   :  { %v10533_v35 = vsel %vm10530_vm4, %v10532_v32, %v10528_v51 }
 0x841   :  { %10535 = vst [vmem:[%s17953_s7] sm:$0xff] %v10533_v35 }
 0x842   :  { %10544 = vsyncpa [#allocation3], 1 }
 0x843   :  { %10545 = vsyncpa [#allocation5], 1 }
 0x844   :  { %10546 = vsyncpa [#allocation8], 1 }

</bundles_post_ra>
